<compile_context>
chip_gen: v7x
topology: tpu7x:2x2x1
jax: 0.10.0
libtpu: 0.0.40
codegen_flags: <defaults>
</compile_context>

<pallas_src>
import jax
import jax.numpy as jnp
from jax import lax
from jax.experimental import pallas as pl
from jax.experimental.pallas import tpu as pltpu

_BN_EPS = 1e-5


def _pad8(x):
    return ((x + 7) // 8) * 8


def _pad128(x):
    return ((x + 127) // 128) * 128


# ---------------------------------------------------------------------------
# Kernel 1: ReLU + ConvTranspose2d(k=4, s=2, p=1) + streaming BN statistics.
# ---------------------------------------------------------------------------
def _convT_stats_kernel(x_ref, w_ref, y_ref, stat_ref):
    # x_ref:    (1, H+2, W+2, Ci)   bf16 zero-padded image (resident in VMEM)
    # w_ref:    (2, 2, 4*Ci, Co)    bf16 phase-stacked weights
    # y_ref:    (1, TH, 2, W, 2*Co) bf16 pre-BN tile [n, Y, py, X, px*Co+co]
    # stat_ref: (1, 1, 2, Co)       f32 per-tile [sum, sum_of_squares]
    TH = y_ref.shape[1]
    W = y_ref.shape[3]
    Ci = x_ref.shape[3]
    Co = w_ref.shape[3]
    t = pl.program_id(1)
    h0 = t * TH  # first padded row of this H-tile

    # 9 unique shifted (TH*W, Ci) slabs of relu(x_pad); reused by the 4 phases.
    slabs = []
    for r in range(3):
        rslab = jnp.maximum(x_ref[0, pl.ds(h0 + r, TH), :, :], 0)  # (TH, W+2, Ci)
        slabs.append([rslab[:, c:c + W, :].reshape(TH * W, Ci) for c in range(3)])

    s1 = jnp.zeros((1, Co), jnp.float32)
    s2 = jnp.zeros((1, Co), jnp.float32)
    for py in range(2):
        per_px = []
        for px in range(2):
            if Ci >= 128:
                # MXU consumes K in 128/256 chunks -> K-fusion saves nothing;
                # skip the 4 slab copies per phase and accumulate 4 dots.
                res = None
                for j, (dh, dw) in enumerate(((0, 0), (0, 1), (1, 0), (1, 1))):
                    part = jnp.dot(slabs[py + dh][px + dw],
                                   w_ref[py, px, pl.ds(j * Ci, Ci), :],
                                   preferred_element_type=jnp.float32)
                    res = part if res is None else res + part
            else:
                # Small Ci: K-fused im2col, one (rows, 4*Ci) x (4*Ci, Co) call.
                lhs = jnp.concatenate(
                    [slabs[py + 0][px + 0], slabs[py + 0][px + 1],
                     slabs[py + 1][px + 0], slabs[py + 1][px + 1]], axis=-1)
                res = jnp.dot(lhs, w_ref[py, px],
                              preferred_element_type=jnp.float32)  # (TH*W, Co)
            s1 = s1 + jnp.sum(res, axis=0, keepdims=True)
            s2 = s2 + jnp.sum(res * res, axis=0, keepdims=True)
            per_px.append(res)
        # px folded into the minor dim -> one store per parity row; for real
        # decoder widths (Co >= 64) the minor dim 2*Co >= 128 is lane-dense.
        rcat = jnp.concatenate(per_px, axis=-1)                    # (TH*W, 2*Co)
        y_ref[0, :, py, :, :] = rcat.reshape(TH, W, 2 * Co).astype(y_ref.dtype)
    stat_ref[0, 0] = jnp.concatenate([s1, s2], axis=0)             # (2, Co)


# ---------------------------------------------------------------------------
# Kernel 2: BatchNorm scale/shift + in-kernel NHWC->NCHW fold.
# ---------------------------------------------------------------------------
def _bn_apply_nchw_kernel(y_ref, scale_ref, shift_ref, o_ref):
    # y_ref:     (1, TR, Co) bf16, rows ordered (Y, py, X, px)
    # scale_ref: (Co, 1)  f32     shift_ref: (Co, 1) f32
    # o_ref:     (1, Co, TR) f32  -> NCHW block, lane-dense minor dim TR
    Co = y_ref.shape[2]
    yv = y_ref[0].astype(jnp.float32)                      # (TR, Co)
    pad = _pad128(Co) - Co
    if pad:
        # keep the XLU transpose on (8,128)-aligned shapes
        yv = jnp.concatenate(
            [yv, jnp.zeros((yv.shape[0], pad), jnp.float32)], axis=-1)
    yT = jnp.transpose(yv, (1, 0))[:Co, :]                 # (Co, TR)
    o_ref[0] = yT * scale_ref[...] + shift_ref[...]


# ---------------------------------------------------------------------------
# Host-side helpers (generation-aware sizing).
# ---------------------------------------------------------------------------
def _tpu_vmem_capacity():
    try:
        return int(pltpu.get_tpu_info().vmem_capacity_bytes)
    except Exception:
        return 64 * 1024 * 1024  # conservative (v7x per-TensorCore)


def _vmem_limit_bytes(need_bytes, cap):
    # ~1.25x of the (double-buffer-inclusive) estimate; never below the 32 MiB
    # default scoped limit, never above ~3/4 of physical VMEM so the compiler
    # keeps headroom for its internal scratch / pipelining windows.
    want = max(32 << 20, (int(need_bytes) * 5) // 4)
    return int(min(want, (cap * 3) // 4))


def _pick_h_tile(H, W, Ci, Co, cap):
    """Largest H-tile dividing H (preferring TH*W % 8 == 0) whose per-tile
    working set fits a generation-aware VMEM budget."""
    big = cap >= (100 << 20)               # 128 MiB v5e/v6e vs 64 MiB v7x
    target_rows = 2048 if big else 512
    budget = (16 << 20) if big else (6 << 20)
    lane_2co = max(2 * Co, 128)
    lane_ci = max(Ci, 128)

    def fits(th):
        y_blk = 2 * th * 2 * _pad8(W) * lane_2co * 2        # bf16 y, x2 buffers
        slabs = 9 * _pad8(th * W) * lane_ci * 2             # shifted input slabs
        acc = 5 * _pad8(th * W) * max(Co, 128) * 4          # f32 phase results
        return (y_blk + slabs + acc) <= budget

    start = max(1, min(H, max(1, target_rows // max(1, W))))
    best = 1
    for th in range(start, 0, -1):
        if H % th == 0 and fits(th):
            if (th * W) % 8 == 0:
                return th
            best = max(best, th)
    return best


def _pick_row_tile(R, Co, cap):
    """Largest row-tile dividing R (preferring multiples of 128 -> lane-dense
    NCHW stores) whose kernel-2 working set fits a generation-aware budget."""
    big = cap >= (100 << 20)
    budget = (24 << 20) if big else (10 << 20)
    lane_in = max(Co, 128)

    def need(tr):
        return (2 * _pad8(tr) * lane_in * 2            # bf16 y in, x2 buffers
                + 2 * _pad8(Co) * _pad128(tr) * 4      # f32 NCHW out, x2 buffers
                + _pad8(tr) * lane_in * 4              # f32 upcast temp
                + 2 * _pad128(Co) * _pad128(tr) * 4)   # padded/transposed temps

    best = None
    for tr in range(128, R + 1, 128):
        if R % tr == 0 and need(tr) <= budget:
            best = tr
    if best is None:
        for tr in range(8, R + 1, 8):
            if R % tr == 0 and need(tr) <= budget:
                best = tr
    return best or R


# ---------------------------------------------------------------------------
# Forward pass.
# ---------------------------------------------------------------------------
def decoder_block_forward(x_nchw, w, b, gamma, beta, use_dropout=False):
    """DecoderBlock forward: ReLU -> ConvTranspose2d(4, 2, 1) -> BatchNorm2d.

    x_nchw: (N, Ci, H, W) f32; w: (Ci, Co, 4, 4) PyTorch ConvTranspose2d weight;
    b: (Co,) conv bias (exactly cancelled by training-mode BN -> unused);
    gamma/beta: (Co,) BN affine params.  Returns (N, Co, 2H, 2W) f32.
    Implements training-mode BatchNorm (batch statistics, biased variance);
    eval-mode BN (running stats, where the bias does NOT cancel) is not routed
    through this kernel.
    """
    if use_dropout:
        # TODO(synk): training-mode nn.Dropout(0.5) (pltpu.prng_seed /
        # prng_random_bits) not implemented; only use_dropout=False is covered.
        raise NotImplementedError("use_dropout=True is not implemented")
    del b  # per-channel constant removed exactly by training-mode BN mean-sub

    N, Ci, H, W = x_nchw.shape
    Co = w.shape[1]
    cap = _tpu_vmem_capacity()

    # ---- layout prep (input-sized; bf16 halves HBM traffic / VMEM) ----
    x_nhwc = jnp.transpose(x_nchw, (0, 2, 3, 1)).astype(jnp.bfloat16)
    x_pad = jnp.pad(x_nhwc, ((0, 0), (1, 1), (1, 1), (0, 0)))

    # Phase-stacked weights: wph[py, px] = concat_{(dh,dw)} Wk[3-py-2dh, 3-px-2dw]
    # so each output-parity phase is one (or 4-chunk) K=4*Ci matmul.
    # TODO(synk): for Co <= 128 the two px phases could be packed into the MXU
    # N dimension with a block-structured (6*Ci, 2*Co) weight (2 matmuls/tile).
    wk = jnp.transpose(w, (2, 3, 0, 1))  # (kh, kw, Ci, Co)
    wph = jnp.stack([
        jnp.stack([
            jnp.concatenate([wk[3 - py - 2 * dh, 3 - px - 2 * dw]
                             for dh in (0, 1) for dw in (0, 1)], axis=0)
            for px in (0, 1)], axis=0)
        for py in (0, 1)], axis=0).astype(jnp.bfloat16)  # (2, 2, 4*Ci, Co)

    TH = _pick_h_tile(H, W, Ci, Co, cap)
    HT = H // TH
    rows = TH * W
    # TODO(synk): for very large H on v7x (64 MiB VMEM) the resident padded
    # image block should be halo-tiled along H (pl.ANY + manual DMA of TH+2
    # rows) and the constant-index weight block single-buffered.
    k1_need = (
        2 * (H + 2) * _pad8(W + 2) * max(Ci, 128) * 2
        + 2 * 4 * _pad8(4 * Ci) * max(Co, 128) * 2
        + 2 * TH * 2 * _pad8(W) * max(2 * Co, 128) * 2
        + 2 * _pad8(2) * max(Co, 128) * 4
        + 9 * _pad8(rows) * max(Ci, 128) * 2
        + _pad8(rows) * max(4 * Ci, 128) * 2
        + 5 * _pad8(rows) * max(Co, 128) * 4
        + _pad8(rows) * max(2 * Co, 128) * 4)

    y, stats = pl.pallas_call(
        _convT_stats_kernel,
        grid=(N, HT),
        in_specs=[
            pl.BlockSpec((1, H + 2, W + 2, Ci), lambda n, t: (n, 0, 0, 0)),
            pl.BlockSpec((2, 2, 4 * Ci, Co), lambda n, t: (0, 0, 0, 0)),
        ],
        out_specs=(
            pl.BlockSpec((1, TH, 2, W, 2 * Co), lambda n, t: (n, t, 0, 0, 0)),
            pl.BlockSpec((1, 1, 2, Co), lambda n, t: (n, t, 0, 0)),
        ),
        out_shape=(
            jax.ShapeDtypeStruct((N, H, 2, W, 2 * Co), jnp.bfloat16),
            jax.ShapeDtypeStruct((N, HT, 2, Co), jnp.float32),
        ),
        compiler_params=pltpu.CompilerParams(
            dimension_semantics=("parallel", "parallel"),
            vmem_limit_bytes=_vmem_limit_bytes(k1_need, cap)),
    )(x_pad, wph)

    # ---- tiny cross-tile BN statistics reduction (training mode, biased var)
    # TODO(synk): for huge N*4*H*W consider mean-shifted / Welford combining;
    # single-pass E[x^2]-E[x]^2 in f32 is fine at decoder scales.
    count = float(N * (2 * H) * (2 * W))
    total = jnp.sum(stats[:, :, 0, :], axis=(0, 1))
    total_sq = jnp.sum(stats[:, :, 1, :], axis=(0, 1))
    mean = total / count
    var = jnp.maximum(total_sq / count - mean * mean, 0.0)
    scale = gamma * lax.rsqrt(var + _BN_EPS)   # (Co,)
    shift = beta - mean * scale                # (Co,)

    # ---- BN apply + NHWC->NCHW fold (no standalone XLA transpose) ------
    # y's flat order per image is (Y, py, X, px, co), i.e. rows are already in
    # NCHW spatial order -> both reshapes below are free bitcasts; the channel
    # transpose happens inside kernel 2 on the XLU.
    R = 4 * H * W
    y2 = y.reshape(N, R, Co)
    scale_col = scale.reshape(Co, 1).astype(jnp.float32)
    shift_col = shift.reshape(Co, 1).astype(jnp.float32)

    TR = _pick_row_tile(R, Co, cap)
    RT = R // TR
    k2_need = (2 * _pad8(TR) * max(Co, 128) * 2
               + 2 * _pad8(Co) * _pad128(TR) * 4
               + _pad8(TR) * max(Co, 128) * 4
               + 2 * _pad128(Co) * _pad128(TR) * 4)

    out = pl.pallas_call(
        _bn_apply_nchw_kernel,
        grid=(N, RT),
        in_specs=[
            pl.BlockSpec((1, TR, Co), lambda n, r: (n, r, 0)),
            pl.BlockSpec((Co, 1), lambda n, r: (0, 0)),
            pl.BlockSpec((Co, 1), lambda n, r: (0, 0)),
        ],
        out_specs=pl.BlockSpec((1, Co, TR), lambda n, r: (n, 0, r)),
        out_shape=jax.ShapeDtypeStruct((N, Co, R), jnp.float32),
        compiler_params=pltpu.CompilerParams(
            dimension_semantics=("parallel", "parallel"),
            vmem_limit_bytes=_vmem_limit_bytes(k2_need, cap)),
    )(y2, scale_col, shift_col)

    # (N, Co, 4*H*W) -> (N, Co, 2H, 2W): free bitcast, already NCHW.
    return out.reshape(N, Co, 2 * H, 2 * W)


# ---------------------------------------------------------------------------
# Pure-JAX reference (PyTorch semantics): ConvTranspose2d as dilated conv.
# ---------------------------------------------------------------------------
def reference_forward(x, w, b, gamma, beta):
    xr = jnp.maximum(x, 0.0)
    w_conv = jnp.transpose(jnp.flip(w, axis=(2, 3)), (1, 0, 2, 3))  # (Co, Ci, 4, 4)
    y = lax.conv_general_dilated(
        xr, w_conv, window_strides=(1, 1), padding=((2, 2), (2, 2)),
        lhs_dilation=(2, 2), rhs_dilation=(1, 1),
        dimension_numbers=("NCHW", "OIHW", "NCHW"))
    y = y + b[None, :, None, None]
    mean = jnp.mean(y, axis=(0, 2, 3), keepdims=True)
    var = jnp.mean((y - mean) ** 2, axis=(0, 2, 3), keepdims=True)
    return ((y - mean) * lax.rsqrt(var + _BN_EPS) * gamma[None, :, None, None]
            + beta[None, :, None, None])


if __name__ == "__main__":
    key = jax.random.PRNGKey(0)
    k1, k2, k3, k4, k5 = jax.random.split(key, 5)
    N, Ci, Co, H, W = 2, 8, 4, 16, 16

    x = jax.random.normal(k1, (N, Ci, H, W), jnp.float32)
    w = 0.1 * jax.random.normal(k2, (Ci, Co, 4, 4), jnp.float32)
    b = 0.1 * jax.random.normal(k3, (Co,), jnp.float32)
    gamma = 1.0 + 0.1 * jax.random.normal(k4, (Co,), jnp.float32)
    beta = 0.1 * jax.random.normal(k5, (Co,), jnp.float32)

    fwd = jax.jit(decoder_block_forward)
    out = jax.block_until_ready(fwd(x, w, b, gamma, beta))

    # Reference with the same bf16-rounded MXU inputs the kernel uses; the
    # kernel additionally stores the pre-BN intermediate in bf16, which adds
    # ~2^-9 * |scale*y| rounding -> use a 3e-2 tolerance (algorithmic errors
    # would be O(1)).
    xq = x.astype(jnp.bfloat16).astype(jnp.float32)
    wq = w.astype(jnp.bfloat16).astype(jnp.float32)
    ref = reference_forward(xq, wq, b, gamma, beta)

    assert out.shape == (N, Co, 2 * H, 2 * W), out.shape
    err = float(jnp.max(jnp.abs(out - ref)))
    assert err < 3e-2, f"max abs err {err}"
    print("KERNEL_OK")
</pallas_src>

<mosaic_0001>
module attributes {stable_mosaic.version = 11 : i64} {
  func.func @_convT_stats_kernel(%arg0: i32, %arg1: i32, %arg2: memref<1x18x18x8xbf16, #tpu.memory_space<vmem>>, %arg3: memref<2x2x32x4xbf16, #tpu.memory_space<vmem>>, %arg4: memref<1x16x2x16x8xbf16, #tpu.memory_space<vmem>>, %arg5: memref<1x1x2x4xf32, #tpu.memory_space<vmem>>) attributes {dimension_semantics = [#tpu.dimension_semantics<parallel>, #tpu.dimension_semantics<parallel>], iteration_bounds = array<i64: 2, 1>, scalar_prefetch = 0 : i64, scratch_operands = 0 : i64, tpu.core_type = #tpu.core_type<tc>, window_params = [{transform_indices = @transform_0, window_bounds = array<i64: 1, 18, 18, 8>}, {pipeline_mode = #tpu.pipeline_mode<synchronous>, transform_indices = @transform_1, window_bounds = array<i64: 2, 2, 32, 4>}, {transform_indices = @transform_2, window_bounds = array<i64: 1, 16, 2, 16, 8>}, {transform_indices = @transform_3, window_bounds = array<i64: 1, 1, 2, 4>}]} {
    %c16_i32 = arith.constant 16 : i32
    %0 = arith.muli %arg1, %c16_i32 : i32
    %c0_i32 = arith.constant 0 : i32
    %1 = arith.addi %0, %c0_i32 : i32
    %c0 = arith.constant 0 : index
    %2 = arith.index_cast %1 : i32 to index
    %c0_0 = arith.constant 0 : index
    %c0_1 = arith.constant 0 : index
    %3 = vector.load %arg2[%c0, %2, %c0_0, %c0_1] : memref<1x18x18x8xbf16, #tpu.memory_space<vmem>>, vector<1x16x18x8xbf16>
    %4 = vector.shape_cast %3 : vector<1x16x18x8xbf16> to vector<16x18x8xbf16>
    %cst = arith.constant 0.000000e+00 : bf16
    %5 = vector.broadcast %cst : bf16 to vector<16x18x8xbf16>
    %6 = arith.maximumf %4, %5 : vector<16x18x8xbf16>
    %7 = vector.extract_strided_slice %6 {offsets = [0, 0, 0], sizes = [16, 16, 8], strides = [1, 1, 1]} : vector<16x18x8xbf16> to vector<16x16x8xbf16>
    %8 = vector.shape_cast %7 : vector<16x16x8xbf16> to vector<256x8xbf16>
    %9 = vector.extract_strided_slice %6 {offsets = [0, 1, 0], sizes = [16, 16, 8], strides = [1, 1, 1]} : vector<16x18x8xbf16> to vector<16x16x8xbf16>
    %10 = vector.shape_cast %9 : vector<16x16x8xbf16> to vector<256x8xbf16>
    %11 = vector.extract_strided_slice %6 {offsets = [0, 2, 0], sizes = [16, 16, 8], strides = [1, 1, 1]} : vector<16x18x8xbf16> to vector<16x16x8xbf16>
    %12 = vector.shape_cast %11 : vector<16x16x8xbf16> to vector<256x8xbf16>
    %c1_i32 = arith.constant 1 : i32
    %13 = arith.addi %0, %c1_i32 : i32
    %c0_2 = arith.constant 0 : index
    %14 = arith.index_cast %13 : i32 to index
    %c0_3 = arith.constant 0 : index
    %c0_4 = arith.constant 0 : index
    %15 = vector.load %arg2[%c0_2, %14, %c0_3, %c0_4] : memref<1x18x18x8xbf16, #tpu.memory_space<vmem>>, vector<1x16x18x8xbf16>
    %16 = vector.shape_cast %15 : vector<1x16x18x8xbf16> to vector<16x18x8xbf16>
    %cst_5 = arith.constant 0.000000e+00 : bf16
    %17 = vector.broadcast %cst_5 : bf16 to vector<16x18x8xbf16>
    %18 = arith.maximumf %16, %17 : vector<16x18x8xbf16>
    %19 = vector.extract_strided_slice %18 {offsets = [0, 0, 0], sizes = [16, 16, 8], strides = [1, 1, 1]} : vector<16x18x8xbf16> to vector<16x16x8xbf16>
    %20 = vector.shape_cast %19 : vector<16x16x8xbf16> to vector<256x8xbf16>
    %21 = vector.extract_strided_slice %18 {offsets = [0, 1, 0], sizes = [16, 16, 8], strides = [1, 1, 1]} : vector<16x18x8xbf16> to vector<16x16x8xbf16>
    %22 = vector.shape_cast %21 : vector<16x16x8xbf16> to vector<256x8xbf16>
    %23 = vector.extract_strided_slice %18 {offsets = [0, 2, 0], sizes = [16, 16, 8], strides = [1, 1, 1]} : vector<16x18x8xbf16> to vector<16x16x8xbf16>
    %24 = vector.shape_cast %23 : vector<16x16x8xbf16> to vector<256x8xbf16>
    %c2_i32 = arith.constant 2 : i32
    %25 = arith.addi %0, %c2_i32 : i32
    %c0_6 = arith.constant 0 : index
    %26 = arith.index_cast %25 : i32 to index
    %c0_7 = arith.constant 0 : index
    %c0_8 = arith.constant 0 : index
    %27 = vector.load %arg2[%c0_6, %26, %c0_7, %c0_8] : memref<1x18x18x8xbf16, #tpu.memory_space<vmem>>, vector<1x16x18x8xbf16>
    %28 = vector.shape_cast %27 : vector<1x16x18x8xbf16> to vector<16x18x8xbf16>
    %cst_9 = arith.constant 0.000000e+00 : bf16
    %29 = vector.broadcast %cst_9 : bf16 to vector<16x18x8xbf16>
    %30 = arith.maximumf %28, %29 : vector<16x18x8xbf16>
    %31 = vector.extract_strided_slice %30 {offsets = [0, 0, 0], sizes = [16, 16, 8], strides = [1, 1, 1]} : vector<16x18x8xbf16> to vector<16x16x8xbf16>
    %32 = vector.shape_cast %31 : vector<16x16x8xbf16> to vector<256x8xbf16>
    %33 = vector.extract_strided_slice %30 {offsets = [0, 1, 0], sizes = [16, 16, 8], strides = [1, 1, 1]} : vector<16x18x8xbf16> to vector<16x16x8xbf16>
    %34 = vector.shape_cast %33 : vector<16x16x8xbf16> to vector<256x8xbf16>
    %35 = vector.extract_strided_slice %30 {offsets = [0, 2, 0], sizes = [16, 16, 8], strides = [1, 1, 1]} : vector<16x18x8xbf16> to vector<16x16x8xbf16>
    %36 = vector.shape_cast %35 : vector<16x16x8xbf16> to vector<256x8xbf16>
    %cst_10 = arith.constant 0.000000e+00 : f32
    %37 = vector.broadcast %cst_10 : f32 to vector<1x4xf32>
    %cst_11 = arith.constant 0.000000e+00 : f32
    %38 = vector.broadcast %cst_11 : f32 to vector<1x4xf32>
    %39 = tpu.concatenate %8, %10, %20, %22 in 1 : vector<256x8xbf16>, vector<256x8xbf16>, vector<256x8xbf16>, vector<256x8xbf16> -> vector<256x32xbf16>
    %c0_12 = arith.constant 0 : index
    %c0_13 = arith.constant 0 : index
    %c0_14 = arith.constant 0 : index
    %c0_15 = arith.constant 0 : index
    %40 = vector.load %arg3[%c0_12, %c0_13, %c0_14, %c0_15] : memref<2x2x32x4xbf16, #tpu.memory_space<vmem>>, vector<1x1x32x4xbf16>
    %41 = vector.shape_cast %40 : vector<1x1x32x4xbf16> to vector<32x4xbf16>
    %cst_16 = arith.constant dense<0.000000e+00> : vector<256x4xf32>
    %42 = tpu.matmul %39, %41, %cst_16 {dimension_numbers = #tpu.dot_dimension_numbers<[1], [0], [0], [1], [0, 0, 1, 1], [], []>} : vector<256x32xbf16>, vector<32x4xbf16>, vector<256x4xf32> -> vector<256x4xf32>
    %cst_17 = arith.constant dense<0.000000e+00> : vector<4xf32>
    %43 = vector.multi_reduction <add>, %42, %cst_17 [0] : vector<256x4xf32> to vector<4xf32>
    %44 = vector.shape_cast %43 : vector<4xf32> to vector<1x4xf32>
    %45 = arith.addf %37, %44 : vector<1x4xf32>
    %46 = arith.mulf %42, %42 : vector<256x4xf32>
    %cst_18 = arith.constant dense<0.000000e+00> : vector<4xf32>
    %47 = vector.multi_reduction <add>, %46, %cst_18 [0] : vector<256x4xf32> to vector<4xf32>
    %48 = vector.shape_cast %47 : vector<4xf32> to vector<1x4xf32>
    %49 = arith.addf %38, %48 : vector<1x4xf32>
    %50 = tpu.concatenate %10, %12, %22, %24 in 1 : vector<256x8xbf16>, vector<256x8xbf16>, vector<256x8xbf16>, vector<256x8xbf16> -> vector<256x32xbf16>
    %c0_19 = arith.constant 0 : index
    %c1 = arith.constant 1 : index
    %c0_20 = arith.constant 0 : index
    %c0_21 = arith.constant 0 : index
    %51 = vector.load %arg3[%c0_19, %c1, %c0_20, %c0_21] : memref<2x2x32x4xbf16, #tpu.memory_space<vmem>>, vector<1x1x32x4xbf16>
    %52 = vector.shape_cast %51 : vector<1x1x32x4xbf16> to vector<32x4xbf16>
    %cst_22 = arith.constant dense<0.000000e+00> : vector<256x4xf32>
    %53 = tpu.matmul %50, %52, %cst_22 {dimension_numbers = #tpu.dot_dimension_numbers<[1], [0], [0], [1], [0, 0, 1, 1], [], []>} : vector<256x32xbf16>, vector<32x4xbf16>, vector<256x4xf32> -> vector<256x4xf32>
    %cst_23 = arith.constant dense<0.000000e+00> : vector<4xf32>
    %54 = vector.multi_reduction <add>, %53, %cst_23 [0] : vector<256x4xf32> to vector<4xf32>
    %55 = vector.shape_cast %54 : vector<4xf32> to vector<1x4xf32>
    %56 = arith.addf %45, %55 : vector<1x4xf32>
    %57 = arith.mulf %53, %53 : vector<256x4xf32>
    %cst_24 = arith.constant dense<0.000000e+00> : vector<4xf32>
    %58 = vector.multi_reduction <add>, %57, %cst_24 [0] : vector<256x4xf32> to vector<4xf32>
    %59 = vector.shape_cast %58 : vector<4xf32> to vector<1x4xf32>
    %60 = arith.addf %49, %59 : vector<1x4xf32>
    %61 = tpu.concatenate %42, %53 in 1 : vector<256x4xf32>, vector<256x4xf32> -> vector<256x8xf32>
    %62 = vector.shape_cast %61 : vector<256x8xf32> to vector<16x16x8xf32>
    %63 = arith.truncf %62 : vector<16x16x8xf32> to vector<16x16x8xbf16>
    %c0_25 = arith.constant 0 : index
    %c0_26 = arith.constant 0 : index
    %c0_27 = arith.constant 0 : index
    %c0_28 = arith.constant 0 : index
    %c0_29 = arith.constant 0 : index
    %64 = vector.load %arg4[%c0_25, %c0_26, %c0_27, %c0_28, %c0_29] : memref<1x16x2x16x8xbf16, #tpu.memory_space<vmem>>, vector<1x16x1x16x8xbf16>
    %65 = vector.shape_cast %64 : vector<1x16x1x16x8xbf16> to vector<16x16x8xbf16>
    %66 = vector.shape_cast %63 : vector<16x16x8xbf16> to vector<1x16x1x16x8xbf16>
    tpu.vector_store %arg4[%c0_25, %c0_26, %c0_27, %c0_28, %c0_29], %66 {strides = array<i32>} : memref<1x16x2x16x8xbf16, #tpu.memory_space<vmem>>, vector<1x16x1x16x8xbf16>,
    %67 = tpu.concatenate %20, %22, %32, %34 in 1 : vector<256x8xbf16>, vector<256x8xbf16>, vector<256x8xbf16>, vector<256x8xbf16> -> vector<256x32xbf16>
    %c1_30 = arith.constant 1 : index
    %c0_31 = arith.constant 0 : index
    %c0_32 = arith.constant 0 : index
    %c0_33 = arith.constant 0 : index
    %68 = vector.load %arg3[%c1_30, %c0_31, %c0_32, %c0_33] : memref<2x2x32x4xbf16, #tpu.memory_space<vmem>>, vector<1x1x32x4xbf16>
    %69 = vector.shape_cast %68 : vector<1x1x32x4xbf16> to vector<32x4xbf16>
    %cst_34 = arith.constant dense<0.000000e+00> : vector<256x4xf32>
    %70 = tpu.matmul %67, %69, %cst_34 {dimension_numbers = #tpu.dot_dimension_numbers<[1], [0], [0], [1], [0, 0, 1, 1], [], []>} : vector<256x32xbf16>, vector<32x4xbf16>, vector<256x4xf32> -> vector<256x4xf32>
    %cst_35 = arith.constant dense<0.000000e+00> : vector<4xf32>
    %71 = vector.multi_reduction <add>, %70, %cst_35 [0] : vector<256x4xf32> to vector<4xf32>
    %72 = vector.shape_cast %71 : vector<4xf32> to vector<1x4xf32>
    %73 = arith.addf %56, %72 : vector<1x4xf32>
    %74 = arith.mulf %70, %70 : vector<256x4xf32>
    %cst_36 = arith.constant dense<0.000000e+00> : vector<4xf32>
    %75 = vector.multi_reduction <add>, %74, %cst_36 [0] : vector<256x4xf32> to vector<4xf32>
    %76 = vector.shape_cast %75 : vector<4xf32> to vector<1x4xf32>
    %77 = arith.addf %60, %76 : vector<1x4xf32>
    %78 = tpu.concatenate %22, %24, %34, %36 in 1 : vector<256x8xbf16>, vector<256x8xbf16>, vector<256x8xbf16>, vector<256x8xbf16> -> vector<256x32xbf16>
    %c1_37 = arith.constant 1 : index
    %c1_38 = arith.constant 1 : index
    %c0_39 = arith.constant 0 : index
    %c0_40 = arith.constant 0 : index
    %79 = vector.load %arg3[%c1_37, %c1_38, %c0_39, %c0_40] : memref<2x2x32x4xbf16, #tpu.memory_space<vmem>>, vector<1x1x32x4xbf16>
    %80 = vector.shape_cast %79 : vector<1x1x32x4xbf16> to vector<32x4xbf16>
    %cst_41 = arith.constant dense<0.000000e+00> : vector<256x4xf32>
    %81 = tpu.matmul %78, %80, %cst_41 {dimension_numbers = #tpu.dot_dimension_numbers<[1], [0], [0], [1], [0, 0, 1, 1], [], []>} : vector<256x32xbf16>, vector<32x4xbf16>, vector<256x4xf32> -> vector<256x4xf32>
    %cst_42 = arith.constant dense<0.000000e+00> : vector<4xf32>
    %82 = vector.multi_reduction <add>, %81, %cst_42 [0] : vector<256x4xf32> to vector<4xf32>
    %83 = vector.shape_cast %82 : vector<4xf32> to vector<1x4xf32>
    %84 = arith.addf %73, %83 : vector<1x4xf32>
    %85 = arith.mulf %81, %81 : vector<256x4xf32>
    %cst_43 = arith.constant dense<0.000000e+00> : vector<4xf32>
    %86 = vector.multi_reduction <add>, %85, %cst_43 [0] : vector<256x4xf32> to vector<4xf32>
    %87 = vector.shape_cast %86 : vector<4xf32> to vector<1x4xf32>
    %88 = arith.addf %77, %87 : vector<1x4xf32>
    %89 = tpu.concatenate %70, %81 in 1 : vector<256x4xf32>, vector<256x4xf32> -> vector<256x8xf32>
    %90 = vector.shape_cast %89 : vector<256x8xf32> to vector<16x16x8xf32>
    %91 = arith.truncf %90 : vector<16x16x8xf32> to vector<16x16x8xbf16>
    %c0_44 = arith.constant 0 : index
    %c0_45 = arith.constant 0 : index
    %c1_46 = arith.constant 1 : index
    %c0_47 = arith.constant 0 : index
    %c0_48 = arith.constant 0 : index
    %92 = vector.load %arg4[%c0_44, %c0_45, %c1_46, %c0_47, %c0_48] : memref<1x16x2x16x8xbf16, #tpu.memory_space<vmem>>, vector<1x16x1x16x8xbf16>
    %93 = vector.shape_cast %92 : vector<1x16x1x16x8xbf16> to vector<16x16x8xbf16>
    %94 = vector.shape_cast %91 : vector<16x16x8xbf16> to vector<1x16x1x16x8xbf16>
    tpu.vector_store %arg4[%c0_44, %c0_45, %c1_46, %c0_47, %c0_48], %94 {strides = array<i32>} : memref<1x16x2x16x8xbf16, #tpu.memory_space<vmem>>, vector<1x16x1x16x8xbf16>,
    %95 = tpu.concatenate %84, %88 in 0 : vector<1x4xf32>, vector<1x4xf32> -> vector<2x4xf32>
    %c0_49 = arith.constant 0 : index
    %c0_50 = arith.constant 0 : index
    %c0_51 = arith.constant 0 : index
    %c0_52 = arith.constant 0 : index
    %96 = vector.load %arg5[%c0_49, %c0_50, %c0_51, %c0_52] : memref<1x1x2x4xf32, #tpu.memory_space<vmem>>, vector<1x1x2x4xf32>
    %97 = vector.shape_cast %96 : vector<1x1x2x4xf32> to vector<2x4xf32>
    %98 = vector.shape_cast %95 : vector<2x4xf32> to vector<1x1x2x4xf32>
    tpu.vector_store %arg5[%c0_49, %c0_50, %c0_51, %c0_52], %98 {strides = array<i32>} : memref<1x1x2x4xf32, #tpu.memory_space<vmem>>, vector<1x1x2x4xf32>,
    return
  }
  func.func @transform_0(%arg0: i32, %arg1: i32) -> (i32, i32, i32, i32) {
    %c0_i32 = arith.constant 0 : i32
    %c0_i32_0 = arith.constant 0 : i32
    %c0_i32_1 = arith.constant 0 : i32
    %c0_i32_2 = arith.constant 0 : i32
    return %arg0, %c0_i32, %c0_i32_0, %c0_i32_1 : i32, i32, i32, i32
  }
  func.func @transform_1(%arg0: i32, %arg1: i32) -> (i32, i32, i32, i32) {
    %c0_i32 = arith.constant 0 : i32
    %c0_i32_0 = arith.constant 0 : i32
    %c0_i32_1 = arith.constant 0 : i32
    %c0_i32_2 = arith.constant 0 : i32
    %c0_i32_3 = arith.constant 0 : i32
    return %c0_i32, %c0_i32_0, %c0_i32_1, %c0_i32_2 : i32, i32, i32, i32
  }
  func.func @transform_2(%arg0: i32, %arg1: i32) -> (i32, i32, i32, i32, i32) {
    %c0_i32 = arith.constant 0 : i32
    %c0_i32_0 = arith.constant 0 : i32
    %c0_i32_1 = arith.constant 0 : i32
    %c0_i32_2 = arith.constant 0 : i32
    return %arg0, %arg1, %c0_i32, %c0_i32_0, %c0_i32_1 : i32, i32, i32, i32, i32
  }
  func.func @transform_3(%arg0: i32, %arg1: i32) -> (i32, i32, i32, i32) {
    %c0_i32 = arith.constant 0 : i32
    %c0_i32_0 = arith.constant 0 : i32
    %c0_i32_1 = arith.constant 0 : i32
    return %arg0, %arg1, %c0_i32, %c0_i32_0 : i32, i32, i32, i32
  }
}

module attributes {stable_mosaic.version = 11 : i64} {
  func.func @_bn_apply_nchw_kernel(%arg0: i32, %arg1: i32, %arg2: memref<1x1024x4xbf16, #tpu.memory_space<vmem>>, %arg3: memref<4x1xf32, #tpu.memory_space<vmem>>, %arg4: memref<4x1xf32, #tpu.memory_space<vmem>>, %arg5: memref<1x4x1024xf32, #tpu.memory_space<vmem>>) attributes {dimension_semantics = [#tpu.dimension_semantics<parallel>, #tpu.dimension_semantics<parallel>], iteration_bounds = array<i64: 2, 1>, scalar_prefetch = 0 : i64, scratch_operands = 0 : i64, tpu.core_type = #tpu.core_type<tc>, window_params = [{transform_indices = @transform_0, window_bounds = array<i64: 1, 1024, 4>}, {pipeline_mode = #tpu.pipeline_mode<synchronous>, transform_indices = @transform_1, window_bounds = array<i64: 4, 1>}, {pipeline_mode = #tpu.pipeline_mode<synchronous>, transform_indices = @transform_2, window_bounds = array<i64: 4, 1>}, {transform_indices = @transform_3, window_bounds = array<i64: 1, 4, 1024>}]} {
    %c0 = arith.constant 0 : index
    %c0_0 = arith.constant 0 : index
    %c0_1 = arith.constant 0 : index
    %0 = vector.load %arg2[%c0, %c0_0, %c0_1] : memref<1x1024x4xbf16, #tpu.memory_space<vmem>>, vector<1x1024x4xbf16>
    %1 = vector.shape_cast %0 : vector<1x1024x4xbf16> to vector<1024x4xbf16>
    %2 = arith.extf %1 : vector<1024x4xbf16> to vector<1024x4xf32>
    %cst = arith.constant 0.000000e+00 : f32
    %3 = vector.broadcast %cst : f32 to vector<1024x124xf32>
    %4 = tpu.concatenate %2, %3 in 1 : vector<1024x4xf32>, vector<1024x124xf32> -> vector<1024x128xf32>
    %5 = tpu.transpose %4, [1, 0] : vector<1024x128xf32> -> vector<128x1024xf32>
    %6 = vector.extract_strided_slice %5 {offsets = [0, 0], sizes = [4, 1024], strides = [1, 1]} : vector<128x1024xf32> to vector<4x1024xf32>
    %c0_2 = arith.constant 0 : index
    %c0_3 = arith.constant 0 : index
    %7 = vector.load %arg3[%c0_2, %c0_3] : memref<4x1xf32, #tpu.memory_space<vmem>>, vector<4x1xf32>
    %8 = vector.broadcast %7 : vector<4x1xf32> to vector<4x1024xf32>
    %9 = arith.mulf %6, %8 : vector<4x1024xf32>
    %c0_4 = arith.constant 0 : index
    %c0_5 = arith.constant 0 : index
    %10 = vector.load %arg4[%c0_4, %c0_5] : memref<4x1xf32, #tpu.memory_space<vmem>>, vector<4x1xf32>
    %11 = vector.broadcast %10 : vector<4x1xf32> to vector<4x1024xf32>
    %12 = arith.addf %9, %11 : vector<4x1024xf32>
    %c0_6 = arith.constant 0 : index
    %c0_7 = arith.constant 0 : index
    %c0_8 = arith.constant 0 : index
    %13 = vector.load %arg5[%c0_6, %c0_7, %c0_8] : memref<1x4x1024xf32, #tpu.memory_space<vmem>>, vector<1x4x1024xf32>
    %14 = vector.shape_cast %13 : vector<1x4x1024xf32> to vector<4x1024xf32>
    %15 = vector.shape_cast %12 : vector<4x1024xf32> to vector<1x4x1024xf32>
    tpu.vector_store %arg5[%c0_6, %c0_7, %c0_8], %15 {strides = array<i32>} : memref<1x4x1024xf32, #tpu.memory_space<vmem>>, vector<1x4x1024xf32>,
    return
  }
  func.func @transform_0(%arg0: i32, %arg1: i32) -> (i32, i32, i32) {
    %c0_i32 = arith.constant 0 : i32
    %c0_i32_0 = arith.constant 0 : i32
    return %arg0, %arg1, %c0_i32 : i32, i32, i32
  }
  func.func @transform_1(%arg0: i32, %arg1: i32) -> (i32, i32) {
    %c0_i32 = arith.constant 0 : i32
    %c0_i32_0 = arith.constant 0 : i32
    %c0_i32_1 = arith.constant 0 : i32
    return %c0_i32, %c0_i32_0 : i32, i32
  }
  func.func @transform_2(%arg0: i32, %arg1: i32) -> (i32, i32) {
    %c0_i32 = arith.constant 0 : i32
    %c0_i32_0 = arith.constant 0 : i32
    %c0_i32_1 = arith.constant 0 : i32
    return %c0_i32, %c0_i32_0 : i32, i32
  }
  func.func @transform_3(%arg0: i32, %arg1: i32) -> (i32, i32, i32) {
    %c0_i32 = arith.constant 0 : i32
    %c0_i32_0 = arith.constant 0 : i32
    return %arg0, %c0_i32, %arg1 : i32, i32, i32
  }
}

</mosaic_0001>

<bundles_post_ra>
// kernel: decoder_block_forward.3
= control target key start
LH: loop header
LB: loop body
LE: loop exit
PB: predicated region body
PF: predicated region fallthrough
CT: control target
= control target key end

     0   :  { %s1538_s12 = smov 0   ;;  %s1540_s13 = smov 0   ;;  %s1775_s0 = inlined_call_operand.vmem [shape: bf16[2,1024,4], index: 0, kind: input, shape index: {}]   ;;  %s1776_s1 = inlined_call_operand.vmem [shape: f32[4,1], index: 1, kind: input, shape index: {}]   ;;  %s1777_s2 = inlined_call_operand.vmem [shape: f32[4,1], index: 2, kind: input, shape index: {}]   ;;  %s1778_s3 = inlined_call_operand.vmem [shape: f32[2,4,1024], index: 3, kind: output, shape index: {}]  }
   0x1   :  { %s1542_s14 = smov 0  }
   0x2 LB: > { %s25_s15 = sadd.s32 1, %s1511_s13  ;;  %p990_p0 = scmp.ge.s32.totalorder %s1515_s14, 1  ;;  %s1515_s14 = sphi %s1542_s14, %s13_s14   ;;  %s1511_s13 = sphi %s1540_s13, %s1780_s13   ;;  %s1507_s12 = sphi %s1538_s12, %s1779_s12  }
   0x3   : > { %p27_p1 = scmp.ge.s32.totalorder %s25_s15, 2  ;;  %p158_p2 = scmp.lt.s32.totalorder %s1515_s14, 3 }
   0x5   : > { %s1782_s15 = smov (%p27_p1, %s25_s15), 0  ;;  %p159_p3 = pnand %p990_p0, %p158_p2 }
   0x6   : > { %p191_p4 = scmp.lt.s32.totalorder (!%p159_p3), %s1507_s12, 1  ;;  %vm466_vm0 = vcmask (!%p159_p3), 31744  }
   0x7   : > { %162 = sbr.rel (%p159_p3) target bundleno = 326 (0x146), region = 32 }
   0xe   : > { %s1784_s12 = smov (!%p191_p4, %s1507_s12), 1 }
   0xf   : > { %s997_s16 = sshll.u32 %s1784_s12, 9  ;;  %s998_s24 = sshll.u32 %s1784_s12, 5 }
  0x10   : > { %s1562_s19 = scalar_lea.vmem %s1775_s0, %s997_s16  ;;  %s208_s27 = scalar_lea.vmem %s1778_s3, %s998_s24 }
  0x11   : > { %v1000_v0 = vld [vmem:[%s1562_s19] sm:$0xff]   ;;  %v1255_v2 = vld [vmem:[%s1562_s19 + $0x8] sm:$0xff]   ;;  %v1256_v29 = vld [vmem:[%s1562_s19 + $0x10] sm:$0xff]  }
  0x12   : > { %v1262_v1 = vld [vmem:[%s1562_s19 + $0x40] sm:$0xff]   ;;  %v1001_v3 = vunpack.c.l.bf16 %v1000_v0  ;;  %v1002_v5 = vunpack.c.h.bf16 %v1000_v0  ;;  %v1263_v7 = vld [vmem:[%s1562_s19 + $0x48] sm:$0xff]   ;;  %v1005_v8 = vunpack.c.l.bf16 %v1255_v2  ;;  %v1006_v17 = vunpack.c.h.bf16 %v1255_v2  ;;  %v1264_v30 = vld [vmem:[%s1562_s19 + $0x50] sm:$0xff]  }
  0x13   : > { %v1033_v4 = vunpack.c.l.bf16 %v1262_v1  ;;  %v1034_v6 = vunpack.c.h.bf16 %v1262_v1  ;;  %v1037_v9 = vunpack.c.l.bf16 %v1263_v7  ;;  %v1270_v10 = vld [vmem:[%s1562_s19 + $0x80] sm:$0xff]   ;;  %v1038_v21 = vunpack.c.h.bf16 %v1263_v7  ;;  %v1271_v27 = vld [vmem:[%s1562_s19 + $0x88] sm:$0xff]   ;;  %v1272_v47 = vld [vmem:[%s1562_s19 + $0x90] sm:$0xff]  }
  0x14   : > { %v467_v11 = vsel %vm466_vm0, %v1001_v3, 0.0  ;;  %v468_v13 = vsel %vm466_vm0, %v1002_v5, 0.0  ;;  %v1278_v15 = vld [vmem:[%s1562_s19 + $0xc0] sm:$0xff]   ;;  %v1065_v18 = vunpack.c.l.bf16 %v1270_v10  ;;  %v469_v20 = vsel %vm466_vm0, %v1005_v8, 0.0  ;;  %v1279_v31 = vld [vmem:[%s1562_s19 + $0xc8] sm:$0xff]   ;;  %v1280_v48 = vld [vmem:[%s1562_s19 + $0xd0] sm:$0xff]  }
  0x15   : > { %v483_v12 = vsel %vm466_vm0, %v1033_v4, 0.0  ;;  %v484_v14 = vsel %vm466_vm0, %v1034_v6, 0.0  ;;  %v1097_v22 = vunpack.c.l.bf16 %v1278_v15  ;;  %v485_v23 = vsel %vm466_vm0, %v1037_v9, 0.0  ;;  %v1257_v55 = vld [vmem:[%s1562_s19 + $0x18] sm:$0xff]  }
  0x16   : > { %v1343_v16 = vpack.i.bf16 %v483_v12, %v467_v11  ;;  %v1345_v19 = vpack.i.bf16 %v484_v14, %v468_v13  ;;  %v499_v24 = vsel %vm466_vm0, %v1065_v18, 0.0  ;;  %v1066_v25 = vunpack.c.h.bf16 %v1270_v10  ;;  %v1265_v56 = vld [vmem:[%s1562_s19 + $0x58] sm:$0xff]  }
  0x17   : > { %v1098_v26 = vunpack.c.h.bf16 %v1278_v15  ;;  %v515_v28 = vsel %vm466_vm0, %v1097_v22, 0.0  ;;  %v1347_v35 = vpack.i.bf16 %v485_v23, %v469_v20  ;;  %v470_v36 = vsel %vm466_vm0, %v1006_v17, 0.0  ;;  %v1273_v7 = vld [vmem:[%s1562_s19 + $0x98] sm:$0xff]   ;;  %v1258_v15 = vld [vmem:[%s1562_s19 + $0x20] sm:$0xff]  }
  0x18   : > { %1344 = vxpose.xlu0.b32.start [1/16] (narrow) %v1343_v16, 8  ;;  %v1380_v32 = vpack.i.bf16 %v515_v28, %v499_v24  ;;  %v500_v33 = vsel %vm466_vm0, %v1066_v25, 0.0  ;;  %v486_v37 = vsel %vm466_vm0, %v1038_v21, 0.0  ;;  %v1069_v38 = vunpack.c.l.bf16 %v1271_v27  ;;  %v1281_v8 = vld [vmem:[%s1562_s19 + $0xd8] sm:$0xff]   ;;  %v1266_v16 = vld [vmem:[%s1562_s19 + $0x60] sm:$0xff]  }
  0x19   : > { %v516_v34 = vsel %vm466_vm0, %v1098_v26, 0.0  ;;  %v1009_v39 = vunpack.c.l.bf16 %v1256_v29  ;;  %v1041_v40 = vunpack.c.l.bf16 %v1264_v30  ;;  %v1101_v42 = vunpack.c.l.bf16 %v1279_v31 }
  0x1a   : > { %1381 = vxpose.xlu1.b32.start [1/16] (narrow) %v1380_v32, 8  ;;  %v1382_v41 = vpack.i.bf16 %v516_v34, %v500_v33  ;;  %v501_v43 = vsel %vm466_vm0, %v1069_v38, 0.0  ;;  %v1070_v44 = vunpack.c.h.bf16 %v1271_v27  ;;  %v1102_v45 = vunpack.c.h.bf16 %v1279_v31  ;;  %v1274_v31 = vld [vmem:[%s1562_s19 + $0xa0] sm:$0xff]  }
  0x1b   : > { %v517_v46 = vsel %vm466_vm0, %v1101_v42, 0.0  ;;  %v1349_v49 = vpack.i.bf16 %v486_v37, %v470_v36  ;;  %v1010_v50 = vunpack.c.h.bf16 %v1256_v29  ;;  %v471_v51 = vsel %vm466_vm0, %v1009_v39, 0.0  ;;  %v1282_v32 = vld [vmem:[%s1562_s19 + $0xe0] sm:$0xff]   ;;  %v1259_v39 = vld [vmem:[%s1562_s19 + $0x28] sm:$0xff]  }
  0x1c   : > { %1346 = vxpose.xlu0.b32.cont [2/16] (narrow) %v1345_v19, 8  ;;  %v487_v52 = vsel %vm466_vm0, %v1041_v40, 0.0  ;;  %v1042_v53 = vunpack.c.h.bf16 %v1264_v30  ;;  %v1384_v54 = vpack.i.bf16 %v517_v46, %v501_v43  ;;  %v502_v57 = vsel %vm466_vm0, %v1070_v44, 0.0  ;;  %v1267_v40 = vld [vmem:[%s1562_s19 + $0x68] sm:$0xff]  }
  0x1d   : > { %v518_v58 = vsel %vm466_vm0, %v1102_v45, 0.0  ;;  %v1073_v59 = vunpack.c.l.bf16 %v1272_v47  ;;  %v1105_v60 = vunpack.c.l.bf16 %v1280_v48  ;;  %v1351_v61 = vpack.i.bf16 %v487_v52, %v471_v51 }
  0x1e   : > { %1383 = vxpose.xlu1.b32.cont [2/16] (narrow) %v1382_v41, 8  ;;  %v472_v62 = vsel %vm466_vm0, %v1010_v50, 0.0  ;;  %v488_v63 = vsel %vm466_vm0, %v1042_v53, 0.0  ;;  %v1013_v0 = vunpack.c.l.bf16 %v1257_v55  ;;  %v1045_v1 = vunpack.c.l.bf16 %v1265_v56 }
  0x1f   : > { %v1386_v2 = vpack.i.bf16 %v518_v58, %v502_v57  ;;  %v503_v3 = vsel %vm466_vm0, %v1073_v59, 0.0  ;;  %v519_v4 = vsel %vm466_vm0, %v1105_v60, 0.0  ;;  %v1074_v5 = vunpack.c.h.bf16 %v1272_v47 }
  0x20   : > { %1348 = vxpose.xlu0.b32.cont [3/16] (narrow) %v1347_v35, 8  ;;  %v1106_v6 = vunpack.c.h.bf16 %v1280_v48  ;;  %v1353_v9 = vpack.i.bf16 %v488_v63, %v472_v62  ;;  %v1014_v10 = vunpack.c.h.bf16 %v1257_v55  ;;  %v473_v11 = vsel %vm466_vm0, %v1013_v0, 0.0  ;;  %v1275_v55 = vld [vmem:[%s1562_s19 + $0xa8] sm:$0xff]   ;;  %v1260_v63 = vld [vmem:[%s1562_s19 + $0x30] sm:$0xff]  }
  0x21   : > { %v489_v12 = vsel %vm466_vm0, %v1045_v1, 0.0  ;;  %v1046_v13 = vunpack.c.h.bf16 %v1265_v56  ;;  %v1388_v14 = vpack.i.bf16 %v519_v4, %v503_v3  ;;  %v504_v17 = vsel %vm466_vm0, %v1074_v5, 0.0  ;;  %v1283_v56 = vld [vmem:[%s1562_s19 + $0xe8] sm:$0xff]   ;;  %v1268_v0 = vld [vmem:[%s1562_s19 + $0x70] sm:$0xff]  }
  0x22   : > { %1385 = vxpose.xlu1.b32.cont [3/16] (narrow) %v1384_v54, 8  ;;  %v520_v18 = vsel %vm466_vm0, %v1106_v6, 0.0  ;;  %v1077_v19 = vunpack.c.l.bf16 %v1273_v7  ;;  %v1109_v20 = vunpack.c.l.bf16 %v1281_v8  ;;  %v1355_v21 = vpack.i.bf16 %v489_v12, %v473_v11 }
  0x23   : > { %v474_v22 = vsel %vm466_vm0, %v1014_v10, 0.0  ;;  %v490_v23 = vsel %vm466_vm0, %v1046_v13, 0.0  ;;  %v1017_v24 = vunpack.c.l.bf16 %v1258_v15  ;;  %v1049_v25 = vunpack.c.l.bf16 %v1266_v16 }
  0x24   : > { %1350 = vxpose.xlu0.b32.cont [4/16] (narrow) %v1349_v49, 8  ;;  %v1390_v26 = vpack.i.bf16 %v520_v18, %v504_v17  ;;  %v505_v27 = vsel %vm466_vm0, %v1077_v19, 0.0  ;;  %v521_v28 = vsel %vm466_vm0, %v1109_v20, 0.0  ;;  %v1078_v29 = vunpack.c.h.bf16 %v1273_v7 }
  0x25   : > { %v1110_v30 = vunpack.c.h.bf16 %v1281_v8  ;;  %v1357_v33 = vpack.i.bf16 %v490_v23, %v474_v22  ;;  %v1018_v34 = vunpack.c.h.bf16 %v1258_v15  ;;  %v475_v35 = vsel %vm466_vm0, %v1017_v24, 0.0  ;;  %v1276_v15 = vld [vmem:[%s1562_s19 + $0xb0] sm:$0xff]   ;;  %v1261_v23 = vld [vmem:[%s1562_s19 + $0x38] sm:$0xff]  }
  0x26   : > { %1387 = vxpose.xlu1.b32.cont [4/16] (narrow) %v1386_v2, 8  ;;  %v491_v36 = vsel %vm466_vm0, %v1049_v25, 0.0  ;;  %v1050_v37 = vunpack.c.h.bf16 %v1266_v16  ;;  %v1392_v38 = vpack.i.bf16 %v521_v28, %v505_v27  ;;  %v506_v41 = vsel %vm466_vm0, %v1078_v29, 0.0  ;;  %v1284_v16 = vld [vmem:[%s1562_s19 + $0xf0] sm:$0xff]   ;;  %v1269_v24 = vld [vmem:[%s1562_s19 + $0x78] sm:$0xff]  }
  0x27   : > { %v522_v42 = vsel %vm466_vm0, %v1110_v30, 0.0  ;;  %v1081_v43 = vunpack.c.l.bf16 %v1274_v31  ;;  %v1113_v44 = vunpack.c.l.bf16 %v1282_v32  ;;  %v1359_v45 = vpack.i.bf16 %v491_v36, %v475_v35 }
  0x28   : > { %1352 = vxpose.xlu0.b32.cont [5/16] (narrow) %v1351_v61, 8  ;;  %v476_v46 = vsel %vm466_vm0, %v1018_v34, 0.0  ;;  %v492_v47 = vsel %vm466_vm0, %v1050_v37, 0.0  ;;  %v1021_v48 = vunpack.c.l.bf16 %v1259_v39  ;;  %v1053_v49 = vunpack.c.l.bf16 %v1267_v40 }
  0x29   : > { %v1394_v50 = vpack.i.bf16 %v522_v42, %v506_v41  ;;  %v507_v51 = vsel %vm466_vm0, %v1081_v43, 0.0  ;;  %v523_v52 = vsel %vm466_vm0, %v1113_v44, 0.0  ;;  %v1082_v53 = vunpack.c.h.bf16 %v1274_v31 }
  0x2a   : > { %1389 = vxpose.xlu1.b32.cont [5/16] (narrow) %v1388_v14, 8  ;;  %v1114_v54 = vunpack.c.h.bf16 %v1282_v32  ;;  %v1361_v57 = vpack.i.bf16 %v492_v47, %v476_v46  ;;  %v1022_v58 = vunpack.c.h.bf16 %v1259_v39  ;;  %v477_v59 = vsel %vm466_vm0, %v1021_v48, 0.0  ;;  %v1277_v39 = vld [vmem:[%s1562_s19 + $0xb8] sm:$0xff]   ;;  %v1286_v47 = vld [vmem:[%s1562_s19 + $0x100] sm:$0xff]  }
  0x2b   : > { %v493_v60 = vsel %vm466_vm0, %v1053_v49, 0.0  ;;  %v1054_v61 = vunpack.c.h.bf16 %v1267_v40  ;;  %v1396_v62 = vpack.i.bf16 %v523_v52, %v507_v51  ;;  %v508_v1 = vsel %vm466_vm0, %v1082_v53, 0.0  ;;  %v1285_v40 = vld [vmem:[%s1562_s19 + $0xf8] sm:$0xff]   ;;  %v1294_v48 = vld [vmem:[%s1562_s19 + $0x140] sm:$0xff]  }
  0x2c   : > { %1354 = vxpose.xlu0.b32.cont [6/16] (narrow) %v1353_v9, 8  ;;  %v524_v2 = vsel %vm466_vm0, %v1114_v54, 0.0  ;;  %v1085_v3 = vunpack.c.l.bf16 %v1275_v55  ;;  %v1117_v4 = vunpack.c.l.bf16 %v1283_v56  ;;  %v1363_v5 = vpack.i.bf16 %v493_v60, %v477_v59 }
  0x2d   : > { %v478_v6 = vsel %vm466_vm0, %v1022_v58, 0.0  ;;  %v494_v7 = vsel %vm466_vm0, %v1054_v61, 0.0  ;;  %v1025_v8 = vunpack.c.l.bf16 %v1260_v63  ;;  %v1057_v9 = vunpack.c.l.bf16 %v1268_v0 }
  0x2e   : > { %1391 = vxpose.xlu1.b32.cont [6/16] (narrow) %v1390_v26, 8  ;;  %v1398_v10 = vpack.i.bf16 %v524_v2, %v508_v1  ;;  %v509_v11 = vsel %vm466_vm0, %v1085_v3, 0.0  ;;  %v525_v12 = vsel %vm466_vm0, %v1117_v4, 0.0  ;;  %v1086_v13 = vunpack.c.h.bf16 %v1275_v55 }
  0x2f   : > { %v1118_v14 = vunpack.c.h.bf16 %v1283_v56  ;;  %v1365_v17 = vpack.i.bf16 %v494_v7, %v478_v6  ;;  %v1026_v18 = vunpack.c.h.bf16 %v1260_v63  ;;  %v479_v19 = vsel %vm466_vm0, %v1025_v8, 0.0  ;;  %v1302_v63 = vld [vmem:[%s1562_s19 + $0x180] sm:$0xff]   ;;  %v1287_v7 = vld [vmem:[%s1562_s19 + $0x108] sm:$0xff]  }
  0x30   : > { %1356 = vxpose.xlu0.b32.cont [7/16] (narrow) %v1355_v21, 8  ;;  %v495_v20 = vsel %vm466_vm0, %v1057_v9, 0.0  ;;  %v1058_v21 = vunpack.c.h.bf16 %v1268_v0  ;;  %v1400_v22 = vpack.i.bf16 %v525_v12, %v509_v11  ;;  %v510_v25 = vsel %vm466_vm0, %v1086_v13, 0.0  ;;  %v1310_v0 = vld [vmem:[%s1562_s19 + $0x1c0] sm:$0xff]   ;;  %v1295_v8 = vld [vmem:[%s1562_s19 + $0x148] sm:$0xff]  }
  0x31   : > { %v526_v26 = vsel %vm466_vm0, %v1118_v14, 0.0  ;;  %v1089_v27 = vunpack.c.l.bf16 %v1276_v15  ;;  %v1121_v28 = vunpack.c.l.bf16 %v1284_v16  ;;  %v1367_v29 = vpack.i.bf16 %v495_v20, %v479_v19 }
  0x32   : > { %1393 = vxpose.xlu1.b32.cont [7/16] (narrow) %v1392_v38, 8  ;;  %v480_v30 = vsel %vm466_vm0, %v1026_v18, 0.0  ;;  %v496_v31 = vsel %vm466_vm0, %v1058_v21, 0.0  ;;  %v1029_v32 = vunpack.c.l.bf16 %v1261_v23  ;;  %v1402_v34 = vpack.i.bf16 %v526_v26, %v510_v25 }
  0x33   : > { %v511_v35 = vsel %vm466_vm0, %v1089_v27, 0.0  ;;  %v527_v36 = vsel %vm466_vm0, %v1121_v28, 0.0  ;;  %v1090_v37 = vunpack.c.h.bf16 %v1276_v15  ;;  %v1122_v38 = vunpack.c.h.bf16 %v1284_v16 }
  0x34   : > { %1358 = vxpose.xlu0.b32.cont [8/16] (narrow) %v1357_v33, 8  ;;  %v1061_v33 = vunpack.c.l.bf16 %v1269_v24  ;;  %v1369_v41 = vpack.i.bf16 %v496_v31, %v480_v30  ;;  %v1030_v42 = vunpack.c.h.bf16 %v1261_v23  ;;  %v481_v43 = vsel %vm466_vm0, %v1029_v32, 0.0  ;;  %v1303_v23 = vld [vmem:[%s1562_s19 + $0x188] sm:$0xff]   ;;  %v1288_v31 = vld [vmem:[%s1562_s19 + $0x110] sm:$0xff]  }
  0x35   : > { %v1404_v46 = vpack.i.bf16 %v527_v36, %v511_v35  ;;  %v512_v49 = vsel %vm466_vm0, %v1090_v37, 0.0  ;;  %v1093_v51 = vunpack.c.l.bf16 %v1277_v39  ;;  %v1125_v52 = vunpack.c.l.bf16 %v1285_v40  ;;  %v1296_v32 = vld [vmem:[%s1562_s19 + $0x150] sm:$0xff]  }
  0x36   : > { %1395 = vxpose.xlu1.b32.cont [8/16] (narrow) %v1394_v50, 8  ;;  %v497_v44 = vsel %vm466_vm0, %v1061_v33, 0.0  ;;  %v528_v50 = vsel %vm466_vm0, %v1122_v38, 0.0  ;;  %v482_v54 = vsel %vm466_vm0, %v1030_v42, 0.0  ;;  %v1129_v56 = vunpack.c.l.bf16 %v1286_v47 }
  0x37   : > { %v1371_v53 = vpack.i.bf16 %v497_v44, %v481_v43  ;;  %v1406_v58 = vpack.i.bf16 %v528_v50, %v512_v49  ;;  %v513_v59 = vsel %vm466_vm0, %v1093_v51, 0.0  ;;  %v529_v60 = vsel %vm466_vm0, %v1125_v52, 0.0 }
  0x38   : > { %1360 = vxpose.xlu0.b32.cont [9/16] (narrow) %v1359_v45, 8  ;;  %v1062_v45 = vunpack.c.h.bf16 %v1269_v24  ;;  %v1094_v61 = vunpack.c.h.bf16 %v1277_v39  ;;  %v1130_v2 = vunpack.c.h.bf16 %v1286_v47  ;;  %v1162_v3 = vunpack.c.h.bf16 %v1294_v48  ;;  %v1311_v24 = vld [vmem:[%s1562_s19 + $0x1c8] sm:$0xff]   ;;  %v1304_v47 = vld [vmem:[%s1562_s19 + $0x190] sm:$0xff]  }
  0x39   : > { %v531_v4 = vsel %vm466_vm0, %v1129_v56, 0.0  ;;  %v1408_v6 = vpack.i.bf16 %v529_v60, %v513_v59  ;;  %v1193_v11 = vunpack.c.l.bf16 %v1302_v63  ;;  %v1225_v12 = vunpack.c.l.bf16 %v1310_v0  ;;  %v1297_v56 = vld [vmem:[%s1562_s19 + $0x158] sm:$0xff]  }
  0x3a   : > { %1397 = vxpose.xlu1.b32.cont [9/16] (narrow) %v1396_v62, 8  ;;  %v498_v55 = vsel %vm466_vm0, %v1062_v45, 0.0  ;;  %v1126_v62 = vunpack.c.h.bf16 %v1285_v40  ;;  %v514_v9 = vsel %vm466_vm0, %v1094_v61, 0.0  ;;  %v532_v14 = vsel %vm466_vm0, %v1130_v2, 0.0 }
  0x3b   : > { %v1373_v1 = vpack.i.bf16 %v498_v55, %v482_v54  ;;  %v548_v15 = vsel %vm466_vm0, %v1162_v3, 0.0  ;;  %v1133_v16 = vunpack.c.l.bf16 %v1287_v7  ;;  %v1194_v19 = vunpack.c.h.bf16 %v1302_v63  ;;  %v1289_v55 = vld [vmem:[%s1562_s19 + $0x118] sm:$0xff]  }
  0x3c   : > { %1362 = vxpose.xlu0.b32.cont [10/16] (narrow) %v1361_v57, 8  ;;  %v1161_v57 = vunpack.c.l.bf16 %v1294_v48  ;;  %v1226_v20 = vunpack.c.h.bf16 %v1310_v0  ;;  %v563_v21 = vsel %vm466_vm0, %v1193_v11, 0.0  ;;  %v1419_v25 = vpack.i.bf16 %v548_v15, %v532_v14  ;;  %v1312_v48 = vld [vmem:[%s1562_s19 + $0x1d0] sm:$0xff]   ;;  %v1290_v15 = vld [vmem:[%s1562_s19 + $0x120] sm:$0xff]  }
  0x3d   : > { %v1134_v26 = vunpack.c.h.bf16 %v1287_v7  ;;  %v533_v27 = vsel %vm466_vm0, %v1133_v16, 0.0  ;;  %v564_v33 = vsel %vm466_vm0, %v1194_v19, 0.0  ;;  %v1197_v35 = vunpack.c.l.bf16 %v1303_v23  ;;  %v1305_v7 = vld [vmem:[%s1562_s19 + $0x198] sm:$0xff]   ;;  %v1298_v16 = vld [vmem:[%s1562_s19 + $0x160] sm:$0xff]  }
  0x3e   : > { %1399 = vxpose.xlu1.b32.cont [10/16] (narrow) %v1398_v10, 8  ;;  %v530_v10 = vsel %vm466_vm0, %v1126_v62, 0.0  ;;  %v1229_v36 = vunpack.c.l.bf16 %v1311_v24  ;;  %v1137_v40 = vunpack.c.l.bf16 %v1288_v31  ;;  %v1198_v45 = vunpack.c.h.bf16 %v1303_v23 }
  0x3f   : > { %v1410_v18 = vpack.i.bf16 %v530_v10, %v514_v9  ;;  %v534_v38 = vsel %vm466_vm0, %v1134_v26, 0.0  ;;  %v565_v43 = vsel %vm466_vm0, %v1197_v35, 0.0  ;;  %v1138_v50 = vunpack.c.h.bf16 %v1288_v31  ;;  %v1306_v31 = vld [vmem:[%s1562_s19 + $0x1a0] sm:$0xff]  }
  0x40   : > { %1364 = vxpose.xlu0.b32.cont [11/16] (narrow) %v1363_v5, 8  ;;  %v547_v5 = vsel %vm466_vm0, %v1161_v57, 0.0  ;;  %v581_v44 = vsel %vm466_vm0, %v1229_v36, 0.0  ;;  %v535_v51 = vsel %vm466_vm0, %v1137_v40, 0.0  ;;  %v566_v57 = vsel %vm466_vm0, %v1198_v45, 0.0  ;;  %v1299_v40 = vld [vmem:[%s1562_s19 + $0x168] sm:$0xff]  }
  0x41   : > { %v1417_v13 = vpack.i.bf16 %v547_v5, %v531_v4  ;;  %v1458_v54 = vpack.i.bf16 %v581_v44, %v565_v43  ;;  %v1201_v59 = vunpack.c.l.bf16 %v1304_v47  ;;  %v1233_v60 = vunpack.c.l.bf16 %v1312_v48 }
  0x42   : > { %1401 = vxpose.xlu1.b32.cont [11/16] (narrow) %v1400_v22, 8  ;;  %v579_v22 = vsel %vm466_vm0, %v1225_v12, 0.0  ;;  %v536_v62 = vsel %vm466_vm0, %v1138_v50, 0.0  ;;  %v1141_v0 = vunpack.c.l.bf16 %v1289_v55  ;;  %v1202_v5 = vunpack.c.h.bf16 %v1304_v47 }
  0x43   : > { %v1454_v30 = vpack.i.bf16 %v579_v22, %v563_v21  ;;  %v567_v3 = vsel %vm466_vm0, %v1201_v59, 0.0  ;;  %v583_v4 = vsel %vm466_vm0, %v1233_v60, 0.0  ;;  %v1142_v10 = vunpack.c.h.bf16 %v1289_v55  ;;  %v1307_v55 = vld [vmem:[%s1562_s19 + $0x1a8] sm:$0xff]  }
  0x44   : > { %1366 = vxpose.xlu0.b32.cont [12/16] (narrow) %v1365_v17, 8  ;;  %v1165_v17 = vunpack.c.l.bf16 %v1295_v8  ;;  %v537_v11 = vsel %vm466_vm0, %v1141_v0, 0.0  ;;  %v1462_v14 = vpack.i.bf16 %v583_v4, %v567_v3  ;;  %v1205_v19 = vunpack.c.l.bf16 %v1305_v7  ;;  %v1300_v0 = vld [vmem:[%s1562_s19 + $0x170] sm:$0xff]  }
  0x45   : > { %v538_v22 = vsel %vm466_vm0, %v1142_v10, 0.0  ;;  %v1209_v43 = vunpack.c.l.bf16 %v1306_v31  ;;  %v1213_v3 = vunpack.c.l.bf16 %v1307_v55 }
  0x46   : > { %1403 = vxpose.xlu1.b32.cont [12/16] (narrow) %v1402_v34, 8  ;;  %v549_v28 = vsel %vm466_vm0, %v1165_v17, 0.0  ;;  %v580_v34 = vsel %vm466_vm0, %v1226_v20, 0.0  ;;  %v568_v17 = vsel %vm466_vm0, %v1202_v5, 0.0 }
  0x47   : > { %v1421_v37 = vpack.i.bf16 %v549_v28, %v533_v27  ;;  %v1456_v42 = vpack.i.bf16 %v580_v34, %v564_v33  ;;  %v569_v27 = vsel %vm466_vm0, %v1205_v19, 0.0  ;;  %v1146_v34 = vunpack.c.h.bf16 %v1290_v15 }
  0x48   : > { %1368 = vxpose.xlu0.b32.cont [13/16] (narrow) %v1367_v29, 8  ;;  %v1166_v29 = vunpack.c.h.bf16 %v1295_v8  ;;  %v1313_v8 = vld [vmem:[%s1562_s19 + $0x1d8] sm:$0xff]  }
  0x49   : > { %v1237_v20 = vunpack.c.l.bf16 %v1313_v8 }
  0x4a   : > { %1405 = vxpose.xlu1.b32.cont [13/16] (narrow) %v1404_v46, 8  ;;  %v550_v39 = vsel %vm466_vm0, %v1166_v29, 0.0  ;;  %v1230_v46 = vunpack.c.h.bf16 %v1311_v24  ;;  %v1145_v24 = vunpack.c.l.bf16 %v1290_v15  ;;  %v1206_v29 = vunpack.c.h.bf16 %v1305_v7  ;;  %v1308_v15 = vld [vmem:[%s1562_s19 + $0x1b0] sm:$0xff]  }
  0x4b   : > { %v1423_v49 = vpack.i.bf16 %v550_v39, %v534_v38  ;;  %v585_v28 = vsel %vm466_vm0, %v1237_v20, 0.0  ;;  %v1291_v39 = vld [vmem:[%s1562_s19 + $0x128] sm:$0xff]  }
  0x4c   : > { %1370 = vxpose.xlu0.b32.cont [14/16] (narrow) %v1369_v41, 8  ;;  %v1169_v41 = vunpack.c.l.bf16 %v1296_v32  ;;  %v539_v35 = vsel %vm466_vm0, %v1145_v24, 0.0  ;;  %v1466_v38 = vpack.i.bf16 %v585_v28, %v569_v27  ;;  %v1301_v24 = vld [vmem:[%s1562_s19 + $0x178] sm:$0xff]   ;;  %v1217_v27 = vunpack.c.l.bf16 %v1308_v15 }
  0x4e   : > { %1407 = vxpose.xlu1.b32.cont [14/16] (narrow) %v1406_v58, 8  ;;  %v551_v52 = vsel %vm466_vm0, %v1169_v41, 0.0  ;;  %v582_v58 = vsel %vm466_vm0, %v1230_v46, 0.0  ;;  %v570_v41 = vsel %vm466_vm0, %v1206_v29, 0.0  ;;  %v540_v46 = vsel %vm466_vm0, %v1146_v34, 0.0 }
  0x4f   : > { %v1425_v61 = vpack.i.bf16 %v551_v52, %v535_v51  ;;  %v1460_v2 = vpack.i.bf16 %v582_v58, %v566_v57  ;;  %v571_v51 = vsel %vm466_vm0, %v1209_v43, 0.0  ;;  %v1150_v58 = vunpack.c.h.bf16 %v1291_v39 }
  0x50   : > { %1372 = vxpose.xlu0.b32.cont [15/16] (narrow) %v1371_v53, 8  ;;  %v1170_v53 = vunpack.c.h.bf16 %v1296_v32  ;;  %v1314_v32 = vld [vmem:[%s1562_s19 + $0x1e0] sm:$0xff]  }
  0x51   : > { %v1241_v44 = vunpack.c.l.bf16 %v1314_v32 }
  0x52   : > { %1409 = vxpose.xlu1.b32.cont [15/16] (narrow) %v1408_v6, 8  ;;  %v552_v63 = vsel %vm466_vm0, %v1170_v53, 0.0  ;;  %v1234_v6 = vunpack.c.h.bf16 %v1312_v48  ;;  %v1149_v48 = vunpack.c.l.bf16 %v1291_v39  ;;  %v1210_v53 = vunpack.c.h.bf16 %v1306_v31  ;;  %v1309_v39 = vld [vmem:[%s1562_s19 + $0x1b8] sm:$0xff]  }
  0x53   : > { %v1427_v9 = vpack.i.bf16 %v552_v63, %v536_v62  ;;  %v587_v52 = vsel %vm466_vm0, %v1241_v44, 0.0  ;;  %v1292_v63 = vld [vmem:[%s1562_s19 + $0x130] sm:$0xff]  }
  0x54   : > { %1374 = vxpose.xlu0.b32.end [16/16] (narrow) %v1373_v1, 8  ;;  %v1173_v1 = vunpack.c.l.bf16 %v1297_v56  ;;  %v541_v59 = vsel %vm466_vm0, %v1149_v48, 0.0  ;;  %v1470_v62 = vpack.i.bf16 %v587_v52, %v571_v51 }
  0x56   : > { %1411 = vxpose.xlu1.b32.end [16/16] (narrow) %v1410_v18, 8  ;;  %v553_v12 = vsel %vm466_vm0, %v1173_v1, 0.0  ;;  %v584_v18 = vsel %vm466_vm0, %v1234_v6, 0.0  ;;  %v572_v1 = vsel %vm466_vm0, %v1210_v53, 0.0  ;;  %v542_v6 = vsel %vm466_vm0, %v1150_v58, 0.0 }
  0x57   : > { %v1429_v21 = vpack.i.bf16 %v553_v12, %v537_v11  ;;  %v1464_v26 = vpack.i.bf16 %v584_v18, %v568_v17  ;;  %v573_v11 = vsel %vm466_vm0, %v1213_v3, 0.0  ;;  %v1154_v18 = vunpack.c.h.bf16 %v1292_v63 }
  0x58   : > { %1418 = vxpose.xlu0.b32.start [1/16] (narrow) %v1417_v13, 8  ;;  %v1174_v13 = vunpack.c.h.bf16 %v1297_v56  ;;  %v1315_v56 = vld [vmem:[%s1562_s19 + $0x1e8] sm:$0xff]   ;;  %v1517_v3 = vmov 0  }
  0x59   : > { %v1245_v4 = vunpack.c.l.bf16 %v1315_v56 }
  0x5a   : > { %1455 = vxpose.xlu1.b32.start [1/16] (narrow) %v1454_v30, 8  ;;  %v554_v23 = vsel %vm466_vm0, %v1174_v13, 0.0  ;;  %v1238_v30 = vunpack.c.h.bf16 %v1313_v8  ;;  %v1153_v8 = vunpack.c.l.bf16 %v1292_v63  ;;  %v1214_v13 = vunpack.c.h.bf16 %v1307_v55 }
  0x5b   : > { %v1431_v33 = vpack.i.bf16 %v554_v23, %v538_v22  ;;  %v589_v12 = vsel %vm466_vm0, %v1245_v4, 0.0  ;;  %v1293_v23 = vld [vmem:[%s1562_s19 + $0x138] sm:$0xff]   ;;  %v851_v4 = vld [vmem:[%s1776_s1] sm:$0xf] }
  0x5c   : > { %1420 = vxpose.xlu0.b32.cont [2/16] (narrow) %v1419_v25, 8  ;;  %v1177_v25 = vunpack.c.l.bf16 %v1298_v16  ;;  %v543_v19 = vsel %vm466_vm0, %v1153_v8, 0.0  ;;  %v1474_v22 = vpack.i.bf16 %v589_v12, %v573_v11 }
  0x5e   : > { %1457 = vxpose.xlu1.b32.cont [2/16] (narrow) %v1456_v42, 8  ;;  %v555_v36 = vsel %vm466_vm0, %v1177_v25, 0.0  ;;  %v586_v42 = vsel %vm466_vm0, %v1238_v30, 0.0  ;;  %v574_v25 = vsel %vm466_vm0, %v1214_v13, 0.0  ;;  %v544_v30 = vsel %vm466_vm0, %v1154_v18, 0.0 }
  0x5f   : > { %v1433_v45 = vpack.i.bf16 %v555_v36, %v539_v35  ;;  %v1468_v50 = vpack.i.bf16 %v586_v42, %v570_v41  ;;  %v575_v35 = vsel %vm466_vm0, %v1217_v27, 0.0  ;;  %v1158_v42 = vunpack.c.h.bf16 %v1293_v23 }
  0x60   : > { %1422 = vxpose.xlu0.b32.cont [3/16] (narrow) %v1421_v37, 8  ;;  %v1178_v37 = vunpack.c.h.bf16 %v1298_v16  ;;  %v1316_v16 = vld [vmem:[%s1562_s19 + $0x1f0] sm:$0xff]  }
  0x61   : > { %v1249_v28 = vunpack.c.l.bf16 %v1316_v16  ;;  %v546_v52 = vsel %vm466_vm0, %v1158_v42, 0.0 }
  0x62   : > { %1459 = vxpose.xlu1.b32.cont [3/16] (narrow) %v1458_v54, 8  ;;  %v556_v47 = vsel %vm466_vm0, %v1178_v37, 0.0  ;;  %v1242_v54 = vunpack.c.h.bf16 %v1314_v32  ;;  %v1157_v32 = vunpack.c.l.bf16 %v1293_v23  ;;  %v1218_v37 = vunpack.c.h.bf16 %v1308_v15 }
  0x63   : > { %v1435_v57 = vpack.i.bf16 %v556_v47, %v540_v46  ;;  %v591_v36 = vsel %vm466_vm0, %v1249_v28, 0.0 }
  0x64   : > { %1424 = vxpose.xlu0.b32.cont [4/16] (narrow) %v1423_v49, 8  ;;  %v1181_v49 = vunpack.c.l.bf16 %v1299_v40  ;;  %v545_v43 = vsel %vm466_vm0, %v1157_v32, 0.0  ;;  %v1478_v46 = vpack.i.bf16 %v591_v36, %v575_v35  ;;  %v576_v47 = vsel %vm466_vm0, %v1218_v37, 0.0 }
  0x66   : > { %1461 = vxpose.xlu1.b32.cont [4/16] (narrow) %v1460_v2, 8  ;;  %v557_v60 = vsel %vm466_vm0, %v1181_v49, 0.0  ;;  %v588_v2 = vsel %vm466_vm0, %v1242_v54, 0.0  ;;  %v1221_v49 = vunpack.c.l.bf16 %v1309_v39 }
  0x67   : > { %v1437_v5 = vpack.i.bf16 %v557_v60, %v541_v59  ;;  %v1472_v10 = vpack.i.bf16 %v588_v2, %v572_v1  ;;  %v865_v2 = vld [vmem:[%s1777_s2] sm:$0xf] }
  0x68   : > { %1426 = vxpose.xlu0.b32.cont [5/16] (narrow) %v1425_v61, 8  ;;  %v1182_v61 = vunpack.c.h.bf16 %v1299_v40  ;;  %v1317_v40 = vld [vmem:[%s1562_s19 + $0x1f8] sm:$0xff]   ;;  %v577_v55 = vsel %vm466_vm0, %v1221_v49, 0.0 }
  0x69   : > { %v1254_v58 = vunpack.c.h.bf16 %v1317_v40 }
  0x6a   : > { %1463 = vxpose.xlu1.b32.cont [5/16] (narrow) %v1462_v14, 8  ;;  %v558_v7 = vsel %vm466_vm0, %v1182_v61, 0.0  ;;  %v1246_v14 = vunpack.c.h.bf16 %v1315_v56 }
  0x6b   : > { %v1439_v17 = vpack.i.bf16 %v558_v7, %v542_v6 }
  0x6c   : > { %1428 = vxpose.xlu0.b32.cont [6/16] (narrow) %v1427_v9, 8  ;;  %v1185_v9 = vunpack.c.l.bf16 %v1300_v0 }
  0x6e   : > { %1465 = vxpose.xlu1.b32.cont [6/16] (narrow) %v1464_v26, 8  ;;  %v559_v20 = vsel %vm466_vm0, %v1185_v9, 0.0  ;;  %v590_v26 = vsel %vm466_vm0, %v1246_v14, 0.0 }
  0x6f   : > { %v1441_v29 = vpack.i.bf16 %v559_v20, %v543_v19  ;;  %v1476_v34 = vpack.i.bf16 %v590_v26, %v574_v25 }
  0x70   : > { %1430 = vxpose.xlu0.b32.cont [7/16] (narrow) %v1429_v21, 8  ;;  %v1186_v21 = vunpack.c.h.bf16 %v1300_v0 }
  0x72   : > { %1467 = vxpose.xlu1.b32.cont [7/16] (narrow) %v1466_v38, 8  ;;  %v560_v31 = vsel %vm466_vm0, %v1186_v21, 0.0  ;;  %v1250_v38 = vunpack.c.h.bf16 %v1316_v16 }
  0x73   : > { %v1443_v41 = vpack.i.bf16 %v560_v31, %v544_v30 }
  0x74   : > { %1432 = vxpose.xlu0.b32.cont [8/16] (narrow) %v1431_v33, 8  ;;  %v1189_v33 = vunpack.c.l.bf16 %v1301_v24  ;;  %v592_v48 = vsel %vm466_vm0, %v1250_v38, 0.0 }
  0x75   : > { %v1480_v54 = vpack.i.bf16 %v592_v48, %v576_v47 }
  0x76   : > { %1469 = vxpose.xlu1.b32.cont [8/16] (narrow) %v1468_v50, 8  ;;  %v561_v44 = vsel %vm466_vm0, %v1189_v33, 0.0  ;;  %v1253_v50 = vunpack.c.l.bf16 %v1317_v40 }
  0x77   : > { %v1445_v51 = vpack.i.bf16 %v561_v44, %v545_v43 }
  0x78   : > { %1434 = vxpose.xlu0.b32.cont [9/16] (narrow) %v1433_v45, 8  ;;  %v1190_v45 = vunpack.c.h.bf16 %v1301_v24  ;;  %v593_v56 = vsel %vm466_vm0, %v1253_v50, 0.0 }
  0x79   : > { %v1482_v60 = vpack.i.bf16 %v593_v56, %v577_v55 }
  0x7a   : > { %1471 = vxpose.xlu1.b32.cont [9/16] (narrow) %v1470_v62, 8  ;;  %v562_v53 = vsel %vm466_vm0, %v1190_v45, 0.0  ;;  %v594_v62 = vsel %vm466_vm0, %v1254_v58, 0.0 }
  0x7b   : > { %v1447_v59 = vpack.i.bf16 %v562_v53, %v546_v52 }
  0x7c   : > { %1436 = vxpose.xlu0.b32.cont [10/16] (narrow) %v1435_v57, 8  ;;  %v1222_v57 = vunpack.c.h.bf16 %v1309_v39 }
  0x7e   : > { %1473 = vxpose.xlu1.b32.cont [10/16] (narrow) %v1472_v10, 8  ;;  %v578_v61 = vsel %vm466_vm0, %v1222_v57, 0.0 }
  0x7f   : > { %v1484_v63 = vpack.i.bf16 %v594_v62, %v578_v61 }
  0x80   : > { %1438 = vxpose.xlu0.b32.cont [11/16] (narrow) %v1437_v5, 8 }
  0x82   : > { %1475 = vxpose.xlu1.b32.cont [11/16] (narrow) %v1474_v22, 8 }
  0x84   : > { %1440 = vxpose.xlu0.b32.cont [12/16] (narrow) %v1439_v17, 8 }
  0x86   : > { %1477 = vxpose.xlu1.b32.cont [12/16] (narrow) %v1476_v34, 8 }
  0x88   : > { %1442 = vxpose.xlu0.b32.cont [13/16] (narrow) %v1441_v29, 8 }
  0x8a   : > { %1479 = vxpose.xlu1.b32.cont [13/16] (narrow) %v1478_v46, 8 }
  0x8c   : > { %1444 = vxpose.xlu0.b32.cont [14/16] (narrow) %v1443_v41, 8 }
  0x8e   : > { %1481 = vxpose.xlu1.b32.cont [14/16] (narrow) %v1480_v54, 8 }
  0x90   : > { %1446 = vxpose.xlu0.b32.cont [15/16] (narrow) %v1445_v51, 8 }
  0x92   : > { %1483 = vxpose.xlu1.b32.cont [15/16] (narrow) %v1482_v60, 8 }
  0x94   : > { %1448 = vxpose.xlu0.b32.end [16/16] (narrow) %v1447_v59, 8 }
  0x96   : > { %1485 = vxpose.xlu1.b32.end [16/16] (narrow) %v1484_v63, 8 }
  0x98   : > { %v1375_v0 = vpop.trf.xlu0 }
  0x99   : > { %v1379_v9 = vunpack.i.h.bf16 %v1375_v0  ;;  %v1376_v10 = vunpack.i.l.bf16 %v1375_v0 }
  0x9a   : > { %v1412_v1 = vpop.trf.xlu1 }
  0x9b   : > { %v1416_v11 = vunpack.i.h.bf16 %v1412_v1  ;;  %v1413_v12 = vunpack.i.l.bf16 %v1412_v1 }
  0xb4   : > { %1492 = vset.pattern.permute.xlu1 %v1517_v3 }
  0xb5   : > { %868 = vperm.xlu1 %1492, %v865_v2  }
  0xbd   : > { %1491 = vset.pattern.permute.xlu0 %v1517_v3 }
  0xbe   : > { %854 = vperm.xlu0 %1491, %v851_v4  }
  0xd8   : > { %v1449_v5 = vpop.trf.xlu0 }
  0xd9   : > { %v1453_v13 = vunpack.i.h.bf16 %v1449_v5  ;;  %v1450_v14 = vunpack.i.l.bf16 %v1449_v5 }
  0xda   : > { %v1486_v6 = vpop.trf.xlu1 }
  0xdb   : > { %v1490_v7 = vunpack.i.h.bf16 %v1486_v6  ;;  %v1487_v8 = vunpack.i.l.bf16 %v1486_v6 }
 0x134   : > { %v869_v16 = vpop.permute.xlu1 %868 }
 0x13d   : > { %v855_v15 = vpop.permute.xlu0 %854 }
 0x13e   : > { %v857_v17 = vmul.f32 %v1376_v10, %v855_v15  ;;  %v858_v18 = vmul.f32 %v1379_v9, %v855_v15  ;;  %v859_v19 = vmul.f32 %v1413_v12, %v855_v15  ;;  %v860_v20 = vmul.f32 %v1416_v11, %v855_v15 }
 0x13f   : > { %v861_v21 = vmul.f32 %v1450_v14, %v855_v15  ;;  %v862_v22 = vmul.f32 %v1453_v13, %v855_v15  ;;  %v863_v23 = vmul.f32 %v1487_v8, %v855_v15  ;;  %v864_v24 = vmul.f32 %v1490_v7, %v855_v15 }
 0x140   : > { %v871_v25 = vadd.f32 %v869_v16, %v857_v17  ;;  %v872_v26 = vadd.f32 %v869_v16, %v858_v18  ;;  %v873_v27 = vadd.f32 %v869_v16, %v859_v19  ;;  %v874_v28 = vadd.f32 %v869_v16, %v860_v20 }
 0x141   : > { %v875_v29 = vadd.f32 %v869_v16, %v861_v21  ;;  %v876_v30 = vadd.f32 %v869_v16, %v862_v22  ;;  %v877_v31 = vadd.f32 %v869_v16, %v863_v23  ;;  %v878_v32 = vadd.f32 %v869_v16, %v864_v24 }
 0x142   : > { %v887_v33 = vcombine.low %v871_v25, %v872_v26  ;;  %v888_v34 = vcombine.low %v873_v27, %v874_v28 }
 0x143   : > { %v889_v35 = vcombine.low %v875_v29, %v876_v30  ;;  %v890_v36 = vcombine.low %v877_v31, %v878_v32 }
 0x144   : > { %895 = vst [vmem:[%s208_s27] sm:$0xff] %v887_v33  ;;  %896 = vst [vmem:[%s208_s27 + $0x8] sm:$0xff] %v888_v34 }
 0x145   : > { %897 = vst [vmem:[%s208_s27 + $0x10] sm:$0xff] %v889_v35  ;;  %898 = vst [vmem:[%s208_s27 + $0x18] sm:$0xff] %v890_v36 }
 0x146 PF: > { %s13_s14 = sadd.s32 1, %s1515_s14   ;;  %s1779_s12 = smov %s1511_s13 }
 0x147   : > { %p10_p5 = scmp.ge.s32.totalorder %s13_s14, 4   ;;  %s1780_s13 = smov %s1782_s15 }
 0x149   :  { %12 = sbr.rel (!%p10_p5) target bundleno = 2 (0x2), region = 62 }

// kernel: decoder_block_forward.2
= control target key start
LH: loop header
LB: loop body
LE: loop exit
PB: predicated region body
PF: predicated region fallthrough
CT: control target
= control target key end

     0   :  { %s6741_s12 = smov 0   ;;  %s6743_s13 = smov 0   ;;  %s10022_s0 = inlined_call_operand.vmem [shape: bf16[2,18,18,8], index: 0, kind: input, shape index: {}]   ;;  %s10023_s1 = inlined_call_operand.vmem [shape: bf16[2,2,32,4], index: 1, kind: input, shape index: {}]   ;;  %s10024_s2 = inlined_call_operand.vmem [shape: bf16[2,16,2,16,8], index: 2, kind: output, shape index: {0}]   ;;  %s10025_s3 = inlined_call_operand.vmem [shape: f32[2,1,2,4], index: 3, kind: output, shape index: {1}]  }
   0x1   :  { %s6745_s14 = smov 0  }
   0x2 LB: > { %s26_s15 = sadd.s32 1, %s6710_s13  ;;  %p5738_p0 = scmp.ge.s32.totalorder %s6714_s14, 1  ;;  %s6714_s14 = sphi %s6745_s14, %s14_s14   ;;  %s6710_s13 = sphi %s6743_s13, %s10488_s13   ;;  %s6706_s12 = sphi %s6741_s12, %s10487_s12  }
   0x3   : > { %p28_p1 = scmp.ge.s32.totalorder %s26_s15, 2  ;;  %p156_p2 = scmp.lt.s32.totalorder %s6714_s14, 3 }
   0x5   : > { %s10490_s15 = smov (%p28_p1, %s26_s15), 0  ;;  %p157_p3 = pnand %p5738_p0, %p156_p2 }
   0x7   : > { %160 = sbr.rel (%p157_p3) target bundleno = 873 (0x369), region = 28 }
   0xe   : > { %p192_p4 = scmp.lt.s32.totalorder %s6706_s12, 1  ;;  %vm316_vm0 = vsmask.f32 3328  ;;  %v10074_v3 = vmov 0   ;;  %vm317_vm1 = vsmask.f32 7440 }
   0xf   : > { %vm6806_vm2 = vmor %vm316_vm0, %vm317_vm1  ;;  %s6717_s20 = smov 8   ;;  %vm751_vm3 = vcmask 1042432   ;;  %vm752_vm4 = vcmask 1046532   ;;  %s6718_s21 = smov 16   ;;  %vm2442_vm6 = vcmask 64512   ;;  %vm2491_vm7 = vcmask 130048  }
  0x10   : > { %s10492_s12 = smov (!%p192_p4, %s6706_s12), 1  ;;  %vm7282_vm5 = vmor %vm751_vm3, %vm752_vm4  ;;  %s6719_s22 = smov 24   ;;  %vm2524_vm8 = vcmask 195584   ;;  %vm2573_vm9 = vcmask 261120   ;;  %vm2767_vm10 = vcmask 31744   ;;  %vm3914_vm11 = vcmask 60416  }
  0x11   : > { %s6494_s16 = smul.u32 216, %s10492_s12  ;;  %s6213_s17 = sshll.u32 %s10492_s12, 8  ;;  %vm5592_vm12 = vcmask 1040384   ;;  %vm5594_vm13 = vcmask 25600  }
  0x13   : > { %s6765_s19 = scalar_lea.vmem %s10022_s0, %s6494_s16  ;;  %s6720_s16 = smov 4  }
  0x14   : > { %v226_v0 = vld [vmem:[%s6765_s19 + $0x18] sm:$0xf]  ;;  %v227_v1 = vld [vmem:[%s6765_s19 + $0x1c] sm:$0xf]  ;;  %v228_v2 = vld [vmem:[%s6765_s19 + $0x20] sm:$0x1] }
  0x15   : > { %v6771_v4 = vmax.bf16 %v10074_v3, %v226_v0  ;;  %v6774_v5 = vmax.bf16 %v10074_v3, %v227_v1  ;;  %v6777_v6 = vmax.bf16 %v10074_v3, %v228_v2  ;;  %v220_v7 = vld [vmem:[%s6765_s19] sm:$0xf]  ;;  %v221_v8 = vld [vmem:[%s6765_s19 + $0x4] sm:$0xf]  ;;  %v222_v9 = vld [vmem:[%s6765_s19 + $0x8] sm:$0x1] }
  0x16   : > { %v6783_v10 = vmax.bf16 %v10074_v3, %v220_v7  ;;  %v6786_v11 = vmax.bf16 %v10074_v3, %v221_v8  ;;  %v6789_v12 = vmax.bf16 %v10074_v3, %v222_v9  ;;  %v229_v17 = vld [vmem:[%s6765_s19 + $0x24] sm:$0xf]  ;;  %v230_v22 = vld [vmem:[%s6765_s19 + $0x28] sm:$0xf]  ;;  %v231_v27 = vld [vmem:[%s6765_s19 + $0x2c] sm:$0x1] }
  0x17   : > { %10182 = vst [vmem:[#allocation2_spill] sm:$0xff] %v6771_v4  ;;  %v368_v13 = vshrl.u32 %v6771_v4, 16  ;;  %v371_v14 = vshll.u32 %v6771_v4, 16  ;;  %v377_v15 = vshll.u32 %v6774_v5, 16  ;;  %v381_v16 = vshrl.u32 %v6774_v5, 16 }
  0x18   : > { %10183 = vst [vmem:[#allocation3_spill] sm:$0xff] %v6783_v10  ;;  %10184 = vst [vmem:[#allocation4_spill] sm:$0xff] %v6786_v11  ;;  %v387_v18 = vshll.u32 %v6777_v6, 16  ;;  %v320_v19 = vshrl.u32 %v6783_v10, 16  ;;  %v323_v20 = vshll.u32 %v6783_v10, 16  ;;  %v329_v21 = vshll.u32 %v6786_v11, 16 }
  0x19   : > { %v370_v23 = vrot.slane %v368_v13, 4  ;;  %v373_v24 = vrot.slane %v371_v14, 5  ;;  %v379_v25 = vrot.slane %v377_v15, 5  ;;  %v383_v26 = vrot.slane %v381_v16, 4  ;;  %v223_v49 = vld [vmem:[%s6765_s19 + $0xc] sm:$0xf] }
  0x1a   : > { %v389_v28 = vrot.slane %v387_v18, 5  ;;  %v322_v29 = vrot.slane %v320_v19, 4  ;;  %v325_v30 = vrot.slane %v323_v20, 5  ;;  %v331_v31 = vrot.slane %v329_v21, 5  ;;  %v224_v54 = vld [vmem:[%s6765_s19 + $0x10] sm:$0xf] }
  0x1b   : > { %v374_v32 = vor.u32 %v373_v24, %v370_v23  ;;  %v384_v33 = vor.u32 %v383_v26, %v379_v25  ;;  %v333_v34 = vshrl.u32 %v6786_v11, 16  ;;  %v339_v35 = vshll.u32 %v6789_v12, 16  ;;  %v225_v55 = vld [vmem:[%s6765_s19 + $0x14] sm:$0x1]  ;;  %v235_v60 = vld [vmem:[%s6765_s19 + $0x3c] sm:$0xf] }
  0x1c   : > { %v326_v37 = vor.u32 %v325_v30, %v322_v29  ;;  %v6811_v38 = vmax.bf16 %v10074_v3, %v229_v17  ;;  %v6814_v39 = vmax.bf16 %v10074_v3, %v230_v22  ;;  %v6817_v40 = vmax.bf16 %v10074_v3, %v231_v27  ;;  %v236_v15 = vld [vmem:[%s6765_s19 + $0x40] sm:$0xf] }
  0x1d   : > { %v375_v41 = vrot.slane %v374_v32, 4  ;;  %v385_v42 = vrot.slane %v384_v33, 4  ;;  %v335_v43 = vrot.slane %v333_v34, 4  ;;  %v341_v44 = vrot.slane %v339_v35, 5  ;;  %v232_v34 = vld [vmem:[%s6765_s19 + $0x30] sm:$0xf] }
  0x1e   : > { %10187 = vst [vmem:[#allocation5_spill] sm:$0xff] %v6811_v38  ;;  %10188 = vst [vmem:[#allocation6_spill] sm:$0xff] %v6814_v39  ;;  %v327_v45 = vrot.slane %v326_v37, 4  ;;  %v392_v46 = vshrl.u32 %v6811_v38, 16  ;;  %v395_v47 = vshll.u32 %v6811_v38, 16  ;;  %v401_v48 = vshll.u32 %v6814_v39, 16 }
  0x1f   : > { %v380_v50 = vsel %vm6806_vm2, %v375_v41, %v379_v25  ;;  %v390_v51 = vsel %vm6806_vm2, %v385_v42, %v389_v28  ;;  %v336_v52 = vor.u32 %v335_v43, %v331_v31  ;;  %v405_v53 = vshrl.u32 %v6814_v39, 16  ;;  %v237_v25 = vld [vmem:[%s6765_s19 + $0x44] sm:$0x1]  ;;  %v233_v43 = vld [vmem:[%s6765_s19 + $0x34] sm:$0xf] }
  0x20   : > { %v6830_v56 = vcombine.low %v380_v50, %v390_v51  ;;  %v332_v57 = vsel %vm6806_vm2, %v327_v45, %v331_v31  ;;  %v394_v58 = vrot.slane %v392_v46, 4  ;;  %v397_v59 = vrot.slane %v395_v47, 5 }
  0x21   : > { %v337_v61 = vrot.slane %v336_v52, 4  ;;  %v403_v62 = vrot.slane %v401_v48, 5  ;;  %v407_v63 = vrot.slane %v405_v53, 4  ;;  %v411_v0 = vshll.u32 %v6817_v40, 16  ;;  %v234_v48 = vld [vmem:[%s6765_s19 + $0x38] sm:$0x1] }
  0x22   : > { %10189 = vst [vmem:[#allocation7_spill] sm:$0xff] %v6830_v56  ;;  %2254 = vrot.lane.b32.xlu1 %v6830_v56, %s6717_s20  ;;  %v398_v1 = vor.u32 %v397_v59, %v394_v58  ;;  %v6839_v2 = vmax.bf16 %v10074_v3, %v223_v49  ;;  %v6842_v7 = vmax.bf16 %v10074_v3, %v224_v54 }
  0x23   : > { %v6845_v8 = vmax.bf16 %v10074_v3, %v225_v55  ;;  %v342_v9 = vsel %vm6806_vm2, %v337_v61, %v341_v44  ;;  %v408_v13 = vor.u32 %v407_v63, %v403_v62  ;;  %v413_v14 = vrot.slane %v411_v0, 5 }
  0x24   : > { %10190 = vst [vmem:[#allocation8_spill] sm:$0xff] %v6839_v2  ;;  %v6851_v16 = vmax.bf16 %v10074_v3, %v235_v60  ;;  %v6853_v17 = vcombine.low %v332_v57, %v342_v9  ;;  %v399_v18 = vrot.slane %v398_v1, 4  ;;  %v344_v19 = vshrl.u32 %v6839_v2, 16  ;;  %v241_v9 = vld [vmem:[%s6765_s19 + $0x54] sm:$0xf] }
  0x25   : > { %v347_v20 = vshll.u32 %v6839_v2, 16  ;;  %v409_v21 = vrot.slane %v408_v13, 4  ;;  %v353_v22 = vshll.u32 %v6842_v7, 16  ;;  %v357_v23 = vshrl.u32 %v6842_v7, 16 }
  0x26   : > { %10191 = vst [vmem:[#allocation9_spill] sm:$0xff] %v6851_v16  ;;  %10192 = vst [vmem:[#allocation10_spill] sm:$0xff] %v6853_v17  ;;  %v363_v24 = vshll.u32 %v6845_v8, 16  ;;  %2250 = vrot.lane.b32.xlu0 %v6853_v17, %s6717_s20  ;;  %v404_v26 = vsel %vm6806_vm2, %v399_v18, %v403_v62  ;;  %v346_v27 = vrot.slane %v344_v19, 4  ;;  %v6866_v29 = vmax.bf16 %v10074_v3, %v236_v15  ;;  %v242_v19 = vld [vmem:[%s6765_s19 + $0x58] sm:$0xf] }
  0x27   : > { %v349_v28 = vrot.slane %v347_v20, 5  ;;  %v414_v30 = vsel %vm6806_vm2, %v409_v21, %v413_v14  ;;  %v355_v31 = vrot.slane %v353_v22, 5  ;;  %v359_v32 = vrot.slane %v357_v23, 4 }
  0x28   : > { %10193 = vst [vmem:[#allocation11_spill] sm:$0xff] %v6866_v29  ;;  %v365_v33 = vrot.slane %v363_v24, 5  ;;  %v6871_v35 = vcombine.low %v404_v26, %v414_v30  ;;  %v6874_v41 = vmax.bf16 %v10074_v3, %v237_v25  ;;  %v440_v42 = vshrl.u32 %v6851_v16, 16  ;;  %v243_v24 = vld [vmem:[%s6765_s19 + $0x5c] sm:$0x1] }
  0x29   : > { %v350_v37 = vor.u32 %v349_v28, %v346_v27  ;;  %v360_v44 = vor.u32 %v359_v32, %v355_v31  ;;  %v443_v45 = vshll.u32 %v6851_v16, 16  ;;  %v449_v46 = vshll.u32 %v6866_v29, 16 }
  0x2a   : > { %10194 = vst [vmem:[#allocation12_spill] sm:$0xff] %v6871_v35  ;;  %v453_v47 = vshrl.u32 %v6866_v29, 16  ;;  %2256 = vrot.lane.b32.xlu1 %v6871_v35, %s6717_s20  ;;  %v442_v50 = vrot.slane %v440_v42, 4  ;;  %v459_v51 = vshll.u32 %v6874_v41, 16  ;;  %v6886_v52 = vmax.bf16 %v10074_v3, %v232_v34  ;;  %v238_v34 = vld [vmem:[%s6765_s19 + $0x48] sm:$0xf] }
  0x2b   : > { %v351_v49 = vrot.slane %v350_v37, 4  ;;  %v361_v53 = vrot.slane %v360_v44, 4  ;;  %v445_v54 = vrot.slane %v443_v45, 5  ;;  %v451_v55 = vrot.slane %v449_v46, 5 }
  0x2c   : > { %10195 = vst [vmem:[#allocation13_spill] sm:$0xff] %v6886_v52  ;;  %v455_v57 = vrot.slane %v453_v47, 4  ;;  %v461_v59 = vrot.slane %v459_v51, 5  ;;  %v6891_v60 = vmax.bf16 %v10074_v3, %v233_v43  ;;  %v6894_v61 = vmax.bf16 %v10074_v3, %v234_v48 }
  0x2d   : > { %v356_v58 = vsel %vm6806_vm2, %v351_v49, %v355_v31  ;;  %v366_v62 = vsel %vm6806_vm2, %v361_v53, %v365_v33  ;;  %v446_v63 = vor.u32 %v445_v54, %v442_v50  ;;  %v416_v1 = vshrl.u32 %v6886_v52, 16  ;;  %v239_v49 = vld [vmem:[%s6765_s19 + $0x4c] sm:$0xf]  ;;  %v240_v54 = vld [vmem:[%s6765_s19 + $0x50] sm:$0x1] }
  0x2e   : > { %10196 = vst [vmem:[#allocation14_spill] sm:$0xff] %v6891_v60  ;;  %v456_v0 = vor.u32 %v455_v57, %v451_v55  ;;  %v6900_v13 = vcombine.low %v356_v58, %v366_v62  ;;  %v419_v14 = vshll.u32 %v6886_v52, 16  ;;  %v425_v15 = vshll.u32 %v6891_v60, 16 }
  0x2f   : > { %v429_v18 = vshrl.u32 %v6891_v60, 16  ;;  %v447_v20 = vrot.slane %v446_v63, 4  ;;  %v418_v22 = vrot.slane %v416_v1, 4  ;;  %v435_v23 = vshll.u32 %v6894_v61, 16 }
  0x30   : > { %10197 = vst [vmem:[#allocation15_spill] sm:$0xff] %v6900_v13  ;;  %v457_v21 = vrot.slane %v456_v0, 4  ;;  %2252 = vrot.lane.b32.xlu0 %v6900_v13, %s6717_s20  ;;  %v421_v25 = vrot.slane %v419_v14, 5  ;;  %v427_v26 = vrot.slane %v425_v15, 5  ;;  %v6911_v28 = vmax.bf16 %v10074_v3, %v241_v9  ;;  %v247_v14 = vld [vmem:[%s6765_s19 + $0x6c] sm:$0xf] }
  0x31   : > { %v431_v27 = vrot.slane %v429_v18, 4  ;;  %v452_v30 = vsel %vm6806_vm2, %v447_v20, %v451_v55  ;;  %v437_v32 = vrot.slane %v435_v23, 5  ;;  %v6918_v33 = vmax.bf16 %v10074_v3, %v242_v19 }
  0x32   : > { %10198 = vst [vmem:[#allocation16_spill] sm:$0xff] %v6911_v28  ;;  %v462_v31 = vsel %vm6806_vm2, %v457_v21, %v461_v59  ;;  %v422_v42 = vor.u32 %v421_v25, %v418_v22  ;;  %v6924_v44 = vmax.bf16 %v10074_v3, %v243_v24  ;;  %v488_v45 = vshrl.u32 %v6911_v28, 16  ;;  %v248_v25 = vld [vmem:[%s6765_s19 + $0x70] sm:$0xf] }
  0x33   : > { %10199 = vst [vmem:[#allocation17_spill] sm:$0xff] %v6918_v33  ;;  %v6921_v37 = vcombine.low %v452_v30, %v462_v31  ;;  %v432_v43 = vor.u32 %v431_v27, %v427_v26  ;;  %v491_v46 = vshll.u32 %v6911_v28, 16  ;;  %v497_v47 = vshll.u32 %v6918_v33, 16  ;;  %v249_v31 = vld [vmem:[%s6765_s19 + $0x74] sm:$0x1] }
  0x34   : > { %10201 = vst [vmem:[#allocation19_spill] sm:$0xff] %v6924_v44  ;;  %v501_v48 = vshrl.u32 %v6918_v33, 16  ;;  %v423_v50 = vrot.slane %v422_v42, 4  ;;  %v507_v53 = vshll.u32 %v6924_v44, 16  ;;  %v6936_v55 = vmax.bf16 %v10074_v3, %v238_v34 }
  0x35   : > { %10200 = vst [vmem:[#allocation18_spill] sm:$0xff] %v6921_v37  ;;  %2260 = vrot.lane.b32.xlu1 %v6921_v37, %s6717_s20  ;;  %v433_v51 = vrot.slane %v432_v43, 4  ;;  %v490_v57 = vrot.slane %v488_v45, 4  ;;  %v493_v58 = vrot.slane %v491_v46, 5  ;;  %v499_v59 = vrot.slane %v497_v47, 5 }
  0x36   : > { %10202 = vst [vmem:[#allocation20_spill] sm:$0xff] %v6936_v55  ;;  %v503_v62 = vrot.slane %v501_v48, 4  ;;  %v428_v63 = vsel %vm6806_vm2, %v423_v50, %v427_v26  ;;  %v509_v1 = vrot.slane %v507_v53, 5  ;;  %v6943_v9 = vmax.bf16 %v10074_v3, %v239_v49  ;;  %v244_v50 = vld [vmem:[%s6765_s19 + $0x60] sm:$0xf] }
  0x37   : > { %v438_v0 = vsel %vm6806_vm2, %v433_v51, %v437_v32  ;;  %v494_v18 = vor.u32 %v493_v58, %v490_v57  ;;  %v6949_v20 = vmax.bf16 %v10074_v3, %v240_v54  ;;  %v464_v21 = vshrl.u32 %v6936_v55, 16 }
  0x38   : > { %10203 = vst [vmem:[#allocation21_spill] sm:$0xff] %v6943_v9  ;;  %v6946_v15 = vcombine.low %v428_v63, %v438_v0  ;;  %v504_v19 = vor.u32 %v503_v62, %v499_v59  ;;  %v467_v22 = vshll.u32 %v6936_v55, 16  ;;  %v473_v23 = vshll.u32 %v6943_v9, 16  ;;  %v245_v0 = vld [vmem:[%s6765_s19 + $0x64] sm:$0xf] }
  0x39   : > { %v477_v24 = vshrl.u32 %v6943_v9, 16  ;;  %v495_v26 = vrot.slane %v494_v18, 4  ;;  %v483_v30 = vshll.u32 %v6949_v20, 16  ;;  %v6961_v32 = vmax.bf16 %v10074_v3, %v247_v14 }
  0x3a   : > { %10204 = vst [vmem:[#allocation22_spill] sm:$0xff] %v6946_v15  ;;  %2258 = vrot.lane.b32.xlu0 %v6946_v15, %s6717_s20  ;;  %v505_v27 = vrot.slane %v504_v19, 4  ;;  %v466_v34 = vrot.slane %v464_v21, 4  ;;  %v469_v42 = vrot.slane %v467_v22, 5  ;;  %v475_v43 = vrot.slane %v473_v23, 5 }
  0x3b   : > { %10205 = vst [vmem:[#allocation23_spill] sm:$0xff] %v6961_v32  ;;  %v479_v45 = vrot.slane %v477_v24, 4  ;;  %v500_v46 = vsel %vm6806_vm2, %v495_v26, %v499_v59  ;;  %v485_v48 = vrot.slane %v483_v30, 5  ;;  %v6968_v49 = vmax.bf16 %v10074_v3, %v248_v25  ;;  %v246_v19 = vld [vmem:[%s6765_s19 + $0x68] sm:$0x1] }
  0x3c   : > { %v510_v47 = vsel %vm6806_vm2, %v505_v27, %v509_v1  ;;  %v470_v53 = vor.u32 %v469_v42, %v466_v34  ;;  %v6974_v57 = vmax.bf16 %v10074_v3, %v249_v31  ;;  %v536_v58 = vshrl.u32 %v6961_v32, 16  ;;  %v253_v34 = vld [vmem:[%s6765_s19 + $0x84] sm:$0xf] }
  0x3d   : > { %10206 = vst [vmem:[#allocation24_spill] sm:$0xff] %v6968_v49  ;;  %v6971_v51 = vcombine.low %v500_v46, %v510_v47  ;;  %v480_v54 = vor.u32 %v479_v45, %v475_v43  ;;  %v539_v59 = vshll.u32 %v6961_v32, 16  ;;  %v545_v62 = vshll.u32 %v6968_v49, 16 }
  0x3e   : > { %10208 = vst [vmem:[#allocation26_spill] sm:$0xff] %v6974_v57  ;;  %v549_v63 = vshrl.u32 %v6968_v49, 16  ;;  %v471_v1 = vrot.slane %v470_v53, 4  ;;  %v555_v18 = vshll.u32 %v6974_v57, 16  ;;  %v6986_v21 = vmax.bf16 %v10074_v3, %v244_v50 }
  0x3f   : > { %10207 = vst [vmem:[#allocation25_spill] sm:$0xff] %v6971_v51  ;;  %2264 = vrot.lane.b32.xlu1 %v6971_v51, %s6717_s20  ;;  %v481_v14 = vrot.slane %v480_v54, 4  ;;  %v538_v22 = vrot.slane %v536_v58, 4  ;;  %v541_v23 = vrot.slane %v539_v59, 5  ;;  %v547_v24 = vrot.slane %v545_v62, 5 }
  0x40   : > { %10209 = vst [vmem:[#allocation27_spill] sm:$0xff] %v6986_v21  ;;  %v551_v25 = vrot.slane %v549_v63, 4  ;;  %v476_v26 = vsel %vm6806_vm2, %v471_v1, %v475_v43  ;;  %v557_v30 = vrot.slane %v555_v18, 5  ;;  %v6993_v31 = vmax.bf16 %v10074_v3, %v245_v0  ;;  %v254_v54 = vld [vmem:[%s6765_s19 + $0x88] sm:$0xf] }
  0x41   : > { %v486_v27 = vsel %vm6806_vm2, %v481_v14, %v485_v48  ;;  %v542_v45 = vor.u32 %v541_v23, %v538_v22  ;;  %v6999_v47 = vmax.bf16 %v10074_v3, %v246_v19  ;;  %v512_v50 = vshrl.u32 %v6986_v21, 16  ;;  %v255_v63 = vld [vmem:[%s6765_s19 + $0x8c] sm:$0x1] }
  0x42   : > { %10210 = vst [vmem:[#allocation28_spill] sm:$0xff] %v6993_v31  ;;  %v6996_v42 = vcombine.low %v476_v26, %v486_v27  ;;  %v552_v46 = vor.u32 %v551_v25, %v547_v24  ;;  %v515_v43 = vshll.u32 %v6986_v21, 16  ;;  %v521_v53 = vshll.u32 %v6993_v31, 16  ;;  %v250_v27 = vld [vmem:[%s6765_s19 + $0x78] sm:$0xf] }
  0x43   : > { %10212 = vst [vmem:[#allocation30_spill] sm:$0xff] %v6999_v47  ;;  %v525_v48 = vshrl.u32 %v6993_v31, 16  ;;  %v543_v58 = vrot.slane %v542_v45, 4  ;;  %v531_v62 = vshll.u32 %v6999_v47, 16  ;;  %v7011_v0 = vmax.bf16 %v10074_v3, %v253_v34 }
  0x44   : > { %10211 = vst [vmem:[#allocation29_spill] sm:$0xff] %v6996_v42  ;;  %2262 = vrot.lane.b32.xlu0 %v6996_v42, %s6717_s20  ;;  %v553_v59 = vrot.slane %v552_v46, 4  ;;  %v514_v1 = vrot.slane %v512_v50, 4  ;;  %v517_v14 = vrot.slane %v515_v43, 5  ;;  %v523_v18 = vrot.slane %v521_v53, 5 }
  0x45   : > { %10213 = vst [vmem:[#allocation31_spill] sm:$0xff] %v7011_v0  ;;  %v527_v19 = vrot.slane %v525_v48, 4  ;;  %v548_v22 = vsel %vm6806_vm2, %v543_v58, %v547_v24  ;;  %v533_v25 = vrot.slane %v531_v62, 5  ;;  %v7018_v26 = vmax.bf16 %v10074_v3, %v254_v54  ;;  %v251_v43 = vld [vmem:[%s6765_s19 + $0x7c] sm:$0xf] }
  0x46   : > { %v558_v23 = vsel %vm6806_vm2, %v553_v59, %v557_v30  ;;  %v518_v46 = vor.u32 %v517_v14, %v514_v1  ;;  %v7024_v50 = vmax.bf16 %v10074_v3, %v255_v63  ;;  %v252_v53 = vld [vmem:[%s6765_s19 + $0x80] sm:$0x1]  ;;  %v584_v48 = vshrl.u32 %v7011_v0, 16 }
  0x47   : > { %10214 = vst [vmem:[#allocation32_spill] sm:$0xff] %v7018_v26  ;;  %v7021_v45 = vcombine.low %v548_v22, %v558_v23  ;;  %v528_v34 = vor.u32 %v527_v19, %v523_v18  ;;  %v587_v24 = vshll.u32 %v7011_v0, 16  ;;  %v593_v30 = vshll.u32 %v7018_v26, 16 }
  0x48   : > { %10216 = vst [vmem:[#allocation34_spill] sm:$0xff] %v7024_v50  ;;  %v597_v54 = vshrl.u32 %v7018_v26, 16  ;;  %v519_v58 = vrot.slane %v518_v46, 4  ;;  %v603_v62 = vshll.u32 %v7024_v50, 16  ;;  %v7036_v63 = vmax.bf16 %v10074_v3, %v250_v27 }
  0x49   : > { %10215 = vst [vmem:[#allocation33_spill] sm:$0xff] %v7021_v45  ;;  %2268 = vrot.lane.b32.xlu1 %v7021_v45, %s6717_s20  ;;  %v529_v59 = vrot.slane %v528_v34, 4  ;;  %v586_v1 = vrot.slane %v584_v48, 4  ;;  %v589_v14 = vrot.slane %v587_v24, 5  ;;  %v595_v19 = vrot.slane %v593_v30, 5 }
  0x4a   : > { %10217 = vst [vmem:[#allocation35_spill] sm:$0xff] %v7036_v63  ;;  %v599_v22 = vrot.slane %v597_v54, 4  ;;  %v524_v23 = vsel %vm6806_vm2, %v519_v58, %v523_v18  ;;  %v605_v42 = vrot.slane %v603_v62, 5  ;;  %v7043_v46 = vmax.bf16 %v10074_v3, %v251_v43  ;;  %v259_v34 = vld [vmem:[%s6765_s19 + $0x9c] sm:$0xf] }
  0x4b   : > { %v534_v51 = vsel %vm6806_vm2, %v529_v59, %v533_v25  ;;  %v590_v27 = vor.u32 %v589_v14, %v586_v1  ;;  %v7049_v24 = vmax.bf16 %v10074_v3, %v252_v53  ;;  %v560_v30 = vshrl.u32 %v7036_v63, 16  ;;  %v260_v58 = vld [vmem:[%s6765_s19 + $0xa0] sm:$0xf]  ;;  %v261_v62 = vld [vmem:[%s6765_s19 + $0xa4] sm:$0x1] }
  0x4c   : > { %10218 = vst [vmem:[#allocation36_spill] sm:$0xff] %v7043_v46  ;;  %v7046_v45 = vcombine.low %v524_v23, %v534_v51  ;;  %v600_v48 = vor.u32 %v599_v22, %v595_v19  ;;  %v563_v18 = vshll.u32 %v7036_v63, 16  ;;  %v569_v54 = vshll.u32 %v7043_v46, 16 }
  0x4d   : > { %10220 = vst [vmem:[#allocation38_spill] sm:$0xff] %v7049_v24  ;;  %v573_v25 = vshrl.u32 %v7043_v46, 16  ;;  %v591_v51 = vrot.slane %v590_v27, 4  ;;  %v579_v59 = vshll.u32 %v7049_v24, 16  ;;  %v7061_v53 = vmax.bf16 %v10074_v3, %v259_v34  ;;  %v5787_v24 = vld [vmem:[%s6765_s19 + $0x7c] sm:$0xf] }
  0x4e   : > { %10219 = vst [vmem:[#allocation37_spill] sm:$0xff] %v7046_v45  ;;  %2266 = vrot.lane.b32.xlu0 %v7046_v45, %s6717_s20  ;;  %v601_v43 = vrot.slane %v600_v48, 4  ;;  %v562_v1 = vrot.slane %v560_v30, 4  ;;  %v565_v14 = vrot.slane %v563_v18, 5  ;;  %v571_v22 = vrot.slane %v569_v54, 5 }
  0x4f   : > { %10221 = vst [vmem:[#allocation39_spill] sm:$0xff] %v7061_v53  ;;  %v575_v23 = vrot.slane %v573_v25, 4  ;;  %v596_v37 = vsel %vm6806_vm2, %v591_v51, %v595_v19  ;;  %v581_v45 = vrot.slane %v579_v59, 5  ;;  %v7068_v27 = vmax.bf16 %v10074_v3, %v260_v58  ;;  %v256_v48 = vld [vmem:[%s6765_s19 + $0x90] sm:$0xf] }
  0x50   : > { %v606_v15 = vsel %vm6806_vm2, %v601_v43, %v605_v42  ;;  %v566_v34 = vor.u32 %v565_v14, %v562_v1  ;;  %v7074_v18 = vmax.bf16 %v10074_v3, %v261_v62  ;;  %v632_v54 = vshrl.u32 %v7061_v53, 16  ;;  %v257_v51 = vld [vmem:[%s6765_s19 + $0x94] sm:$0xf]  ;;  %v258_v43 = vld [vmem:[%s6765_s19 + $0x98] sm:$0x1] }
  0x51   : > { %10222 = vst [vmem:[#allocation40_spill] sm:$0xff] %v7068_v27  ;;  %v7071_v35 = vcombine.low %v596_v37, %v606_v15  ;;  %v576_v30 = vor.u32 %v575_v23, %v571_v22  ;;  %v635_v19 = vshll.u32 %v7061_v53, 16  ;;  %v641_v25 = vshll.u32 %v7068_v27, 16  ;;  %v5784_v46 = vld [vmem:[%s6765_s19 + $0x70] sm:$0xf] }
  0x52   : > { %10224 = vst [vmem:[#allocation42_spill] sm:$0xff] %v7074_v18  ;;  %v645_v42 = vshrl.u32 %v7068_v27, 16  ;;  %v567_v37 = vrot.slane %v566_v34, 4  ;;  %v651_v58 = vshll.u32 %v7074_v18, 16  ;;  %v7086_v59 = vmax.bf16 %v10074_v3, %v256_v48 }
  0x53   : > { %10223 = vst [vmem:[#allocation41_spill] sm:$0xff] %v7071_v35  ;;  %2272 = vrot.lane.b32.xlu1 %v7071_v35, %s6717_s20  ;;  %v577_v15 = vrot.slane %v576_v30, 4  ;;  %v634_v62 = vrot.slane %v632_v54, 4  ;;  %v637_v1 = vrot.slane %v635_v19, 5  ;;  %v643_v14 = vrot.slane %v641_v25, 5 }
  0x54   : > { %10225 = vst [vmem:[#allocation43_spill] sm:$0xff] %v7086_v59  ;;  %v647_v23 = vrot.slane %v645_v42, 4  ;;  %v572_v56 = vsel %vm6806_vm2, %v567_v37, %v571_v22  ;;  %v653_v35 = vrot.slane %v651_v58, 5  ;;  %v7093_v34 = vmax.bf16 %v10074_v3, %v257_v51  ;;  %v265_v30 = vld [vmem:[%s6765_s19 + $0xb4] sm:$0xf] }
  0x55   : > { %v582_v13 = vsel %vm6806_vm2, %v577_v15, %v581_v45  ;;  %v638_v48 = vor.u32 %v637_v1, %v634_v62  ;;  %v7099_v19 = vmax.bf16 %v10074_v3, %v258_v43  ;;  %v608_v25 = vshrl.u32 %v7086_v59, 16  ;;  %v266_v37 = vld [vmem:[%s6765_s19 + $0xb8] sm:$0xf]  ;;  %v267_v15 = vld [vmem:[%s6765_s19 + $0xbc] sm:$0x1] }
  0x56   : > { %10226 = vst [vmem:[#allocation44_spill] sm:$0xff] %v7093_v34  ;;  %v7096_v17 = vcombine.low %v572_v56, %v582_v13  ;;  %v648_v54 = vor.u32 %v647_v23, %v643_v14  ;;  %v611_v22 = vshll.u32 %v7086_v59, 16  ;;  %v617_v42 = vshll.u32 %v7093_v34, 16  ;;  %v5786_v59 = vld [vmem:[%s6765_s19 + $0x78] sm:$0xf] }
  0x57   : > { %10228 = vst [vmem:[#allocation46_spill] sm:$0xff] %v7099_v19  ;;  %v621_v45 = vshrl.u32 %v7093_v34, 16  ;;  %v639_v56 = vrot.slane %v638_v48, 4  ;;  %v627_v51 = vshll.u32 %v7099_v19, 16  ;;  %v7111_v58 = vmax.bf16 %v10074_v3, %v265_v30 }
  0x58   : > { %10227 = vst [vmem:[#allocation45_spill] sm:$0xff] %v7096_v17  ;;  %2270 = vrot.lane.b32.xlu0 %v7096_v17, %s6717_s20  ;;  %v649_v13 = vrot.slane %v648_v54, 4  ;;  %v610_v43 = vrot.slane %v608_v25, 4  ;;  %v613_v62 = vrot.slane %v611_v22, 5  ;;  %v619_v1 = vrot.slane %v617_v42, 5 }
  0x59   : > { %10229 = vst [vmem:[#allocation47_spill] sm:$0xff] %v7111_v58  ;;  %v623_v23 = vrot.slane %v621_v45, 4  ;;  %v644_v18 = vsel %vm6806_vm2, %v639_v56, %v643_v14  ;;  %v629_v17 = vrot.slane %v627_v51, 5  ;;  %v7118_v48 = vmax.bf16 %v10074_v3, %v266_v37  ;;  %v262_v54 = vld [vmem:[%s6765_s19 + $0xa8] sm:$0xf] }
  0x5a   : > { %v654_v27 = vsel %vm6806_vm2, %v649_v13, %v653_v35  ;;  %v614_v30 = vor.u32 %v613_v62, %v610_v43  ;;  %v7124_v22 = vmax.bf16 %v10074_v3, %v267_v15  ;;  %v680_v42 = vshrl.u32 %v7111_v58, 16  ;;  %v263_v56 = vld [vmem:[%s6765_s19 + $0xac] sm:$0xf]  ;;  %v264_v13 = vld [vmem:[%s6765_s19 + $0xb0] sm:$0x1] }
  0x5b   : > { %10230 = vst [vmem:[#allocation48_spill] sm:$0xff] %v7118_v48  ;;  %v7121_v53 = vcombine.low %v644_v18, %v654_v27  ;;  %v624_v25 = vor.u32 %v623_v23, %v619_v1  ;;  %v683_v14 = vshll.u32 %v7111_v58, 16  ;;  %v689_v45 = vshll.u32 %v7118_v48, 16 }
  0x5c   : > { %10232 = vst [vmem:[#allocation50_spill] sm:$0xff] %v7124_v22  ;;  %v693_v35 = vshrl.u32 %v7118_v48, 16  ;;  %v615_v27 = vrot.slane %v614_v30, 4  ;;  %v699_v37 = vshll.u32 %v7124_v22, 16  ;;  %v7136_v51 = vmax.bf16 %v10074_v3, %v262_v54  ;;  %v5762_v22 = vld [vmem:[%s6765_s19 + $0x18] sm:$0xf] }
  0x5d   : > { %10231 = vst [vmem:[#allocation49_spill] sm:$0xff] %v7121_v53  ;;  %2276 = vrot.lane.b32.xlu1 %v7121_v53, %s6717_s20  ;;  %v625_v18 = vrot.slane %v624_v25, 4  ;;  %v682_v15 = vrot.slane %v680_v42, 4  ;;  %v685_v43 = vrot.slane %v683_v14, 5  ;;  %v691_v62 = vrot.slane %v689_v45, 5 }
  0x5e   : > { %10233 = vst [vmem:[#allocation51_spill] sm:$0xff] %v7136_v51  ;;  %v695_v23 = vrot.slane %v693_v35, 4  ;;  %v620_v48 = vsel %vm6806_vm2, %v615_v27, %v619_v1  ;;  %v701_v25 = vrot.slane %v699_v37, 5  ;;  %v7143_v53 = vmax.bf16 %v10074_v3, %v263_v56  ;;  %v5763_v14 = vld [vmem:[%s6765_s19 + $0x1c] sm:$0xf] }
  0x5f   : > { %v630_v30 = vsel %vm6806_vm2, %v625_v18, %v629_v17  ;;  %v686_v54 = vor.u32 %v685_v43, %v682_v15  ;;  %v7149_v42 = vmax.bf16 %v10074_v3, %v264_v13  ;;  %v5759_v45 = vld [vmem:[%s6765_s19 + $0xc] sm:$0xf]  ;;  %v656_v1 = vshrl.u32 %v7136_v51, 16  ;;  %v5760_v27 = vld [vmem:[%s6765_s19 + $0x10] sm:$0xf] }
  0x60   : > { %10234 = vst [vmem:[#allocation52_spill] sm:$0xff] %v7143_v53  ;;  %v7146_v58 = vcombine.low %v620_v48, %v630_v30  ;;  %v696_v19 = vor.u32 %v695_v23, %v691_v62  ;;  %v659_v35 = vshll.u32 %v7136_v51, 16  ;;  %v665_v17 = vshll.u32 %v7143_v53, 16  ;;  %v5768_v15 = vld [vmem:[%s6765_s19 + $0x30] sm:$0xf] }
  0x61   : > { %10236 = vst [vmem:[#allocation54_spill] sm:$0xff] %v7149_v42  ;;  %v669_v56 = vshrl.u32 %v7143_v53, 16  ;;  %v687_v48 = vrot.slane %v686_v54, 4  ;;  %v675_v37 = vshll.u32 %v7149_v42, 16  ;;  %v7162_v13 = vmax.bf16 %v10074_v3, %v5762_v22  ;;  %v5769_v51 = vld [vmem:[%s6765_s19 + $0x34] sm:$0xf] }
  0x62   : > { %10235 = vst [vmem:[#allocation53_spill] sm:$0xff] %v7146_v58  ;;  %2274 = vrot.lane.b32.xlu0 %v7146_v58, %s6717_s20  ;;  %v697_v18 = vrot.slane %v696_v19, 4  ;;  %v658_v43 = vrot.slane %v656_v1, 4  ;;  %v661_v23 = vrot.slane %v659_v35, 5  ;;  %v667_v30 = vrot.slane %v665_v17, 5 }
  0x63   : > { %v671_v53 = vrot.slane %v669_v56, 4  ;;  %v692_v34 = vsel %vm6806_vm2, %v687_v48, %v691_v62  ;;  %v677_v54 = vrot.slane %v675_v37, 5  ;;  %v7171_v22 = vmax.bf16 %v10074_v3, %v5763_v14  ;;  %v5765_v58 = vld [vmem:[%s6765_s19 + $0x24] sm:$0xf]  ;;  %v5766_v42 = vld [vmem:[%s6765_s19 + $0x28] sm:$0xf] }
  0x64   : > { %v702_v19 = vsel %vm6806_vm2, %v697_v18, %v701_v25  ;;  %v662_v35 = vor.u32 %v661_v23, %v658_v43  ;;  %v7178_v56 = vmax.bf16 %v10074_v3, %v5759_v45  ;;  %v5774_v62 = vld [vmem:[%s6765_s19 + $0x48] sm:$0xf]  ;;  %v5775_v48 = vld [vmem:[%s6765_s19 + $0x4c] sm:$0xf]  ;;  %v7187_v14 = vmax.bf16 %v10074_v3, %v5760_v27  ;;  %v5771_v45 = vld [vmem:[%s6765_s19 + $0x3c] sm:$0xf] }
  0x65   : > { %v7175_v1 = vcombine.low %v692_v34, %v702_v19  ;;  %v672_v17 = vor.u32 %v671_v53, %v667_v30  ;;  %v7184_v25 = vcombine.low %v7162_v13, %v7171_v22  ;;  %v7190_v34 = vmax.bf16 %v10074_v3, %v5768_v15  ;;  %v5772_v18 = vld [vmem:[%s6765_s19 + $0x40] sm:$0xf] }
  0x66   : > { %v7193_v53 = vmax.bf16 %v10074_v3, %v5769_v51  ;;  %v663_v37 = vrot.slane %v662_v35, 4  ;;  %v7200_v27 = vmax.bf16 %v10074_v3, %v5765_v58  ;;  %v7203_v15 = vmax.bf16 %v10074_v3, %v5766_v42  ;;  %v5780_v23 = vld [vmem:[%s6765_s19 + $0x60] sm:$0xf]  ;;  %v5781_v51 = vld [vmem:[%s6765_s19 + $0x64] sm:$0xf] }
  0x67   : > { %10237 = vst [vmem:[#allocation55_spill] sm:$0xff] %v7175_v1  ;;  %10238 = vst [vmem:[#allocation56_spill] sm:$0xff] %v7184_v25  ;;  %2280 = vrot.lane.b32.xlu1 %v7175_v1, %s6717_s20  ;;  %v673_v43 = vrot.slane %v672_v17, 4  ;;  %v7209_v19 = vcombine.low %v7178_v56, %v7187_v14  ;;  %v7216_v35 = vmax.bf16 %v10074_v3, %v5774_v62  ;;  %v5777_v17 = vld [vmem:[%s6765_s19 + $0x54] sm:$0xf]  ;;  %v759_v32 = vrot.slane %v6789_v12, 5 }
  0x68   : > { %v7213_v1 = vcombine.low %v7190_v34, %v7193_v53  ;;  %v7219_v58 = vmax.bf16 %v10074_v3, %v5775_v48  ;;  %v5778_v42 = vld [vmem:[%s6765_s19 + $0x58] sm:$0xf]  ;;  %v668_v50 = vsel %vm6806_vm2, %v663_v37, %v667_v30  ;;  %v7230_v0 = vcombine.low %v7200_v27, %v7203_v15  ;;  %v5783_v48 = vld [vmem:[%s6765_s19 + $0x6c] sm:$0xf]  ;;  %v5789_v37 = vld [vmem:[%s6765_s19 + $0x84] sm:$0xf] }
  0x69   : > { %10239 = vst [vmem:[#allocation57_spill] sm:$0xff] %v7209_v19  ;;  %v678_v26 = vsel %vm6806_vm2, %v673_v43, %v677_v54  ;;  %v7233_v62 = vmax.bf16 %v10074_v3, %v5771_v45  ;;  %v7245_v30 = vmax.bf16 %v10074_v3, %v5772_v18  ;;  %v7248_v54 = vmax.bf16 %v10074_v3, %v5780_v23 }
  0x6a   : > { %10240 = vst [vmem:[#allocation58_spill] sm:$0xff] %v7213_v1  ;;  %10241 = vst [vmem:[#allocation59_spill] sm:$0xff] %v7230_v0  ;;  %v7238_v63 = vcombine.low %v668_v50, %v678_v26  ;;  %v7242_v57 = vcombine.low %v7216_v35, %v7219_v58  ;;  %v7253_v45 = vmax.bf16 %v10074_v3, %v5781_v51  ;;  %v10257_v47 = vmov 0  }
  0x6b   : > { %10244 = vst [vmem:[#allocation62_spill] sm:$0xff] %v7248_v54  ;;  %2332 = vrot.lane.b32.xlu1 %v7184_v25, %s6718_s21  ;;  %v7256_v26 = vmax.bf16 %v10074_v3, %v5777_v17  ;;  %v7259_v50 = vmax.bf16 %v10074_v3, %v5778_v42  ;;  %v7262_v18 = vmax.bf16 %v10074_v3, %v5786_v59  ;;  %v5790_v42 = vld [vmem:[%s6765_s19 + $0x88] sm:$0xf]  ;;  %v5761_v25 = vld [vmem:[%s6765_s19 + $0x14] sm:$0x1]  ;;  %v967_v12 = vshrl.u32 %v7178_v56, 16 }
  0x6c   : > { %10242 = vst [vmem:[#allocation60_spill] sm:$0xff] %v7238_v63  ;;  %10243 = vst [vmem:[#allocation61_spill] sm:$0xff] %v7242_v57  ;;  %2278 = vrot.lane.b32.xlu0 %v7238_v63, %s6717_s20  ;;  %v7269_v43 = vcombine.low %v7233_v62, %v7245_v30  ;;  %v7272_v23 = vmax.bf16 %v10074_v3, %v5787_v24  ;;  %v7275_v51 = vmax.bf16 %v10074_v3, %v5783_v48 }
  0x6d   : > { %10245 = vst [vmem:[#allocation63_spill] sm:$0xff] %v7253_v45  ;;  %10246 = vst [vmem:[#allocation64_spill] sm:$0xff] %v7262_v18  ;;  %v7278_v17 = vmax.bf16 %v10074_v3, %v5784_v46  ;;  %v7290_v63 = vcombine.low %v7248_v54, %v7253_v45  ;;  %v7294_v24 = vcombine.low %v7256_v26, %v7259_v50  ;;  %v5743_v48 = vrot.slane %v6783_v10, 9  ;;  %v5764_v54 = vld [vmem:[%s6765_s19 + $0x20] sm:$0x1] }
  0x6e   : > { %10247 = vst [vmem:[#allocation65_spill] sm:$0xff] %v7269_v43  ;;  %10248 = vst [vmem:[#allocation66_spill] sm:$0xff] %v7272_v23  ;;  %v756_v46 = vrot.slane %v6786_v11, 5  ;;  %v7300_v3 = vcombine.low %v7262_v18, %v7272_v23  ;;  %v7308_v31 = vmax.bf16 %v10257_v47, %v5789_v37  ;;  %v7317_v23 = vmax.bf16 %v10257_v47, %v5790_v42 }
  0x6f   : > { %10249 = vst [vmem:[#allocation67_spill] sm:$0xff] %v7275_v51  ;;  %10250 = vst [vmem:[#allocation68_spill] sm:$0xff] %v7278_v17  ;;  %v7304_v49 = vcombine.low %v7275_v51, %v7278_v17  ;;  %2336 = vrot.lane.b32.xlu1 %v7213_v1, %s6718_s21  ;;  %v920_v18 = vmax.bf16 %v10257_v47, %v5761_v25  ;;  %v970_v37 = vshll.u32 %v7178_v56, 16  ;;  %v976_v1 = vshll.u32 %v7187_v14, 16 }
  0x70   : > { %10253 = vst [vmem:[#allocation69_spill] sm:$0xff] %v7290_v63  ;;  %10254 = vst [vmem:[#allocation70_spill] sm:$0xff] %v7294_v24  ;;  %v7314_v10 = vsel %vm7282_vm5, %v5743_v48, %v756_v46  ;;  %v758_v11 = vrot.slane %v756_v46, 4  ;;  %2330 = vrot.lane.b32.xlu0 %v7209_v19, %s6718_s21  ;;  %v980_v17 = vshrl.u32 %v7187_v14, 16  ;;  %v7332_v42 = vcombine.low %v7308_v31, %v7317_v23 }
  0x71   : > { %10255 = vst [vmem:[#allocation71_spill] sm:$0xff] %v7300_v3  ;;  %10256 = vst [vmem:[#allocation72_spill] sm:$0xff] %v7304_v49  ;;  %v986_v25 = vshll.u32 %v920_v18, 16  ;;  %v5744_v46 = vrot.slane %v6839_v2, 9  ;;  %v969_v51 = vrot.slane %v967_v12, 4  ;;  %v972_v21 = vrot.slane %v970_v37, 5 }
  0x72   : > { %10258 = vst [vmem:[#allocation73_spill] sm:$0xff] %v7308_v31  ;;  %10259 = vst [vmem:[#allocation74_spill] sm:$0xff] %v7317_v23  ;;  %v7328_v48 = vsel %vm7282_vm5, %v758_v11, %v759_v32  ;;  %v978_v45 = vrot.slane %v976_v1, 5  ;;  %v982_v44 = vrot.slane %v980_v17, 4  ;;  %v763_v32 = vrot.slane %v6842_v7, 5 }
  0x73   : > { %10260 = vst [vmem:[#allocation75_spill] sm:$0xff] %v7332_v42  ;;  %v5969_v19 = vcombine.low %v7314_v10, %v7328_v48  ;;  %2340 = vrot.lane.b32.xlu1 %v7242_v57, %s6718_s21  ;;  %v988_v11 = vrot.slane %v986_v25, 5  ;;  %v766_v23 = vrot.slane %v6845_v8, 5  ;;  %v973_v2 = vor.u32 %v972_v21, %v969_v51 }
  0x74   : > { %2334 = vrot.lane.b32.xlu0 %v7230_v0, %s6718_s21  ;;  %v5807_v31 = vrot.slane %v7178_v56, 9  ;;  %v1400_v10 = vrot.slane %v7187_v14, 5  ;;  %v1403_v12 = vrot.slane %v920_v18, 5  ;;  %v983_v1 = vor.u32 %v982_v44, %v978_v45  ;;  %v10288_v0 = vld [vmem:[#allocation35_spill] sm:$0xff] }
  0x75   : > { %v7348_v37 = vsel %vm7282_vm5, %v5744_v46, %v763_v32  ;;  %v765_v17 = vrot.slane %v763_v32, 4  ;;  %v923_v48 = vmax.bf16 %v10257_v47, %v5764_v54  ;;  %v974_v25 = vrot.slane %v973_v2, 4 }
  0x76   : > { %v1401_v8 = vsel %vm7282_vm5, %v5807_v31, %v1400_v10  ;;  %v1402_v57 = vrot.slane %v1400_v10, 4  ;;  %v991_v21 = vshrl.u32 %v7162_v13, 16  ;;  %v984_v56 = vrot.slane %v983_v1, 4 }
  0x77   : > { %2344 = vrot.lane.b32.xlu1 %v7290_v63, %s6718_s21  ;;  %v7358_v44 = vsel %vm7282_vm5, %v765_v17, %v766_v23  ;;  %v994_v14 = vshll.u32 %v7162_v13, 16  ;;  %v1000_v54 = vshll.u32 %v7171_v22, 16  ;;  %v979_v2 = vsel %vm6806_vm2, %v974_v25, %v978_v45  ;;  %v5767_v25 = vld [vmem:[%s6765_s19 + $0x2c] sm:$0x1] }
  0x78   : > { %2338 = vrot.lane.b32.xlu0 %v7269_v43, %s6718_s21  ;;  %v1404_v18 = vsel %vm7282_vm5, %v1402_v57, %v1403_v12  ;;  %v993_v51 = vrot.slane %v991_v21, 4  ;;  %v989_v23 = vsel %vm6806_vm2, %v984_v56, %v988_v11  ;;  %v1004_v17 = vshrl.u32 %v7171_v22, 16 }
  0x79   : > { %v7372_v46 = vcombine.low %v1401_v8, %v1404_v18  ;;  %v996_v32 = vrot.slane %v994_v14, 5  ;;  %v1002_v10 = vrot.slane %v1000_v54, 5  ;;  %v7374_v1 = vcombine.low %v979_v2, %v989_v23 }
  0x7a   : > { %v1010_v63 = vshll.u32 %v923_v48, 16  ;;  %v5745_v45 = vrot.slane %v6771_v4, 9  ;;  %v770_v12 = vrot.slane %v6774_v5, 5  ;;  %v773_v11 = vrot.slane %v6777_v6, 5 }
  0x7b   : > { %10261 = vst [vmem:[#allocation76_spill] sm:$0xff] %v7374_v1  ;;  %2348 = vrot.lane.b32.xlu1 %v7300_v3, %s6718_s21  ;;  %v997_v57 = vor.u32 %v996_v32, %v993_v51  ;;  %v5808_v8 = vrot.slane %v7162_v13, 9  ;;  %v1006_v21 = vrot.slane %v1004_v17, 4  ;;  %v1407_v14 = vrot.slane %v7171_v22, 5  ;;  %v10281_v3 = vld [vmem:[#allocation26_spill] sm:$0xff] }
  0x7c   : > { %2342 = vrot.lane.b32.xlu0 %v7294_v24, %s6718_s21  ;;  %v1012_v56 = vrot.slane %v1010_v63, 5  ;;  %v1410_v54 = vrot.slane %v923_v48, 5  ;;  %v7389_v18 = vsel %vm7282_vm5, %v5745_v45, %v770_v12  ;;  %v772_v51 = vrot.slane %v770_v12, 4  ;;  %v5788_v24 = vld [vmem:[%s6765_s19 + $0x80] sm:$0x1] }
  0x7d   : > { %v998_v2 = vrot.slane %v997_v57, 4  ;;  %v926_v23 = vmax.bf16 %v10257_v47, %v5767_v25  ;;  %v1007_v32 = vor.u32 %v1006_v21, %v1002_v10  ;;  %v1408_v6 = vsel %vm7282_vm5, %v5808_v8, %v1407_v14 }
  0x7e   : > { %v1409_v13 = vrot.slane %v1407_v14, 4  ;;  %v1015_v31 = vshrl.u32 %v7200_v27, 16  ;;  %v774_v22 = vsel %vm7282_vm5, %v772_v51, %v773_v11  ;;  %v1018_v48 = vshll.u32 %v7200_v27, 16 }
  0x7f   : > { %2988 = vrot.lane.b32.xlu1 %v5969_v19, %s6717_s20  ;;  %v1003_v63 = vsel %vm6806_vm2, %v998_v2, %v1002_v10  ;;  %v1024_v17 = vshll.u32 %v7203_v15, 16  ;;  %v1008_v45 = vrot.slane %v1007_v32, 4  ;;  %v5971_v25 = vcombine.low %v7389_v18, %v774_v22 }
  0x80   : > { %2346 = vrot.lane.b32.xlu0 %v7304_v49, %s6718_s21  ;;  %v1411_v19 = vsel %vm7282_vm5, %v1409_v13, %v1410_v54  ;;  %v1017_v57 = vrot.slane %v1015_v31, 4  ;;  %v1020_v10 = vrot.slane %v1018_v48, 5  ;;  %v1028_v11 = vshrl.u32 %v7203_v15, 16 }
  0x81   : > { %v7407_v12 = vcombine.low %v1408_v6, %v1411_v19  ;;  %v1026_v8 = vrot.slane %v1024_v17, 5  ;;  %v1013_v21 = vsel %vm6806_vm2, %v1008_v45, %v1012_v56  ;;  %v1034_v14 = vshll.u32 %v926_v23, 16  ;;  %v5770_v6 = vld [vmem:[%s6765_s19 + $0x38] sm:$0x1] }
  0x82   : > { %v5746_v2 = vrot.slane %v6811_v38, 9  ;;  %v777_v51 = vrot.slane %v6814_v39, 5  ;;  %v7416_v18 = vcombine.low %v1003_v63, %v1013_v21  ;;  %v1021_v31 = vor.u32 %v1020_v10, %v1017_v57 }
  0x83   : > { %3020 = vrot.lane.b32.xlu1 %v7374_v1, %s6718_s21  ;;  %v1030_v54 = vrot.slane %v1028_v11, 4  ;;  %v780_v32 = vrot.slane %v6817_v40, 5  ;;  %v1036_v13 = vrot.slane %v1034_v14, 5  ;;  %v5809_v48 = vrot.slane %v7200_v27, 9 }
  0x84   : > { %10262 = vst [vmem:[#allocation77_spill] sm:$0xff] %v7416_v18  ;;  %2350 = vrot.lane.b32.xlu0 %v7332_v42, %s6718_s21  ;;  %v7424_v56 = vsel %vm7282_vm5, %v5746_v2, %v777_v51  ;;  %v779_v22 = vrot.slane %v777_v51, 4  ;;  %v1022_v17 = vrot.slane %v1021_v31, 4  ;;  %v1414_v63 = vrot.slane %v7203_v15, 5 }
  0x85   : > { %v1031_v45 = vor.u32 %v1030_v54, %v1026_v8  ;;  %v1417_v19 = vrot.slane %v926_v23, 5  ;;  %v929_v57 = vmax.bf16 %v10257_v47, %v5770_v6  ;;  %v1039_v10 = vshrl.u32 %v7190_v34, 16 }
  0x86   : > { %v7430_v40 = vsel %vm7282_vm5, %v779_v22, %v780_v32  ;;  %v1042_v11 = vshll.u32 %v7190_v34, 16  ;;  %v1027_v27 = vsel %vm6806_vm2, %v1022_v17, %v1026_v8  ;;  %v1415_v23 = vsel %vm7282_vm5, %v5809_v48, %v1414_v63 }
  0x87   : > { %3100 = vrot.lane.b32.xlu1 %v7372_v46, %s6719_s22  ;;  %v1032_v21 = vrot.slane %v1031_v45, 4  ;;  %v5972_v15 = vcombine.low %v7424_v56, %v7430_v40  ;;  %v10263_v14 = vcombine.low %v7348_v37, %v7358_v44  ;;  %v1416_v2 = vrot.slane %v1414_v63, 4 }
  0x88   : > { %v1041_v51 = vrot.slane %v1039_v10, 4  ;;  %v1044_v31 = vrot.slane %v1042_v11, 5  ;;  %v1048_v54 = vshll.u32 %v7193_v53, 16  ;;  %v1052_v32 = vshrl.u32 %v7193_v53, 16  ;;  %v5773_v11 = vld [vmem:[%s6765_s19 + $0x44] sm:$0x1] }
  0x89   : > { %2990 = vrot.lane.b32.xlu0 %v10263_v14, %s6717_s20  ;;  %v1037_v8 = vsel %vm6806_vm2, %v1032_v21, %v1036_v13  ;;  %v1058_v6 = vshll.u32 %v929_v57, 16  ;;  %v5747_v22 = vrot.slane %v6886_v52, 9  ;;  %v1418_v37 = vsel %vm7282_vm5, %v1416_v2, %v1417_v19 }
  0x8a   : > { %v7452_v48 = vcombine.low %v1027_v27, %v1037_v8  ;;  %v1045_v44 = vor.u32 %v1044_v31, %v1041_v51  ;;  %v1050_v17 = vrot.slane %v1048_v54, 5  ;;  %v7457_v45 = vcombine.low %v1415_v23, %v1418_v37 }
  0x8b   : > { %2992 = vrot.lane.b32.xlu1 %v5971_v25, %s6717_s20  ;;  %v1054_v63 = vrot.slane %v1052_v32, 4  ;;  %v1060_v10 = vrot.slane %v1058_v6, 5  ;;  %v784_v13 = vrot.slane %v6891_v60, 5  ;;  %v787_v27 = vrot.slane %v6894_v61, 5  ;;  %v6684_v25 = vld [vmem:[%s10023_s1 + $0x10] sm:$0xff]  }
  0x8c   : > { %10264 = vst [vmem:[#allocation78_spill] sm:$0xff] %v7452_v48  ;;  %v1046_v21 = vrot.slane %v1045_v44, 4  ;;  %v5810_v14 = vrot.slane %v7190_v34, 9  ;;  %v1421_v19 = vrot.slane %v7193_v53, 5  ;;  %v1424_v31 = vrot.slane %v929_v57, 5  ;;  %6386 = vmatprep.subr.bf16.mxu1 %v6684_v25 }
  0x8d   : > { %3022 = vrot.lane.b32.xlu0 %v7416_v18, %s6718_s21  ;;  %v1055_v23 = vor.u32 %v1054_v63, %v1050_v17  ;;  %v785_v2 = vsel %vm7282_vm5, %v5747_v22, %v784_v13  ;;  %v786_v51 = vrot.slane %v784_v13, 4  ;;  %v932_v34 = vmax.bf16 %v10257_v47, %v5773_v11  ;;  %6387 = vmatpush3.bf16.msra.mxu1 %v6684_v25  ;;  %v6685_v63 = vld [vmem:[%s10023_s1 + $0x18] sm:$0xff]  }
  0x8e   : > { %v1051_v54 = vsel %vm6806_vm2, %v1046_v21, %v1050_v17  ;;  %v1422_v61 = vsel %vm7282_vm5, %v5810_v14, %v1421_v19  ;;  %v1423_v8 = vrot.slane %v1421_v19, 4  ;;  %v1063_v6 = vshrl.u32 %v7233_v62, 16  ;;  %6388 = vmatprep.subr.bf16.mxu1 %v6685_v63 }
  0x8f   : > { %3024 = vrot.lane.b32.xlu1 %v7452_v48, %s6718_s21  ;;  %v1056_v53 = vrot.slane %v1055_v23, 4  ;;  %v788_v32 = vsel %vm7282_vm5, %v786_v51, %v787_v27  ;;  %v1066_v57 = vshll.u32 %v7233_v62, 16  ;;  %v1072_v44 = vshll.u32 %v7245_v30, 16 }
  0x90   : > { %v5973_v22 = vcombine.low %v785_v2, %v788_v32  ;;  %v1425_v37 = vsel %vm7282_vm5, %v1423_v8, %v1424_v31  ;;  %v1076_v17 = vshrl.u32 %v7245_v30, 16  ;;  %v1065_v21 = vrot.slane %v1063_v6, 4 }
  0x91   : > { %3102 = vrot.lane.b32.xlu0 %v7407_v12, %s6719_s22  ;;  %v1061_v13 = vsel %vm6806_vm2, %v1056_v53, %v1060_v10  ;;  %v7493_v11 = vcombine.low %v1422_v61, %v1425_v37  ;;  %v1068_v27 = vrot.slane %v1066_v57, 5  ;;  %v1074_v19 = vrot.slane %v1072_v44, 5  ;;  %v5776_v61 = vld [vmem:[%s6765_s19 + $0x50] sm:$0x1]  ;;  %6389 = vmatpush3.bf16.msra.mxu1 %v6685_v63 }
  0x92   : > { %v7495_v14 = vcombine.low %v1051_v54, %v1061_v13  ;;  %v1078_v25 = vrot.slane %v1076_v17, 4  ;;  %v1082_v23 = vshll.u32 %v932_v34, 16  ;;  %v5748_v51 = vrot.slane %v6851_v16, 9 }
  0x93   : > { %3104 = vrot.lane.b32.xlu1 %v7457_v45, %s6719_s22  ;;  %v1069_v2 = vor.u32 %v1068_v27, %v1065_v21  ;;  %v791_v31 = vrot.slane %v6866_v29, 5  ;;  %v794_v10 = vrot.slane %v6874_v41, 5  ;;  %v5811_v53 = vrot.slane %v7233_v62, 9 }
  0x94   : > { %10265 = vst [vmem:[#allocation79_spill] sm:$0xff] %v7495_v14  ;;  %v1079_v54 = vor.u32 %v1078_v25, %v1074_v19  ;;  %v1084_v8 = vrot.slane %v1082_v23, 5  ;;  %v1428_v32 = vrot.slane %v7245_v30, 5  ;;  %v1431_v44 = vrot.slane %v932_v34, 5 }
  0x95   : > { %2994 = vrot.lane.b32.xlu0 %v5972_v15, %s6717_s20  ;;  %v1070_v6 = vrot.slane %v1069_v2, 4  ;;  %v792_v57 = vsel %vm7282_vm5, %v5748_v51, %v791_v31  ;;  %v793_v37 = vrot.slane %v791_v31, 4  ;;  %v935_v56 = vmax.bf16 %v10257_v47, %v5776_v61  ;;  %v5779_v61 = vld [vmem:[%s6765_s19 + $0x5c] sm:$0x1] }
  0x96   : > { %v1080_v41 = vrot.slane %v1079_v54, 4  ;;  %v1429_v17 = vsel %vm7282_vm5, %v5811_v53, %v1428_v32  ;;  %v1430_v63 = vrot.slane %v1428_v32, 4  ;;  %v1087_v40 = vshrl.u32 %v7216_v35, 16 }
  0x97   : > { %2996 = vrot.lane.b32.xlu1 %v5973_v22, %s6717_s20  ;;  %v1075_v62 = vsel %vm6806_vm2, %v1070_v6, %v1074_v19  ;;  %v795_v30 = vsel %vm7282_vm5, %v793_v37, %v794_v10  ;;  %v1090_v15 = vshll.u32 %v7216_v35, 16  ;;  %v1096_v21 = vshll.u32 %v7219_v58, 16 }
  0x98   : > { %v1085_v34 = vsel %vm6806_vm2, %v1080_v41, %v1084_v8  ;;  %v5974_v13 = vcombine.low %v792_v57, %v795_v30  ;;  %v1432_v22 = vsel %vm7282_vm5, %v1430_v63, %v1431_v44  ;;  %v1089_v25 = vrot.slane %v1087_v40, 4 }
  0x99   : > { %3026 = vrot.lane.b32.xlu0 %v7495_v14, %s6718_s21  ;;  %v7528_v27 = vcombine.low %v1075_v62, %v1085_v34  ;;  %v7530_v19 = vcombine.low %v1429_v17, %v1432_v22  ;;  %v1092_v23 = vrot.slane %v1090_v15, 5  ;;  %v1098_v2 = vrot.slane %v1096_v21, 5 }
  0x9a   : > { %v1100_v51 = vshrl.u32 %v7219_v58, 16  ;;  %v1106_v31 = vshll.u32 %v935_v56, 16  ;;  %v5749_v10 = vrot.slane %v6936_v55, 9  ;;  %v798_v8 = vrot.slane %v6943_v9, 5  ;;  %v5797_v55 = vld [vmem:[%s6765_s19 + $0xa4] sm:$0x1] }
  0x9b   : > { %10266 = vst [vmem:[#allocation80_spill] sm:$0xff] %v7528_v27  ;;  %3028 = vrot.lane.b32.xlu1 %v7528_v27, %s6718_s21  ;;  %v1093_v54 = vor.u32 %v1092_v23, %v1089_v25  ;;  %v801_v53 = vrot.slane %v6949_v20, 5  ;;  %v5812_v32 = vrot.slane %v7216_v35, 9  ;;  %v1435_v37 = vrot.slane %v7219_v58, 5 }
  0x9c   : > { %v1102_v6 = vrot.slane %v1100_v51, 4  ;;  %v1108_v57 = vrot.slane %v1106_v31, 5  ;;  %v1438_v44 = vrot.slane %v935_v56, 5  ;;  %v799_v17 = vsel %vm7282_vm5, %v5749_v10, %v798_v8 }
  0x9d   : > { %3106 = vrot.lane.b32.xlu0 %v7493_v11, %s6719_s22  ;;  %v1094_v41 = vrot.slane %v1093_v54, 4  ;;  %v800_v63 = vrot.slane %v798_v8, 4  ;;  %v938_v62 = vmax.bf16 %v10257_v47, %v5779_v61  ;;  %v1436_v20 = vsel %vm7282_vm5, %v5812_v32, %v1435_v37 }
  0x9e   : > { %v1103_v30 = vor.u32 %v1102_v6, %v1098_v2  ;;  %v1437_v35 = vrot.slane %v1435_v37, 4  ;;  %v1111_v40 = vshrl.u32 %v7256_v26, 16  ;;  %v1114_v15 = vshll.u32 %v7256_v26, 16  ;;  %v10268_v37 = vld [vmem:[#allocation19_spill] sm:$0xff] }
  0x9f   : > { %3108 = vrot.lane.b32.xlu1 %v7530_v19, %s6719_s22  ;;  %v1099_v58 = vsel %vm6806_vm2, %v1094_v41, %v1098_v2  ;;  %v802_v56 = vsel %vm7282_vm5, %v800_v63, %v801_v53  ;;  %v1120_v34 = vshll.u32 %v7259_v50, 16  ;;  %v1124_v10 = vshrl.u32 %v7259_v50, 16  ;;  %v5782_v41 = vld [vmem:[%s6765_s19 + $0x68] sm:$0x1] }
  0xa0   : > { %v1104_v22 = vrot.slane %v1103_v30, 4  ;;  %v5975_v21 = vcombine.low %v799_v17, %v802_v56  ;;  %v1439_v25 = vsel %vm7282_vm5, %v1437_v35, %v1438_v44  ;;  %v1113_v23 = vrot.slane %v1111_v40, 4 }
  0xa1   : > { %2998 = vrot.lane.b32.xlu0 %v5974_v13, %s6717_s20  ;;  %v7560_v51 = vcombine.low %v1436_v20, %v1439_v25  ;;  %v1116_v31 = vrot.slane %v1114_v15, 5  ;;  %v1122_v2 = vrot.slane %v1120_v34, 5  ;;  %v1130_v54 = vshll.u32 %v938_v62, 16  ;;  %v10269_v34 = vld [vmem:[#allocation62_spill] sm:$0xff] }
  0xa2   : > { %v1109_v61 = vsel %vm6806_vm2, %v1104_v22, %v1108_v57  ;;  %v5750_v8 = vrot.slane %v6911_v28, 9  ;;  %v805_v13 = vrot.slane %v6918_v33, 5  ;;  %v1126_v6 = vrot.slane %v1124_v10, 4 }
  0xa3   : > { %v7567_v53 = vcombine.low %v1099_v58, %v1109_v61  ;;  %3000 = vrot.lane.b32.xlu1 %v5975_v21, %s6717_s20  ;;  %v1117_v32 = vor.u32 %v1116_v31, %v1113_v23  ;;  %v808_v44 = vrot.slane %v10268_v37, 5  ;;  %v1132_v17 = vrot.slane %v1130_v54, 5  ;;  %v10270_v61 = vld [vmem:[#allocation63_spill] sm:$0xff] }
  0xa4   : > { %v806_v63 = vsel %vm7282_vm5, %v5750_v8, %v805_v13  ;;  %v807_v30 = vrot.slane %v805_v13, 4  ;;  %v5813_v57 = vrot.slane %v7256_v26, 9  ;;  %v1127_v35 = vor.u32 %v1126_v6, %v1122_v2 }
  0xa5   : > { %10267 = vst [vmem:[#allocation81_spill] sm:$0xff] %v7567_v53  ;;  %3030 = vrot.lane.b32.xlu0 %v7567_v53, %s6718_s21  ;;  %v1118_v20 = vrot.slane %v1117_v32, 4  ;;  %v1442_v40 = vrot.slane %v7259_v50, 5  ;;  %v1445_v58 = vrot.slane %v938_v62, 5  ;;  %v941_v15 = vmax.bf16 %v10257_v47, %v5782_v41  ;;  %v10271_v32 = vld [vmem:[#allocation27_spill] sm:$0xff] }
  0xa6   : > { %v809_v56 = vsel %vm7282_vm5, %v807_v30, %v808_v44  ;;  %v1135_v22 = vshrl.u32 %v10269_v34, 16  ;;  %v1138_v21 = vshll.u32 %v10269_v34, 16  ;;  %v1128_v25 = vrot.slane %v1127_v35, 4  ;;  %v10273_v35 = vld [vmem:[#allocation28_spill] sm:$0xff] }
  0xa7   : > { %v1123_v26 = vsel %vm6806_vm2, %v1118_v20, %v1122_v2  ;;  %v5976_v23 = vcombine.low %v806_v63, %v809_v56  ;;  %v1443_v31 = vsel %vm7282_vm5, %v5813_v57, %v1442_v40  ;;  %v1444_v10 = vrot.slane %v1442_v40, 4  ;;  %v5785_v56 = vld [vmem:[%s6765_s19 + $0x74] sm:$0x1] }
  0xa8   : > { %v1137_v50 = vrot.slane %v1135_v22, 4  ;;  %v1140_v62 = vrot.slane %v1138_v21, 5  ;;  %v1144_v54 = vshll.u32 %v10270_v61, 16  ;;  %v1133_v8 = vsel %vm6806_vm2, %v1128_v25, %v1132_v17  ;;  %v10274_v22 = vld [vmem:[#allocation30_spill] sm:$0xff] }
  0xa9   : > { %3110 = vrot.lane.b32.xlu0 %v7560_v51, %s6719_s22  ;;  %v1148_v13 = vshrl.u32 %v10270_v61, 16  ;;  %v1154_v2 = vshll.u32 %v941_v15, 16  ;;  %v5751_v6 = vrot.slane %v10271_v32, 9  ;;  %v7594_v37 = vcombine.low %v1123_v26, %v1133_v8 }
  0xaa   : > { %v1446_v44 = vsel %vm7282_vm5, %v1444_v10, %v1445_v58  ;;  %v1141_v41 = vor.u32 %v1140_v62, %v1137_v50  ;;  %v1146_v63 = vrot.slane %v1144_v54, 5  ;;  %v812_v40 = vrot.slane %v10273_v35, 5  ;;  %v5792_v35 = vld [vmem:[%s6765_s19 + $0x90] sm:$0xf] }
  0xab   : > { %10272 = vst [vmem:[#allocation19_spill] sm:$0xff] %v7594_v37  ;;  %v7598_v30 = vcombine.low %v1443_v31, %v1446_v44  ;;  %v1150_v57 = vrot.slane %v1148_v13, 4  ;;  %v1156_v20 = vrot.slane %v1154_v2, 5  ;;  %3032 = vrot.lane.b32.xlu1 %v7594_v37, %s6718_s21  ;;  %v815_v21 = vrot.slane %v10274_v22, 5 }
  0xac   : > { %v1142_v17 = vrot.slane %v1141_v41, 4  ;;  %v5814_v26 = vrot.slane %v10269_v34, 9  ;;  %v1449_v25 = vrot.slane %v10270_v61, 5  ;;  %v813_v31 = vsel %vm7282_vm5, %v5751_v6, %v812_v40  ;;  %v7619_v6 = vpop.permute.xlu1 %2254 }
  0xad   : > { %3002 = vrot.lane.b32.xlu0 %v5976_v23, %s6717_s20  ;;  %v1151_v58 = vor.u32 %v1150_v57, %v1146_v63  ;;  %v814_v10 = vrot.slane %v812_v40, 4  ;;  %v1452_v50 = vrot.slane %v941_v15, 5  ;;  %v944_v13 = vmax.bf16 %v10257_v47, %v5785_v56  ;;  %v10275_v23 = vld [vmem:[#allocation67_spill] sm:$0xff]  ;;  %10276 = vst [vmem:[#allocation62_spill] sm:$0xff] %v7619_v6 }
  0xae   : > { %v1147_v62 = vsel %vm6806_vm2, %v1142_v17, %v1146_v63  ;;  %v1450_v54 = vsel %vm7282_vm5, %v5814_v26, %v1449_v25  ;;  %v1451_v8 = vrot.slane %v1449_v25, 4  ;;  %v1159_v2 = vshrl.u32 %v10275_v23, 16  ;;  %v10277_v63 = vld [vmem:[#allocation68_spill] sm:$0xff] }
  0xaf   : > { %v1152_v34 = vrot.slane %v1151_v58, 4  ;;  %v816_v61 = vsel %vm7282_vm5, %v814_v10, %v815_v21  ;;  %v1162_v44 = vshll.u32 %v10275_v23, 16  ;;  %3112 = vrot.lane.b32.xlu1 %v7598_v30, %s6719_s22  ;;  %v1168_v57 = vshll.u32 %v10277_v63, 16 }
  0xb0   : > { %v5977_v15 = vcombine.low %v813_v31, %v816_v61  ;;  %v1453_v41 = vsel %vm7282_vm5, %v1451_v8, %v1452_v50  ;;  %v1172_v40 = vshrl.u32 %v10277_v63, 16  ;;  %v1161_v22 = vrot.slane %v1159_v2, 4  ;;  %v10279_v61 = vld [vmem:[#allocation23_spill] sm:$0xff]  ;;  %v10280_v50 = vld [vmem:[#allocation24_spill] sm:$0xff]  ;;  %v7642_v2 = vpop.permute.xlu0 %2250 }
  0xb1   : > { %v1157_v56 = vsel %vm6806_vm2, %v1152_v34, %v1156_v20  ;;  %v7629_v17 = vcombine.low %v1450_v54, %v1453_v41  ;;  %v1164_v21 = vrot.slane %v1162_v44, 5  ;;  %v1170_v25 = vrot.slane %v1168_v57, 5 }
  0xb2   : > { %v7631_v26 = vcombine.low %v1147_v62, %v1157_v56  ;;  %v1174_v58 = vrot.slane %v1172_v40, 4  ;;  %v1178_v31 = vshll.u32 %v944_v13, 16  ;;  %v5752_v42 = vrot.slane %v10279_v61, 9  ;;  %v7646_v40 = vpop.permute.xlu1 %2256 }
  0xb3   : > { %v1165_v10 = vor.u32 %v1164_v21, %v1161_v22  ;;  %v819_v8 = vrot.slane %v10280_v50, 5  ;;  %v822_v49 = vrot.slane %v10281_v3, 5  ;;  %3004 = vrot.lane.b32.xlu1 %v5977_v15, %s6717_s20  ;;  %v5815_v62 = vrot.slane %v10275_v23, 9  ;;  %10282 = vst [vmem:[#allocation30_spill] sm:$0xff] %v7646_v40  ;;  %v10289_v50 = vld [vmem:[#allocation36_spill] sm:$0xff] }
  0xb4   : > { %10278 = vst [vmem:[#allocation63_spill] sm:$0xff] %v7631_v26  ;;  %3034 = vrot.lane.b32.xlu0 %v7631_v26, %s6718_s21  ;;  %v1175_v20 = vor.u32 %v1174_v58, %v1170_v25  ;;  %v1180_v54 = vrot.slane %v1178_v31, 5  ;;  %v1456_v34 = vrot.slane %v10277_v63, 5  ;;  %v1459_v3 = vrot.slane %v944_v13, 5  ;;  %v10283_v58 = vld [vmem:[#allocation64_spill] sm:$0xff]  ;;  %v7667_v43 = vpop.permute.xlu0 %2252 }
  0xb5   : > { %v1166_v44 = vrot.slane %v1165_v10, 4  ;;  %v820_v41 = vsel %vm7282_vm5, %v5752_v42, %v819_v8  ;;  %v821_v57 = vrot.slane %v819_v8, 4  ;;  %v947_v21 = vmax.bf16 %v10257_v47, %v5788_v24  ;;  %v10284_v8 = vld [vmem:[#allocation66_spill] sm:$0xff] }
  0xb6   : > { %v1176_v56 = vrot.slane %v1175_v20, 4  ;;  %v1457_v15 = vsel %vm7282_vm5, %v5815_v62, %v1456_v34  ;;  %v1458_v22 = vrot.slane %v1456_v34, 4  ;;  %v1183_v31 = vshrl.u32 %v10283_v58, 16 }
  0xb7   : > { %v1171_v23 = vsel %vm6806_vm2, %v1166_v44, %v1170_v25  ;;  %v823_v63 = vsel %vm7282_vm5, %v821_v57, %v822_v49  ;;  %v1186_v42 = vshll.u32 %v10283_v58, 16  ;;  %v1192_v20 = vshll.u32 %v10284_v8, 16 }
  0xb8   : > { %3114 = vrot.lane.b32.xlu0 %v7629_v17, %s6719_s22  ;;  %v1181_v13 = vsel %vm6806_vm2, %v1176_v56, %v1180_v54  ;;  %v5978_v10 = vcombine.low %v820_v41, %v823_v63  ;;  %v1460_v24 = vsel %vm7282_vm5, %v1458_v22, %v1459_v3  ;;  %v1185_v62 = vrot.slane %v1183_v31, 4  ;;  %v7674_v56 = vpop.permute.xlu1 %2260 }
  0xb9   : > { %v7664_v25 = vcombine.low %v1171_v23, %v1181_v13  ;;  %v1188_v49 = vrot.slane %v1186_v42, 5  ;;  %v1194_v34 = vrot.slane %v1192_v20, 5  ;;  %v1196_v44 = vshrl.u32 %v10284_v8, 16  ;;  %10287 = vst [vmem:[#allocation26_spill] sm:$0xff] %v7674_v56 }
  0xba   : > { %v1202_v57 = vshll.u32 %v947_v21, 16  ;;  %v7671_v54 = vcombine.low %v1457_v15, %v1460_v24  ;;  %v1463_v3 = vrot.slane %v10284_v8, 5  ;;  %v5816_v63 = vrot.slane %v10283_v58, 9  ;;  %v5791_v24 = vld [vmem:[%s6765_s19 + $0x8c] sm:$0x1]  ;;  %v10290_v8 = vld [vmem:[#allocation38_spill] sm:$0xff] }
  0xbb   : > { %10285 = vst [vmem:[#allocation67_spill] sm:$0xff] %v7664_v25  ;;  %3036 = vrot.lane.b32.xlu1 %v7664_v25, %s6718_s21  ;;  %v1189_v41 = vor.u32 %v1188_v49, %v1185_v62  ;;  %v1198_v22 = vrot.slane %v1196_v44, 4  ;;  %v1466_v42 = vrot.slane %v947_v21, 5  ;;  %v5753_v61 = vrot.slane %v10288_v0, 9  ;;  %v7688_v44 = vpop.permute.xlu0 %2258 }
  0xbc   : > { %10286 = vst [vmem:[#allocation68_spill] sm:$0xff] %v7671_v54  ;;  %3006 = vrot.lane.b32.xlu0 %v5978_v10, %s6717_s20  ;;  %v1465_v31 = vrot.slane %v1463_v3, 4  ;;  %v1204_v20 = vrot.slane %v1202_v57, 5  ;;  %v826_v15 = vrot.slane %v10289_v50, 5  ;;  %v829_v62 = vrot.slane %v10290_v8, 5  ;;  %10291 = vst [vmem:[#allocation64_spill] sm:$0xff] %v7688_v44 }
  0xbd   : > { %v1190_v23 = vrot.slane %v1189_v41, 4  ;;  %v1199_v13 = vor.u32 %v1198_v22, %v1194_v34  ;;  %v6686_v57 = vld [vmem:[%s10023_s1] sm:$0xff]   ;;  %v1464_v41 = vsel %vm7282_vm5, %v5816_v63, %v1463_v3  ;;  %v950_v8 = vmax.bf16 %v10257_v47, %v5791_v24  ;;  %v5803_v44 = vld [vmem:[%s6765_s19 + $0xbc] sm:$0x1] }
  0xbe   : > { %v827_v58 = vsel %vm7282_vm5, %v5753_v61, %v826_v15  ;;  %v828_v21 = vrot.slane %v826_v15, 4  ;;  %v1467_v22 = vsel %vm7282_vm5, %v1465_v31, %v1466_v42  ;;  %v10294_v50 = vld [vmem:[#allocation74_spill] sm:$0xff]  ;;  %6350 = vmatprep.subr.bf16.mxu0 %v6686_v57 }
  0xbf   : > { %3116 = vrot.lane.b32.xlu1 %v7671_v54, %s6719_s22  ;;  %v1195_v10 = vsel %vm6806_vm2, %v1190_v23, %v1194_v34  ;;  %v1200_v49 = vrot.slane %v1199_v13, 4  ;;  %v10292_v34 = vld [vmem:[#allocation73_spill] sm:$0xff]  ;;  %v7699_v13 = vpop.permute.xlu1 %2264  ;;  %v1216_v32 = vshll.u32 %v10294_v50, 16  ;;  %6351 = vmatpush3.bf16.msra.mxu0 %v6686_v57  ;;  %v1220_v24 = vshrl.u32 %v10294_v50, 16  ;;  %v7724_v28 = vpop.permute.xlu0 %2262 }
  0xc0   : > { %v1207_v23 = vshrl.u32 %v10292_v34, 16  ;;  %10293 = vst [vmem:[#allocation66_spill] sm:$0xff] %v7699_v13  ;;  %v830_v15 = vsel %vm7282_vm5, %v828_v21, %v829_v62  ;;  %v1210_v0 = vshll.u32 %v10292_v34, 16  ;;  %v1226_v62 = vshll.u32 %v950_v8, 16  ;;  %v10297_v21 = vld [vmem:[#allocation31_spill] sm:$0xff]  ;;  %10300 = vst [vmem:[#allocation74_spill] sm:$0xff] %v7724_v28 }
  0xc1   : > { %v1205_v61 = vsel %vm6806_vm2, %v1200_v49, %v1204_v20  ;;  %v5979_v63 = vcombine.low %v827_v58, %v830_v15  ;;  %v1218_v20 = vrot.slane %v1216_v32, 5  ;;  %v6687_v49 = vld [vmem:[%s10023_s1 + $0x8] sm:$0xff]   ;;  %v10298_v58 = vld [vmem:[#allocation32_spill] sm:$0xff]  ;;  %v1222_v32 = vrot.slane %v1220_v24, 4  ;;  %v5794_v24 = vld [vmem:[%s6765_s19 + $0x98] sm:$0x1] }
  0xc2   : > { %v7707_v3 = vcombine.low %v1195_v10, %v1205_v61  ;;  %v1209_v31 = vrot.slane %v1207_v23, 4  ;;  %v1212_v42 = vrot.slane %v1210_v0, 5  ;;  %v7717_v10 = vcombine.low %v1464_v41, %v1467_v22  ;;  %v10299_v23 = vld [vmem:[#allocation34_spill] sm:$0xff]  ;;  %v5793_v13 = vld [vmem:[%s6765_s19 + $0x94] sm:$0xf]  ;;  %6352 = vmatprep.subr.bf16.mxu0 %v6687_v49 }
  0xc3   : > { %2410 = vrot.lane.b32.xlu1 %v7374_v1, %s6719_s22  ;;  %v5754_v61 = vrot.slane %v10297_v21, 9  ;;  %v833_v15 = vrot.slane %v10298_v58, 5  ;;  %v836_v57 = vrot.slane %v10299_v23, 5  ;;  %v1228_v33 = vrot.slane %v1226_v62, 5  ;;  %v7729_v21 = vpop.permute.xlu1 %2268  ;;  %6353 = vmatpush3.bf16.msra.mxu0 %v6687_v49 }
  0xc4   : > { %10295 = vst [vmem:[#allocation38_spill] sm:$0xff] %v7707_v3  ;;  %3038 = vrot.lane.b32.xlu0 %v7707_v3, %s6718_s21  ;;  %10296 = vst [vmem:[#allocation73_spill] sm:$0xff] %v7717_v10  ;;  %v1213_v0 = vor.u32 %v1212_v42, %v1209_v31  ;;  %v1223_v23 = vor.u32 %v1222_v32, %v1218_v20  ;;  %v5817_v31 = vrot.slane %v10292_v34, 9  ;;  %v1470_v42 = vrot.slane %v10294_v50, 5 }
  0xc5   : > { %v834_v41 = vsel %vm7282_vm5, %v5754_v61, %v833_v15  ;;  %v835_v22 = vrot.slane %v833_v15, 4  ;;  %10301 = vst [vmem:[#allocation34_spill] sm:$0xff] %v7729_v21  ;;  %v1473_v62 = vrot.slane %v950_v8, 5  ;;  %v7739_v61 = vmax.bf16 %v10257_v47, %v5792_v35 }
  0xc6   : > { %v1214_v58 = vrot.slane %v1213_v0, 4  ;;  %v7742_v15 = vmax.bf16 %v10257_v47, %v5793_v13  ;;  %v1224_v34 = vrot.slane %v1223_v23, 4  ;;  %v1472_v50 = vrot.slane %v1470_v42, 4 }
  0xc7   : > { %3008 = vrot.lane.b32.xlu1 %v5979_v63, %s6717_s20  ;;  %v837_v63 = vsel %vm7282_vm5, %v835_v22, %v836_v57  ;;  %v953_v32 = vmax.bf16 %v10257_v47, %v5794_v24  ;;  %v1231_v21 = vshrl.u32 %v7739_v61, 16  ;;  %v1234_v28 = vshll.u32 %v7739_v61, 16 }
  0xc8   : > { %3118 = vrot.lane.b32.xlu0 %v7717_v10, %s6719_s22  ;;  %v1219_v49 = vsel %vm6806_vm2, %v1214_v58, %v1218_v20  ;;  %v5980_v0 = vcombine.low %v834_v41, %v837_v63  ;;  %v1229_v8 = vsel %vm6806_vm2, %v1224_v34, %v1228_v33  ;;  %v1471_v35 = vsel %vm7282_vm5, %v5817_v31, %v1470_v42  ;;  %v7755_v20 = vpop.permute.xlu0 %2266  ;;  %v7763_v33 = vpop.permute.xlu1 %2272 }
  0xc9   : > { %v1240_v13 = vshll.u32 %v7742_v15, 16  ;;  %v1244_v57 = vshrl.u32 %v7742_v15, 16  ;;  %10302 = vst [vmem:[#allocation82_spill] sm:$0xff] %v7755_v20  ;;  %v7759_v58 = vcombine.low %v1219_v49, %v1229_v8  ;;  %v1474_v41 = vsel %vm7282_vm5, %v1472_v50, %v1473_v62  ;;  %10304 = vst [vmem:[#allocation84_spill] sm:$0xff] %v7763_v33 }
  0xca   : > { %v1233_v22 = vrot.slane %v1231_v21, 4  ;;  %v1236_v23 = vrot.slane %v1234_v28, 5  ;;  %v1250_v42 = vshll.u32 %v953_v32, 16  ;;  %v7767_v63 = vcombine.low %v1471_v35, %v1474_v41 }
  0xcb   : > { %10303 = vst [vmem:[#allocation83_spill] sm:$0xff] %v7759_v58  ;;  %v1242_v24 = vrot.slane %v1240_v13, 5  ;;  %v1246_v31 = vrot.slane %v1244_v57, 4  ;;  %3040 = vrot.lane.b32.xlu1 %v7759_v58, %s6718_s21  ;;  %v5818_v49 = vrot.slane %v7739_v61, 9  ;;  %v1477_v21 = vrot.slane %v7742_v15, 5  ;;  %v10306_v57 = vld [vmem:[#allocation43_spill] sm:$0xff] }
  0xcc   : > { %2412 = vrot.lane.b32.xlu0 %v7416_v18, %s6719_s22  ;;  %10305 = vst [vmem:[#allocation85_spill] sm:$0xff] %v7767_v63  ;;  %v1237_v34 = vor.u32 %v1236_v23, %v1233_v22  ;;  %v1252_v20 = vrot.slane %v1250_v42, 5  ;;  %v1480_v28 = vrot.slane %v953_v32, 5  ;;  %v5755_v33 = vrot.slane %v10306_v57, 9  ;;  %v7773_v35 = vpop.permute.xlu0 %2270  ;;  %v10308_v32 = vld [vmem:[#allocation44_spill] sm:$0xff]  ;;  %v10310_v57 = vld [vmem:[#allocation46_spill] sm:$0xff] }
  0xcd   : > { %v1247_v8 = vor.u32 %v1246_v31, %v1242_v24  ;;  %v1479_v13 = vrot.slane %v1477_v21, 4  ;;  %10307 = vst [vmem:[#allocation86_spill] sm:$0xff] %v7773_v35  ;;  %v1478_v22 = vsel %vm7282_vm5, %v5818_v49, %v1477_v21  ;;  %v840_v23 = vrot.slane %v10308_v32, 5  ;;  %v5796_v31 = vld [vmem:[%s6765_s19 + $0xa0] sm:$0xf] }
  0xce   : > { %v1238_v62 = vrot.slane %v1237_v34, 4  ;;  %v843_v35 = vrot.slane %v10310_v57, 5 }
  0xcf   : > { %v1248_v50 = vrot.slane %v1247_v8, 4  ;;  %3120 = vrot.lane.b32.xlu1 %v7767_v63, %s6719_s22  ;;  %v7784_v42 = vpop.permute.xlu1 %2276  ;;  %v1481_v8 = vsel %vm7282_vm5, %v1479_v13, %v1480_v28  ;;  %v842_v49 = vrot.slane %v840_v23, 4  ;;  %v10313_v28 = vld [vmem:[#allocation39_spill] sm:$0xff]  ;;  %v10314_v13 = vld [vmem:[#allocation40_spill] sm:$0xff] }
  0xd0   : > { %3010 = vrot.lane.b32.xlu0 %v5980_v0, %s6717_s20  ;;  %v1243_v41 = vsel %vm6806_vm2, %v1238_v62, %v1242_v24  ;;  %v5795_v0 = vld [vmem:[%s6765_s19 + $0x9c] sm:$0xf]  ;;  %10309 = vst [vmem:[#allocation87_spill] sm:$0xff] %v7784_v42  ;;  %v841_v24 = vsel %vm7282_vm5, %v5755_v33, %v840_v23  ;;  %v7796_v21 = vcombine.low %v1478_v22, %v1481_v8  ;;  %v847_v57 = vrot.slane %v10314_v13, 5 }
  0xd1   : > { %v1253_v34 = vsel %vm6806_vm2, %v1248_v50, %v1252_v20  ;;  %v7799_v62 = vmax.bf16 %v10257_v47, %v5795_v0  ;;  %v7802_v42 = vmax.bf16 %v10257_v47, %v5796_v31  ;;  %v844_v20 = vsel %vm7282_vm5, %v842_v49, %v843_v35 }
  0xd2   : > { %v7792_v9 = vcombine.low %v1243_v41, %v1253_v34  ;;  %10312 = vst [vmem:[#allocation88_spill] sm:$0xff] %v7796_v21  ;;  %v956_v33 = vmax.bf16 %v10257_v47, %v5797_v55  ;;  %v5756_v50 = vrot.slane %v10313_v28, 9  ;;  %v5981_v41 = vcombine.low %v841_v24, %v844_v20  ;;  %v10317_v24 = vld [vmem:[#allocation42_spill] sm:$0xff] }
  0xd3   : > { %2414 = vrot.lane.b32.xlu1 %v7452_v48, %s6719_s22  ;;  %v1255_v22 = vshrl.u32 %v7799_v62, 16  ;;  %v1258_v23 = vshll.u32 %v7799_v62, 16  ;;  %v1264_v31 = vshll.u32 %v7802_v42, 16  ;;  %v1268_v34 = vshrl.u32 %v7802_v42, 16  ;;  %v5798_v48 = vld [vmem:[%s6765_s19 + $0xa8] sm:$0xf] }
  0xd4   : > { %10311 = vst [vmem:[#allocation46_spill] sm:$0xff] %v7792_v9  ;;  %3042 = vrot.lane.b32.xlu0 %v7792_v9, %s6718_s21  ;;  %v7815_v0 = vpop.permute.xlu0 %2274  ;;  %v1274_v35 = vshll.u32 %v956_v33, 16  ;;  %v849_v32 = vrot.slane %v847_v57, 4  ;;  %v850_v20 = vrot.slane %v10317_v24, 5  ;;  %v848_v13 = vsel %vm7282_vm5, %v5756_v50, %v847_v57 }
  0xd5   : > { %10315 = vst [vmem:[#allocation89_spill] sm:$0xff] %v7815_v0  ;;  %v1257_v55 = vrot.slane %v1255_v22, 4  ;;  %v1260_v49 = vrot.slane %v1258_v23, 5  ;;  %v1266_v0 = vrot.slane %v1264_v31, 5  ;;  %v1270_v28 = vrot.slane %v1268_v34, 4 }
  0xd6   : > { %v851_v22 = vsel %vm7282_vm5, %v849_v32, %v850_v20  ;;  %v5819_v23 = vrot.slane %v7799_v62, 9  ;;  %v1276_v24 = vrot.slane %v1274_v35, 5  ;;  %v1484_v16 = vrot.slane %v7802_v42, 5 }
  0xd7   : > { %3012 = vrot.lane.b32.xlu1 %v5981_v41, %s6717_s20  ;;  %v1261_v63 = vor.u32 %v1260_v49, %v1257_v55  ;;  %v1271_v56 = vor.u32 %v1270_v28, %v1266_v0  ;;  %v5982_v31 = vcombine.low %v848_v13, %v851_v22  ;;  %v1487_v34 = vrot.slane %v956_v33, 5 }
  0xd8   : > { %3122 = vrot.lane.b32.xlu0 %v7796_v21, %s6719_s22  ;;  %v5800_v21 = vld [vmem:[%s6765_s19 + $0xb0] sm:$0x1]  ;;  %v7837_v50 = vmax.bf16 %v10257_v47, %v5798_v48  ;;  %v1485_v28 = vsel %vm7282_vm5, %v5819_v23, %v1484_v16  ;;  %v1486_v35 = vrot.slane %v1484_v16, 4 }
  0xd9   : > { %v7819_v8 = vpop.permute.xlu1 %2280  ;;  %v1262_v41 = vrot.slane %v1261_v63, 4  ;;  %v1272_v32 = vrot.slane %v1271_v56, 4  ;;  %v959_v33 = vmax.bf16 %v10257_v47, %v5800_v21 }
  0xda   : > { %10316 = vst [vmem:[#allocation90_spill] sm:$0xff] %v7819_v8  ;;  %v5799_v8 = vld [vmem:[%s6765_s19 + $0xac] sm:$0xf]  ;;  %v1279_v48 = vshrl.u32 %v7837_v50, 16  ;;  %v1282_v13 = vshll.u32 %v7837_v50, 16  ;;  %v1488_v56 = vsel %vm7282_vm5, %v1486_v35, %v1487_v34  ;;  %v5820_v35 = vrot.slane %v7837_v50, 9 }
  0xdb   : > { %v7846_v55 = vmax.bf16 %v10257_v47, %v5799_v8  ;;  %v1267_v63 = vsel %vm6806_vm2, %v1262_v41, %v1266_v0  ;;  %v1277_v49 = vsel %vm6806_vm2, %v1272_v32, %v1276_v24  ;;  %v1298_v24 = vshll.u32 %v959_v33, 16 }
  0xdc   : > { %2416 = vrot.lane.b32.xlu0 %v7495_v14, %s6719_s22  ;;  %v7861_v22 = vcombine.low %v1267_v63, %v1277_v49  ;;  %v1281_v0 = vrot.slane %v1279_v48, 4  ;;  %v1284_v21 = vrot.slane %v1282_v13, 5  ;;  %v7868_v34 = vcombine.low %v1485_v28, %v1488_v56  ;;  %v10324_v28 = vld [vmem:[#allocation51_spill] sm:$0xff] }
  0xdd   : > { %v7834_v29 = vpop.permute.xlu1 %2332  ;;  %v1288_v16 = vshll.u32 %v7846_v55, 16  ;;  %v1292_v8 = vshrl.u32 %v7846_v55, 16  ;;  %v1491_v63 = vrot.slane %v7846_v55, 5  ;;  %v1300_v13 = vrot.slane %v1298_v24, 5 }
  0xde   : > { %v7839_v57 = vpop.permute.xlu0 %2278  ;;  %10320 = vst [vmem:[#allocation92_spill] sm:$0xff] %v7861_v22  ;;  %3044 = vrot.lane.b32.xlu1 %v7861_v22, %s6718_s21  ;;  %10321 = vst [vmem:[#allocation93_spill] sm:$0xff] %v7868_v34  ;;  %v1285_v32 = vor.u32 %v1284_v21, %v1281_v0  ;;  %v1494_v49 = vrot.slane %v959_v33, 5  ;;  %v5757_v56 = vrot.slane %v10324_v28, 9  ;;  %v10325_v0 = vld [vmem:[#allocation52_spill] sm:$0xff] }
  0xdf   : > { %10318 = vst [vmem:[#allocation42_spill] sm:$0xff] %v7839_v57  ;;  %v1290_v41 = vrot.slane %v1288_v16, 5  ;;  %v1294_v57 = vrot.slane %v1292_v8, 4  ;;  %v1493_v8 = vrot.slane %v1491_v63, 4  ;;  %v854_v21 = vrot.slane %v10325_v0, 5 }
  0xe0   : > { %3014 = vrot.lane.b32.xlu0 %v5982_v31, %s6717_s20  ;;  %v1286_v16 = vrot.slane %v1285_v32, 4  ;;  %v1492_v33 = vsel %vm7282_vm5, %v5820_v35, %v1491_v63  ;;  %v5801_v32 = vld [vmem:[%s6765_s19 + $0xb4] sm:$0xf] }
  0xe1   : > { %v7859_v20 = vpop.permute.xlu1 %2336  ;;  %v1295_v48 = vor.u32 %v1294_v57, %v1290_v41  ;;  %v1495_v24 = vsel %vm7282_vm5, %v1493_v8, %v1494_v49  ;;  %v856_v28 = vrot.slane %v854_v21, 4  ;;  %v7903_v49 = vmax.bf16 %v10257_v47, %v5801_v32 }
  0xe2   : > { %10319 = vst [vmem:[#allocation91_spill] sm:$0xff] %v7859_v20  ;;  %v7863_v23 = vpop.permute.xlu0 %2330  ;;  %3124 = vrot.lane.b32.xlu1 %v7868_v34, %s6719_s22  ;;  %v1291_v57 = vsel %vm6806_vm2, %v1286_v16, %v1290_v41  ;;  %v855_v41 = vsel %vm7282_vm5, %v5757_v56, %v854_v21  ;;  %v10328_v16 = vld [vmem:[#allocation54_spill] sm:$0xff]  ;;  %v7900_v63 = vcombine.low %v1492_v33, %v1495_v24  ;;  %v10333_v56 = vld [vmem:[#allocation47_spill] sm:$0xff] }
  0xe3   : > { %v1296_v18 = vrot.slane %v1295_v48, 4  ;;  %v857_v34 = vrot.slane %v10328_v16, 5  ;;  %10331 = vst [vmem:[#allocation99_spill] sm:$0xff] %v7903_v49  ;;  %v5758_v21 = vrot.slane %v10333_v56, 9  ;;  %v10335_v24 = vld [vmem:[#allocation50_spill] sm:$0xff] }
  0xe4   : > { %10330 = vst [vmem:[#allocation98_spill] sm:$0xff] %v7900_v63  ;;  %v5805_v56 = vld [vmem:[%s6765_s19 + $0xc4] sm:$0xf] }
  0xe5   : > { %v7872_v31 = vpop.permute.xlu1 %2340  ;;  %v1301_v48 = vsel %vm6806_vm2, %v1296_v18, %v1300_v13  ;;  %v962_v13 = vmax.bf16 %v10257_v47, %v5803_v44  ;;  %v858_v8 = vsel %vm7282_vm5, %v856_v28, %v857_v34  ;;  %v1303_v44 = vshrl.u32 %v7903_v49, 16 }
  0xe6   : > { %10322 = vst [vmem:[#allocation94_spill] sm:$0xff] %v7872_v31  ;;  %v7874_v14 = vpop.permute.xlu0 %2334  ;;  %v5802_v31 = vld [vmem:[%s6765_s19 + $0xb8] sm:$0xf]  ;;  %v7893_v1 = vcombine.low %v1291_v57, %v1301_v48  ;;  %2418 = vrot.lane.b32.xlu1 %v7528_v27, %s6719_s22  ;;  %v10334_v57 = vld [vmem:[#allocation48_spill] sm:$0xff]  ;;  %v5983_v32 = vcombine.low %v855_v41, %v858_v8  ;;  %v1306_v48 = vshll.u32 %v7903_v49, 16 }
  0xe7   : > { %10323 = vst [vmem:[#allocation95_spill] sm:$0xff] %v7874_v14  ;;  %v7906_v18 = vmax.bf16 %v10257_v47, %v5802_v31  ;;  %v861_v33 = vrot.slane %v10334_v57, 5  ;;  %v864_v31 = vrot.slane %v10335_v24, 5  ;;  %v1322_v34 = vshll.u32 %v962_v13, 16  ;;  %v5806_v41 = vld [vmem:[%s6765_s19 + $0xc8] sm:$0x1] }
  0xe8   : > { %10327 = vst [vmem:[#allocation97_spill] sm:$0xff] %v7893_v1  ;;  %3046 = vrot.lane.b32.xlu0 %v7893_v1, %s6718_s21  ;;  %v1305_v57 = vrot.slane %v1303_v44, 4  ;;  %v1308_v60 = vrot.slane %v1306_v48, 5  ;;  %v1501_v48 = vrot.slane %v962_v13, 5 }
  0xe9   : > { %v7891_v0 = vpop.permute.xlu1 %2344  ;;  %10332 = vst [vmem:[#allocation100_spill] sm:$0xff] %v7906_v18  ;;  %v1312_v16 = vshll.u32 %v7906_v18, 16  ;;  %v1316_v27 = vshrl.u32 %v7906_v18, 16  ;;  %v863_v28 = vrot.slane %v861_v33, 4  ;;  %v1324_v54 = vrot.slane %v1322_v34, 5 }
  0xea   : > { %10326 = vst [vmem:[#allocation96_spill] sm:$0xff] %v7891_v0  ;;  %v7898_v35 = vpop.permute.xlu0 %2338  ;;  %v5804_v0 = vld [vmem:[%s6765_s19 + $0xc0] sm:$0xf]  ;;  %3016 = vrot.lane.b32.xlu1 %v5983_v32, %s6717_s20  ;;  %v1309_v20 = vor.u32 %v1308_v60, %v1305_v57  ;;  %v1498_v44 = vrot.slane %v7906_v18, 5  ;;  %v965_v32 = vmax.bf16 %v10257_v47, %v5806_v41 }
  0xeb   : > { %10329 = vst [vmem:[#allocation54_spill] sm:$0xff] %v7898_v35  ;;  %v1314_v24 = vrot.slane %v1312_v16, 5  ;;  %v1318_v8 = vrot.slane %v1316_v27, 4  ;;  %v865_v10 = vsel %vm7282_vm5, %v863_v28, %v864_v31  ;;  %v7942_v27 = vmax.bf16 %v10257_v47, %v5805_v56 }
  0xec   : > { %3126 = vrot.lane.b32.xlu0 %v7900_v63, %s6719_s22  ;;  %v7939_v63 = vmax.bf16 %v10257_v47, %v5804_v0  ;;  %v1500_v60 = vrot.slane %v1498_v44, 4 }
  0xed   : > { %v7922_v35 = vpop.permute.xlu1 %2348  ;;  %v1319_v40 = vor.u32 %v1318_v8, %v1314_v24  ;;  %10339 = vst [vmem:[#allocation103_spill] sm:$0xff] %v7942_v27  ;;  %v1336_v34 = vshll.u32 %v7942_v27, 16 }
  0xee   : > { %10336 = vst [vmem:[#allocation50_spill] sm:$0xff] %v7922_v35  ;;  %v7926_v52 = vpop.permute.xlu0 %2342  ;;  %v862_v35 = vsel %vm7282_vm5, %v5758_v21, %v861_v33  ;;  %10338 = vst [vmem:[#allocation102_spill] sm:$0xff] %v7939_v63  ;;  %v1310_v33 = vrot.slane %v1309_v20, 4  ;;  %v1327_v13 = vshrl.u32 %v7939_v63, 16  ;;  %v1330_v0 = vshll.u32 %v7939_v63, 16 }
  0xef   : > { %10337 = vst [vmem:[#allocation101_spill] sm:$0xff] %v7926_v52  ;;  %v5821_v52 = vrot.slane %v7903_v49, 9  ;;  %v5984_v31 = vcombine.low %v862_v35, %v865_v10  ;;  %v1320_v57 = vrot.slane %v1319_v40, 4  ;;  %v1340_v10 = vshrl.u32 %v7942_v27, 16 }
  0xf0   : > { %2420 = vrot.lane.b32.xlu0 %v7567_v53, %s6719_s22  ;;  %v1315_v56 = vsel %vm6806_vm2, %v1310_v33, %v1314_v24  ;;  %v1346_v20 = vshll.u32 %v965_v32, 16  ;;  %v1502_v41 = vsel %vm7282_vm5, %v1500_v60, %v1501_v48  ;;  %v1329_v8 = vrot.slane %v1327_v13, 4 }
  0xf1   : > { %v2989_v16 = vpop.permute.xlu1 %2988  ;;  %v1499_v28 = vsel %vm7282_vm5, %v5821_v52, %v1498_v44  ;;  %v1325_v40 = vsel %vm6806_vm2, %v1320_v57, %v1324_v54  ;;  %v1332_v53 = vrot.slane %v1330_v0, 5  ;;  %v1338_v33 = vrot.slane %v1336_v34, 5  ;;  %v5823_v44 = vld [vmem:[%s6765_s19 + $0x18] sm:$0xf]  ;;  %v5824_v57 = vld [vmem:[%s6765_s19 + $0x1c] sm:$0xf] }
  0xf2   : > { %v7945_v21 = vpop.permute.xlu0 %2346  ;;  %v7963_v24 = vcombine.low %v1315_v56, %v1325_v40  ;;  %v1342_v52 = vrot.slane %v1340_v10, 4  ;;  %v5822_v39 = vrot.slane %v7939_v63, 9  ;;  %v1505_v54 = vrot.slane %v7942_v27, 5  ;;  %v5825_v34 = vld [vmem:[%s6765_s19 + $0x20] sm:$0x1] }
  0xf3   : > { %10340 = vst [vmem:[#allocation104_spill] sm:$0xff] %v7945_v21  ;;  %v1333_v38 = vor.u32 %v1332_v53, %v1329_v8  ;;  %v7972_v48 = vcombine.low %v1499_v28, %v1502_v41  ;;  %v1348_v13 = vrot.slane %v1346_v20, 5  ;;  %v1508_v0 = vrot.slane %v965_v32, 5  ;;  %v10344_v40 = vld [vmem:[#allocation10_spill] sm:$0xff] }
  0xf4   : > { %10342 = vst [vmem:[#allocation106_spill] sm:$0xff] %v7963_v24  ;;  %3018 = vrot.lane.b32.xlu0 %v5984_v31, %s6717_s20  ;;  %3048 = vrot.lane.b32.xlu1 %v7963_v24, %s6718_s21  ;;  %v1343_v60 = vor.u32 %v1342_v52, %v1338_v33  ;;  %v1506_v53 = vsel %vm7282_vm5, %v5822_v39, %v1505_v54  ;;  %v1507_v31 = vrot.slane %v1505_v54, 4  ;;  %v5826_v54 = vld [vmem:[%s6765_s19 + $0x24] sm:$0xf] }
  0xf5   : > { %v3021_v35 = vpop.permute.xlu1 %3020  ;;  %10343 = vst [vmem:[#allocation107_spill] sm:$0xff] %v7972_v48  ;;  %v1334_v10 = vrot.slane %v1333_v38, 4  ;;  %v3134_v8 = vsel %vm2442_vm6, %v10344_v40, %v2989_v16  ;;  %v7982_v28 = vmax.bf16 %v10257_v47, %v5823_v44  ;;  %v7985_v32 = vmax.bf16 %v10257_v47, %v5824_v57  ;;  %v10349_v40 = vld [vmem:[#allocation15_spill] sm:$0xff] }
  0xf6   : > { %v7961_v21 = vpop.permute.xlu0 %2350  ;;  %v1344_v24 = vrot.slane %v1343_v60, 4  ;;  %v1509_v39 = vsel %vm7282_vm5, %v1507_v31, %v1508_v0  ;;  %v1564_v20 = vmax.bf16 %v10257_v47, %v5825_v34  ;;  %v7993_v16 = vsel %vm2491_vm7, %v3134_v8, %v3021_v35 }
  0xf7   : > { %10341 = vst [vmem:[#allocation105_spill] sm:$0xff] %v7961_v21  ;;  %10345 = vst [vmem:[#allocation10_spill] sm:$0xff] %v7982_v28  ;;  %v1339_v38 = vsel %vm6806_vm2, %v1334_v10, %v1338_v33  ;;  %v7999_v52 = vcombine.low %v1506_v53, %v1509_v39  ;;  %v1611_v44 = vshrl.u32 %v7982_v28, 16  ;;  %v1614_v33 = vshll.u32 %v7982_v28, 16  ;;  %v5827_v10 = vld [vmem:[%s6765_s19 + $0x28] sm:$0xf] }
  0xf8   : > { %10346 = vst [vmem:[#allocation108_spill] sm:$0xff] %v7985_v32  ;;  %3128 = vrot.lane.b32.xlu1 %v7972_v48, %s6719_s22  ;;  %v1349_v41 = vsel %vm6806_vm2, %v1344_v24, %v1348_v13  ;;  %v1620_v35 = vshll.u32 %v7985_v32, 16  ;;  %v1624_v0 = vshrl.u32 %v7985_v32, 16  ;;  %v1630_v34 = vshll.u32 %v1564_v20, 16  ;;  %v8014_v24 = vld [vmem:[%s10023_s1 + $0x30] sm:$0xff]  }
  0xf9   : > { %v7975_v56 = vpop.permute.xlu1 %3100  ;;  %10347 = vst [vmem:[#allocation109_spill] sm:$0xff] %v7999_v52  ;;  %v8006_v60 = vcombine.low %v1339_v38, %v1349_v41  ;;  %v1613_v13 = vrot.slane %v1611_v44, 4  ;;  %v1616_v53 = vrot.slane %v1614_v33, 5  ;;  %v5871_v38 = vrot.slane %v7982_v28, 9  ;;  %v5828_v39 = vld [vmem:[%s6765_s19 + $0x2c] sm:$0x1]  ;;  %6458 = vmatprep.subr.bf16.mxu1 %v8014_v24 }
  0xfa   : > { %v1622_v41 = vrot.slane %v1620_v35, 5  ;;  %v1626_v48 = vrot.slane %v1624_v0, 4  ;;  %v1632_v14 = vrot.slane %v1630_v34, 5  ;;  %v2044_v49 = vrot.slane %v7985_v32, 5 }
  0xfb   : > { %v2991_v21 = vpop.permute.xlu0 %2990  ;;  %10348 = vst [vmem:[#allocation110_spill] sm:$0xff] %v8006_v60  ;;  %3050 = vrot.lane.b32.xlu0 %v8006_v60, %s6718_s21  ;;  %v1617_v44 = vor.u32 %v1616_v53, %v1613_v13  ;;  %v2047_v33 = vrot.slane %v1564_v20, 5  ;;  %v1567_v34 = vmax.bf16 %v10257_v47, %v5828_v39 }
  0xfc   : > { %v3137_v8 = vsel %vm2442_vm6, %v10349_v40, %v2991_v21  ;;  %2422 = vrot.lane.b32.xlu1 %v7594_v37, %s6719_s22  ;;  %v8027_v21 = vmax.bf16 %v10257_v47, %v5826_v54  ;;  %v8030_v40 = vmax.bf16 %v10257_v47, %v5827_v10  ;;  %v1627_v60 = vor.u32 %v1626_v48, %v1622_v41 }
  0xfd   : > { %v8004_v57 = vpop.permute.xlu1 %2992  ;;  %v2045_v35 = vsel %vm7282_vm5, %v5871_v38, %v2044_v49  ;;  %v2046_v0 = vrot.slane %v2044_v49, 4  ;;  %v1618_v18 = vrot.slane %v1617_v44, 4  ;;  %v1654_v49 = vshll.u32 %v1567_v34, 16 }
  0xfe   : > { %v1635_v37 = vshrl.u32 %v8027_v21, 16  ;;  %v1638_v20 = vshll.u32 %v8027_v21, 16  ;;  %v1644_v54 = vshll.u32 %v8030_v40, 16  ;;  %v1628_v10 = vrot.slane %v1627_v60, 4 }
  0xff   : > { %v3023_v31 = vpop.permute.xlu0 %3022  ;;  %3130 = vrot.lane.b32.xlu0 %v7999_v52, %s6719_s22  ;;  %v2048_v48 = vsel %vm7282_vm5, %v2046_v0, %v2047_v33  ;;  %v1648_v13 = vshrl.u32 %v8030_v40, 16  ;;  %v1623_v53 = vsel %vm6806_vm2, %v1618_v18, %v1622_v41  ;;  %v1656_v33 = vrot.slane %v1654_v49, 5 }
 0x100   : > { %4633 = vrot.lane.b32.xlu1 %v7372_v46, %s6717_s20  ;;  %v6109_v38 = vcombine.low %v2045_v35, %v2048_v48  ;;  %v1637_v39 = vrot.slane %v1635_v37, 4  ;;  %v1640_v44 = vrot.slane %v1638_v20, 5  ;;  %v1633_v60 = vsel %vm6806_vm2, %v1628_v10, %v1632_v14  ;;  %v5829_v35 = vld [vmem:[%s6765_s19 + $0x30] sm:$0xf]  ;;  %v5830_v10 = vld [vmem:[%s6765_s19 + $0x34] sm:$0xf] }
 0x101   : > { %v3025_v28 = vpop.permute.xlu1 %3024  ;;  %v1646_v52 = vrot.slane %v1644_v54, 5  ;;  %v1650_v63 = vrot.slane %v1648_v13, 4  ;;  %v8049_v27 = vcombine.low %v1623_v53, %v1633_v60  ;;  %v3183_v4 = vsel %vm2491_vm7, %v3137_v8, %v3023_v31  ;;  %v10350_v8 = vld [vmem:[#allocation7_spill] sm:$0xff] }
 0x102   : > { %v1641_v46 = vor.u32 %v1640_v44, %v1637_v39  ;;  %v5872_v18 = vrot.slane %v8027_v21, 9  ;;  %v2051_v41 = vrot.slane %v8030_v40, 5  ;;  %v2054_v14 = vrot.slane %v1567_v34, 5  ;;  %v10351_v44 = vld [vmem:[#allocation12_spill] sm:$0xff] }
 0x103   : > { %v3103_v32 = vpop.permute.xlu0 %3102  ;;  %2424 = vrot.lane.b32.xlu0 %v7631_v26, %s6719_s22  ;;  %v1651_v37 = vor.u32 %v1650_v63, %v1646_v52  ;;  %v3213_v31 = vsel %vm2524_vm8, %v7993_v16, %v7975_v56  ;;  %v3140_v54 = vsel %vm2442_vm6, %v10350_v8, %v8004_v57  ;;  %v5831_v63 = vld [vmem:[%s6765_s19 + $0x38] sm:$0x1] }
 0x104   : > { %4665 = vrot.lane.b32.xlu1 %v8049_v27, %s6718_s21  ;;  %v1642_v20 = vrot.slane %v1641_v46, 4  ;;  %v2052_v13 = vsel %vm7282_vm5, %v5872_v18, %v2051_v41  ;;  %v2053_v49 = vrot.slane %v2051_v41, 4  ;;  %6390 = vmatprep.mubr.msk.bf16.mxu1 %vm2573_vm9, %v3213_v31  ;;  %v3215_v53 = vsel %vm2524_vm8, %v3183_v4, %v3103_v32  ;;  %v6689_v56 = vld [vmem:[%s10023_s1 + $0x38] sm:$0xff]   ;;  %v5833_v31 = vld [vmem:[%s6765_s19 + $0x40] sm:$0xf] }
 0x105   : > { %v3105_v6 = vpop.permute.xlu1 %3104  ;;  %v1652_v34 = vrot.slane %v1651_v37, 4  ;;  %6391 = vmatmul.mubr.msk.bf16.vlgmr.msra.gmra.mrb[0].mxu1 %vm2573_vm9, %v3215_v53  ;;  %v3185_v57 = vsel %vm2491_vm7, %v3140_v54, %v3025_v28  ;;  %v8083_v46 = vmax.bf16 %v10257_v47, %v5829_v35  ;;  %v1570_v28 = vmax.bf16 %v10257_v47, %v5831_v63 }
 0x106   : > { %v1647_v16 = vsel %vm6806_vm2, %v1642_v20, %v1646_v52  ;;  %v2055_v32 = vsel %vm7282_vm5, %v2053_v49, %v2054_v14  ;;  %v8092_v52 = vmax.bf16 %v10257_v47, %v5830_v10  ;;  %6459 = vmatpush3.bf16.msra.mxu1 %v8014_v24 }
 0x107   : > { %v2995_v0 = vpop.permute.xlu0 %2994  ;;  %4635 = vrot.lane.b32.xlu0 %v7407_v12, %s6717_s20  ;;  %v1657_v4 = vsel %vm6806_vm2, %v1652_v34, %v1656_v33  ;;  %v6110_v18 = vcombine.low %v2052_v13, %v2055_v32  ;;  %v1659_v37 = vshrl.u32 %v8083_v46, 16  ;;  %v1662_v12 = vshll.u32 %v8083_v46, 16  ;;  %v5832_v33 = vld [vmem:[%s6765_s19 + $0x3c] sm:$0xf]  ;;  %6460 = vmatprep.subr.bf16.mxu1 %v6689_v56  ;;  %v5834_v13 = vld [vmem:[%s6765_s19 + $0x44] sm:$0x1] }
 0x108   : > { %v3143_v60 = vsel %vm2442_vm6, %v10351_v44, %v2995_v0  ;;  %4745 = vrot.lane.b32.xlu1 %v6109_v38, %s6719_s22  ;;  %v8096_v0 = vcombine.low %v1647_v16, %v1657_v4  ;;  %v1668_v14 = vshll.u32 %v8092_v52, 16  ;;  %v1672_v35 = vshrl.u32 %v8092_v52, 16 }
 0x109   : > { %v8067_v48 = vpop.permute.xlu1 %2996  ;;  %v1678_v20 = vshll.u32 %v1570_v28, 16  ;;  %v3217_v38 = vsel %vm2524_vm8, %v3185_v57, %v3105_v6  ;;  %v1661_v54 = vrot.slane %v1659_v37, 4  ;;  %v1664_v10 = vrot.slane %v1662_v12, 5 }
 0x10a   : > { %v5873_v34 = vrot.slane %v8083_v46, 9  ;;  %6394 = vmatprep.mubr.msk.bf16.mxu1 %vm2573_vm9, %v3217_v38  ;;  %v1670_v24 = vrot.slane %v1668_v14, 5  ;;  %v1674_v49 = vrot.slane %v1672_v35, 4  ;;  %v2058_v6 = vrot.slane %v8092_v52, 5  ;;  %6461 = vmatpush3.bf16.msra.mxu1 %v6689_v56 }
 0x10b   : > { %v3027_v39 = vpop.permute.xlu0 %3026  ;;  %4667 = vrot.lane.b32.xlu0 %v8096_v0, %s6718_s21  ;;  %v1680_v53 = vrot.slane %v1678_v20, 5  ;;  %v1665_v16 = vor.u32 %v1664_v10, %v1661_v54  ;;  %v2061_v57 = vrot.slane %v1570_v28, 5  ;;  %v8121_v44 = vmax.bf16 %v10257_v47, %v5833_v31 }
 0x10c   : > { %v3187_v63 = vsel %vm2491_vm7, %v3143_v60, %v3027_v39  ;;  %2426 = vrot.lane.b32.xlu1 %v7664_v25, %s6719_s22  ;;  %v8118_v39 = vmax.bf16 %v10257_v47, %v5832_v33  ;;  %v1675_v60 = vor.u32 %v1674_v49, %v1670_v24  ;;  %v2059_v4 = vsel %vm7282_vm5, %v5873_v34, %v2058_v6  ;;  %v10352_v25 = vld [vmem:[#allocation22_spill] sm:$0xff] }
 0x10d   : > { %v8101_v41 = vpop.permute.xlu1 %3028  ;;  %v2060_v32 = vrot.slane %v2058_v6, 4  ;;  %v1573_v37 = vmax.bf16 %v10257_v47, %v5834_v13  ;;  %v1666_v35 = vrot.slane %v1665_v16, 4  ;;  %v1692_v33 = vshll.u32 %v8121_v44, 16 }
 0x10e   : > { %v1683_v20 = vshrl.u32 %v8118_v39, 16  ;;  %v1686_v28 = vshll.u32 %v8118_v39, 16  ;;  %v1676_v38 = vrot.slane %v1675_v60, 4  ;;  %v1696_v31 = vshrl.u32 %v8121_v44, 16 }
 0x10f   : > { %v3107_v8 = vpop.permute.xlu0 %3106  ;;  %4747 = vrot.lane.b32.xlu0 %v6110_v18, %s6719_s22  ;;  %v2062_v56 = vsel %vm7282_vm5, %v2060_v32, %v2061_v57  ;;  %v1702_v54 = vshll.u32 %v1573_v37, 16  ;;  %v1671_v10 = vsel %vm6806_vm2, %v1666_v35, %v1670_v24  ;;  %v1694_v18 = vrot.slane %v1692_v33, 5 }
 0x110   : > { %4637 = vrot.lane.b32.xlu1 %v7457_v45, %s6717_s20  ;;  %v6111_v34 = vcombine.low %v2059_v4, %v2062_v56  ;;  %v1685_v13 = vrot.slane %v1683_v20, 4  ;;  %v1688_v49 = vrot.slane %v1686_v28, 5  ;;  %v1681_v6 = vsel %vm6806_vm2, %v1676_v38, %v1680_v53  ;;  %v5839_v38 = vld [vmem:[%s6765_s19 + $0x58] sm:$0xf] }
 0x111   : > { %v3109_v14 = vpop.permute.xlu1 %3108  ;;  %v1698_v16 = vrot.slane %v1696_v31, 4  ;;  %v1704_v60 = vrot.slane %v1702_v54, 5  ;;  %v8139_v57 = vcombine.low %v1671_v10, %v1681_v6  ;;  %v3146_v45 = vsel %vm2442_vm6, %v10352_v25, %v8067_v48  ;;  %v5838_v48 = vld [vmem:[%s6765_s19 + $0x54] sm:$0xf] }
 0x112   : > { %v1689_v32 = vor.u32 %v1688_v49, %v1685_v13  ;;  %v3219_v24 = vsel %vm2524_vm8, %v3187_v63, %v3107_v8  ;;  %v8149_v53 = vcombine.low %v7739_v61, %v7742_v15  ;;  %v5874_v20 = vrot.slane %v8118_v39, 9  ;;  %v10354_v61 = vld [vmem:[#allocation18_spill] sm:$0xff]  ;;  %v5840_v13 = vld [vmem:[%s6765_s19 + $0x5c] sm:$0x1] }
 0x113   : > { %v2999_v12 = vpop.permute.xlu0 %2998  ;;  %2428 = vrot.lane.b32.xlu0 %v7707_v3, %s6719_s22  ;;  %v1699_v35 = vor.u32 %v1698_v16, %v1694_v18  ;;  %v2065_v28 = vrot.slane %v8121_v44, 5  ;;  %6395 = vmatmul.mubr.msk.bf16.gmra.mrb[4].mxu1 %vm2573_vm9, %v3219_v24  ;;  %v2068_v63 = vrot.slane %v1573_v37, 5  ;;  %v3189_v33 = vsel %vm2491_vm7, %v3146_v45, %v8101_v41  ;;  %v10355_v41 = vld [vmem:[#allocation29_spill] sm:$0xff] }
 0x114   : > { %10353 = vst [vmem:[#allocation15_spill] sm:$0xff] %v8149_v53  ;;  %4669 = vrot.lane.b32.xlu1 %v8139_v57, %s6718_s21  ;;  %v1690_v8 = vrot.slane %v1689_v32, 4  ;;  %v3149_v15 = vsel %vm2442_vm6, %v10354_v61, %v2999_v12  ;;  %v3221_v10 = vsel %vm2524_vm8, %v3189_v33, %v3109_v14  ;;  %v8173_v16 = vmax.bf16 %v10257_v47, %v5838_v48  ;;  %v5835_v32 = vld [vmem:[%s6765_s19 + $0x48] sm:$0xf] }
 0x115   : > { %v3001_v25 = vpop.permute.xlu1 %3000  ;;  %v1700_v56 = vrot.slane %v1699_v35, 4  ;;  %v2066_v31 = vsel %vm7282_vm5, %v5874_v20, %v2065_v28  ;;  %v2067_v54 = vrot.slane %v2065_v28, 4  ;;  %6398 = vmatprep.mubr.msk.bf16.mxu1 %vm2573_vm9, %v3221_v10  ;;  %v8184_v24 = vmax.bf16 %v10257_v47, %v5839_v38  ;;  %v5837_v35 = vld [vmem:[%s6765_s19 + $0x50] sm:$0x1] }
 0x116   : > { %v1695_v37 = vsel %vm6806_vm2, %v1690_v8, %v1694_v18  ;;  %v3152_v12 = vsel %vm2442_vm6, %v10355_v41, %v3001_v25  ;;  %v1734_v25 = vshll.u32 %v8173_v16, 16  ;;  %v8206_v38 = vmax.bf16 %v10257_v47, %v5837_v35 }
 0x117   : > { %v3031_v4 = vpop.permute.xlu0 %3030  ;;  %4639 = vrot.lane.b32.xlu0 %v7493_v11, %s6717_s20  ;;  %v1705_v14 = vsel %vm6806_vm2, %v1700_v56, %v1704_v60  ;;  %v2069_v18 = vsel %vm7282_vm5, %v2067_v54, %v2068_v63  ;;  %v8192_v11 = vmax.bf16 %v10257_v47, %v5840_v13  ;;  %v1731_v60 = vshrl.u32 %v8173_v16, 16 }
 0x118   : > { %v3191_v49 = vsel %vm2491_vm7, %v3149_v15, %v3031_v4  ;;  %v5836_v4 = vld [vmem:[%s6765_s19 + $0x4c] sm:$0xf]  ;;  %4749 = vrot.lane.b32.xlu1 %v6111_v34, %s6719_s22  ;;  %v8189_v20 = vcombine.low %v1695_v37, %v1705_v14  ;;  %v6112_v28 = vcombine.low %v2066_v31, %v2069_v18  ;;  %v1740_v48 = vshll.u32 %v8184_v24, 16 }
 0x119   : > { %v1744_v8 = vshrl.u32 %v8184_v24, 16  ;;  %v8199_v63 = vmax.bf16 %v10257_v47, %v5835_v32  ;;  %v1733_v61 = vrot.slane %v1731_v60, 4  ;;  %v1750_v34 = vshll.u32 %v8192_v11, 16  ;;  %v10356_v60 = vld [vmem:[#allocation4_spill] sm:$0xff] }
 0x11a   : > { %v8203_v15 = vmax.bf16 %v10257_v47, %v5836_v4  ;;  %v1736_v56 = vrot.slane %v1734_v25, 5  ;;  %v1742_v31 = vrot.slane %v1740_v48, 5  ;;  %v1726_v4 = vshll.u32 %v8206_v38, 16  ;;  %v10357_v25 = vld [vmem:[#allocation3_spill] sm:$0xff] }
 0x11b   : > { %v3111_v6 = vpop.permute.xlu0 %3110  ;;  %4671 = vrot.lane.b32.xlu0 %v8189_v20, %s6718_s21  ;;  %v1746_v54 = vrot.slane %v1744_v8, 4  ;;  %v1707_v10 = vshrl.u32 %v8199_v63, 16  ;;  %v1752_v37 = vrot.slane %v1750_v34, 5 }
 0x11c   : > { %v3223_v45 = vsel %vm2524_vm8, %v3191_v49, %v3111_v6  ;;  %2352 = vrot.lane.b32.xlu1 %v8149_v53, %s6718_s21  ;;  %v1710_v49 = vshll.u32 %v8199_v63, 16  ;;  %v1716_v41 = vshll.u32 %v8203_v15, 16  ;;  %v1720_v6 = vshrl.u32 %v8203_v15, 16 }
 0x11d   : > { %v3033_v33 = vpop.permute.xlu1 %3032  ;;  %6399 = vmatmul.mubr.msk.bf16.gmra.mrb[8].mxu1 %vm2573_vm9, %v3223_v45  ;;  %v1737_v32 = vor.u32 %v1736_v56, %v1733_v61  ;;  %v1747_v14 = vor.u32 %v1746_v54, %v1742_v31  ;;  %v1709_v18 = vrot.slane %v1707_v10, 4  ;;  %v5887_v45 = vcombine.low %v10357_v25, %v10356_v60  ;;  %v10358_v25 = vld [vmem:[#allocation25_spill] sm:$0xff] }
 0x11e   : > { %v1712_v48 = vrot.slane %v1710_v49, 5  ;;  %v1718_v8 = vrot.slane %v1716_v41, 5  ;;  %v1722_v3 = vrot.slane %v1720_v6, 4  ;;  %v3193_v26 = vsel %vm2491_vm7, %v3152_v12, %v3033_v33 }
 0x11f   : > { %v3003_v13 = vpop.permute.xlu0 %3002  ;;  %4751 = vrot.lane.b32.xlu0 %v6112_v28, %s6719_s22  ;;  %v1738_v34 = vrot.slane %v1737_v32, 4  ;;  %v1748_v53 = vrot.slane %v1747_v14, 4  ;;  %v1728_v54 = vrot.slane %v1726_v4, 5  ;;  %v2079_v10 = vrot.slane %v8184_v24, 5 }
 0x120   : > { %2432 = vrot.lane.b32.xlu1 %v7792_v9, %s6719_s22  ;;  %v1713_v61 = vor.u32 %v1712_v48, %v1709_v18  ;;  %v1723_v56 = vor.u32 %v1722_v3, %v1718_v8  ;;  %v5876_v28 = vrot.slane %v8173_v16, 9  ;;  %v2082_v41 = vrot.slane %v8192_v11, 5  ;;  %v5844_v48 = vld [vmem:[%s6765_s19 + $0x6c] sm:$0xf] }
 0x121   : > { %v3113_v35 = vpop.permute.xlu1 %3112  ;;  %v1743_v60 = vsel %vm6806_vm2, %v1738_v34, %v1742_v31  ;;  %v1753_v49 = vsel %vm6806_vm2, %v1748_v53, %v1752_v37  ;;  %v8233_v12 = vsel %vm2442_vm6, %v5887_v45, %v7642_v2  ;;  %v5875_v32 = vrot.slane %v8199_v63, 9  ;;  %v5841_v34 = vld [vmem:[%s6765_s19 + $0x60] sm:$0xf] }
 0x122   : > { %v1714_v3 = vrot.slane %v1713_v61, 4  ;;  %v1724_v33 = vrot.slane %v1723_v56, 4  ;;  %v2081_v53 = vrot.slane %v2079_v10, 4  ;;  %v2072_v37 = vrot.slane %v8203_v15, 5  ;;  %v5846_v56 = vld [vmem:[%s6765_s19 + $0x74] sm:$0x1] }
 0x123   : > { %2430 = vrot.lane.b32.xlu0 %v7759_v58, %s6719_s22  ;;  %v2075_v11 = vrot.slane %v8206_v38, 5  ;;  %v3225_v14 = vsel %vm2524_vm8, %v3193_v26, %v3113_v35  ;;  %v8243_v2 = vcombine.low %v1743_v60, %v1753_v49  ;;  %v3155_v45 = vsel %vm2442_vm6, %v10358_v25, %v3003_v13  ;;  %v5845_v38 = vld [vmem:[%s6765_s19 + $0x70] sm:$0xf]  ;;  %v10359_v49 = vld [vmem:[#allocation37_spill] sm:$0xff] }
 0x124   : > { %4643 = vrot.lane.b32.xlu1 %v7560_v51, %s6717_s20  ;;  %v1719_v18 = vsel %vm6806_vm2, %v1714_v3, %v1718_v8  ;;  %v1729_v4 = vsel %vm6806_vm2, %v1724_v33, %v1728_v54  ;;  %v2080_v26 = vsel %vm7282_vm5, %v5876_v28, %v2079_v10  ;;  %v2083_v51 = vsel %vm7282_vm5, %v2081_v53, %v2082_v41  ;;  %v5842_v54 = vld [vmem:[%s6765_s19 + $0x64] sm:$0xf]  ;;  %v5843_v33 = vld [vmem:[%s6765_s19 + $0x68] sm:$0x1] }
 0x125   : > { %v3005_v31 = vpop.permute.xlu1 %3004  ;;  %v2074_v35 = vrot.slane %v2072_v37, 4  ;;  %6402 = vmatprep.mubr.msk.bf16.mxu1 %vm2573_vm9, %v3225_v14  ;;  %v8262_v60 = vcombine.low %v1719_v18, %v1729_v4  ;;  %v2073_v13 = vsel %vm7282_vm5, %v5875_v32, %v2072_v37  ;;  %v8278_v3 = vmax.bf16 %v10257_v47, %v5845_v38 }
 0x126   : > { %v3035_v6 = vpop.permute.xlu0 %3034  ;;  %v3158_v10 = vsel %vm2442_vm6, %v10359_v49, %v3005_v31  ;;  %v6114_v32 = vcombine.low %v2080_v26, %v2083_v51  ;;  %v8284_v53 = vmax.bf16 %v10257_v47, %v5846_v56  ;;  %v8290_v37 = vmax.bf16 %v10257_v47, %v5842_v54 }
 0x127   : > { %v3195_v61 = vsel %vm2491_vm7, %v3155_v45, %v3035_v6  ;;  %4641 = vrot.lane.b32.xlu0 %v7530_v19, %s6717_s20  ;;  %v2076_v41 = vsel %vm7282_vm5, %v2074_v35, %v2075_v11  ;;  %v8275_v6 = vmax.bf16 %v10257_v47, %v5844_v48  ;;  %v8287_v19 = vmax.bf16 %v10257_v47, %v5841_v34 }
 0x128   : > { %4675 = vrot.lane.b32.xlu1 %v8243_v2, %s6718_s21  ;;  %v8294_v11 = vcombine.low %v7837_v50, %v7846_v55  ;;  %v1788_v4 = vshll.u32 %v8278_v3, 16  ;;  %v6113_v25 = vcombine.low %v2073_v13, %v2076_v41  ;;  %v1792_v48 = vshrl.u32 %v8278_v3, 16 }
 0x129   : > { %v1779_v14 = vshrl.u32 %v8275_v6, 16  ;;  %v1782_v18 = vshll.u32 %v8275_v6, 16  ;;  %v8302_v38 = vmax.bf16 %v10257_v47, %v5843_v33  ;;  %v1755_v26 = vshrl.u32 %v8287_v19, 16 }
 0x12a   : > { %v3115_v8 = vpop.permute.xlu0 %3114  ;;  %10360 = vst [vmem:[#allocation7_spill] sm:$0xff] %v8294_v11  ;;  %v8306_v55 = vrot.slane %v1788_v4, 5  ;;  %v1758_v56 = vshll.u32 %v8287_v19, 16  ;;  %v1764_v54 = vshll.u32 %v8290_v37, 16  ;;  %v8323_v4 = vcombine.low %v7799_v62, %v7802_v42 }
 0x12b   : > { %v3227_v28 = vsel %vm2524_vm8, %v3195_v61, %v3115_v8  ;;  %4673 = vrot.lane.b32.xlu0 %v8262_v60, %s6718_s21  ;;  %v1781_v34 = vrot.slane %v1779_v14, 4  ;;  %v1784_v50 = vrot.slane %v1782_v18, 5  ;;  %v1794_v61 = vrot.slane %v1792_v48, 4  ;;  %v10361_v14 = vld [vmem:[#allocation8_spill] sm:$0xff] }
 0x12c   : > { %6403 = vmatmul.mubr.msk.bf16.gmra.mrb[12].mxu1 %vm2573_vm9, %v3227_v28  ;;  %4755 = vrot.lane.b32.xlu1 %v6114_v32, %s6719_s22  ;;  %v1798_v8 = vshll.u32 %v8284_v53, 16  ;;  %v1768_v28 = vshrl.u32 %v8290_v37, 16  ;;  %v1760_v33 = vrot.slane %v1758_v56, 5  ;;  %v1774_v32 = vshll.u32 %v8302_v38, 16  ;;  %10362 = vst [vmem:[#allocation12_spill] sm:$0xff] %v8323_v4 }
 0x12d   : > { %v3037_v31 = vpop.permute.xlu1 %3036  ;;  %v1785_v49 = vor.u32 %v1784_v50, %v1781_v34  ;;  %v1795_v41 = vor.u32 %v1794_v61, %v8306_v55  ;;  %v5888_v18 = vcombine.low %v10361_v14, %v6842_v7  ;;  %v2093_v48 = vrot.slane %v8278_v3, 5 }
 0x12e   : > { %v3197_v45 = vsel %vm2491_vm7, %v3158_v10, %v3037_v31  ;;  %v3007_v51 = vpop.permute.xlu0 %3006  ;;  %v1757_v10 = vrot.slane %v1755_v26, 4  ;;  %v1766_v31 = vrot.slane %v1764_v54, 5  ;;  %v2493_v34 = vsel %vm2491_vm7, %v8233_v12, %v7863_v23 }
 0x12f   : > { %4753 = vrot.lane.b32.xlu0 %v6113_v25, %s6719_s22  ;;  %v1786_v50 = vrot.slane %v1785_v49, 4  ;;  %v1800_v26 = vrot.slane %v1798_v8, 5  ;;  %v1796_v61 = vrot.slane %v1795_v41, 4  ;;  %v1776_v56 = vrot.slane %v1774_v32, 5  ;;  %v10363_v49 = vld [vmem:[#allocation33_spill] sm:$0xff] }
 0x130   : > { %2356 = vrot.lane.b32.xlu1 %v8294_v11, %s6718_s21  ;;  %v5878_v42 = vrot.slane %v8275_v6, 9  ;;  %v2448_v8 = vsel %vm2442_vm6, %v5888_v18, %v7667_v43  ;;  %v2086_v41 = vrot.slane %v8290_v37, 5  ;;  %v5850_v32 = vld [vmem:[%s6765_s19 + $0x84] sm:$0xf]  ;;  %v5877_v18 = vrot.slane %v8287_v19, 9 }
 0x131   : > { %v3117_v35 = vpop.permute.xlu1 %3116 }
 0x132   : > { %v3229_v13 = vsel %vm2524_vm8, %v3197_v45, %v3117_v35  ;;  %v1770_v45 = vrot.slane %v1768_v28, 4  ;;  %v1761_v35 = vor.u32 %v1760_v33, %v1757_v10  ;;  %v2096_v28 = vrot.slane %v8284_v53, 5  ;;  %v5847_v33 = vld [vmem:[%s6765_s19 + $0x78] sm:$0xf] }
 0x133   : > { %6406 = vmatprep.mubr.msk.bf16.mxu1 %vm2573_vm9, %v3229_v13  ;;  %v2095_v13 = vrot.slane %v2093_v48, 4  ;;  %2354 = vrot.lane.b32.xlu0 %v8323_v4, %s6718_s21  ;;  %v3161_v10 = vsel %vm2442_vm6, %v10363_v49, %v3007_v51  ;;  %v1791_v53 = vsel %vm6806_vm2, %v1786_v50, %v8306_v55  ;;  %v2094_v43 = vsel %vm7282_vm5, %v5878_v42, %v2093_v48  ;;  %v5851_v51 = vld [vmem:[%s6765_s19 + $0x88] sm:$0xf] }
 0x134   : > { %v1771_v25 = vor.u32 %v1770_v45, %v1766_v31  ;;  %v1762_v54 = vrot.slane %v1761_v35, 4  ;;  %2436 = vrot.lane.b32.xlu1 %v7893_v1, %s6719_s22  ;;  %v1801_v45 = vsel %vm6806_vm2, %v1796_v61, %v1800_v26  ;;  %v2088_v61 = vrot.slane %v2086_v41, 4  ;;  %v10390_v1 = vld [vmem:[#allocation64_spill] sm:$0xff] }
 0x135   : > { %v2411_v7 = vpop.permute.xlu1 %2410  ;;  %v8368_v42 = vmax.bf16 %v10257_v47, %v5847_v33 }
 0x136   : > { %v3039_v62 = vpop.permute.xlu0 %3038  ;;  %v2526_v23 = vsel %vm2524_vm8, %v2493_v34, %v2411_v7  ;;  %v1772_v12 = vrot.slane %v1771_v25, 4  ;;  %v5848_v34 = vld [vmem:[%s6765_s19 + $0x7c] sm:$0xf]  ;;  %v1767_v35 = vsel %vm6806_vm2, %v1762_v54, %v1766_v31  ;;  %v2097_v7 = vsel %vm7282_vm5, %v2095_v13, %v2096_v28 }
 0x137   : > { %6354 = vmatprep.mubr.msk.bf16.mxu0 %vm2573_vm9, %v2526_v23  ;;  %v3199_v14 = vsel %vm2491_vm7, %v3161_v10, %v3039_v62  ;;  %v2089_v25 = vrot.slane %v8302_v38, 5  ;;  %2434 = vrot.lane.b32.xlu0 %v7861_v22, %s6719_s22  ;;  %v8371_v31 = vmax.bf16 %v10257_v47, %v5850_v32  ;;  %v8379_v38 = vmax.bf16 %v10257_v47, %v5848_v34  ;;  %v10365_v23 = vld [vmem:[#allocation45_spill] sm:$0xff]  ;;  %v5852_v10 = vld [vmem:[%s6765_s19 + $0x8c] sm:$0x1] }
 0x138   : > { %v1777_v55 = vsel %vm6806_vm2, %v1772_v12, %v1776_v56  ;;  %4647 = vrot.lane.b32.xlu1 %v7629_v17, %s6717_s20  ;;  %v8375_v56 = vcombine.low %v1791_v53, %v1801_v45  ;;  %v8382_v62 = vmax.bf16 %v10257_v47, %v5851_v51  ;;  %v2495_v54 = vsel %vm2491_vm7, %v2448_v8, %v7834_v29 }
 0x139   : > { %v3009_v26 = vpop.permute.xlu1 %3008  ;;  %v6116_v13 = vcombine.low %v2094_v43, %v2097_v7  ;;  %v8386_v28 = vcombine.low %v1767_v35, %v1777_v55  ;;  %v2087_v17 = vsel %vm7282_vm5, %v5877_v18, %v2086_v41  ;;  %v1827_v53 = vshrl.u32 %v8371_v31, 16  ;;  %v10366_v55 = vld [vmem:[#allocation2_spill] sm:$0xff] }
 0x13a   : > { %v3119_v50 = vpop.permute.xlu0 %3118  ;;  %v3164_v12 = vsel %vm2442_vm6, %v10365_v23, %v3009_v26  ;;  %v2090_v29 = vsel %vm7282_vm5, %v2088_v61, %v2089_v25  ;;  %v1803_v33 = vshrl.u32 %v8368_v42, 16  ;;  %v1806_v32 = vshll.u32 %v8368_v42, 16  ;;  %v10368_v23 = vld [vmem:[#allocation102_spill] sm:$0xff] }
 0x13b   : > { %v3231_v48 = vsel %vm2524_vm8, %v3199_v14, %v3119_v50  ;;  %10364 = vst [vmem:[#allocation22_spill] sm:$0xff] %v8386_v28  ;;  %4645 = vrot.lane.b32.xlu0 %v7598_v30, %s6717_s20  ;;  %v5849_v14 = vld [vmem:[%s6765_s19 + $0x80] sm:$0x1]  ;;  %v1812_v45 = vshll.u32 %v8379_v38, 16  ;;  %v1816_v30 = vshrl.u32 %v8379_v38, 16  ;;  %v1830_v43 = vshll.u32 %v8371_v31, 16 }
 0x13c   : > { %6407 = vmatmul.mubr.msk.bf16.gmra.mrb[16].mxu1 %vm2573_vm9, %v3231_v48  ;;  %4679 = vrot.lane.b32.xlu1 %v8375_v56, %s6718_s21  ;;  %v1836_v18 = vshll.u32 %v8382_v62, 16  ;;  %v8410_v34 = vmax.bf16 %v10257_v47, %v5852_v10  ;;  %v1829_v51 = vrot.slane %v1827_v53, 4  ;;  %v1840_v35 = vshrl.u32 %v8382_v62, 16 }
 0x13d   : > { %v3041_v41 = vpop.permute.xlu1 %3040  ;;  %v5889_v50 = vcombine.low %v10366_v55, %v6774_v5  ;;  %v1832_v26 = vrot.slane %v1830_v43, 5  ;;  %v6115_v61 = vcombine.low %v2087_v17, %v2090_v29  ;;  %v8423_v10 = vmax.bf16 %v10257_v47, %v5849_v14  ;;  %v10370_v29 = vld [vmem:[#allocation62_spill] sm:$0xff] }
 0x13e   : > { %v2413_v49 = vpop.permute.xlu0 %2412  ;;  %v3201_v7 = vsel %vm2491_vm7, %v3164_v12, %v3041_v41  ;;  %v1838_v48 = vrot.slane %v1836_v18, 5  ;;  %v1842_v53 = vrot.slane %v1840_v35, 4  ;;  %v1808_v12 = vrot.slane %v1806_v32, 5  ;;  %v10371_v35 = vld [vmem:[#allocation100_spill] sm:$0xff] }
 0x13f   : > { %v2528_v8 = vsel %vm2524_vm8, %v2495_v54, %v2413_v49  ;;  %4677 = vrot.lane.b32.xlu0 %v8386_v28, %s6718_s21  ;;  %v10367_v54 = vld [vmem:[#allocation103_spill] sm:$0xff]  ;;  %v1814_v41 = vrot.slane %v1812_v45, 5  ;;  %v1818_v43 = vrot.slane %v1816_v30, 4  ;;  %v1833_v55 = vor.u32 %v1832_v26, %v1829_v51 }
 0x140   : > { %6355 = vmatmul.mubr.msk.bf16.vlgmr.msra.gmra.mrb[0].mxu0 %vm2573_vm9, %v2528_v8  ;;  %v8420_v49 = vcombine.low %v10368_v23, %v10367_v54  ;;  %4759 = vrot.lane.b32.xlu1 %v6116_v13, %s6719_s22  ;;  %v1805_v8 = vrot.slane %v1803_v33, 4  ;;  %v1843_v4 = vor.u32 %v1842_v53, %v1838_v48  ;;  %v1846_v17 = vshll.u32 %v8410_v34, 16  ;;  %v10372_v13 = vld [vmem:[#allocation99_spill] sm:$0xff] }
 0x141   : > { %v3121_v5 = vpop.permute.xlu1 %3120  ;;  %v2451_v14 = vsel %vm2442_vm6, %v5889_v50, %v10370_v29  ;;  %v8434_v54 = vcombine.low %v10372_v13, %v10371_v35  ;;  %v10374_v33 = vld [vmem:[#allocation95_spill] sm:$0xff]  ;;  %v1822_v26 = vshll.u32 %v8423_v10, 16  ;;  %v1834_v23 = vrot.slane %v1833_v55, 4 }
 0x142   : > { %v3011_v25 = vpop.permute.xlu0 %3010  ;;  %10369 = vst [vmem:[#allocation18_spill] sm:$0xff] %v8420_v49  ;;  %v3233_v18 = vsel %vm2524_vm8, %v3201_v7, %v3121_v5  ;;  %v2497_v32 = vsel %vm2491_vm7, %v2451_v14, %v10374_v33  ;;  %v1809_v51 = vor.u32 %v1808_v12, %v1805_v8  ;;  %v1819_v7 = vor.u32 %v1818_v43, %v1814_v41  ;;  %v10375_v5 = vld [vmem:[#allocation6_spill] sm:$0xff]  ;;  %v10377_v14 = vld [vmem:[#allocation41_spill] sm:$0xff] }
 0x143   : > { %6410 = vmatprep.mubr.msk.bf16.mxu1 %vm2573_vm9, %v3233_v18  ;;  %4757 = vrot.lane.b32.xlu0 %v6115_v61, %s6719_s22  ;;  %10373 = vst [vmem:[#allocation29_spill] sm:$0xff] %v8434_v54  ;;  %v1844_v61 = vrot.slane %v1843_v4, 4  ;;  %v1848_v53 = vrot.slane %v1846_v17, 5  ;;  %v10376_v18 = vld [vmem:[#allocation5_spill] sm:$0xff]  ;;  %v3167_v8 = vsel %vm2442_vm6, %v10377_v14, %v3011_v25  ;;  %v2100_v12 = vrot.slane %v8379_v38, 5  ;;  %v10378_v43 = vld [vmem:[#allocation110_spill] sm:$0xff] }
 0x144   : > { %2360 = vrot.lane.b32.xlu1 %v8420_v49, %s6718_s21  ;;  %v5890_v29 = vcombine.low %v10376_v18, %v10375_v5  ;;  %v1810_v17 = vrot.slane %v1809_v51, 4  ;;  %v1820_v35 = vrot.slane %v1819_v7, 4  ;;  %v1824_v13 = vrot.slane %v1822_v26, 5  ;;  %v10379_v25 = vld [vmem:[#allocation30_spill] sm:$0xff]  ;;  %v5856_v5 = vld [vmem:[%s6765_s19 + $0x9c] sm:$0xf] }
 0x145   : > { %v2415_v30 = vpop.permute.xlu1 %2414  ;;  %v10380_v51 = vld [vmem:[#allocation91_spill] sm:$0xff]  ;;  %v10381_v26 = vld [vmem:[#allocation106_spill] sm:$0xff] }
 0x146   : > { %v3043_v45 = vpop.permute.xlu0 %3042  ;;  %v2530_v50 = vsel %vm2524_vm8, %v2497_v32, %v2415_v30  ;;  %v1839_v32 = vsel %vm6806_vm2, %v1834_v23, %v1838_v48  ;;  %v1849_v30 = vsel %vm6806_vm2, %v1844_v61, %v1848_v53  ;;  %v5879_v48 = vrot.slane %v8368_v42, 9  ;;  %v10382_v53 = vld [vmem:[#allocation73_spill] sm:$0xff] }
 0x147   : > { %6358 = vmatprep.mubr.msk.bf16.mxu0 %vm2573_vm9, %v2530_v50  ;;  %2358 = vrot.lane.b32.xlu0 %v8434_v54, %s6718_s21  ;;  %v3203_v4 = vsel %vm2491_vm7, %v3167_v8, %v3043_v45  ;;  %v2454_v50 = vsel %vm2442_vm6, %v5890_v29, %v10379_v25  ;;  %v5857_v45 = vld [vmem:[%s6765_s19 + $0xa0] sm:$0xf]  ;;  %v2102_v23 = vrot.slane %v2100_v12, 4  ;;  %v2103_v61 = vrot.slane %v8423_v10, 5 }
 0x148   : > { %2440 = vrot.lane.b32.xlu1 %v10378_v43, %s6719_s22  ;;  %v2499_v7 = vsel %vm2491_vm7, %v2454_v50, %v10380_v51  ;;  %v1815_v29 = vsel %vm6806_vm2, %v1810_v17, %v1814_v41  ;;  %v1825_v14 = vsel %vm6806_vm2, %v1820_v35, %v1824_v13  ;;  %v8475_v8 = vcombine.low %v1839_v32, %v1849_v30  ;;  %v5854_v50 = vld [vmem:[%s6765_s19 + $0x94] sm:$0xf]  ;;  %v6690_v17 = vld [vmem:[%s10023_s1 + $0x20] sm:$0xff]  }
 0x149   : > { %v3013_v18 = vpop.permute.xlu1 %3012  ;;  %v8482_v10 = vmax.bf16 %v10257_v47, %v5856_v5  ;;  %v8485_v51 = vmax.bf16 %v10257_v47, %v5857_v45  ;;  %v5880_v41 = vrot.slane %v8371_v31, 9  ;;  %v10384_v35 = vld [vmem:[#allocation68_spill] sm:$0xff]  ;;  %v8494_v13 = vcombine.low %v1815_v29, %v1825_v14  ;;  %v10386_v45 = vld [vmem:[#allocation53_spill] sm:$0xff]  ;;  %6422 = vmatprep.subr.bf16.mxu0 %v6690_v17 }
 0x14a   : > { %v3123_v55 = vpop.permute.xlu0 %3122  ;;  %10383 = vst [vmem:[#allocation4_spill] sm:$0xff] %v8475_v8  ;;  %v2101_v32 = vsel %vm7282_vm5, %v5879_v48, %v2100_v12  ;;  %v2104_v30 = vsel %vm7282_vm5, %v2102_v23, %v2103_v61  ;;  %v8509_v29 = vmax.bf16 %v10257_v47, %v5854_v50  ;;  %v5858_v48 = vld [vmem:[%s6765_s19 + $0xa4] sm:$0x1]  ;;  %6423 = vmatpush3.bf16.msra.mxu0 %v6690_v17  ;;  %v6691_v50 = vld [vmem:[%s10023_s1 + $0x28] sm:$0xff]  }
 0x14b   : > { %v3235_v33 = vsel %vm2524_vm8, %v3203_v4, %v3123_v55  ;;  %2438 = vrot.lane.b32.xlu0 %v10381_v26, %s6719_s22  ;;  %v2107_v55 = vrot.slane %v8382_v62, 5  ;;  %10385 = vst [vmem:[#allocation3_spill] sm:$0xff] %v8494_v13  ;;  %v1875_v23 = vshrl.u32 %v8482_v10, 16  ;;  %v1878_v61 = vshll.u32 %v8482_v10, 16  ;;  %6424 = vmatprep.subr.bf16.mxu0 %v6691_v50 }
 0x14c   : > { %6411 = vmatmul.mubr.msk.bf16.gmra.mrb[20].mxu1 %vm2573_vm9, %v3235_v33  ;;  %4651 = vrot.lane.b32.xlu1 %v10382_v53, %s6717_s20  ;;  %v5853_v33 = vld [vmem:[%s6765_s19 + $0x90] sm:$0xf]  ;;  %v1884_v14 = vshll.u32 %v8485_v51, 16  ;;  %v1864_v26 = vshrl.u32 %v8509_v29, 16 }
 0x14d   : > { %v8501_v5 = vmax.bf16 %v10257_v47, %v5853_v33  ;;  %v2109_v53 = vrot.slane %v2107_v55, 4  ;;  %v1888_v33 = vshrl.u32 %v8485_v51, 16  ;;  %v2108_v49 = vsel %vm7282_vm5, %v5880_v41, %v2107_v55 }
 0x14e   : > { %v2417_v4 = vpop.permute.xlu0 %2416  ;;  %v1877_v55 = vrot.slane %v1875_v23, 4  ;;  %v1880_v41 = vrot.slane %v1878_v61, 5  ;;  %v8538_v43 = vrot.slane %v1884_v14, 5  ;;  %6425 = vmatpush3.bf16.msra.mxu0 %v6691_v50  ;;  %v10391_v61 = vld [vmem:[#allocation77_spill] sm:$0xff]  ;;  %v10392_v50 = vld [vmem:[#allocation54_spill] sm:$0xff] }
 0x14f   : > { %v2532_v25 = vsel %vm2524_vm8, %v2499_v7, %v2417_v4  ;;  %4649 = vrot.lane.b32.xlu0 %v10384_v35, %s6717_s20  ;;  %v3170_v7 = vsel %vm2442_vm6, %v10386_v45, %v3013_v18  ;;  %v2110_v4 = vrot.slane %v8410_v34, 5  ;;  %v10387_v18 = vld [vmem:[#allocation14_spill] sm:$0xff]  ;;  %v6117_v34 = vcombine.low %v2101_v32, %v2104_v30  ;;  %v5855_v30 = vld [vmem:[%s6765_s19 + $0x98] sm:$0x1] }
 0x150   : > { %6359 = vmatmul.mubr.msk.bf16.gmra.mrb[4].mxu0 %vm2573_vm9, %v2532_v25  ;;  %4683 = vrot.lane.b32.xlu1 %v8475_v8, %s6718_s21  ;;  %v3045_v12 = vpop.permute.xlu1 %3044  ;;  %v10388_v25 = vld [vmem:[#allocation13_spill] sm:$0xff]  ;;  %v1851_v11 = vshrl.u32 %v8501_v5, 16  ;;  %v1854_v17 = vshll.u32 %v8501_v5, 16  ;;  %v1890_v22 = vrot.slane %v1888_v33, 4  ;;  %v8548_v23 = vmax.bf16 %v10257_v47, %v5855_v30 }
 0x151   : > { %v5891_v35 = vcombine.low %v10388_v25, %v10387_v18  ;;  %v3205_v45 = vsel %vm2491_vm7, %v3170_v7, %v3045_v12  ;;  %v10389_v18 = vld [vmem:[#allocation76_spill] sm:$0xff]  ;;  %v2111_v32 = vsel %vm7282_vm5, %v2109_v53, %v2110_v4  ;;  %v1860_v25 = vshll.u32 %v8509_v29, 16 }
 0x152   : > { %v3015_v54 = vpop.permute.xlu0 %3014  ;;  %v8536_v7 = vmax.bf16 %v10257_v47, %v5858_v48  ;;  %v6118_v4 = vcombine.low %v2108_v49, %v2111_v32  ;;  %v6056_v48 = vcombine.low %v8027_v21, %v8030_v40  ;;  %v1853_v14 = vrot.slane %v1851_v11, 4  ;;  %v10395_v11 = vld [vmem:[#allocation108_spill] sm:$0xff] }
 0x153   : > { %4681 = vrot.lane.b32.xlu0 %v8494_v13, %s6718_s21  ;;  %v2457_v58 = vsel %vm2442_vm6, %v5891_v35, %v10390_v1  ;;  %v1856_v33 = vrot.slane %v1854_v17, 5  ;;  %v8552_v1 = vrot.slane %v1860_v25, 5  ;;  %v1866_v35 = vrot.slane %v1864_v26, 4  ;;  %v10396_v17 = vld [vmem:[#allocation10_spill] sm:$0xff]  ;;  %v10409_v13 = vld [vmem:[#allocation17_spill] sm:$0xff] }
 0x154   : > { %3947 = vrot.lane.b32.xlu1 %v10389_v18, %s6717_s20  ;;  %v3125_v12 = vpop.permute.xlu1 %3124  ;;  %v1881_v32 = vor.u32 %v1880_v41, %v1877_v55  ;;  %v1891_v21 = vor.u32 %v1890_v22, %v8538_v43  ;;  %v1894_v40 = vshll.u32 %v8536_v7, 16  ;;  %v6055_v26 = vcombine.low %v10396_v17, %v10395_v11 }
 0x155   : > { %v3237_v53 = vsel %vm2524_vm8, %v3205_v45, %v3125_v12  ;;  %v10393_v12 = vld [vmem:[#allocation11_spill] sm:$0xff]  ;;  %v1857_v22 = vor.u32 %v1856_v33, %v1853_v14  ;;  %v1867_v55 = vor.u32 %v1866_v35, %v8552_v1  ;;  %v1870_v41 = vshll.u32 %v8548_v23, 16 }
 0x156   : > { %6414 = vmatprep.mubr.msk.bf16.mxu1 %vm2573_vm9, %v3237_v53  ;;  %v10394_v53 = vld [vmem:[#allocation9_spill] sm:$0xff] }
 0x157   : > { %4761 = vrot.lane.b32.xlu0 %v6117_v34, %s6719_s22  ;;  %v2501_v34 = vsel %vm2491_vm7, %v2457_v58, %v10392_v50  ;;  %v5892_v9 = vcombine.low %v10394_v53, %v10393_v12  ;;  %v10397_v58 = vld [vmem:[#allocation49_spill] sm:$0xff]  ;;  %v1896_v12 = vrot.slane %v1894_v40, 5  ;;  %v1858_v33 = vrot.slane %v1857_v22, 4 }
 0x158   : > { %3949 = vrot.lane.b32.xlu1 %v10391_v61, %s6717_s20  ;;  %v2419_v45 = vpop.permute.xlu1 %2418  ;;  %v3173_v25 = vsel %vm2442_vm6, %v10397_v58, %v3015_v54  ;;  %v10398_v54 = vld [vmem:[#allocation26_spill] sm:$0xff]  ;;  %v1868_v35 = vrot.slane %v1867_v55, 4  ;;  %v2117_v22 = vrot.slane %v8548_v23, 5  ;;  %v2121_v55 = vrot.slane %v8485_v51, 5 }
 0x159   : > { %v2534_v30 = vsel %vm2524_vm8, %v2501_v34, %v2419_v45  ;;  %v1892_v45 = vrot.slane %v1891_v21, 4  ;;  %v10399_v21 = vld [vmem:[#allocation94_spill] sm:$0xff] }
 0x15a   : > { %v3047_v49 = vpop.permute.xlu0 %3046  ;;  %6362 = vmatprep.mubr.msk.bf16.mxu0 %vm2573_vm9, %v2534_v30  ;;  %v2114_v30 = vrot.slane %v8509_v29, 5 }
 0x15b   : > { %4763 = vrot.lane.b32.xlu0 %v6118_v4, %s6719_s22  ;;  %v3207_v50 = vsel %vm2491_vm7, %v3173_v25, %v3047_v49  ;;  %v1882_v4 = vrot.slane %v1881_v32, 4  ;;  %v1872_v49 = vrot.slane %v1870_v41, 5  ;;  %v5862_v32 = vld [vmem:[%s6765_s19 + $0xb4] sm:$0xf]  ;;  %v5859_v41 = vld [vmem:[%s6765_s19 + $0xa8] sm:$0xf] }
 0x15c   : > { %4029 = vrot.lane.b32.xlu1 %v6056_v48, %s6718_s21  ;;  %v2460_v48 = vsel %vm2442_vm6, %v5892_v9, %v10398_v54  ;;  %v3017_v14 = vpop.permute.xlu1 %3016  ;;  %v1897_v9 = vsel %vm6806_vm2, %v1892_v45, %v1896_v12  ;;  %v2116_v25 = vrot.slane %v2114_v30, 4  ;;  %v10402_v12 = vld [vmem:[#allocation60_spill] sm:$0xff] }
 0x15d   : > { %v2503_v40 = vsel %vm2491_vm7, %v2460_v48, %v10399_v21  ;;  %v1887_v17 = vsel %vm6806_vm2, %v1882_v4, %v8538_v43  ;;  %v5860_v43 = vld [vmem:[%s6765_s19 + $0xac] sm:$0xf]  ;;  %v1863_v4 = vsel %vm6806_vm2, %v1858_v33, %v8552_v1  ;;  %v1873_v23 = vsel %vm6806_vm2, %v1868_v35, %v1872_v49 }
 0x15e   : > { %v3127_v34 = vpop.permute.xlu0 %3126  ;;  %v8607_v45 = vcombine.low %v1887_v17, %v1897_v9  ;;  %v5882_v48 = vrot.slane %v8482_v10, 9  ;;  %v2118_v33 = vsel %vm7282_vm5, %v2116_v25, %v2117_v22  ;;  %v2123_v35 = vrot.slane %v2121_v55, 4  ;;  %v10405_v9 = vld [vmem:[#allocation21_spill] sm:$0xff] }
 0x15f   : > { %v3239_v53 = vsel %vm2524_vm8, %v3207_v50, %v3127_v34  ;;  %4027 = vrot.lane.b32.xlu0 %v6055_v26, %s6718_s21  ;;  %v5863_v26 = vld [vmem:[%s6765_s19 + $0xb8] sm:$0xf]  ;;  %v8598_v50 = vmax.bf16 %v10257_v47, %v5862_v32  ;;  %v10400_v34 = vld [vmem:[#allocation88_spill] sm:$0xff]  ;;  %v8618_v32 = vmax.bf16 %v10257_v47, %v5859_v41  ;;  %v2124_v49 = vrot.slane %v8536_v7, 5  ;;  %v5864_v7 = vld [vmem:[%s6765_s19 + $0xbc] sm:$0x1] }
 0x160   : > { %6415 = vmatmul.mubr.msk.bf16.gmra.mrb[24].mxu1 %vm2573_vm9, %v3239_v53  ;;  %4109 = vrot.lane.b32.xlu1 %v8096_v0, %s6719_s22  ;;  %v5881_v0 = vrot.slane %v8501_v5, 9  ;;  %10401 = vst [vmem:[#allocation25_spill] sm:$0xff] %v8607_v45  ;;  %v3176_v53 = vsel %vm2442_vm6, %v10402_v12, %v3017_v14  ;;  %v8624_v21 = vmax.bf16 %v10257_v47, %v5860_v43  ;;  %v10403_v14 = vld [vmem:[#allocation85_spill] sm:$0xff]  ;;  %v5861_v12 = vld [vmem:[%s6765_s19 + $0xb0] sm:$0x1] }
 0x161   : > { %v1926_v17 = vshll.u32 %v8598_v50, 16  ;;  %v2122_v43 = vsel %vm7282_vm5, %v5882_v48, %v2121_v55  ;;  %v8653_v55 = vmax.bf16 %v10257_v47, %v5864_v7 }
 0x162   : > { %v2421_v11 = vpop.permute.xlu0 %2420  ;;  %v2115_v54 = vsel %vm7282_vm5, %v5881_v0, %v2114_v30  ;;  %v10406_v0 = vld [vmem:[#allocation20_spill] sm:$0xff] }
 0x163   : > { %v2536_v58 = vsel %vm2524_vm8, %v2503_v40, %v2421_v11  ;;  %4107 = vrot.lane.b32.xlu0 %v8049_v27, %s6719_s22  ;;  %v8610_v27 = vmax.bf16 %v10257_v47, %v5863_v26  ;;  %v8628_v40 = vcombine.low %v1863_v4, %v1873_v23  ;;  %v1923_v11 = vshrl.u32 %v8598_v50, 16 }
 0x164   : > { %6363 = vmatmul.mubr.msk.bf16.gmra.mrb[8].mxu0 %vm2573_vm9, %v2536_v58  ;;  %4655 = vrot.lane.b32.xlu1 %v10400_v34, %s6717_s20  ;;  %v5893_v26 = vcombine.low %v10406_v0, %v10405_v9  ;;  %v6119_v41 = vcombine.low %v2115_v54, %v2118_v33  ;;  %v1899_v34 = vshrl.u32 %v8618_v32, 16  ;;  %v2125_v23 = vsel %vm7282_vm5, %v2123_v35, %v2124_v49  ;;  %v10407_v9 = vld [vmem:[#allocation74_spill] sm:$0xff] }
 0x165   : > { %10404 = vst [vmem:[#allocation37_spill] sm:$0xff] %v8628_v40  ;;  %v1932_v25 = vshll.u32 %v8610_v27, 16  ;;  %v1936_v22 = vshrl.u32 %v8610_v27, 16  ;;  %v1925_v48 = vrot.slane %v1923_v11, 4  ;;  %v1928_v33 = vrot.slane %v1926_v17, 5  ;;  %v10408_v49 = vld [vmem:[#allocation78_spill] sm:$0xff] }
 0x166   : > { %v3049_v1 = vpop.permute.xlu1 %3048  ;;  %v3019_v30 = vpop.permute.xlu0 %3018  ;;  %v2463_v35 = vsel %vm2442_vm6, %v5893_v26, %v10407_v9  ;;  %v8667_v11 = vmax.bf16 %v10257_v47, %v5861_v12  ;;  %v6120_v26 = vcombine.low %v2122_v43, %v2125_v23  ;;  %v1901_v9 = vrot.slane %v1899_v34, 4  ;;  %v10413_v43 = vld [vmem:[#allocation79_spill] sm:$0xff] }
 0x167   : > { %4653 = vrot.lane.b32.xlu0 %v10403_v14, %s6717_s20  ;;  %v3209_v58 = vsel %vm2491_vm7, %v3176_v53, %v3049_v1  ;;  %v1902_v53 = vshll.u32 %v8618_v32, 16  ;;  %v1908_v1 = vshll.u32 %v8624_v21, 16  ;;  %v1912_v14 = vshrl.u32 %v8624_v21, 16 }
 0x168   : > { %4687 = vrot.lane.b32.xlu1 %v8607_v45, %s6718_s21  ;;  %v8660_v0 = vrot.slane %v1932_v25, 5  ;;  %v1938_v45 = vrot.slane %v1936_v22, 4  ;;  %v1929_v25 = vor.u32 %v1928_v33, %v1925_v48  ;;  %v1942_v22 = vshll.u32 %v8653_v55, 16  ;;  %v5865_v48 = vld [vmem:[%s6765_s19 + $0xc0] sm:$0xf] }
 0x169   : > { %v1904_v28 = vrot.slane %v1902_v53, 5  ;;  %v6058_v34 = vcombine.low %v8118_v39, %v8121_v44  ;;  %v5866_v33 = vld [vmem:[%s6765_s19 + $0xc4] sm:$0xf]  ;;  %v6057_v39 = vcombine.low %v8083_v46, %v8092_v52  ;;  %v1918_v44 = vshll.u32 %v8667_v11, 16 }
 0x16a   : > { %v3129_v4 = vpop.permute.xlu1 %3128  ;;  %v1939_v23 = vor.u32 %v1938_v45, %v8660_v0  ;;  %v8703_v46 = vmax.bf16 %v10257_v47, %v5866_v33  ;;  %v2138_v33 = vrot.slane %v8653_v55, 5 }
 0x16b   : > { %4685 = vrot.lane.b32.xlu0 %v8628_v40, %s6718_s21  ;;  %v3241_v54 = vsel %vm2524_vm8, %v3209_v58, %v3129_v4  ;;  %v10410_v40 = vld [vmem:[#allocation16_spill] sm:$0xff]  ;;  %v10411_v58 = vld [vmem:[#allocation101_spill] sm:$0xff] }
 0x16c   : > { %3951 = vrot.lane.b32.xlu1 %v10408_v49, %s6717_s20  ;;  %6418 = vmatprep.mubr.msk.bf16.mxu1 %vm2573_vm9, %v3241_v54  ;;  %v5894_v8 = vcombine.low %v10410_v40, %v10409_v13  ;;  %v2505_v7 = vsel %vm2491_vm7, %v2463_v35, %v10411_v58  ;;  %v8669_v54 = vrot.slane %v1908_v1, 5  ;;  %v1914_v40 = vrot.slane %v1912_v14, 4  ;;  %v10412_v35 = vld [vmem:[#allocation55_spill] sm:$0xff]  ;;  %v10415_v58 = vld [vmem:[#allocation96_spill] sm:$0xff] }
 0x16d   : > { %v3051_v4 = vpop.permute.xlu0 %3050  ;;  %v3179_v12 = vsel %vm2442_vm6, %v10412_v35, %v3019_v30  ;;  %v5868_v30 = vld [vmem:[%s6765_s19 + $0xcc] sm:$0xf]  ;;  %v1944_v35 = vrot.slane %v1942_v22, 5 }
 0x16e   : > { %v2423_v17 = vpop.permute.xlu1 %2422  ;;  %v3211_v1 = vsel %vm2491_vm7, %v3179_v12, %v3051_v4  ;;  %v1915_v45 = vor.u32 %v1914_v40, %v8669_v54  ;;  %v1930_v4 = vrot.slane %v1929_v25, 4  ;;  %v5869_v12 = vld [vmem:[%s6765_s19 + $0xd0] sm:$0xf]  ;;  %v8706_v52 = vmax.bf16 %v10257_v47, %v5868_v30 }
 0x16f   : > { %4765 = vrot.lane.b32.xlu0 %v6119_v41, %s6719_s22  ;;  %v2538_v13 = vsel %vm2524_vm8, %v2505_v7, %v2423_v17  ;;  %v10414_v41 = vld [vmem:[#allocation66_spill] sm:$0xff]  ;;  %v6064_v40 = vcombine.low %v8371_v31, %v8382_v62 }
 0x170   : > { %6366 = vmatprep.mubr.msk.bf16.mxu0 %vm2573_vm9, %v2538_v13  ;;  %3953 = vrot.lane.b32.xlu1 %v10413_v43, %s6717_s20  ;;  %v2466_v53 = vsel %vm2442_vm6, %v5894_v8, %v10414_v41  ;;  %v1905_v8 = vor.u32 %v1904_v28, %v1901_v9  ;;  %v1940_v41 = vrot.slane %v1939_v23, 4  ;;  %v8718_v23 = vmax.bf16 %v10257_v47, %v5869_v12 }
 0x171   : > { %v3131_v14 = vpop.permute.xlu0 %3130  ;;  %v2507_v7 = vsel %vm2491_vm7, %v2466_v53, %v10415_v58  ;;  %v8700_v53 = vmax.bf16 %v10257_v47, %v5865_v48  ;;  %v2128_v48 = vrot.slane %v8624_v21, 5  ;;  %v1971_v55 = vshrl.u32 %v8706_v52, 16 }
 0x172   : > { %v3243_v17 = vsel %vm2524_vm8, %v3211_v1, %v3131_v14  ;;  %v4634_v13 = vpop.permute.xlu1 %4633  ;;  %v1920_v14 = vrot.slane %v1918_v44, 5  ;;  %v10417_v44 = vld [vmem:[#allocation27_spill] sm:$0xff]  ;;  %v1945_v30 = vsel %vm6806_vm2, %v1940_v41, %v1944_v35  ;;  %v10421_v41 = vld [vmem:[#allocation82_spill] sm:$0xff] }
 0x173   : > { %4767 = vrot.lane.b32.xlu0 %v6120_v26, %s6719_s22  ;;  %6419 = vmatmul.mubr.msk.bf16.gmra.mrb[28].mxu1 %vm2573_vm9, %v3243_v17  ;;  %v4779_v28 = vsel %vm2442_vm6, %v10389_v18, %v4634_v13  ;;  %v1916_v17 = vrot.slane %v1915_v45, 4  ;;  %v2131_v13 = vrot.slane %v8667_v11, 5 }
 0x174   : > { %4033 = vrot.lane.b32.xlu1 %v6058_v34, %s6718_s21 }
 0x175   : > { %v2425_v26 = vpop.permute.xlu0 %2424  ;;  %v1921_v35 = vsel %vm6806_vm2, %v1916_v17, %v1920_v14 }
 0x176   : > { %v2540_v22 = vsel %vm2524_vm8, %v2507_v7, %v2425_v26  ;;  %v4666_v34 = vpop.permute.xlu1 %4665  ;;  %v1906_v7 = vrot.slane %v1905_v8, 4  ;;  %v2135_v8 = vrot.slane %v8610_v27, 5 }
 0x177   : > { %4031 = vrot.lane.b32.xlu0 %v6057_v39, %s6718_s21  ;;  %6367 = vmatmul.mubr.msk.bf16.gmra.mrb[12].mxu0 %vm2573_vm9, %v2540_v22  ;;  %v4826_v58 = vsel %vm2491_vm7, %v4779_v28, %v4666_v34  ;;  %v10416_v39 = vld [vmem:[#allocation28_spill] sm:$0xff]  ;;  %v1935_v22 = vsel %vm6806_vm2, %v1930_v4, %v8660_v0  ;;  %v10419_v34 = vld [vmem:[#allocation23_spill] sm:$0xff]  ;;  %v10420_v0 = vld [vmem:[#allocation98_spill] sm:$0xff] }
 0x178   : > { %4113 = vrot.lane.b32.xlu1 %v8189_v20, %s6719_s22  ;;  %v5895_v12 = vcombine.low %v10417_v44, %v10416_v39  ;;  %v10418_v28 = vld [vmem:[#allocation24_spill] sm:$0xff]  ;;  %v5883_v39 = vrot.slane %v8618_v32, 9  ;;  %v2130_v44 = vrot.slane %v2128_v48, 4  ;;  %v1911_v4 = vsel %vm6806_vm2, %v1906_v7, %v8669_v54  ;;  %v10423_v54 = vld [vmem:[#allocation93_spill] sm:$0xff] }
 0x179   : > { %v4636_v26 = vpop.permute.xlu0 %4635  ;;  %v5896_v18 = vcombine.low %v10419_v34, %v10418_v28  ;;  %v10422_v34 = vld [vmem:[#allocation104_spill] sm:$0xff] }
 0x17a   : > { %v4746_v20 = vpop.permute.xlu1 %4745  ;;  %v2129_v7 = vsel %vm7282_vm5, %v5883_v39, %v2128_v48  ;;  %v2132_v17 = vsel %vm7282_vm5, %v2130_v44, %v2131_v13  ;;  %v5870_v39 = vld [vmem:[%s6765_s19 + $0xd4] sm:$0x1]  ;;  %v1974_v13 = vshll.u32 %v8706_v52, 16  ;;  %v1980_v44 = vshll.u32 %v8718_v23, 16 }
 0x17b   : > { %4111 = vrot.lane.b32.xlu0 %v8139_v57, %s6719_s22  ;;  %v4858_v45 = vsel %vm2524_vm8, %v4826_v58, %v4746_v20  ;;  %v8759_v57 = vcombine.low %v1935_v22, %v1945_v30  ;;  %v2469_v58 = vsel %vm2442_vm6, %v5895_v12, %v10421_v41  ;;  %v8770_v30 = vcombine.low %v1911_v4, %v1921_v35  ;;  %v10424_v12 = vld [vmem:[#allocation34_spill] sm:$0xff] }
 0x17c   : > { %4659 = vrot.lane.b32.xlu1 %v10420_v0, %s6717_s20  ;;  %6462 = vmatprep.mubr.msk.bf16.mxu1 %vm2573_vm9, %v4858_v45  ;;  %v2509_v11 = vsel %vm2491_vm7, %v2469_v58, %v10422_v34  ;;  %v5884_v45 = vrot.slane %v8598_v50, 9  ;;  %v2137_v0 = vrot.slane %v2135_v8, 4  ;;  %v2472_v22 = vsel %vm2442_vm6, %v5896_v18, %v10424_v12 }
 0x17d   : > { %v4668_v28 = vpop.permute.xlu0 %4667  ;;  %v4782_v41 = vsel %vm2442_vm6, %v10391_v61, %v4636_v26  ;;  %v1984_v18 = vshrl.u32 %v8718_v23, 16  ;;  %v6121_v35 = vcombine.low %v2129_v7, %v2132_v17  ;;  %v10425_v7 = vld [vmem:[#allocation50_spill] sm:$0xff] }
 0x17e   : > { %v2427_v20 = vpop.permute.xlu1 %2426  ;;  %v4828_v4 = vsel %vm2491_vm7, %v4782_v41, %v4668_v28  ;;  %v2136_v58 = vsel %vm7282_vm5, %v5884_v45, %v2135_v8  ;;  %v2139_v34 = vsel %vm7282_vm5, %v2137_v0, %v2138_v33  ;;  %v5867_v28 = vld [vmem:[%s6765_s19 + $0xc8] sm:$0x1]  ;;  %v2511_v8 = vsel %vm2491_vm7, %v2472_v22, %v10425_v7  ;;  %v10426_v45 = vld [vmem:[#allocation80_spill] sm:$0xff] }
 0x17f   : > { %4657 = vrot.lane.b32.xlu0 %v10423_v54, %s6717_s20  ;;  %v2542_v14 = vsel %vm2524_vm8, %v2509_v11, %v2427_v20  ;;  %v1947_v11 = vshrl.u32 %v8700_v53, 16  ;;  %v1950_v20 = vshll.u32 %v8700_v53, 16  ;;  %v1956_v54 = vshll.u32 %v8703_v46, 16 }
 0x180   : > { %6370 = vmatprep.mubr.msk.bf16.mxu0 %vm2573_vm9, %v2542_v14  ;;  %4691 = vrot.lane.b32.xlu1 %v8759_v57, %s6718_s21  ;;  %v1960_v14 = vshrl.u32 %v8703_v46, 16  ;;  %v8807_v33 = vmax.bf16 %v10257_v47, %v5870_v39  ;;  %v1973_v0 = vrot.slane %v1971_v55, 4  ;;  %v1976_v41 = vrot.slane %v1974_v13, 5  ;;  %v10427_v13 = vld [vmem:[#allocation81_spill] sm:$0xff] }
 0x181   : > { %v4748_v48 = vpop.permute.xlu0 %4747  ;;  %v6122_v1 = vcombine.low %v2136_v58, %v2139_v34  ;;  %v8813_v22 = vmax.bf16 %v10257_v47, %v5867_v28  ;;  %v1949_v39 = vrot.slane %v1947_v11, 4  ;;  %v1952_v55 = vrot.slane %v1950_v20, 5 }
 0x182   : > { %v4860_v61 = vsel %vm2524_vm8, %v4828_v4, %v4748_v48  ;;  %v4638_v26 = vpop.permute.xlu1 %4637  ;;  %v1982_v4 = vrot.slane %v1980_v44, 5  ;;  %v1986_v48 = vrot.slane %v1984_v18, 4  ;;  %v1958_v7 = vrot.slane %v1956_v54, 5 }
 0x183   : > { %4689 = vrot.lane.b32.xlu0 %v8770_v30, %s6718_s21  ;;  %6463 = vmatmul.mubr.msk.bf16.vlgmr.msra.gmra.mrb[32].mxu1 %vm2573_vm9, %v4860_v61  ;;  %v4785_v17 = vsel %vm2442_vm6, %v10408_v49, %v4638_v26  ;;  %v1962_v9 = vrot.slane %v1960_v14, 4  ;;  %v6060_v44 = vcombine.low %v8173_v16, %v8184_v24  ;;  %v1977_v26 = vor.u32 %v1976_v41, %v1973_v0  ;;  %v10429_v0 = vld [vmem:[#allocation31_spill] sm:$0xff] }
 0x184   : > { %3955 = vrot.lane.b32.xlu1 %v10426_v45, %s6717_s20  ;;  %v1987_v47 = vor.u32 %v1986_v48, %v1982_v4  ;;  %v1990_v58 = vshll.u32 %v8807_v33, 16  ;;  %v6059_v34 = vcombine.low %v8199_v63, %v8203_v15  ;;  %v1966_v20 = vshll.u32 %v8813_v22, 16  ;;  %v10430_v63 = vld [vmem:[#allocation36_spill] sm:$0xff]  ;;  %v10431_v15 = vld [vmem:[#allocation35_spill] sm:$0xff] }
 0x185   : > { %v2429_v12 = vpop.permute.xlu0 %2428  ;;  %v1963_v11 = vor.u32 %v1962_v9, %v1958_v7  ;;  %v1978_v24 = vrot.slane %v1977_v26, 4 }
 0x186   : > { %v2544_v61 = vsel %vm2524_vm8, %v2511_v8, %v2429_v12  ;;  %v4670_v25 = vpop.permute.xlu1 %4669  ;;  %v1988_v54 = vrot.slane %v1987_v47, 4  ;;  %v1992_v14 = vrot.slane %v1990_v58, 5  ;;  %v10428_v8 = vld [vmem:[#allocation32_spill] sm:$0xff]  ;;  %v1968_v48 = vrot.slane %v1966_v20, 5  ;;  %v10434_v20 = vld [vmem:[#allocation109_spill] sm:$0xff] }
 0x187   : > { %4769 = vrot.lane.b32.xlu0 %v6121_v35, %s6719_s22  ;;  %6371 = vmatmul.mubr.msk.bf16.gmra.mrb[16].mxu0 %vm2573_vm9, %v2544_v61  ;;  %v4830_v49 = vsel %vm2491_vm7, %v4785_v17, %v4670_v25  ;;  %v1953_v25 = vor.u32 %v1952_v55, %v1949_v39  ;;  %v5898_v17 = vcombine.low %v10429_v0, %v10428_v8  ;;  %v1964_v41 = vrot.slane %v1963_v11, 4  ;;  %v10432_v47 = vld [vmem:[#allocation84_spill] sm:$0xff] }
 0x188   : > { %3957 = vrot.lane.b32.xlu1 %v10427_v13, %s6717_s20  ;;  %v2142_v61 = vrot.slane %v8703_v46, 5  ;;  %v1993_v26 = vsel %vm6806_vm2, %v1988_v54, %v1992_v14  ;;  %v10435_v54 = vld [vmem:[#allocation105_spill] sm:$0xff] }
 0x189   : > { %v4640_v18 = vpop.permute.xlu0 %4639  ;;  %v1954_v9 = vrot.slane %v1953_v25, 4  ;;  %v2478_v58 = vsel %vm2442_vm6, %v5898_v17, %v10432_v47  ;;  %v10436_v17 = vld [vmem:[#allocation107_spill] sm:$0xff] }
 0x18a   : > { %v4750_v35 = vpop.permute.xlu1 %4749  ;;  %v4788_v39 = vsel %vm2442_vm6, %v10413_v43, %v4640_v18  ;;  %v2144_v25 = vrot.slane %v2142_v61, 4 }
 0x18b   : > { %4771 = vrot.lane.b32.xlu0 %v6122_v1, %s6719_s22  ;;  %v4862_v28 = vsel %vm2524_vm8, %v4830_v49, %v4750_v35  ;;  %v5897_v1 = vcombine.low %v10431_v15, %v10430_v63  ;;  %v10433_v35 = vld [vmem:[#allocation86_spill] sm:$0xff] }
 0x18c   : > { %4037 = vrot.lane.b32.xlu1 %v6060_v44, %s6718_s21  ;;  %6466 = vmatprep.mubr.msk.bf16.mxu1 %vm2573_vm9, %v4862_v28  ;;  %v1983_v44 = vsel %vm6806_vm2, %v1978_v24, %v1982_v4  ;;  %v1969_v4 = vsel %vm6806_vm2, %v1964_v41, %v1968_v48  ;;  %v5885_v28 = vrot.slane %v8700_v53, 9  ;;  %v2149_v24 = vrot.slane %v8718_v23, 5 }
 0x18d   : > { %v4672_v16 = vpop.permute.xlu0 %4671 }
 0x18e   : > { %v2353_v12 = vpop.permute.xlu1 %2352  ;;  %v4832_v55 = vsel %vm2491_vm7, %v4788_v39, %v4672_v16  ;;  %v8861_v16 = vcombine.low %v1983_v44, %v1993_v26 }
 0x18f   : > { %4035 = vrot.lane.b32.xlu0 %v6059_v34, %s6718_s21  ;;  %v2475_v34 = vsel %vm2442_vm6, %v5897_v1, %v10433_v35  ;;  %v2515_v11 = vsel %vm2491_vm7, %v2478_v58, %v2353_v12  ;;  %v5886_v1 = vrot.slane %v8706_v52, 9  ;;  %v2151_v12 = vrot.slane %v2149_v24, 4  ;;  %v10438_v35 = vld [vmem:[#allocation63_spill] sm:$0xff] }
 0x190   : > { %4117 = vrot.lane.b32.xlu1 %v8243_v2, %s6719_s22  ;;  %v1959_v2 = vsel %vm6806_vm2, %v1954_v9, %v1958_v7  ;;  %v2513_v7 = vsel %vm2491_vm7, %v2475_v34, %v10435_v54  ;;  %v2152_v9 = vrot.slane %v8807_v33, 5  ;;  %v6062_v34 = vcombine.low %v8275_v6, %v8278_v3  ;;  %v10442_v6 = vld [vmem:[#allocation43_spill] sm:$0xff] }
 0x191   : > { %v4752_v49 = vpop.permute.xlu0 %4751  ;;  %v8872_v63 = vcombine.low %v1959_v2, %v1969_v4  ;;  %v10443_v54 = vld [vmem:[#allocation87_spill] sm:$0xff] }
 0x192   : > { %v4864_v43 = vsel %vm2524_vm8, %v4832_v55, %v4752_v49  ;;  %v2433_v18 = vpop.permute.xlu1 %2432  ;;  %v10437_v55 = vld [vmem:[#allocation19_spill] sm:$0xff]  ;;  %v2150_v49 = vsel %vm7282_vm5, %v5886_v1, %v2149_v24  ;;  %v2153_v44 = vsel %vm7282_vm5, %v2151_v12, %v2152_v9  ;;  %v10446_v1 = vld [vmem:[#allocation38_spill] sm:$0xff] }
 0x193   : > { %4115 = vrot.lane.b32.xlu0 %v8262_v60, %s6719_s22  ;;  %6467 = vmatmul.mubr.msk.bf16.gmra.mrb[36].mxu1 %vm2573_vm9, %v4864_v43  ;;  %v2145_v60 = vrot.slane %v8813_v22, 5  ;;  %v2548_v36 = vsel %vm2524_vm8, %v2515_v11, %v2433_v18  ;;  %v2143_v22 = vsel %vm7282_vm5, %v5885_v28, %v2142_v61  ;;  %v10439_v28 = vld [vmem:[#allocation40_spill] sm:$0xff] }
 0x194   : > { %4663 = vrot.lane.b32.xlu1 %v10434_v20, %s6717_s20  ;;  %v10441_v20 = vld [vmem:[#allocation44_spill] sm:$0xff] }
 0x195   : > { %v2431_v14 = vpop.permute.xlu0 %2430  ;;  %v2146_v15 = vsel %vm7282_vm5, %v2144_v25, %v2145_v60  ;;  %v10440_v25 = vld [vmem:[#allocation39_spill] sm:$0xff]  ;;  %v5899_v3 = vcombine.low %v10442_v6, %v10441_v20  ;;  %v10459_v20 = vcombine.low %v8482_v10, %v8485_v51  ;;  %v10461_v10 = vld [vmem:[#allocation25_spill] sm:$0xff] }
 0x196   : > { %v2546_v8 = vsel %vm2524_vm8, %v2513_v7, %v2431_v14  ;;  %v4644_v0 = vpop.permute.xlu1 %4643  ;;  %v6123_v61 = vcombine.low %v2143_v22, %v2146_v15  ;;  %v5900_v11 = vcombine.low %v10440_v25, %v10439_v28  ;;  %v10445_v15 = vld [vmem:[#allocation22_spill] sm:$0xff]  ;;  %v10457_v28 = vld [vmem:[#allocation83_spill] sm:$0xff] }
 0x197   : > { %4661 = vrot.lane.b32.xlu0 %v10436_v17, %s6717_s20  ;;  %6374 = vmatprep.mubr.msk.bf16.mxu0 %vm2573_vm9, %v2546_v8  ;;  %v4794_v39 = vsel %vm2442_vm6, %v10427_v13, %v4644_v0  ;;  %v6124_v13 = vcombine.low %v2150_v49, %v2153_v44  ;;  %v10448_v49 = vcombine.low %v8368_v42, %v8379_v38  ;;  %v10452_v42 = vld [vmem:[#allocation3_spill] sm:$0xff]  ;;  %v10453_v38 = vld [vmem:[#allocation52_spill] sm:$0xff]  ;;  %v10458_v25 = vld [vmem:[#allocation42_spill] sm:$0xff] }
 0x198   : > { %6375 = vmatmul.mubr.msk.bf16.gmra.mrb[20].mxu0 %vm2573_vm9, %v2548_v36  ;;  %4695 = vrot.lane.b32.xlu1 %v8861_v16, %s6718_s21  ;;  %v2484_v7 = vsel %vm2442_vm6, %v5900_v11, %v10443_v54  ;;  %v10444_v36 = vld [vmem:[#allocation89_spill] sm:$0xff] }
 0x199   : > { %v4642_v41 = vpop.permute.xlu0 %4641  ;;  %v2481_v14 = vsel %vm2442_vm6, %v5899_v3, %v10444_v36 }
 0x19a   : > { %v4676_v48 = vpop.permute.xlu1 %4675  ;;  %v4791_v58 = vsel %vm2442_vm6, %v10426_v45, %v4642_v41  ;;  %v6061_v45 = vcombine.low %v8287_v19, %v8290_v37  ;;  %v10447_v41 = vld [vmem:[#allocation67_spill] sm:$0xff] }
 0x19b   : > { %4693 = vrot.lane.b32.xlu0 %v8872_v63, %s6718_s21  ;;  %v4836_v33 = vsel %vm2491_vm7, %v4794_v39, %v4676_v48 }
 0x19c   : > { %3959 = vrot.lane.b32.xlu1 %v10437_v55, %s6717_s20 }
 0x19d   : > { %v4674_v26 = vpop.permute.xlu0 %4673 }
 0x19e   : > { %v4756_v47 = vpop.permute.xlu1 %4755  ;;  %v4834_v43 = vsel %vm2491_vm7, %v4791_v58, %v4674_v26  ;;  %v10449_v26 = vld [vmem:[#allocation4_spill] sm:$0xff]  ;;  %v10451_v58 = vld [vmem:[#allocation47_spill] sm:$0xff] }
 0x19f   : > { %4773 = vrot.lane.b32.xlu0 %v6123_v61, %s6719_s22  ;;  %v4868_v59 = vsel %vm2524_vm8, %v4836_v33, %v4756_v47 }
 0x1a0   : > { %3961 = vrot.lane.b32.xlu1 %v10438_v35, %s6717_s20 }
 0x1a1   : > { %v4754_v18 = vpop.permute.xlu0 %4753 }
 0x1a2   : > { %v4866_v2 = vsel %vm2524_vm8, %v4834_v43, %v4754_v18  ;;  %v2357_v4 = vpop.permute.xlu1 %2356  ;;  %v10455_v43 = vld [vmem:[#allocation46_spill] sm:$0xff] }
 0x1a3   : > { %4775 = vrot.lane.b32.xlu0 %v6124_v13, %s6719_s22  ;;  %6470 = vmatprep.mubr.msk.bf16.mxu1 %vm2573_vm9, %v4866_v2  ;;  %v2519_v8 = vsel %vm2491_vm7, %v2484_v7, %v2357_v4  ;;  %v10450_v13 = vld [vmem:[#allocation48_spill] sm:$0xff]  ;;  %v10456_v2 = vld [vmem:[#allocation90_spill] sm:$0xff]  ;;  %v10460_v7 = vcombine.low %v8501_v5, %v8509_v29 }
 0x1a4   : > { %6471 = vmatmul.mubr.msk.bf16.gmra.mrb[40].mxu1 %vm2573_vm9, %v4868_v59  ;;  %4041 = vrot.lane.b32.xlu1 %v6062_v34, %s6718_s21  ;;  %v10464_v5 = vld [vmem:[#allocation92_spill] sm:$0xff] }
 0x1a5   : > { %v2355_v60 = vpop.permute.xlu0 %2354 }
 0x1a6   : > { %v2437_v24 = vpop.permute.xlu1 %2436  ;;  %v2517_v19 = vsel %vm2491_vm7, %v2481_v14, %v2355_v60  ;;  %v10462_v14 = vld [vmem:[#allocation37_spill] sm:$0xff] }
 0x1a7   : > { %4039 = vrot.lane.b32.xlu0 %v6061_v45, %s6718_s21  ;;  %v2552_v37 = vsel %vm2524_vm8, %v2519_v8, %v2437_v24  ;;  %v10463_v8 = vld [vmem:[#allocation97_spill] sm:$0xff] }
 0x1a8   : > { %4121 = vrot.lane.b32.xlu1 %v8375_v56, %s6719_s22 }
 0x1a9   : > { %v2435_v0 = vpop.permute.xlu0 %2434 }
 0x1aa   : > { %v2550_v17 = vsel %vm2524_vm8, %v2517_v19, %v2435_v0  ;;  %v4648_v22 = vpop.permute.xlu1 %4647  ;;  %v10465_v0 = vcombine.low %v8598_v50, %v8610_v27 }
 0x1ab   : > { %4119 = vrot.lane.b32.xlu0 %v10445_v15, %s6719_s22  ;;  %6378 = vmatprep.mubr.msk.bf16.mxu0 %vm2573_vm9, %v2550_v17  ;;  %v4800_v9 = vsel %vm2442_vm6, %v10438_v35, %v4648_v22  ;;  %v5902_v35 = vcombine.low %v10451_v58, %v10450_v13  ;;  %v10472_v13 = vcombine.low %v8700_v53, %v8703_v46 }
 0x1ac   : > { %6379 = vmatmul.mubr.msk.bf16.gmra.mrb[24].mxu0 %vm2573_vm9, %v2552_v37  ;;  %3965 = vrot.lane.b32.xlu1 %v10446_v1, %s6717_s20 }
 0x1ad   : > { %v4646_v12 = vpop.permute.xlu0 %4645  ;;  %v2490_v4 = vsel %vm2442_vm6, %v5902_v35, %v10456_v2 }
 0x1ae   : > { %v4680_v56 = vpop.permute.xlu1 %4679  ;;  %v4797_v44 = vsel %vm2442_vm6, %v10437_v55, %v4646_v12  ;;  %v10454_v55 = vld [vmem:[#allocation51_spill] sm:$0xff] }
 0x1af   : > { %3963 = vrot.lane.b32.xlu0 %v10447_v41, %s6717_s20  ;;  %v4840_v39 = vsel %vm2491_vm7, %v4800_v9, %v4680_v56  ;;  %v5901_v34 = vcombine.low %v10454_v55, %v10453_v38  ;;  %v10466_v9 = vcombine.low %v8618_v32, %v8624_v21  ;;  %v10468_v32 = vld [vmem:[#allocation110_spill] sm:$0xff] }
 0x1b0   : > { %4045 = vrot.lane.b32.xlu1 %v6064_v40, %s6718_s21 }
 0x1b1   : > { %v4678_v48 = vpop.permute.xlu0 %4677  ;;  %v2487_v11 = vsel %vm2442_vm6, %v5901_v34, %v10458_v25 }
 0x1b2   : > { %v4760_v61 = vpop.permute.xlu1 %4759  ;;  %v4838_v33 = vsel %vm2491_vm7, %v4797_v44, %v4678_v48 }
 0x1b3   : > { %4043 = vrot.lane.b32.xlu0 %v10448_v49, %s6718_s21  ;;  %v4872_v31 = vsel %vm2524_vm8, %v4840_v39, %v4760_v61  ;;  %v10469_v61 = vld [vmem:[#allocation57_spill] sm:$0xff] }
 0x1b4   : > { %4125 = vrot.lane.b32.xlu1 %v10449_v26, %s6719_s22  ;;  %v10470_v26 = vld [vmem:[#allocation106_spill] sm:$0xff] }
 0x1b5   : > { %v4758_v62 = vpop.permute.xlu0 %4757 }
 0x1b6   : > { %v4870_v40 = vsel %vm2524_vm8, %v4838_v33, %v4758_v62  ;;  %v2361_v47 = vpop.permute.xlu1 %2360  ;;  %v10471_v33 = vcombine.low %v8706_v52, %v8718_v23 }
 0x1b7   : > { %4123 = vrot.lane.b32.xlu0 %v10452_v42, %s6719_s22  ;;  %6474 = vmatprep.mubr.msk.bf16.mxu1 %vm2573_vm9, %v4870_v40  ;;  %v2523_v45 = vsel %vm2491_vm7, %v2490_v4, %v2361_v47 }
 0x1b8   : > { %6475 = vmatmul.mubr.msk.bf16.gmra.mrb[44].mxu1 %vm2573_vm9, %v4872_v31  ;;  %3969 = vrot.lane.b32.xlu1 %v10455_v43, %s6717_s20 }
 0x1b9   : > { %v2359_v59 = vpop.permute.xlu0 %2358 }
 0x1ba   : > { %v2441_v18 = vpop.permute.xlu1 %2440  ;;  %v2521_v6 = vsel %vm2491_vm7, %v2487_v11, %v2359_v59 }
 0x1bb   : > { %3967 = vrot.lane.b32.xlu0 %v10457_v28, %s6717_s20  ;;  %v2556_v3 = vsel %vm2524_vm8, %v2523_v45, %v2441_v18 }
 0x1bc   : > { %4049 = vrot.lane.b32.xlu1 %v10459_v20, %s6718_s21 }
 0x1bd   : > { %v2439_v60 = vpop.permute.xlu0 %2438 }
 0x1be   : > { %v2554_v24 = vsel %vm2524_vm8, %v2521_v6, %v2439_v60  ;;  %v4652_v54 = vpop.permute.xlu1 %4651 }
 0x1bf   : > { %4047 = vrot.lane.b32.xlu0 %v10460_v7, %s6718_s21  ;;  %6382 = vmatprep.mubr.msk.bf16.mxu0 %vm2573_vm9, %v2554_v24  ;;  %v4806_v15 = vsel %vm2442_vm6, %v10446_v1, %v4652_v54  ;;  %v10467_v1 = vld [vmem:[#allocation56_spill] sm:$0xff] }
 0x1c0   : > { %6383 = vmatmul.mubr.msk.bf16.gmra.mrb[28].mxu0 %vm2573_vm9, %v2556_v3  ;;  %4129 = vrot.lane.b32.xlu1 %v10461_v10, %s6719_s22 }
 0x1c1   : > { %v4650_v51 = vpop.permute.xlu0 %4649 }
 0x1c2   : > { %v4684_v36 = vpop.permute.xlu1 %4683  ;;  %v4803_v29 = vsel %vm2442_vm6, %v10447_v41, %v4650_v51 }
 0x1c3   : > { %4127 = vrot.lane.b32.xlu0 %v10462_v14, %s6719_s22  ;;  %v4844_v50 = vsel %vm2491_vm7, %v4806_v15, %v4684_v36 }
 0x1c4   : > { %3973 = vrot.lane.b32.xlu1 %v10463_v8, %s6717_s20 }
 0x1c5   : > { %v4682_v19 = vpop.permute.xlu0 %4681 }
 0x1c6   : > { %v3948_v37 = vpop.permute.xlu1 %3947  ;;  %v4842_v17 = vsel %vm2491_vm7, %v4803_v29, %v4682_v19 }
 0x1c7   : > { %3971 = vrot.lane.b32.xlu0 %v10464_v5, %s6717_s20 }
 0x1c8   : > { %4053 = vrot.lane.b32.xlu1 %v10465_v0, %s6718_s21 }
 0x1c9   : > { %v4762_v22 = vpop.permute.xlu0 %4761 }
 0x1ca   : > { %v4874_v12 = vsel %vm2524_vm8, %v4842_v17, %v4762_v22  ;;  %v3950_v56 = vpop.permute.xlu1 %3949 }
 0x1cb   : > { %4051 = vrot.lane.b32.xlu0 %v10466_v9, %s6718_s21  ;;  %6478 = vmatprep.mubr.msk.bf16.mxu1 %vm2573_vm9, %v4874_v12  ;;  %v4144_v39 = vsel %vm2442_vm6, %v10467_v1, %v3950_v56  ;;  %v10473_v56 = vld [vmem:[#allocation58_spill] sm:$0xff] }
 0x1cc   : > { %4133 = vrot.lane.b32.xlu1 %v8759_v57, %s6719_s22  ;;  %v4141_v57 = vsel %vm2442_vm6, %v10469_v61, %v3948_v37  ;;  %v10474_v61 = vld [vmem:[#allocation59_spill] sm:$0xff] }
 0x1cd   : > { %v4764_v27 = vpop.permute.xlu0 %4763 }
 0x1ce   : > { %v4876_v41 = vsel %vm2524_vm8, %v4844_v50, %v4764_v27  ;;  %v4030_v48 = vpop.permute.xlu1 %4029 }
 0x1cf   : > { %4131 = vrot.lane.b32.xlu0 %v8770_v30, %s6719_s22  ;;  %6479 = vmatmul.mubr.msk.bf16.gmra.mrb[48].mxu1 %vm2573_vm9, %v4876_v41  ;;  %v4190_v49 = vsel %vm2491_vm7, %v4144_v39, %v4030_v48 }
 0x1d0   : > { %3977 = vrot.lane.b32.xlu1 %v10468_v32, %s6717_s20 }
 0x1d1   : > { %v4028_v21 = vpop.permute.xlu0 %4027 }
 0x1d2   : > { %v4110_v44 = vpop.permute.xlu1 %4109  ;;  %v4188_v30 = vsel %vm2491_vm7, %v4141_v57, %v4028_v21 }
 0x1d3   : > { %3975 = vrot.lane.b32.xlu0 %v10470_v26, %s6717_s20  ;;  %v4222_v62 = vsel %vm2524_vm8, %v4190_v49, %v4110_v44  ;;  %s9334_s20 = scalar_lea.vmem %s10024_s2, %s6213_s17 }
 0x1d4   : > { %4057 = vrot.lane.b32.xlu1 %v10471_v33, %s6718_s21 }
 0x1d5   : > { %v4108_v31 = vpop.permute.xlu0 %4107 }
 0x1d6   : > { %v4220_v40 = vsel %vm2524_vm8, %v4188_v30, %v4108_v31  ;;  %v4656_v47 = vpop.permute.xlu1 %4655 }
 0x1d7   : > { %4055 = vrot.lane.b32.xlu0 %v10472_v13, %s6718_s21  ;;  %6426 = vmatprep.mubr.msk.bf16.mxu0 %vm2573_vm9, %v4220_v40  ;;  %v4812_v51 = vsel %vm2442_vm6, %v10455_v43, %v4656_v47  ;;  %s5742_s21 = sshll.u32 %s10492_s12, 1 }
 0x1d8   : > { %6427 = vmatmul.mubr.msk.bf16.vlgmr.msra.gmra.mrb[32].mxu0 %vm2573_vm9, %v4222_v62  ;;  %4137 = vrot.lane.b32.xlu1 %v8861_v16, %s6719_s22  ;;  %v6392_v23 = vpop.f32.mrb[0].mxu1  ;;  %s214_s24 = scalar_lea.vmem %s10025_s3, %s5742_s21 }
 0x1d9   : > { %v4654_v52 = vpop.permute.xlu0 %4653  ;;  %v3327_v35 = vpop.f32.mrb[1].mxu1  ;;  %v3526_v55 = vmul.f32 %v6392_v23, %v6392_v23  ;;  %v3457_v11 = vsel %vm2767_vm10, %v6392_v23, 0.0 }
 0x1da   : > { %v4688_v58 = vpop.permute.xlu1 %4687  ;;  %v3524_v42 = vmul.f32 %v3327_v35, %v3327_v35  ;;  %v6393_v38 = vpop.f32.mrb[2].mxu1  ;;  %v3454_v59 = vsel %vm2767_vm10, %v3327_v35, 0.0  ;;  %v4809_v6 = vsel %vm2442_vm6, %v10457_v28, %v4654_v52 }
 0x1db   : > { %4135 = vrot.lane.b32.xlu0 %v8872_v63, %s6719_s22  ;;  %v6529_v53 = vpack.i.bf16 %v6393_v38, %v6392_v23  ;;  %v3330_v46 = vpop.f32.mrb[3].mxu1  ;;  %v3527_v45 = vmul.f32 %v6393_v38, %v6393_v38  ;;  %v3559_v7 = vsel %vm2767_vm10, %v3526_v55, 0.0  ;;  %v3459_v10 = vsel %vm2767_vm10, %v6393_v38, 0.0 }
 0x1dc   : > { %v6524_v18 = vpack.i.bf16 %v3330_v46, %v3327_v35  ;;  %v3455_v2 = vsel %vm2767_vm10, %v3330_v46, 0.0  ;;  %v3525_v16 = vmul.f32 %v3330_v46, %v3330_v46  ;;  %v3556_v63 = vsel %vm2767_vm10, %v3524_v42, 0.0 }
 0x1dd   : > { %v4686_v34 = vpop.permute.xlu0 %4685  ;;  %v3456_v25 = vadd.f32 %v3455_v2, %v3454_v59  ;;  %6530 = vrot.lane.b32.xlu1 %v6529_v53, %s6720_s16  ;;  %v3561_v28 = vsel %vm2767_vm10, %v3527_v45, 0.0  ;;  %v4848_v0 = vsel %vm2491_vm7, %v4812_v51, %v4688_v58 }
 0x1de   : > { %v3952_v4 = vpop.permute.xlu1 %3951  ;;  %v3557_v20 = vsel %vm2767_vm10, %v3525_v16, 0.0  ;;  %v4846_v24 = vsel %vm2491_vm7, %v4809_v6, %v4686_v34 }
 0x1df   : > { %6525 = vrot.lane.b32.xlu0 %v6524_v18, %s6720_s16  ;;  %v3458_v3 = vadd.f32 %v3457_v11, %v3456_v25  ;;  %v3558_v60 = vadd.f32 %v3557_v20, %v3556_v63  ;;  %v4147_v57 = vsel %vm2442_vm6, %v10474_v61, %v3952_v4 }
 0x1e1   : > { %v4766_v54 = vpop.permute.xlu0 %4765  ;;  %v3560_v19 = vadd.f32 %v3559_v7, %v3558_v60  ;;  %v3460_v37 = vadd.f32 %v3459_v10, %v3458_v3 }
 0x1e2   : > { %v4878_v36 = vsel %vm2524_vm8, %v4846_v24, %v4766_v54  ;;  %v3954_v14 = vpop.permute.xlu1 %3953 }
 0x1e3   : > { %6482 = vmatprep.mubr.msk.bf16.mxu1 %vm2573_vm9, %v4878_v36  ;;  %v3562_v29 = vadd.f32 %v3561_v28, %v3560_v19  ;;  %v4150_v43 = vsel %vm2442_vm6, %v10473_v56, %v3954_v14 }
 0x1e5   : > { %v4768_v17 = vpop.permute.xlu0 %4767 }
 0x1e6   : > { %v4880_v22 = vsel %vm2524_vm8, %v4848_v0, %v4768_v17  ;;  %v4034_v15 = vpop.permute.xlu1 %4033  ;;  %v6396_v12 = vpop.f32.mrb[4].mxu1 }
 0x1e7   : > { %6483 = vmatmul.mubr.msk.bf16.gmra.mrb[52].mxu1 %vm2573_vm9, %v4880_v22  ;;  %v3343_v9 = vpop.f32.mrb[5].mxu1  ;;  %v4194_v49 = vsel %vm2491_vm7, %v4150_v43, %v4034_v15  ;;  %v3530_v31 = vmul.f32 %v6396_v12, %v6396_v12  ;;  %v3465_v13 = vsel %vm2767_vm10, %v6396_v12, 0.0 }
 0x1e8   : > { %v3461_v50 = vsel %vm2767_vm10, %v3343_v9, 0.0  ;;  %v3528_v27 = vmul.f32 %v3343_v9, %v3343_v9  ;;  %v6397_v41 = vpop.f32.mrb[6].mxu1 }
 0x1e9   : > { %v4032_v48 = vpop.permute.xlu0 %4031  ;;  %v3462_v1 = vadd.f32 %v3461_v50, %v3460_v37  ;;  %v6539_v39 = vpack.i.bf16 %v6397_v41, %v6396_v12  ;;  %v3346_v21 = vpop.f32.mrb[7].mxu1  ;;  %v3531_v42 = vmul.f32 %v6397_v41, %v6397_v41  ;;  %v3567_v18 = vsel %vm2767_vm10, %v3530_v31, 0.0 }
 0x1ea   : > { %v4114_v44 = vpop.permute.xlu1 %4113  ;;  %v3563_v33 = vsel %vm2767_vm10, %v3528_v27, 0.0  ;;  %v6534_v30 = vpack.i.bf16 %v3346_v21, %v3343_v9  ;;  %v3463_v40 = vsel %vm2767_vm10, %v3346_v21, 0.0  ;;  %v3529_v47 = vmul.f32 %v3346_v21, %v3346_v21 }
 0x1eb   : > { %v3564_v62 = vadd.f32 %v3563_v33, %v3562_v29  ;;  %6540 = vrot.lane.b32.xlu1 %v6539_v39, %s6720_s16  ;;  %v3464_v52 = vadd.f32 %v3463_v40, %v3462_v1  ;;  %v4192_v23 = vsel %vm2491_vm7, %v4147_v57, %v4032_v48  ;;  %v4226_v35 = vsel %vm2524_vm8, %v4194_v49, %v4114_v44 }
 0x1ec   : > { %6535 = vrot.lane.b32.xlu0 %v6534_v30, %s6720_s16  ;;  %v3565_v38 = vsel %vm2767_vm10, %v3529_v47, 0.0  ;;  %v3467_v2 = vsel %vm2767_vm10, %v6397_v41, 0.0  ;;  %v3569_v6 = vsel %vm2767_vm10, %v3531_v42, 0.0 }
 0x1ed   : > { %v4112_v58 = vpop.permute.xlu0 %4111  ;;  %v3466_v46 = vadd.f32 %v3465_v13, %v3464_v52  ;;  %v3566_v34 = vadd.f32 %v3565_v38, %v3564_v62 }
 0x1ee   : > { %v4224_v55 = vsel %vm2524_vm8, %v4192_v23, %v4112_v58  ;;  %v4660_v53 = vpop.permute.xlu1 %4659  ;;  %v10475_v23 = vld [vmem:[#allocation61_spill] sm:$0xff] }
 0x1ef   : > { %6430 = vmatprep.mubr.msk.bf16.mxu0 %vm2573_vm9, %v4224_v55  ;;  %v3568_v4 = vadd.f32 %v3567_v18, %v3566_v34  ;;  %v3468_v25 = vadd.f32 %v3467_v2, %v3466_v46  ;;  %v4818_v39 = vsel %vm2442_vm6, %v10463_v8, %v4660_v53 }
 0x1f0   : > { %v6400_v59 = vpop.f32.mrb[8].mxu1  ;;  %6431 = vmatmul.mubr.msk.bf16.gmra.mrb[36].mxu0 %vm2573_vm9, %v4226_v35 }
 0x1f1   : > { %v3359_v16 = vpop.f32.mrb[9].mxu1  ;;  %v4658_v20 = vpop.permute.xlu0 %4657  ;;  %v3570_v7 = vadd.f32 %v3569_v6, %v3568_v4  ;;  %v3534_v14 = vmul.f32 %v6400_v59, %v6400_v59  ;;  %v3473_v0 = vsel %vm2767_vm10, %v6400_v59, 0.0 }
 0x1f2   : > { %v3469_v11 = vsel %vm2767_vm10, %v3359_v16, 0.0  ;;  %v3532_v63 = vmul.f32 %v3359_v16, %v3359_v16  ;;  %v6401_v45 = vpop.f32.mrb[10].mxu1  ;;  %v4692_v24 = vpop.permute.xlu1 %4691  ;;  %v4815_v9 = vsel %vm2442_vm6, %v10464_v5, %v4658_v20 }
 0x1f3   : > { %v6549_v3 = vpack.i.bf16 %v6401_v45, %v6400_v59  ;;  %v3362_v60 = vpop.f32.mrb[11].mxu1  ;;  %v3470_v54 = vadd.f32 %v3469_v11, %v3468_v25  ;;  %v3535_v22 = vmul.f32 %v6401_v45, %v6401_v45  ;;  %v3475_v56 = vsel %vm2767_vm10, %v6401_v45, 0.0  ;;  %v10476_v25 = vld [vmem:[#allocation65_spill] sm:$0xff] }
 0x1f4   : > { %v3571_v10 = vsel %vm2767_vm10, %v3532_v63, 0.0  ;;  %v6544_v51 = vpack.i.bf16 %v3362_v60, %v3359_v16  ;;  %v3471_v36 = vsel %vm2767_vm10, %v3362_v60, 0.0  ;;  %v3533_v28 = vmul.f32 %v3362_v60, %v3362_v60 }
 0x1f5   : > { %6550 = vrot.lane.b32.xlu1 %v6549_v3, %s6720_s16  ;;  %v3572_v19 = vadd.f32 %v3571_v10, %v3570_v7  ;;  %v3472_v37 = vadd.f32 %v3471_v36, %v3470_v54  ;;  %v4690_v29 = vpop.permute.xlu0 %4689  ;;  %v3575_v50 = vsel %vm2767_vm10, %v3534_v14, 0.0  ;;  %v3577_v57 = vsel %vm2767_vm10, %v3535_v22, 0.0 }
 0x1f6   : > { %6545 = vrot.lane.b32.xlu0 %v6544_v51, %s6720_s16  ;;  %v3956_v17 = vpop.permute.xlu1 %3955  ;;  %v3573_v12 = vsel %vm2767_vm10, %v3533_v28, 0.0  ;;  %v4850_v41 = vsel %vm2491_vm7, %v4815_v9, %v4690_v29  ;;  %v4852_v62 = vsel %vm2491_vm7, %v4818_v39, %v4692_v24 }
 0x1f7   : > { %v3474_v15 = vadd.f32 %v3473_v0, %v3472_v37  ;;  %v3574_v43 = vadd.f32 %v3573_v12, %v3572_v19  ;;  %v4153_v11 = vsel %vm2442_vm6, %v10476_v25, %v3956_v17 }
 0x1f9   : > { %v3476_v27 = vadd.f32 %v3475_v56, %v3474_v15  ;;  %v4770_v48 = vpop.permute.xlu0 %4769  ;;  %v3576_v1 = vadd.f32 %v3575_v50, %v3574_v43 }
 0x1fa   : > { %v4882_v21 = vsel %vm2524_vm8, %v4850_v41, %v4770_v48  ;;  %v3958_v61 = vpop.permute.xlu1 %3957 }
 0x1fb   : > { %6486 = vmatprep.mubr.msk.bf16.mxu1 %vm2573_vm9, %v4882_v21  ;;  %v3578_v5 = vadd.f32 %v3577_v57, %v3576_v1  ;;  %v4156_v58 = vsel %vm2442_vm6, %v10475_v23, %v3958_v61 }
 0x1fd   : > { %v4772_v40 = vpop.permute.xlu0 %4771 }
 0x1fe   : > { %v4884_v52 = vsel %vm2524_vm8, %v4852_v62, %v4772_v40  ;;  %v4038_v35 = vpop.permute.xlu1 %4037 }
 0x1ff   : > { %v6404_v49 = vpop.f32.mrb[12].mxu1  ;;  %6487 = vmatmul.mubr.msk.bf16.gmra.mrb[56].mxu1 %vm2573_vm9, %v4884_v52  ;;  %v4198_v63 = vsel %vm2491_vm7, %v4156_v58, %v4038_v35 }
 0x200   : > { %v3375_v44 = vpop.f32.mrb[13].mxu1  ;;  %v3538_v55 = vmul.f32 %v6404_v49, %v6404_v49  ;;  %v3481_v2 = vsel %vm2767_vm10, %v6404_v49, 0.0 }
 0x201   : > { %v3477_v33 = vsel %vm2767_vm10, %v3375_v44, 0.0  ;;  %v3536_v30 = vmul.f32 %v3375_v44, %v3375_v44  ;;  %v6405_v31 = vpop.f32.mrb[14].mxu1  ;;  %v4036_v18 = vpop.permute.xlu0 %4035 }
 0x202   : > { %v3478_v47 = vadd.f32 %v3477_v33, %v3476_v27  ;;  %v6559_v13 = vpack.i.bf16 %v6405_v31, %v6404_v49  ;;  %v3378_v8 = vpop.f32.mrb[15].mxu1  ;;  %v3539_v16 = vmul.f32 %v6405_v31, %v6405_v31  ;;  %v4118_v45 = vpop.permute.xlu1 %4117  ;;  %v3583_v3 = vsel %vm2767_vm10, %v3538_v55, 0.0 }
 0x203   : > { %v3579_v42 = vsel %vm2767_vm10, %v3536_v30, 0.0  ;;  %v6554_v38 = vpack.i.bf16 %v3378_v8, %v3375_v44  ;;  %v3479_v46 = vsel %vm2767_vm10, %v3378_v8, 0.0  ;;  %v3537_v34 = vmul.f32 %v3378_v8, %v3378_v8 }
 0x204   : > { %v3580_v53 = vadd.f32 %v3579_v42, %v3578_v5  ;;  %6560 = vrot.lane.b32.xlu1 %v6559_v13, %s6720_s16  ;;  %v3480_v59 = vadd.f32 %v3479_v46, %v3478_v47  ;;  %v3483_v60 = vsel %vm2767_vm10, %v6405_v31, 0.0  ;;  %v4196_v7 = vsel %vm2491_vm7, %v4153_v11, %v4036_v18  ;;  %v10477_v11 = vld [vmem:[#allocation69_spill] sm:$0xff] }
 0x205   : > { %6555 = vrot.lane.b32.xlu0 %v6554_v38, %s6720_s16  ;;  %v3581_v4 = vsel %vm2767_vm10, %v3537_v34, 0.0  ;;  %v4116_v10 = vpop.permute.xlu0 %4115  ;;  %v4230_v51 = vsel %vm2524_vm8, %v4198_v63, %v4118_v45  ;;  %v3585_v36 = vsel %vm2767_vm10, %v3539_v16, 0.0 }
 0x206   : > { %v3482_v20 = vadd.f32 %v3481_v2, %v3480_v59  ;;  %v3582_v6 = vadd.f32 %v3581_v4, %v3580_v53  ;;  %v4228_v14 = vsel %vm2524_vm8, %v4196_v7, %v4116_v10  ;;  %v4664_v19 = vpop.permute.xlu1 %4663  ;;  %v10478_v7 = vld [vmem:[#allocation70_spill] sm:$0xff] }
 0x207   : > { %6434 = vmatprep.mubr.msk.bf16.mxu0 %vm2573_vm9, %v4228_v14  ;;  %v4824_v43 = vsel %vm2442_vm6, %v10468_v32, %v4664_v19 }
 0x208   : > { %v3584_v24 = vadd.f32 %v3583_v3, %v3582_v6  ;;  %v3484_v54 = vadd.f32 %v3483_v60, %v3482_v20  ;;  %6435 = vmatmul.mubr.msk.bf16.gmra.mrb[40].mxu0 %vm2573_vm9, %v4230_v51 }
 0x209   : > { %v4662_v28 = vpop.permute.xlu0 %4661 }
 0x20a   : > { %v3586_v37 = vadd.f32 %v3585_v36, %v3584_v24  ;;  %v4696_v29 = vpop.permute.xlu1 %4695  ;;  %v4821_v48 = vsel %vm2442_vm6, %v10470_v26, %v4662_v28 }
 0x20b   : > { %v4856_v30 = vsel %vm2491_vm7, %v4824_v43, %v4696_v29 }
 0x20d   : > { %v4694_v22 = vpop.permute.xlu0 %4693 }
 0x20e   : > { %v3960_v9 = vpop.permute.xlu1 %3959  ;;  %v4854_v32 = vsel %vm2491_vm7, %v4821_v48, %v4694_v22 }
 0x20f   : > { %v6408_v0 = vpop.f32.mrb[16].mxu1  ;;  %v4159_v10 = vsel %vm2442_vm6, %v10478_v7, %v3960_v9 }
 0x210   : > { %v3391_v17 = vpop.f32.mrb[17].mxu1  ;;  %v3542_v1 = vmul.f32 %v6408_v0, %v6408_v0  ;;  %v3489_v13 = vsel %vm2767_vm10, %v6408_v0, 0.0 }
 0x211   : > { %v3485_v15 = vsel %vm2767_vm10, %v3391_v17, 0.0  ;;  %v3540_v12 = vmul.f32 %v3391_v17, %v3391_v17  ;;  %v6409_v56 = vpop.f32.mrb[18].mxu1  ;;  %v4774_v26 = vpop.permute.xlu0 %4773 }
 0x212   : > { %v3486_v50 = vadd.f32 %v3485_v15, %v3484_v54  ;;  %v6569_v27 = vpack.i.bf16 %v6409_v56, %v6408_v0  ;;  %v3394_v41 = vpop.f32.mrb[19].mxu1  ;;  %v3543_v21 = vmul.f32 %v6409_v56, %v6409_v56  ;;  %v4886_v40 = vsel %vm2524_vm8, %v4854_v32, %v4774_v26  ;;  %v3962_v47 = vpop.permute.xlu1 %3961 }
 0x213   : > { %v3587_v39 = vsel %vm2767_vm10, %v3540_v12, 0.0  ;;  %v9123_v61 = vpop.f32.mrb[0].mxu0  ;;  %v6564_v49 = vpack.i.bf16 %v3394_v41, %v3391_v17  ;;  %v3487_v44 = vsel %vm2767_vm10, %v3394_v41, 0.0  ;;  %v3541_v5 = vmul.f32 %v3394_v41, %v3394_v41  ;;  %6490 = vmatprep.mubr.msk.bf16.mxu1 %vm2573_vm9, %v4886_v40 }
 0x214   : > { %v3588_v57 = vadd.f32 %v3587_v39, %v3586_v37  ;;  %v9126_v33 = vpop.f32.mrb[1].mxu0  ;;  %6570 = vrot.lane.b32.xlu1 %v6569_v27, %s6720_s16  ;;  %v3488_v31 = vadd.f32 %v3487_v44, %v3486_v50  ;;  %v3591_v58 = vsel %vm2767_vm10, %v3542_v1, 0.0  ;;  %v3491_v35 = vsel %vm2767_vm10, %v6409_v56, 0.0 }
 0x215   : > { %v9131_v62 = vpop.f32.mrb[2].mxu0  ;;  %v3589_v8 = vsel %vm2767_vm10, %v3541_v5, 0.0  ;;  %v2838_v52 = vmul.f32 %v9126_v33, %v9126_v33  ;;  %6565 = vrot.lane.b32.xlu0 %v6564_v49, %s6720_s16  ;;  %v3593_v55 = vsel %vm2767_vm10, %v3543_v21, 0.0  ;;  %v2840_v53 = vmul.f32 %v9123_v61, %v9123_v61  ;;  %v4776_v59 = vpop.permute.xlu0 %4775 }
 0x216   : > { %v9139_v23 = vpop.f32.mrb[3].mxu0  ;;  %v3490_v42 = vadd.f32 %v3489_v13, %v3488_v31  ;;  %v3590_v38 = vadd.f32 %v3589_v8, %v3588_v57  ;;  %v2768_v46 = vsel %vm2767_vm10, %v9126_v33, 0.0  ;;  %v4888_v25 = vsel %vm2524_vm8, %v4856_v30, %v4776_v59  ;;  %v4042_v45 = vpop.permute.xlu1 %4041 }
 0x217   : > { %v2769_v34 = vsel %vm2767_vm10, %v9139_v23, 0.0  ;;  %v2839_v16 = vmul.f32 %v9139_v23, %v9139_v23  ;;  %v4162_v63 = vsel %vm2442_vm6, %v10477_v11, %v3962_v47  ;;  %v2771_v20 = vsel %vm2767_vm10, %v9123_v61, 0.0  ;;  %6491 = vmatmul.mubr.msk.bf16.gmra.mrb[60].mxu1 %vm2573_vm9, %v4888_v25 }
 0x218   : > { %v3592_v18 = vadd.f32 %v3591_v58, %v3590_v38  ;;  %v2770_v2 = vadd.f32 %v2769_v34, %v2768_v46  ;;  %v3492_v4 = vadd.f32 %v3491_v35, %v3490_v42  ;;  %v2870_v6 = vsel %vm2767_vm10, %v2838_v52, 0.0  ;;  %v10479_v58 = vld [vmem:[#allocation72_spill] sm:$0xff]  ;;  %v10480_v42 = vld [vmem:[#allocation71_spill] sm:$0xff] }
 0x219   : > { %v2841_v3 = vmul.f32 %v9131_v62, %v9131_v62  ;;  %v2871_v24 = vsel %vm2767_vm10, %v2839_v16, 0.0  ;;  %v2773_v51 = vsel %vm2767_vm10, %v9131_v62, 0.0  ;;  %v4040_v14 = vpop.permute.xlu0 %4039  ;;  %v2873_v19 = vsel %vm2767_vm10, %v2840_v53, 0.0 }
 0x21a   : > { %v2772_v60 = vadd.f32 %v2771_v20, %v2770_v2  ;;  %v3594_v54 = vadd.f32 %v3593_v55, %v3592_v18  ;;  %v2872_v36 = vadd.f32 %v2871_v24, %v2870_v6  ;;  %v4202_v28 = vsel %vm2491_vm7, %v4162_v63, %v4042_v45  ;;  %v4122_v0 = vpop.permute.xlu1 %4121 }
 0x21b   : > { %v4200_v17 = vsel %vm2491_vm7, %v4159_v10, %v4040_v14  ;;  %v2875_v22 = vsel %vm2767_vm10, %v2841_v3, 0.0  ;;  %v4234_v56 = vsel %vm2524_vm8, %v4202_v28, %v4122_v0 }
 0x21c   : > { %v2774_v37 = vadd.f32 %v2773_v51, %v2772_v60  ;;  %v2874_v29 = vadd.f32 %v2873_v19, %v2872_v36 }
 0x21d   : > { %v4120_v12 = vpop.permute.xlu0 %4119 }
 0x21e   : > { %v2876_v15 = vadd.f32 %v2875_v22, %v2874_v29  ;;  %v4232_v9 = vsel %vm2524_vm8, %v4200_v17, %v4120_v12  ;;  %v3966_v50 = vpop.permute.xlu1 %3965 }
 0x21f   : > { %v6412_v43 = vpop.f32.mrb[20].mxu1  ;;  %6438 = vmatprep.mubr.msk.bf16.mxu0 %vm2573_vm9, %v4232_v9  ;;  %v4168_v38 = vsel %vm2442_vm6, %v10480_v42, %v3966_v50 }
 0x220   : > { %v3407_v27 = vpop.f32.mrb[21].mxu1  ;;  %6439 = vmatmul.mubr.msk.bf16.gmra.mrb[44].mxu0 %vm2573_vm9, %v4234_v56  ;;  %v3546_v44 = vmul.f32 %v6412_v43, %v6412_v43  ;;  %v3497_v55 = vsel %vm2767_vm10, %v6412_v43, 0.0 }
 0x221   : > { %v3493_v41 = vsel %vm2767_vm10, %v3407_v27, 0.0  ;;  %v3544_v48 = vmul.f32 %v3407_v27, %v3407_v27  ;;  %v6413_v1 = vpop.f32.mrb[22].mxu1  ;;  %v3964_v49 = vpop.permute.xlu0 %3963 }
 0x222   : > { %v3494_v39 = vadd.f32 %v3493_v41, %v3492_v4  ;;  %v6579_v21 = vpack.i.bf16 %v6413_v1, %v6412_v43  ;;  %v3410_v57 = vpop.f32.mrb[23].mxu1  ;;  %v4046_v31 = vpop.permute.xlu1 %4045  ;;  %v3547_v47 = vmul.f32 %v6413_v1, %v6413_v1  ;;  %v4165_v35 = vsel %vm2442_vm6, %v10479_v58, %v3964_v49  ;;  %v10482_v49 = vld [vmem:[#allocation75_spill] sm:$0xff] }
 0x223   : > { %v3595_v5 = vsel %vm2767_vm10, %v3544_v48, 0.0  ;;  %v6574_v32 = vpack.i.bf16 %v3410_v57, %v3407_v27  ;;  %v3495_v30 = vsel %vm2767_vm10, %v3410_v57, 0.0  ;;  %v9178_v26 = vpop.f32.mrb[4].mxu0  ;;  %v3545_v8 = vmul.f32 %v3410_v57, %v3410_v57 }
 0x224   : > { %v3596_v40 = vadd.f32 %v3595_v5, %v3594_v54  ;;  %v3496_v13 = vadd.f32 %v3495_v30, %v3494_v39  ;;  %v9180_v52 = vpop.f32.mrb[5].mxu0  ;;  %6580 = vrot.lane.b32.xlu1 %v6579_v21, %s6720_s16  ;;  %v3599_v4 = vsel %vm2767_vm10, %v3546_v44, 0.0  ;;  %v3499_v25 = vsel %vm2767_vm10, %v6413_v1, 0.0  ;;  %v10481_v39 = vld [vmem:[#allocation15_spill] sm:$0xff] }
 0x225   : > { %v9188_v53 = vpop.f32.mrb[6].mxu0  ;;  %6575 = vrot.lane.b32.xlu0 %v6574_v32, %s6720_s16  ;;  %v3597_v34 = vsel %vm2767_vm10, %v3545_v8, 0.0  ;;  %v2775_v59 = vsel %vm2767_vm10, %v9180_v52, 0.0  ;;  %v2842_v18 = vmul.f32 %v9180_v52, %v9180_v52  ;;  %v4044_v16 = vpop.permute.xlu0 %4043  ;;  %v4206_v45 = vsel %vm2491_vm7, %v4168_v38, %v4046_v31 }
 0x226   : > { %v3498_v46 = vadd.f32 %v3497_v55, %v3496_v13  ;;  %v9196_v2 = vpop.f32.mrb[7].mxu0  ;;  %v3598_v11 = vadd.f32 %v3597_v34, %v3596_v40  ;;  %v2776_v63 = vadd.f32 %v2775_v59, %v2774_v37  ;;  %v3601_v20 = vsel %vm2767_vm10, %v3547_v47, 0.0  ;;  %v4126_v6 = vpop.permute.xlu1 %4125 }
 0x227   : > { %v2877_v3 = vsel %vm2767_vm10, %v2842_v18, 0.0  ;;  %v2777_v60 = vsel %vm2767_vm10, %v9196_v2, 0.0  ;;  %v4204_v24 = vsel %vm2491_vm7, %v4165_v35, %v4044_v16  ;;  %v2779_v51 = vsel %vm2767_vm10, %v9178_v26, 0.0 }
 0x228   : > { %v3600_v54 = vadd.f32 %v3599_v4, %v3598_v11  ;;  %v2878_v7 = vadd.f32 %v2877_v3, %v2876_v15  ;;  %v2778_v10 = vadd.f32 %v2777_v60, %v2776_v63  ;;  %v2844_v36 = vmul.f32 %v9178_v26, %v9178_v26 }
 0x229   : > { %v2843_v14 = vmul.f32 %v9196_v2, %v9196_v2  ;;  %v3500_v19 = vadd.f32 %v3499_v25, %v3498_v46  ;;  %v4124_v37 = vpop.permute.xlu0 %4123  ;;  %v4238_v28 = vsel %vm2524_vm8, %v4206_v45, %v4126_v6  ;;  %v2781_v22 = vsel %vm2767_vm10, %v9188_v53, 0.0 }
 0x22a   : > { %v2780_v29 = vadd.f32 %v2779_v51, %v2778_v10  ;;  %v3602_v0 = vadd.f32 %v3601_v20, %v3600_v54  ;;  %v4236_v17 = vsel %vm2524_vm8, %v4204_v24, %v4124_v37  ;;  %v2845_v15 = vmul.f32 %v9188_v53, %v9188_v53  ;;  %v3970_v56 = vpop.permute.xlu1 %3969 }
 0x22b   : > { %v2879_v12 = vsel %vm2767_vm10, %v2843_v14, 0.0  ;;  %6442 = vmatprep.mubr.msk.bf16.mxu0 %vm2573_vm9, %v4236_v17  ;;  %v2881_v50 = vsel %vm2767_vm10, %v2844_v36, 0.0  ;;  %v4174_v21 = vsel %vm2442_vm6, %v10481_v39, %v3970_v56 }
 0x22c   : > { %v2880_v43 = vadd.f32 %v2879_v12, %v2878_v7  ;;  %v2782_v9 = vadd.f32 %v2781_v22, %v2780_v29  ;;  %6443 = vmatmul.mubr.msk.bf16.gmra.mrb[48].mxu0 %vm2573_vm9, %v4238_v28  ;;  %v2883_v48 = vsel %vm2767_vm10, %v2845_v15, 0.0  ;;  %v10483_v29 = vld [vmem:[#allocation7_spill] sm:$0xff] }
 0x22d   : > { %v3968_v41 = vpop.permute.xlu0 %3967 }
 0x22e   : > { %v2882_v27 = vadd.f32 %v2881_v50, %v2880_v43  ;;  %v4050_v1 = vpop.permute.xlu1 %4049  ;;  %v4171_v44 = vsel %vm2442_vm6, %v10482_v49, %v3968_v41  ;;  %v10484_v43 = vld [vmem:[#allocation12_spill] sm:$0xff] }
 0x22f   : > { %v4210_v32 = vsel %vm2491_vm7, %v4174_v21, %v4050_v1 }
 0x230   : > { %v2884_v57 = vadd.f32 %v2883_v48, %v2882_v27 }
 0x231   : > { %v4048_v5 = vpop.permute.xlu0 %4047 }
 0x232   : > { %v4130_v30 = vpop.permute.xlu1 %4129  ;;  %v4208_v40 = vsel %vm2491_vm7, %v4171_v44, %v4048_v5 }
 0x233   : > { %v6416_v31 = vpop.f32.mrb[24].mxu1  ;;  %v4242_v38 = vsel %vm2524_vm8, %v4210_v32, %v4130_v30 }
 0x234   : > { %v3423_v47 = vpop.f32.mrb[25].mxu1  ;;  %v3550_v13 = vmul.f32 %v6416_v31, %v6416_v31  ;;  %v3505_v6 = vsel %vm2767_vm10, %v6416_v31, 0.0 }
 0x235   : > { %v3501_v8 = vsel %vm2767_vm10, %v3423_v47, 0.0  ;;  %v3548_v58 = vmul.f32 %v3423_v47, %v3423_v47  ;;  %v6417_v35 = vpop.f32.mrb[26].mxu1  ;;  %v4128_v42 = vpop.permute.xlu0 %4127 }
 0x236   : > { %v3502_v55 = vadd.f32 %v3501_v8, %v3500_v19  ;;  %v6589_v46 = vpack.i.bf16 %v6417_v35, %v6416_v31  ;;  %v3426_v34 = vpop.f32.mrb[27].mxu1  ;;  %v4240_v59 = vsel %vm2524_vm8, %v4208_v40, %v4128_v42  ;;  %v3974_v4 = vpop.permute.xlu1 %3973  ;;  %v3607_v3 = vsel %vm2767_vm10, %v3550_v13, 0.0 }
 0x237   : > { %v3603_v18 = vsel %vm2767_vm10, %v3548_v58, 0.0  ;;  %v6584_v16 = vpack.i.bf16 %v3426_v34, %v3423_v47  ;;  %v9233_v25 = vpop.f32.mrb[8].mxu0  ;;  %6446 = vmatprep.mubr.msk.bf16.mxu0 %vm2573_vm9, %v4240_v59  ;;  %v3503_v63 = vsel %vm2767_vm10, %v3426_v34, 0.0  ;;  %v3549_v45 = vmul.f32 %v3426_v34, %v3426_v34 }
 0x238   : > { %v3604_v11 = vadd.f32 %v3603_v18, %v3602_v0  ;;  %v9237_v20 = vpop.f32.mrb[9].mxu0  ;;  %6590 = vrot.lane.b32.xlu1 %v6589_v46, %s6720_s16  ;;  %6447 = vmatmul.mubr.msk.bf16.gmra.mrb[52].mxu0 %vm2573_vm9, %v4242_v38  ;;  %v3504_v60 = vadd.f32 %v3503_v63, %v3502_v55  ;;  %v3551_v54 = vmul.f32 %v6417_v35, %v6417_v35  ;;  %v3507_v19 = vsel %vm2767_vm10, %v6417_v35, 0.0 }
 0x239   : > { %v9243_v24 = vpop.f32.mrb[10].mxu0  ;;  %6585 = vrot.lane.b32.xlu0 %v6584_v16, %s6720_s16  ;;  %v3972_v7 = vpop.permute.xlu0 %3971  ;;  %v3605_v10 = vsel %vm2767_vm10, %v3549_v45, 0.0  ;;  %v2783_v51 = vsel %vm2767_vm10, %v9237_v20, 0.0  ;;  %v2846_v36 = vmul.f32 %v9237_v20, %v9237_v20  ;;  %v4180_v0 = vsel %vm2442_vm6, %v10483_v29, %v3974_v4 }
 0x23a   : > { %v9251_v14 = vpop.f32.mrb[11].mxu0  ;;  %v3506_v37 = vadd.f32 %v3505_v6, %v3504_v60  ;;  %v3606_v28 = vadd.f32 %v3605_v10, %v3604_v11  ;;  %v4054_v17 = vpop.permute.xlu1 %4053  ;;  %v2848_v22 = vmul.f32 %v9233_v25, %v9233_v25  ;;  %v2784_v15 = vadd.f32 %v2783_v51, %v2782_v9  ;;  %v10485_v11 = vld [vmem:[#allocation18_spill] sm:$0xff] }
 0x23b   : > { %v2885_v12 = vsel %vm2767_vm10, %v2846_v36, 0.0  ;;  %v2785_v56 = vsel %vm2767_vm10, %v9251_v14, 0.0  ;;  %v4177_v50 = vsel %vm2442_vm6, %v10484_v43, %v3972_v7  ;;  %v2847_v48 = vmul.f32 %v9251_v14, %v9251_v14  ;;  %v10486_v7 = vld [vmem:[#allocation29_spill] sm:$0xff] }
 0x23c   : > { %v3608_v27 = vadd.f32 %v3607_v3, %v3606_v28  ;;  %v2886_v41 = vadd.f32 %v2885_v12, %v2884_v57  ;;  %v3609_v1 = vsel %vm2767_vm10, %v3551_v54, 0.0  ;;  %v2787_v39 = vsel %vm2767_vm10, %v9233_v25, 0.0 }
 0x23d   : > { %v2786_v21 = vadd.f32 %v2785_v56, %v2784_v15  ;;  %v4052_v9 = vpop.permute.xlu0 %4051  ;;  %v3508_v49 = vadd.f32 %v3507_v19, %v3506_v37  ;;  %v2849_v44 = vmul.f32 %v9243_v24, %v9243_v24  ;;  %v2887_v5 = vsel %vm2767_vm10, %v2847_v48, 0.0 }
 0x23e   : > { %v4214_v32 = vsel %vm2491_vm7, %v4180_v0, %v4054_v17  ;;  %v4134_v30 = vpop.permute.xlu1 %4133  ;;  %v3610_v57 = vadd.f32 %v3609_v1, %v3608_v27  ;;  %v2888_v40 = vadd.f32 %v2887_v5, %v2886_v41  ;;  %v4212_v47 = vsel %vm2491_vm7, %v4177_v50, %v4052_v9 }
 0x23f   : > { %v2788_v31 = vadd.f32 %v2787_v39, %v2786_v21  ;;  %v2889_v13 = vsel %vm2767_vm10, %v2848_v22, 0.0  ;;  %v2789_v8 = vsel %vm2767_vm10, %v9243_v24, 0.0  ;;  %v4246_v42 = vsel %vm2524_vm8, %v4214_v32, %v4134_v30 }
 0x240   : > { %v2890_v58 = vadd.f32 %v2889_v13, %v2888_v40  ;;  %v2891_v55 = vsel %vm2767_vm10, %v2849_v44, 0.0 }
 0x241   : > { %v4132_v35 = vpop.permute.xlu0 %4131  ;;  %v2790_v38 = vadd.f32 %v2789_v8, %v2788_v31 }
 0x242   : > { %v4244_v46 = vsel %vm2524_vm8, %v4212_v47, %v4132_v35  ;;  %v3978_v34 = vpop.permute.xlu1 %3977  ;;  %v2892_v59 = vadd.f32 %v2891_v55, %v2890_v58 }
 0x243   : > { %6450 = vmatprep.mubr.msk.bf16.mxu0 %vm2573_vm9, %v4244_v46  ;;  %v4186_v63 = vsel %vm2442_vm6, %v10485_v11, %v3978_v34 }
 0x244   : > { %6451 = vmatmul.mubr.msk.bf16.gmra.mrb[56].mxu0 %vm2573_vm9, %v4246_v42 }
 0x245   : > { %v3976_v18 = vpop.permute.xlu0 %3975 }
 0x246   : > { %v6420_v16 = vpop.f32.mrb[28].mxu1  ;;  %v4058_v4 = vpop.permute.xlu1 %4057  ;;  %v4183_v10 = vsel %vm2442_vm6, %v10486_v7, %v3976_v18 }
 0x247   : > { %v3554_v45 = vmul.f32 %v6420_v16, %v6420_v16  ;;  %v3439_v6 = vpop.f32.mrb[29].mxu1  ;;  %v3513_v51 = vsel %vm2767_vm10, %v6420_v16, 0.0  ;;  %v4218_v22 = vsel %vm2491_vm7, %v4186_v63, %v4058_v4 }
 0x248   : > { %v3509_v3 = vsel %vm2767_vm10, %v3439_v6, 0.0  ;;  %v3552_v60 = vmul.f32 %v3439_v6, %v3439_v6  ;;  %v6421_v54 = vpop.f32.mrb[30].mxu1 }
 0x249   : > { %v3510_v36 = vadd.f32 %v3509_v3, %v3508_v49  ;;  %v6599_v19 = vpack.i.bf16 %v6421_v54, %v6420_v16  ;;  %v4056_v37 = vpop.permute.xlu0 %4055  ;;  %v3442_v28 = vpop.f32.mrb[31].mxu1  ;;  %v3555_v0 = vmul.f32 %v6421_v54, %v6421_v54  ;;  %v3615_v12 = vsel %vm2767_vm10, %v3554_v45, 0.0 }
 0x24a   : > { %v3611_v29 = vsel %vm2767_vm10, %v3552_v60, 0.0  ;;  %v6594_v17 = vpack.i.bf16 %v3442_v28, %v3439_v6  ;;  %v9289_v15 = vpop.f32.mrb[12].mxu0  ;;  %v3511_v43 = vsel %vm2767_vm10, %v3442_v28, 0.0  ;;  %v3553_v50 = vmul.f32 %v3442_v28, %v3442_v28  ;;  %v4138_v9 = vpop.permute.xlu1 %4137 }
 0x24b   : > { %v3612_v56 = vadd.f32 %v3611_v29, %v3610_v57  ;;  %v9293_v27 = vpop.f32.mrb[13].mxu0  ;;  %6600 = vrot.lane.b32.xlu1 %v6599_v19, %s6720_s16  ;;  %v3515_v41 = vsel %vm2767_vm10, %v6421_v54, 0.0  ;;  %v4216_v48 = vsel %vm2491_vm7, %v4183_v10, %v4056_v37  ;;  %v3512_v1 = vadd.f32 %v3511_v43, %v3510_v36 }
 0x24c   : > { %v2791_v39 = vsel %vm2767_vm10, %v9293_v27, 0.0  ;;  %v9300_v21 = vpop.f32.mrb[14].mxu0  ;;  %6595 = vrot.lane.b32.xlu0 %v6594_v17, %s6720_s16  ;;  %v3613_v49 = vsel %vm2767_vm10, %v3553_v50, 0.0  ;;  %v2795_v44 = vsel %vm2767_vm10, %v9289_v15, 0.0  ;;  %v2850_v32 = vmul.f32 %v9293_v27, %v9293_v27 }
 0x24d   : > { %v2792_v5 = vadd.f32 %v2791_v39, %v2790_v38  ;;  %v9308_v30 = vpop.f32.mrb[15].mxu0  ;;  %v4136_v57 = vpop.permute.xlu0 %4135  ;;  %v3617_v31 = vsel %vm2767_vm10, %v3555_v0, 0.0  ;;  %v3514_v40 = vadd.f32 %v3513_v51, %v3512_v1  ;;  %v3614_v47 = vadd.f32 %v3613_v49, %v3612_v56 }
 0x24e   : > { %v2852_v13 = vmul.f32 %v9289_v15, %v9289_v15  ;;  %v2893_v8 = vsel %vm2767_vm10, %v2850_v32, 0.0  ;;  %v2793_v58 = vsel %vm2767_vm10, %v9308_v30, 0.0  ;;  %v2851_v35 = vmul.f32 %v9308_v30, %v9308_v30 }
 0x24f   : > { %v4248_v42 = vsel %vm2524_vm8, %v4216_v48, %v4136_v57  ;;  %v9319_v38 = vadd.f32 %v3515_v41, %v3514_v40  ;;  %v3616_v55 = vadd.f32 %v3615_v12, %v3614_v47  ;;  %v2894_v46 = vadd.f32 %v2893_v8, %v2892_v59  ;;  %v6531_v18 = vpop.permute.xlu1 %6530 }
 0x250   : > { %v2853_v34 = vmul.f32 %v9300_v21, %v9300_v21  ;;  %6454 = vmatprep.mubr.msk.bf16.mxu0 %vm2573_vm9, %v4248_v42  ;;  %v2794_v16 = vadd.f32 %v2793_v58, %v2792_v5  ;;  %v2895_v4 = vsel %vm2767_vm10, %v2851_v35, 0.0  ;;  %v4250_v11 = vsel %vm2524_vm8, %v4218_v22, %v4138_v9 }
 0x251   : > { %v6533_v63 = vunpack.i.h.bf16 %v6531_v18  ;;  %v6526_v45 = vpop.permute.xlu0 %6525  ;;  %v9327_v6 = vadd.f32 %v3617_v31, %v3616_v55  ;;  %v2897_v3 = vsel %vm2767_vm10, %v2852_v13, 0.0  ;;  %v2896_v60 = vadd.f32 %v2895_v4, %v2894_v46  ;;  %6455 = vmatmul.mubr.msk.bf16.gmra.mrb[60].mxu0 %vm2573_vm9, %v4250_v11 }
 0x252   : > { %v6532_v59 = vunpack.i.l.bf16 %v6531_v18  ;;  %v2796_v54 = vadd.f32 %v2795_v44, %v2794_v16  ;;  %v6528_v10 = vunpack.i.h.bf16 %v6526_v45  ;;  %v6527_v51 = vunpack.i.l.bf16 %v6526_v45 }
 0x253   : > { %v3757_v7 = vsel %vm2767_vm10, %v9131_v62, %v6533_v63  ;;  %v2797_v36 = vsel %vm2767_vm10, %v9300_v21, 0.0  ;;  %v2899_v19 = vsel %vm2767_vm10, %v2853_v34, 0.0  ;;  %v2898_v37 = vadd.f32 %v2897_v3, %v2896_v60 }
 0x254   : > { %v6217_v28 = vpack.c.bf16 %v3757_v7, %v3757_v7  ;;  %v2798_v29 = vadd.f32 %v2797_v36, %v2796_v54  ;;  %v3756_v0 = vsel %vm2767_vm10, %v9123_v61, %v6532_v59  ;;  %v3755_v17 = vsel %vm2767_vm10, %v9139_v23, %v6528_v10 }
 0x255   : > { %v3754_v62 = vsel %vm2767_vm10, %v9126_v33, %v6527_v51  ;;  %v2900_v12 = vadd.f32 %v2899_v19, %v2898_v37  ;;  %v6216_v56 = vpack.c.bf16 %v3756_v0, %v3756_v0  ;;  %v6215_v41 = vpack.c.bf16 %v3755_v17, %v3755_v17 }
 0x256   : > { %v6464_v22 = vpop.f32.mrb[32].mxu1  ;;  %3918 = vst.msk [vmem:[%s9334_s20 + $0x14] sm:$0xf] %vm3914_vm11, %v6217_v28  ;;  %v6214_v48 = vpack.c.bf16 %v3754_v62, %v3754_v62 }
 0x257   : > { %v5171_v43 = vmul.f32 %v6464_v22, %v6464_v22  ;;  %v4972_v50 = vpop.f32.mrb[33].mxu1  ;;  %3917 = vst.msk [vmem:[%s9334_s20 + $0x10] sm:$0xf] %vm3914_vm11, %v6216_v56  ;;  %3916 = vst.msk [vmem:[%s9334_s20 + $0x4] sm:$0xf] %vm3914_vm11, %v6215_v41  ;;  %v5102_v33 = vsel %vm2767_vm10, %v6464_v22, 0.0 }
 0x258   : > { %v5169_v1 = vmul.f32 %v4972_v50, %v4972_v50  ;;  %v6465_v39 = vpop.f32.mrb[34].mxu1  ;;  %3915 = vst.msk [vmem:[%s9334_s20] sm:$0xf] %vm3914_vm11, %v6214_v48  ;;  %v5099_v32 = vsel %vm2767_vm10, %v4972_v50, 0.0 }
 0x259   : > { %v6604_v61 = vpack.i.bf16 %v6465_v39, %v6464_v22  ;;  %v5172_v23 = vmul.f32 %v6465_v39, %v6465_v39  ;;  %v4975_v9 = vpop.f32.mrb[35].mxu1  ;;  %v5204_v5 = vsel %vm2767_vm10, %v5171_v43, 0.0  ;;  %v5104_v13 = vsel %vm2767_vm10, %v6465_v39, 0.0 }
 0x25a   : > { %v6609_v49 = vpack.i.bf16 %v4975_v9, %v4972_v50  ;;  %v9356_v44 = vpop.f32.mrb[16].mxu0  ;;  %v5100_v57 = vsel %vm2767_vm10, %v4975_v9, 0.0  ;;  %v5170_v31 = vmul.f32 %v4975_v9, %v4975_v9  ;;  %v5201_v47 = vsel %vm2767_vm10, %v5169_v1, 0.0 }
 0x25b   : > { %v9361_v40 = vpop.f32.mrb[17].mxu0  ;;  %6605 = vrot.lane.b32.xlu1 %v6604_v61, %s6720_s16  ;;  %v5101_v8 = vadd.f32 %v5100_v57, %v5099_v32  ;;  %v2856_v58 = vmul.f32 %v9356_v44, %v9356_v44  ;;  %v5206_v42 = vsel %vm2767_vm10, %v5172_v23, 0.0  ;;  %v2803_v11 = vsel %vm2767_vm10, %v9356_v44, 0.0 }
 0x25c   : > { %v9368_v35 = vpop.f32.mrb[18].mxu0  ;;  %6610 = vrot.lane.b32.xlu0 %v6609_v49, %s6720_s16  ;;  %v5202_v55 = vsel %vm2767_vm10, %v5170_v31, 0.0  ;;  %v2799_v46 = vsel %vm2767_vm10, %v9361_v40, 0.0  ;;  %v2854_v34 = vmul.f32 %v9361_v40, %v9361_v40 }
 0x25d   : > { %v9377_v18 = vpop.f32.mrb[19].mxu0  ;;  %v5103_v16 = vadd.f32 %v5102_v33, %v5101_v8  ;;  %v5203_v4 = vadd.f32 %v5202_v55, %v5201_v47  ;;  %v2805_v63 = vsel %vm2767_vm10, %v9368_v35, 0.0  ;;  %v6541_v45 = vpop.permute.xlu1 %6540  ;;  %v2905_v3 = vsel %vm2767_vm10, %v2856_v58, 0.0 }
 0x25e   : > { %v2800_v60 = vadd.f32 %v2799_v46, %v2798_v29  ;;  %v2901_v59 = vsel %vm2767_vm10, %v2854_v34, 0.0  ;;  %v2801_v54 = vsel %vm2767_vm10, %v9377_v18, 0.0  ;;  %v6536_v7 = vpop.permute.xlu0 %6535  ;;  %v2855_v36 = vmul.f32 %v9377_v18, %v9377_v18 }
 0x25f   : > { %v5205_v10 = vadd.f32 %v5204_v5, %v5203_v4  ;;  %v2902_v51 = vadd.f32 %v2901_v59, %v2900_v12  ;;  %v5105_v19 = vadd.f32 %v5104_v13, %v5103_v16  ;;  %v2857_v37 = vmul.f32 %v9368_v35, %v9368_v35 }
 0x260   : > { %v2802_v28 = vadd.f32 %v2801_v54, %v2800_v60  ;;  %v6543_v0 = vunpack.i.h.bf16 %v6541_v45  ;;  %v6542_v17 = vunpack.i.l.bf16 %v6541_v45  ;;  %v2903_v29 = vsel %vm2767_vm10, %v2855_v36, 0.0 }
 0x261   : > { %v5207_v62 = vadd.f32 %v5206_v42, %v5205_v10  ;;  %v6538_v22 = vunpack.i.h.bf16 %v6536_v7  ;;  %v6537_v56 = vunpack.i.l.bf16 %v6536_v7  ;;  %v2904_v50 = vadd.f32 %v2903_v29, %v2902_v51 }
 0x262   : > { %v2804_v43 = vadd.f32 %v2803_v11, %v2802_v28  ;;  %v3761_v12 = vsel %vm2767_vm10, %v9188_v53, %v6543_v0  ;;  %v3760_v41 = vsel %vm2767_vm10, %v9178_v26, %v6542_v17  ;;  %v2907_v53 = vsel %vm2767_vm10, %v2857_v37, 0.0 }
 0x263   : > { %v6221_v48 = vpack.c.bf16 %v3761_v12, %v3761_v12  ;;  %v6220_v1 = vpack.c.bf16 %v3760_v41, %v3760_v41  ;;  %v3759_v39 = vsel %vm2767_vm10, %v9196_v2, %v6538_v22  ;;  %v3758_v61 = vsel %vm2767_vm10, %v9180_v52, %v6537_v56 }
 0x264   : > { %v2906_v23 = vadd.f32 %v2905_v3, %v2904_v50  ;;  %v6219_v9 = vpack.c.bf16 %v3759_v39, %v3759_v39  ;;  %v6218_v33 = vpack.c.bf16 %v3758_v61, %v3758_v61  ;;  %v2806_v49 = vadd.f32 %v2805_v63, %v2804_v43 }
 0x265   : > { %3922 = vst.msk [vmem:[%s9334_s20 + $0x34] sm:$0xf] %vm3914_vm11, %v6221_v48  ;;  %3921 = vst.msk [vmem:[%s9334_s20 + $0x30] sm:$0xf] %vm3914_vm11, %v6220_v1 }
 0x266   : > { %v6468_v32 = vpop.f32.mrb[36].mxu1  ;;  %3920 = vst.msk [vmem:[%s9334_s20 + $0x24] sm:$0xf] %vm3914_vm11, %v6219_v9  ;;  %3919 = vst.msk [vmem:[%s9334_s20 + $0x20] sm:$0xf] %vm3914_vm11, %v6218_v33  ;;  %v2908_v52 = vadd.f32 %v2907_v53, %v2906_v23 }
 0x267   : > { %v6551_v5 = vpop.permute.xlu1 %6550  ;;  %v5175_v31 = vmul.f32 %v6468_v32, %v6468_v32  ;;  %v4988_v2 = vpop.f32.mrb[37].mxu1  ;;  %v5110_v47 = vsel %vm2767_vm10, %v6468_v32, 0.0 }
 0x268   : > { %v6553_v26 = vunpack.i.h.bf16 %v6551_v5  ;;  %v6552_v57 = vunpack.i.l.bf16 %v6551_v5  ;;  %v5106_v13 = vsel %vm2767_vm10, %v4988_v2, 0.0  ;;  %v5173_v8 = vmul.f32 %v4988_v2, %v4988_v2  ;;  %v6469_v58 = vpop.f32.mrb[38].mxu1 }
 0x269   : > { %v5212_v55 = vsel %vm2767_vm10, %v5175_v31, 0.0  ;;  %v5107_v46 = vadd.f32 %v5106_v13, %v5105_v19  ;;  %v6614_v34 = vpack.i.bf16 %v6469_v58, %v6468_v32  ;;  %v4991_v16 = vpop.f32.mrb[39].mxu1  ;;  %v5176_v63 = vmul.f32 %v6469_v58, %v6469_v58 }
 0x26a   : > { %v3765_v42 = vsel %vm2767_vm10, %v9243_v24, %v6553_v26  ;;  %v3764_v4 = vsel %vm2767_vm10, %v9233_v25, %v6552_v57  ;;  %v5208_v11 = vsel %vm2767_vm10, %v5173_v8, 0.0  ;;  %v6619_v45 = vpack.i.bf16 %v4991_v16, %v4988_v2 }
 0x26b   : > { %v5108_v3 = vsel %vm2767_vm10, %v4991_v16, 0.0  ;;  %v5209_v60 = vadd.f32 %v5208_v11, %v5207_v62  ;;  %v5174_v54 = vmul.f32 %v4991_v16, %v4991_v16  ;;  %v9418_v7 = vpop.f32.mrb[20].mxu0  ;;  %6615 = vrot.lane.b32.xlu1 %v6614_v34, %s6720_s16  ;;  %v6225_v24 = vpack.c.bf16 %v3765_v42, %v3765_v42  ;;  %v6546_v62 = vpop.permute.xlu0 %6545 }
 0x26c   : > { %v5109_v59 = vadd.f32 %v5108_v3, %v5107_v46  ;;  %v5112_v10 = vsel %vm2767_vm10, %v6469_v58, 0.0  ;;  %v5214_v51 = vsel %vm2767_vm10, %v5176_v63, 0.0  ;;  %v2860_v25 = vmul.f32 %v9418_v7, %v9418_v7  ;;  %v9425_v36 = vpop.f32.mrb[21].mxu0  ;;  %6620 = vrot.lane.b32.xlu0 %v6619_v45, %s6720_s16 }
 0x26d   : > { %v6224_v19 = vpack.c.bf16 %v3764_v4, %v3764_v4  ;;  %v5210_v28 = vsel %vm2767_vm10, %v5174_v54, 0.0  ;;  %v2807_v0 = vsel %vm2767_vm10, %v9425_v36, 0.0  ;;  %v2858_v17 = vmul.f32 %v9425_v36, %v9425_v36  ;;  %v9433_v29 = vpop.f32.mrb[22].mxu0  ;;  %3926 = vst.msk [vmem:[%s9334_s20 + $0x54] sm:$0xf] %vm3914_vm11, %v6225_v24 }
 0x26e   : > { %v5111_v37 = vadd.f32 %v5110_v47, %v5109_v59  ;;  %v5211_v22 = vadd.f32 %v5210_v28, %v5209_v60  ;;  %v2811_v56 = vsel %vm2767_vm10, %v9418_v7, 0.0  ;;  %v2913_v43 = vsel %vm2767_vm10, %v2860_v25, 0.0  ;;  %v9440_v12 = vpop.f32.mrb[23].mxu0 }
 0x26f   : > { %v2808_v50 = vadd.f32 %v2807_v0, %v2806_v49  ;;  %3925 = vst.msk [vmem:[%s9334_s20 + $0x50] sm:$0xf] %vm3914_vm11, %v6224_v19  ;;  %v2909_v41 = vsel %vm2767_vm10, %v2858_v17, 0.0  ;;  %v2813_v48 = vsel %vm2767_vm10, %v9433_v29, 0.0  ;;  %v2809_v1 = vsel %vm2767_vm10, %v9440_v12, 0.0 }
 0x270   : > { %v2859_v39 = vmul.f32 %v9440_v12, %v9440_v12  ;;  %v5213_v61 = vadd.f32 %v5212_v55, %v5211_v22  ;;  %v2910_v23 = vadd.f32 %v2909_v41, %v2908_v52  ;;  %v6548_v33 = vunpack.i.h.bf16 %v6546_v62 }
 0x271   : > { %v2810_v9 = vadd.f32 %v2809_v1, %v2808_v50  ;;  %v2861_v49 = vmul.f32 %v9433_v29, %v9433_v29  ;;  %v6547_v53 = vunpack.i.l.bf16 %v6546_v62  ;;  %v5113_v32 = vadd.f32 %v5112_v10, %v5111_v37 }
 0x272   : > { %v2911_v5 = vsel %vm2767_vm10, %v2859_v39, 0.0  ;;  %v3763_v2 = vsel %vm2767_vm10, %v9251_v14, %v6548_v33  ;;  %v5215_v47 = vadd.f32 %v5214_v51, %v5213_v61 }
 0x273   : > { %v2812_v57 = vadd.f32 %v2811_v56, %v2810_v9  ;;  %v2912_v31 = vadd.f32 %v2911_v5, %v2910_v23  ;;  %v6223_v52 = vpack.c.bf16 %v3763_v2, %v3763_v2  ;;  %v3762_v8 = vsel %vm2767_vm10, %v9237_v20, %v6547_v53 }
 0x274   : > { %v6222_v46 = vpack.c.bf16 %v3762_v8, %v3762_v8  ;;  %v2915_v4 = vsel %vm2767_vm10, %v2861_v49, 0.0 }
 0x275   : > { %v2914_v55 = vadd.f32 %v2913_v43, %v2912_v31  ;;  %v2814_v34 = vadd.f32 %v2813_v48, %v2812_v57  ;;  %3924 = vst.msk [vmem:[%s9334_s20 + $0x44] sm:$0xf] %vm3914_vm11, %v6223_v52 }
 0x276   : > { %v6561_v26 = vpop.permute.xlu1 %6560  ;;  %3923 = vst.msk [vmem:[%s9334_s20 + $0x40] sm:$0xf] %vm3914_vm11, %v6222_v46 }
 0x277   : > { %v6556_v13 = vpop.permute.xlu0 %6555  ;;  %v6563_v58 = vunpack.i.h.bf16 %v6561_v26  ;;  %v6562_v42 = vunpack.i.l.bf16 %v6561_v26  ;;  %v2916_v20 = vadd.f32 %v2915_v4, %v2914_v55  ;;  %v6472_v59 = vpop.f32.mrb[40].mxu1 }
 0x278   : > { %v6558_v16 = vunpack.i.h.bf16 %v6556_v13  ;;  %v6557_v63 = vunpack.i.l.bf16 %v6556_v13  ;;  %v5179_v17 = vmul.f32 %v6472_v59, %v6472_v59  ;;  %v5118_v43 = vsel %vm2767_vm10, %v6472_v59, 0.0 }
 0x279   : > { %v3769_v14 = vsel %vm2767_vm10, %v9300_v21, %v6563_v58  ;;  %v3768_v11 = vsel %vm2767_vm10, %v9289_v15, %v6562_v42  ;;  %v5004_v21 = vpop.f32.mrb[41].mxu1 }
 0x27a   : > { %v6229_v45 = vpack.c.bf16 %v3769_v14, %v3769_v14  ;;  %v6228_v3 = vpack.c.bf16 %v3768_v11, %v3768_v11  ;;  %v3767_v60 = vsel %vm2767_vm10, %v9308_v30, %v6558_v16  ;;  %v3766_v24 = vsel %vm2767_vm10, %v9293_v27, %v6557_v63  ;;  %v6473_v25 = vpop.f32.mrb[42].mxu1 }
 0x27b   : > { %v6227_v54 = vpack.c.bf16 %v3767_v60, %v3767_v60  ;;  %v6226_v15 = vpack.c.bf16 %v3766_v24, %v3766_v24  ;;  %v5114_v10 = vsel %vm2767_vm10, %v5004_v21, 0.0  ;;  %v5177_v51 = vmul.f32 %v5004_v21, %v5004_v21  ;;  %v5007_v30 = vpop.f32.mrb[43].mxu1 }
 0x27c   : > { %3930 = vst.msk [vmem:[%s9334_s20 + $0x74] sm:$0xf] %vm3914_vm11, %v6229_v45  ;;  %3929 = vst.msk [vmem:[%s9334_s20 + $0x70] sm:$0xf] %vm3914_vm11, %v6228_v3  ;;  %v5115_v19 = vadd.f32 %v5114_v10, %v5113_v32  ;;  %v6624_v37 = vpack.i.bf16 %v6473_v25, %v6472_v59  ;;  %v6629_v27 = vpack.i.bf16 %v5007_v30, %v5004_v21  ;;  %v5116_v0 = vsel %vm2767_vm10, %v5007_v30, 0.0 }
 0x27d   : > { %3928 = vst.msk [vmem:[%s9334_s20 + $0x64] sm:$0xf] %vm3914_vm11, %v6227_v54  ;;  %3927 = vst.msk [vmem:[%s9334_s20 + $0x60] sm:$0xf] %vm3914_vm11, %v6226_v15  ;;  %v5216_v28 = vsel %vm2767_vm10, %v5177_v51, 0.0  ;;  %v5178_v56 = vmul.f32 %v5007_v30, %v5007_v30  ;;  %v5180_v50 = vmul.f32 %v6473_v25, %v6473_v25  ;;  %v5120_v1 = vsel %vm2767_vm10, %v6473_v25, 0.0 }
 0x27e   : > { %v5217_v62 = vadd.f32 %v5216_v28, %v5215_v47  ;;  %v5117_v22 = vadd.f32 %v5116_v0, %v5115_v19  ;;  %6625 = vrot.lane.b32.xlu1 %v6624_v37, %s6720_s16  ;;  %6630 = vrot.lane.b32.xlu0 %v6629_v27, %s6720_s16  ;;  %v5220_v23 = vsel %vm2767_vm10, %v5179_v17, 0.0 }
 0x27f   : > { %v5218_v48 = vsel %vm2767_vm10, %v5178_v56, 0.0  ;;  %v9487_v61 = vpop.f32.mrb[24].mxu0  ;;  %v5222_v57 = vsel %vm2767_vm10, %v5180_v50, 0.0  ;;  %v3619_v50 = vrot.slane %v9327_v6, 4 }
 0x280   : > { %v5119_v41 = vadd.f32 %v5118_v43, %v5117_v22  ;;  %v5219_v39 = vadd.f32 %v5218_v48, %v5217_v62  ;;  %v2864_v9 = vmul.f32 %v9487_v61, %v9487_v61  ;;  %v9492_v33 = vpop.f32.mrb[25].mxu0  ;;  %v2819_v31 = vsel %vm2767_vm10, %v9487_v61, 0.0 }
 0x281   : > { %v2815_v53 = vsel %vm2767_vm10, %v9492_v33, 0.0  ;;  %v2862_v32 = vmul.f32 %v9492_v33, %v9492_v33  ;;  %v9498_v26 = vpop.f32.mrb[26].mxu0 }
 0x282   : > { %v5121_v49 = vadd.f32 %v5120_v1, %v5119_v41  ;;  %v5221_v5 = vadd.f32 %v5220_v23, %v5219_v39  ;;  %v2921_v2 = vsel %vm2767_vm10, %v2864_v9, 0.0  ;;  %v2816_v47 = vadd.f32 %v2815_v53, %v2814_v34  ;;  %v9504_v13 = vpop.f32.mrb[27].mxu0 }
 0x283   : > { %v2917_v8 = vsel %vm2767_vm10, %v2862_v32, 0.0  ;;  %v2817_v58 = vsel %vm2767_vm10, %v9504_v13, 0.0  ;;  %v2863_v42 = vmul.f32 %v9504_v13, %v9504_v13  ;;  %v2865_v16 = vmul.f32 %v9498_v26, %v9498_v26 }
 0x284   : > { %v5223_v55 = vadd.f32 %v5222_v57, %v5221_v5  ;;  %v2918_v46 = vadd.f32 %v2917_v8, %v2916_v20  ;;  %v2818_v4 = vadd.f32 %v2817_v58, %v2816_v47  ;;  %v2821_v60 = vsel %vm2767_vm10, %v9498_v26, 0.0 }
 0x285   : > { %v2919_v34 = vsel %vm2767_vm10, %v2863_v42, 0.0  ;;  %v2923_v30 = vsel %vm2767_vm10, %v2865_v16, 0.0 }
 0x286   : > { %v6571_v52 = vpop.permute.xlu1 %6570  ;;  %v2820_v59 = vadd.f32 %v2819_v31, %v2818_v4  ;;  %v2920_v54 = vadd.f32 %v2919_v34, %v2918_v46 }
 0x287   : > { %v6573_v14 = vunpack.i.h.bf16 %v6571_v52  ;;  %v6566_v11 = vpop.permute.xlu0 %6565  ;;  %v6572_v63 = vunpack.i.l.bf16 %v6571_v52  ;;  %v3620_v52 = vadd.f32 %v3619_v50, %v9327_v6 }
 0x288   : > { %v6568_v45 = vunpack.i.h.bf16 %v6566_v11  ;;  %v6567_v3 = vunpack.i.l.bf16 %v6566_v11  ;;  %v2922_v51 = vadd.f32 %v2921_v2, %v2920_v54  ;;  %v2822_v28 = vadd.f32 %v2821_v60, %v2820_v59 }
 0x289   : > { %v3773_v20 = vsel %vm2767_vm10, %v9368_v35, %v6573_v14  ;;  %v3772_v21 = vsel %vm2767_vm10, %v9356_v44, %v6572_v63  ;;  %v3517_v35 = vrot.slane %v9319_v38, 4  ;;  %v3621_v50 = vrot.slane %v3620_v52, 2 }
 0x28a   : > { %v6233_v24 = vpack.c.bf16 %v3773_v20, %v3773_v20  ;;  %v3771_v15 = vsel %vm2767_vm10, %v9377_v18, %v6568_v45  ;;  %v3770_v10 = vsel %vm2767_vm10, %v9361_v40, %v6567_v3  ;;  %v6232_v25 = vpack.c.bf16 %v3772_v21, %v3772_v21 }
 0x28b   : > { %v6231_v19 = vpack.c.bf16 %v3771_v15, %v3771_v15  ;;  %v6230_v37 = vpack.c.bf16 %v3770_v10, %v3770_v10  ;;  %v2924_v44 = vadd.f32 %v2923_v30, %v2922_v51  ;;  %v6476_v18 = vpop.f32.mrb[44].mxu1  ;;  %v9536_v62 = vadd.f32 %v3517_v35, %v9319_v38 }
 0x28c   : > { %3934 = vst.msk [vmem:[%s9334_s20 + $0x94] sm:$0xf] %vm3914_vm11, %v6233_v24  ;;  %3933 = vst.msk [vmem:[%s9334_s20 + $0x90] sm:$0xf] %vm3914_vm11, %v6232_v25  ;;  %v5020_v40 = vpop.f32.mrb[45].mxu1  ;;  %v5183_v39 = vmul.f32 %v6476_v18, %v6476_v18  ;;  %v5126_v53 = vsel %vm2767_vm10, %v6476_v18, 0.0 }
 0x28d   : > { %3932 = vst.msk [vmem:[%s9334_s20 + $0x84] sm:$0xf] %vm3914_vm11, %v6231_v19  ;;  %3931 = vst.msk [vmem:[%s9334_s20 + $0x80] sm:$0xf] %vm3914_vm11, %v6230_v37  ;;  %v5122_v27 = vsel %vm2767_vm10, %v5020_v40, 0.0  ;;  %v5181_v0 = vmul.f32 %v5020_v40, %v5020_v40  ;;  %v6477_v17 = vpop.f32.mrb[46].mxu1 }
 0x28e   : > { %v5123_v22 = vadd.f32 %v5122_v27, %v5121_v49  ;;  %v6634_v56 = vpack.i.bf16 %v6477_v17, %v6476_v18  ;;  %v5023_v43 = vpop.f32.mrb[47].mxu1  ;;  %v5184_v38 = vmul.f32 %v6477_v17, %v6477_v17  ;;  %v5128_v57 = vsel %vm2767_vm10, %v6477_v17, 0.0 }
 0x28f   : > { %v5224_v41 = vsel %vm2767_vm10, %v5181_v0, 0.0  ;;  %v6639_v48 = vpack.i.bf16 %v5023_v43, %v5020_v40  ;;  %v5124_v1 = vsel %vm2767_vm10, %v5023_v43, 0.0  ;;  %v5182_v5 = vmul.f32 %v5023_v43, %v5023_v43 }
 0x290   : > { %v5225_v23 = vadd.f32 %v5224_v41, %v5223_v55  ;;  %v5125_v9 = vadd.f32 %v5124_v1, %v5123_v22  ;;  %6635 = vrot.lane.b32.xlu1 %v6634_v56, %s6720_s16  ;;  %v3519_v47 = vrot.slane %v9536_v62, 2  ;;  %v5228_v8 = vsel %vm2767_vm10, %v5183_v39, 0.0 }
 0x291   : > { %6640 = vrot.lane.b32.xlu0 %v6639_v48, %s6720_s16  ;;  %v5226_v32 = vsel %vm2767_vm10, %v5182_v5, 0.0  ;;  %v5230_v34 = vsel %vm2767_vm10, %v5184_v38, 0.0 }
 0x292   : > { %v5127_v49 = vadd.f32 %v5126_v53, %v5125_v9  ;;  %v5227_v31 = vadd.f32 %v5226_v32, %v5225_v23  ;;  %v3622_v23 = vadd.f32 %v3621_v50, %v3620_v52 }
 0x293   : > { %v9546_v2 = vpop.f32.mrb[28].mxu0 }
 0x294   : > { %v9551_v58 = vpop.f32.mrb[29].mxu0  ;;  %v5129_v55 = vadd.f32 %v5128_v57, %v5127_v49  ;;  %v5229_v46 = vadd.f32 %v5228_v8, %v5227_v31  ;;  %v2827_v6 = vsel %vm2767_vm10, %v9546_v2, 0.0  ;;  %v2868_v63 = vmul.f32 %v9546_v2, %v9546_v2 }
 0x295   : > { %v2823_v16 = vsel %vm2767_vm10, %v9551_v58, 0.0  ;;  %v2866_v4 = vmul.f32 %v9551_v58, %v9551_v58  ;;  %v9557_v14 = vpop.f32.mrb[30].mxu0 }
 0x296   : > { %v6581_v42 = vpop.permute.xlu1 %6580  ;;  %v2824_v45 = vadd.f32 %v2823_v16, %v2822_v28  ;;  %v9564_v3 = vpop.f32.mrb[31].mxu0  ;;  %v2869_v15 = vmul.f32 %v9557_v14, %v9557_v14  ;;  %v2929_v28 = vsel %vm2767_vm10, %v2868_v63, 0.0 }
 0x297   : > { %v6583_v11 = vunpack.i.h.bf16 %v6581_v42  ;;  %v6576_v60 = vpop.permute.xlu0 %6575  ;;  %v2925_v59 = vsel %vm2767_vm10, %v2866_v4, 0.0  ;;  %v2825_v54 = vsel %vm2767_vm10, %v9564_v3, 0.0  ;;  %v2867_v20 = vmul.f32 %v9564_v3, %v9564_v3 }
 0x298   : > { %v2926_v21 = vadd.f32 %v2925_v59, %v2924_v44  ;;  %v2826_v10 = vadd.f32 %v2825_v54, %v2824_v45  ;;  %v6582_v19 = vunpack.i.l.bf16 %v6581_v42  ;;  %v6578_v37 = vunpack.i.h.bf16 %v6576_v60 }
 0x299   : > { %v3777_v24 = vsel %vm2767_vm10, %v9433_v29, %v6583_v11  ;;  %v2927_v25 = vsel %vm2767_vm10, %v2867_v20, 0.0  ;;  %v6577_v30 = vunpack.i.l.bf16 %v6576_v60  ;;  %v5231_v29 = vadd.f32 %v5230_v34, %v5229_v46 }
 0x29a   : > { %v6237_v51 = vpack.c.bf16 %v3777_v24, %v3777_v24  ;;  %v2828_v35 = vadd.f32 %v2827_v6, %v2826_v10  ;;  %v2928_v18 = vadd.f32 %v2927_v25, %v2926_v21  ;;  %v2829_v44 = vsel %vm2767_vm10, %v9557_v14, 0.0 }
 0x29b   : > { %v3776_v40 = vsel %vm2767_vm10, %v9418_v7, %v6582_v19  ;;  %v3775_v27 = vsel %vm2767_vm10, %v9440_v12, %v6578_v37  ;;  %v3774_v0 = vsel %vm2767_vm10, %v9425_v36, %v6577_v30  ;;  %v2931_v41 = vsel %vm2767_vm10, %v2869_v15, 0.0 }
 0x29c   : > { %3938 = vst.msk [vmem:[%s9334_s20 + $0xb4] sm:$0xf] %vm3914_vm11, %v6237_v51  ;;  %v2830_v17 = vadd.f32 %v2829_v44, %v2828_v35  ;;  %v2930_v22 = vadd.f32 %v2929_v28, %v2928_v18  ;;  %v6236_v56 = vpack.c.bf16 %v3776_v40, %v3776_v40  ;;  %v6235_v43 = vpack.c.bf16 %v3775_v27, %v3775_v27 }
 0x29d   : > { %v6234_v48 = vpack.c.bf16 %v3774_v0, %v3774_v0  ;;  %v3520_v7 = vadd.f32 %v3519_v47, %v9536_v62  ;;  %v3623_v46 = vrot.slane %v3622_v23, 1 }
 0x29e   : > { %v2831_v1 = vrot.slane %v2830_v17, 4  ;;  %v2932_v39 = vadd.f32 %v2931_v41, %v2930_v22  ;;  %3937 = vst.msk [vmem:[%s9334_s20 + $0xb0] sm:$0xf] %vm3914_vm11, %v6236_v56  ;;  %3936 = vst.msk [vmem:[%s9334_s20 + $0xa4] sm:$0xf] %vm3914_vm11, %v6235_v43 }
 0x29f   : > { %3935 = vst.msk [vmem:[%s9334_s20 + $0xa0] sm:$0xf] %vm3914_vm11, %v6234_v48  ;;  %v3521_v38 = vrot.slane %v3520_v7, 1  ;;  %v3624_v21 = vadd.f32 %v3623_v46, %v3622_v23 }
 0x2a0   : > { %v2832_v12 = vadd.f32 %v2831_v1, %v2830_v17  ;;  %v2933_v36 = vrot.slane %v2932_v39, 4 }
 0x2a1   : > { %v3522_v59 = vadd.f32 %v3521_v38, %v3520_v7 }
 0x2a2   : > { %v2833_v9 = vrot.slane %v2832_v12, 2  ;;  %v2934_v5 = vadd.f32 %v2933_v36, %v2932_v39  ;;  %v6480_v53 = vpop.f32.mrb[48].mxu1 }
 0x2a3   : > { %v5036_v49 = vpop.f32.mrb[49].mxu1  ;;  %v5187_v34 = vmul.f32 %v6480_v53, %v6480_v53 }
 0x2a4   : > { %v2834_v32 = vadd.f32 %v2833_v9, %v2832_v12  ;;  %v2935_v57 = vrot.slane %v2934_v5, 2  ;;  %v5130_v31 = vsel %vm2767_vm10, %v5036_v49, 0.0  ;;  %v5185_v8 = vmul.f32 %v5036_v49, %v5036_v49  ;;  %v6481_v42 = vpop.f32.mrb[50].mxu1 }
 0x2a5   : > { %v5131_v16 = vadd.f32 %v5130_v31, %v5129_v55  ;;  %v6644_v4 = vpack.i.bf16 %v6481_v42, %v6480_v53  ;;  %v5039_v62 = vpop.f32.mrb[51].mxu1  ;;  %v5134_v55 = vsel %vm2767_vm10, %v6480_v53, 0.0  ;;  %v5188_v15 = vmul.f32 %v6481_v42, %v6481_v42 }
 0x2a6   : > { %v2835_v47 = vrot.slane %v2834_v32, 1  ;;  %v2936_v11 = vadd.f32 %v2935_v57, %v2934_v5  ;;  %v5232_v52 = vsel %vm2767_vm10, %v5185_v8, 0.0  ;;  %v6649_v63 = vpack.i.bf16 %v5039_v62, %v5036_v49 }
 0x2a7   : > { %v5233_v6 = vadd.f32 %v5232_v52, %v5231_v29  ;;  %v5132_v45 = vsel %vm2767_vm10, %v5039_v62, 0.0  ;;  %v5186_v60 = vmul.f32 %v5039_v62, %v5039_v62  ;;  %6645 = vrot.lane.b32.xlu1 %v6644_v4, %s6720_s16  ;;  %v5236_v35 = vsel %vm2767_vm10, %v5187_v34, 0.0 }
 0x2a8   : > { %v2836_v54 = vadd.f32 %v2835_v47, %v2834_v32  ;;  %v2937_v20 = vrot.slane %v2936_v11, 1  ;;  %v5133_v24 = vadd.f32 %v5132_v45, %v5131_v16  ;;  %6650 = vrot.lane.b32.xlu0 %v6649_v63, %s6720_s16  ;;  %v5136_v18 = vsel %vm2767_vm10, %v6481_v42, 0.0 }
 0x2a9   : > { %v5234_v10 = vsel %vm2767_vm10, %v5186_v60, 0.0  ;;  %v5238_v43 = vsel %vm2767_vm10, %v5188_v15, 0.0 }
 0x2aa   : > { %v6591_v51 = vpop.permute.xlu1 %6590  ;;  %v2938_v25 = vadd.f32 %v2937_v20, %v2936_v11  ;;  %v9602_v19 = vadd.f32 %v3522_v59, %v2836_v54  ;;  %v5135_v37 = vadd.f32 %v5134_v55, %v5133_v24  ;;  %v5235_v30 = vadd.f32 %v5234_v10, %v5233_v6 }
 0x2ab   : > { %v6586_v28 = vpop.permute.xlu0 %6585  ;;  %v9606_v29 = vpop.f32.mrb[32].mxu0  ;;  %v6593_v44 = vunpack.i.h.bf16 %v6591_v51  ;;  %v6592_v40 = vunpack.i.l.bf16 %v6591_v51 }
 0x2ac   : > { %v9608_v27 = vadd.f32 %v3624_v21, %v2938_v25  ;;  %v5237_v0 = vadd.f32 %v5236_v35, %v5235_v30  ;;  %v9610_v17 = vpop.f32.mrb[33].mxu0  ;;  %v6588_v22 = vunpack.i.h.bf16 %v6586_v28  ;;  %v6587_v56 = vunpack.i.l.bf16 %v6586_v28 }
 0x2ad   : > { %v4531_v50 = vmul.f32 %v9610_v17, %v9610_v17  ;;  %v9615_v41 = vpop.f32.mrb[34].mxu0  ;;  %v3781_v48 = vsel %vm2767_vm10, %v9498_v26, %v6593_v44  ;;  %v3780_v1 = vsel %vm2767_vm10, %v9487_v61, %v6592_v40  ;;  %v4464_v39 = vsel %vm2767_vm10, %v9606_v29, 0.0 }
 0x2ae   : > { %v4533_v7 = vmul.f32 %v9606_v29, %v9606_v29  ;;  %v4461_v12 = vsel %vm2767_vm10, %v9610_v17, 0.0  ;;  %v6241_v36 = vpack.c.bf16 %v3781_v48, %v3781_v48  ;;  %v9627_v23 = vpop.f32.mrb[35].mxu0  ;;  %v4534_v9 = vmul.f32 %v9615_v41, %v9615_v41 }
 0x2af   : > { %v6240_v26 = vpack.c.bf16 %v3780_v1, %v3780_v1  ;;  %v4462_v5 = vsel %vm2767_vm10, %v9627_v23, 0.0  ;;  %v4532_v61 = vmul.f32 %v9627_v23, %v9627_v23  ;;  %v4563_v53 = vsel %vm2767_vm10, %v4531_v50, 0.0 }
 0x2b0   : > { %3942 = vst.msk [vmem:[%s9334_s20 + $0xd4] sm:$0xf] %vm3914_vm11, %v6241_v36  ;;  %v4463_v38 = vadd.f32 %v4462_v5, %v4461_v12  ;;  %v3779_v49 = vsel %vm2767_vm10, %v9504_v13, %v6588_v22  ;;  %v3778_v32 = vsel %vm2767_vm10, %v9492_v33, %v6587_v56  ;;  %v5137_v42 = vadd.f32 %v5136_v18, %v5135_v37 }
 0x2b1   : > { %3941 = vst.msk [vmem:[%s9334_s20 + $0xd0] sm:$0xf] %vm3914_vm11, %v6240_v26  ;;  %v4564_v57 = vsel %vm2767_vm10, %v4532_v61, 0.0  ;;  %v6239_v31 = vpack.c.bf16 %v3779_v49, %v3779_v49  ;;  %v6238_v8 = vpack.c.bf16 %v3778_v32, %v3778_v32  ;;  %v5239_v4 = vadd.f32 %v5238_v43, %v5237_v0 }
 0x2b2   : > { %v4465_v46 = vadd.f32 %v4464_v39, %v4463_v38  ;;  %v4565_v16 = vadd.f32 %v4564_v57, %v4563_v53  ;;  %v4566_v62 = vsel %vm2767_vm10, %v4533_v7, 0.0  ;;  %v4466_v47 = vsel %vm2767_vm10, %v9615_v41, 0.0 }
 0x2b3   : > { %3940 = vst.msk [vmem:[%s9334_s20 + $0xc4] sm:$0xf] %vm3914_vm11, %v6239_v31  ;;  %3939 = vst.msk [vmem:[%s9334_s20 + $0xc0] sm:$0xf] %vm3914_vm11, %v6238_v8  ;;  %v4568_v11 = vsel %vm2767_vm10, %v4534_v9, 0.0 }
 0x2b4   : > { %v4567_v33 = vadd.f32 %v4566_v62, %v4565_v16  ;;  %v4467_v13 = vadd.f32 %v4466_v47, %v4465_v46 }
 0x2b6   : > { %v4569_v34 = vadd.f32 %v4568_v11, %v4567_v33 }
 0x2ba   : > { %v6484_v52 = vpop.f32.mrb[52].mxu1 }
 0x2bb   : > { %v5052_v6 = vpop.f32.mrb[53].mxu1  ;;  %v5191_v21 = vmul.f32 %v6484_v52, %v6484_v52  ;;  %v5142_v35 = vsel %vm2767_vm10, %v6484_v52, 0.0 }
 0x2bc   : > { %v5138_v63 = vsel %vm2767_vm10, %v5052_v6, 0.0  ;;  %v5189_v45 = vmul.f32 %v5052_v6, %v5052_v6  ;;  %v6485_v60 = vpop.f32.mrb[54].mxu1 }
 0x2bd   : > { %v5139_v59 = vadd.f32 %v5138_v63, %v5137_v42  ;;  %v6654_v54 = vpack.i.bf16 %v6485_v60, %v6484_v52  ;;  %v6601_v20 = vpop.permute.xlu1 %6600  ;;  %v5055_v24 = vpop.f32.mrb[55].mxu1  ;;  %v5192_v50 = vmul.f32 %v6485_v60, %v6485_v60  ;;  %v5244_v7 = vsel %vm2767_vm10, %v5191_v21, 0.0 }
 0x2be   : > { %v5240_v55 = vsel %vm2767_vm10, %v5189_v45, 0.0  ;;  %v6603_v15 = vunpack.i.h.bf16 %v6601_v20  ;;  %v6602_v10 = vunpack.i.l.bf16 %v6601_v20  ;;  %v6596_v51 = vpop.permute.xlu0 %6595  ;;  %v6659_v37 = vpack.i.bf16 %v5055_v24, %v5052_v6 }
 0x2bf   : > { %v5241_v25 = vadd.f32 %v5240_v55, %v5239_v4  ;;  %v5140_v30 = vsel %vm2767_vm10, %v5055_v24, 0.0  ;;  %v5190_v28 = vmul.f32 %v5055_v24, %v5055_v24  ;;  %6655 = vrot.lane.b32.xlu1 %v6654_v54, %s6720_s16  ;;  %v6598_v43 = vunpack.i.h.bf16 %v6596_v51 }
 0x2c0   : > { %v3785_v18 = vsel %vm2767_vm10, %v9557_v14, %v6603_v15  ;;  %v3784_v44 = vsel %vm2767_vm10, %v9546_v2, %v6602_v10  ;;  %v5141_v40 = vadd.f32 %v5140_v30, %v5139_v59  ;;  %6660 = vrot.lane.b32.xlu0 %v6659_v37, %s6720_s16  ;;  %v6597_v39 = vunpack.i.l.bf16 %v6596_v51 }
 0x2c1   : > { %v6245_v0 = vpack.c.bf16 %v3785_v18, %v3785_v18  ;;  %v6244_v22 = vpack.c.bf16 %v3784_v44, %v3784_v44  ;;  %v5242_v56 = vsel %vm2767_vm10, %v5190_v28, 0.0  ;;  %v3783_v2 = vsel %vm2767_vm10, %v9564_v3, %v6598_v43 }
 0x2c2   : > { %v5143_v48 = vadd.f32 %v5142_v35, %v5141_v40  ;;  %v5243_v1 = vadd.f32 %v5242_v56, %v5241_v25  ;;  %v6243_v36 = vpack.c.bf16 %v3783_v2, %v3783_v2  ;;  %v3782_v9 = vsel %vm2767_vm10, %v9551_v58, %v6597_v39 }
 0x2c3   : > { %3946 = vst.msk [vmem:[%s9334_s20 + $0xf4] sm:$0xf] %vm3914_vm11, %v6245_v0  ;;  %3945 = vst.msk [vmem:[%s9334_s20 + $0xf0] sm:$0xf] %vm3914_vm11, %v6244_v22  ;;  %v9671_v14 = vpop.f32.mrb[36].mxu0  ;;  %v5144_v5 = vsel %vm2767_vm10, %v6485_v60, 0.0  ;;  %v6242_v61 = vpack.c.bf16 %v3782_v9, %v3782_v9 }
 0x2c4   : > { %v5245_v12 = vadd.f32 %v5244_v7, %v5243_v1  ;;  %v9675_v26 = vpop.f32.mrb[37].mxu0  ;;  %v5246_v49 = vsel %vm2767_vm10, %v5192_v50, 0.0  ;;  %3944 = vst.msk [vmem:[%s9334_s20 + $0xe4] sm:$0xf] %vm3914_vm11, %v6243_v36  ;;  %v5145_v58 = vadd.f32 %v5144_v5, %v5143_v48  ;;  %v4537_v31 = vmul.f32 %v9671_v14, %v9671_v14 }
 0x2c5   : > { %v4468_v53 = vsel %vm2767_vm10, %v9675_v26, 0.0  ;;  %v4535_v38 = vmul.f32 %v9675_v26, %v9675_v26  ;;  %v9682_v3 = vpop.f32.mrb[38].mxu0  ;;  %3943 = vst.msk [vmem:[%s9334_s20 + $0xe0] sm:$0xf] %vm3914_vm11, %v6242_v61  ;;  %v4472_v47 = vsel %vm2767_vm10, %v9671_v14, 0.0 }
 0x2c6   : > { %v4469_v32 = vadd.f32 %v4468_v53, %v4467_v13  ;;  %v9687_v57 = vpop.f32.mrb[39].mxu0  ;;  %v5247_v62 = vadd.f32 %v5246_v49, %v5245_v12  ;;  %v4538_v33 = vmul.f32 %v9682_v3, %v9682_v3  ;;  %v4574_v6 = vsel %vm2767_vm10, %v4537_v31, 0.0 }
 0x2c7   : > { %v4570_v8 = vsel %vm2767_vm10, %v4535_v38, 0.0  ;;  %v4470_v42 = vsel %vm2767_vm10, %v9687_v57, 0.0  ;;  %v4536_v46 = vmul.f32 %v9687_v57, %v9687_v57  ;;  %v4474_v63 = vsel %vm2767_vm10, %v9682_v3, 0.0 }
 0x2c8   : > { %v4571_v16 = vadd.f32 %v4570_v8, %v4569_v34  ;;  %v4471_v4 = vadd.f32 %v4470_v42, %v4469_v32  ;;  %v4576_v34 = vsel %vm2767_vm10, %v4538_v33, 0.0 }
 0x2c9   : > { %v4572_v13 = vsel %vm2767_vm10, %v4536_v46, 0.0 }
 0x2ca   : > { %v4473_v11 = vadd.f32 %v4472_v47, %v4471_v4  ;;  %v4573_v52 = vadd.f32 %v4572_v13, %v4571_v16 }
 0x2cc   : > { %v4575_v45 = vadd.f32 %v4574_v6, %v4573_v52  ;;  %v4475_v60 = vadd.f32 %v4474_v63, %v4473_v11 }
 0x2cd   : > { %v6606_v59 = vpop.permute.xlu1 %6605 }
 0x2ce   : > { %v6608_v54 = vunpack.i.h.bf16 %v6606_v59  ;;  %v6607_v20 = vunpack.i.l.bf16 %v6606_v59  ;;  %v6611_v24 = vpop.permute.xlu0 %6610  ;;  %v4577_v21 = vadd.f32 %v4576_v34, %v4575_v45 }
 0x2cf   : > { %v6613_v55 = vunpack.i.h.bf16 %v6611_v24  ;;  %v6612_v15 = vunpack.i.l.bf16 %v6611_v24 }
 0x2d0   : > { %v5402_v10 = vsel %vm2767_vm10, %v9615_v41, %v6608_v54  ;;  %v5401_v51 = vsel %vm2767_vm10, %v9606_v29, %v6607_v20 }
 0x2d1   : > { %v6249_v25 = vpack.c.bf16 %v5402_v10, %v5402_v10  ;;  %v6248_v37 = vpack.c.bf16 %v5401_v51, %v5401_v51  ;;  %v5400_v30 = vsel %vm2767_vm10, %v9627_v23, %v6613_v55  ;;  %v5399_v28 = vsel %vm2767_vm10, %v9610_v17, %v6612_v15 }
 0x2d2   : > { %v6247_v35 = vpack.c.bf16 %v5400_v30, %v5400_v30  ;;  %v6246_v18 = vpack.c.bf16 %v5399_v28, %v5399_v28  ;;  %v6488_v44 = vpop.f32.mrb[56].mxu1 }
 0x2d3   : > { %6182 = vst.msk [vmem:[%s9334_s20 + $0x1c] sm:$0xf] %vm3914_vm11, %v6249_v25  ;;  %6181 = vst.msk [vmem:[%s9334_s20 + $0x18] sm:$0xf] %vm3914_vm11, %v6248_v37  ;;  %v5068_v40 = vpop.f32.mrb[57].mxu1  ;;  %v5195_v48 = vmul.f32 %v6488_v44, %v6488_v44  ;;  %v5150_v2 = vsel %vm2767_vm10, %v6488_v44, 0.0 }
 0x2d4   : > { %6180 = vst.msk [vmem:[%s9334_s20 + $0xc] sm:$0xf] %vm3914_vm11, %v6247_v35  ;;  %6179 = vst.msk [vmem:[%s9334_s20 + $0x8] sm:$0xf] %vm3914_vm11, %v6246_v18  ;;  %v5146_v29 = vsel %vm2767_vm10, %v5068_v40, 0.0  ;;  %v5193_v41 = vmul.f32 %v5068_v40, %v5068_v40  ;;  %v6489_v0 = vpop.f32.mrb[58].mxu1 }
 0x2d5   : > { %v5147_v23 = vadd.f32 %v5146_v29, %v5145_v58  ;;  %v6664_v22 = vpack.i.bf16 %v6489_v0, %v6488_v44  ;;  %v5071_v56 = vpop.f32.mrb[59].mxu1  ;;  %v5196_v12 = vmul.f32 %v6489_v0, %v6489_v0  ;;  %v5152_v5 = vsel %vm2767_vm10, %v6489_v0, 0.0 }
 0x2d6   : > { %v5248_v17 = vsel %vm2767_vm10, %v5193_v41, 0.0  ;;  %v6669_v43 = vpack.i.bf16 %v5071_v56, %v5068_v40  ;;  %v5148_v50 = vsel %vm2767_vm10, %v5071_v56, 0.0  ;;  %v5194_v7 = vmul.f32 %v5071_v56, %v5071_v56 }
 0x2d7   : > { %v5249_v1 = vadd.f32 %v5248_v17, %v5247_v62  ;;  %v5149_v39 = vadd.f32 %v5148_v50, %v5147_v23  ;;  %6665 = vrot.lane.b32.xlu1 %v6664_v22, %s6720_s16  ;;  %v5252_v53 = vsel %vm2767_vm10, %v5195_v48, 0.0  ;;  %v5254_v31 = vsel %vm2767_vm10, %v5196_v12, 0.0 }
 0x2d8   : > { %6670 = vrot.lane.b32.xlu0 %v6669_v43, %s6720_s16  ;;  %v5250_v9 = vsel %vm2767_vm10, %v5194_v7, 0.0 }
 0x2d9   : > { %v5151_v36 = vadd.f32 %v5150_v2, %v5149_v39  ;;  %v5251_v61 = vadd.f32 %v5250_v9, %v5249_v1 }
 0x2db   : > { %v9732_v38 = vpop.f32.mrb[40].mxu0  ;;  %v5153_v49 = vadd.f32 %v5152_v5, %v5151_v36  ;;  %v5253_v32 = vadd.f32 %v5252_v53, %v5251_v61 }
 0x2dc   : > { %v9734_v58 = vpop.f32.mrb[41].mxu0  ;;  %v4480_v4 = vsel %vm2767_vm10, %v9732_v38, 0.0  ;;  %v4541_v62 = vmul.f32 %v9732_v38, %v9732_v38 }
 0x2dd   : > { %v4476_v8 = vsel %vm2767_vm10, %v9734_v58, 0.0  ;;  %v4539_v42 = vmul.f32 %v9734_v58, %v9734_v58  ;;  %v9741_v46 = vpop.f32.mrb[42].mxu0  ;;  %v6616_v16 = vpop.permute.xlu1 %6615 }
 0x2de   : > { %v4477_v47 = vadd.f32 %v4476_v8, %v4475_v60  ;;  %v4482_v33 = vsel %vm2767_vm10, %v9741_v46, 0.0  ;;  %v9749_v13 = vpop.f32.mrb[43].mxu0  ;;  %v6621_v11 = vpop.permute.xlu0 %6620  ;;  %v6618_v6 = vunpack.i.h.bf16 %v6616_v16  ;;  %v6617_v63 = vunpack.i.l.bf16 %v6616_v16 }
 0x2df   : > { %v4578_v52 = vsel %vm2767_vm10, %v4539_v42, 0.0  ;;  %v4478_v45 = vsel %vm2767_vm10, %v9749_v13, 0.0  ;;  %v4542_v59 = vmul.f32 %v9741_v46, %v9741_v46  ;;  %v4540_v60 = vmul.f32 %v9749_v13, %v9749_v13 }
 0x2e0   : > { %v4579_v34 = vadd.f32 %v4578_v52, %v4577_v21  ;;  %v4479_v54 = vadd.f32 %v4478_v45, %v4477_v47  ;;  %v5406_v20 = vsel %vm2767_vm10, %v9682_v3, %v6618_v6  ;;  %v5405_v24 = vsel %vm2767_vm10, %v9671_v14, %v6617_v63 }
 0x2e1   : > { %v6623_v55 = vunpack.i.h.bf16 %v6621_v11  ;;  %v6622_v15 = vunpack.i.l.bf16 %v6621_v11  ;;  %v6253_v10 = vpack.c.bf16 %v5406_v20, %v5406_v20  ;;  %v6252_v21 = vpack.c.bf16 %v5405_v24, %v5405_v24 }
 0x2e2   : > { %v4481_v51 = vadd.f32 %v4480_v4, %v4479_v54  ;;  %v4580_v25 = vsel %vm2767_vm10, %v4540_v60, 0.0  ;;  %v5255_v3 = vadd.f32 %v5254_v31, %v5253_v32  ;;  %v4582_v35 = vsel %vm2767_vm10, %v4541_v62, 0.0 }
 0x2e3   : > { %v4581_v37 = vadd.f32 %v4580_v25, %v4579_v34  ;;  %v5404_v30 = vsel %vm2767_vm10, %v9687_v57, %v6623_v55  ;;  %v5403_v28 = vsel %vm2767_vm10, %v9675_v26, %v6622_v15  ;;  %6186 = vst.msk [vmem:[%s9334_s20 + $0x3c] sm:$0xf] %vm3914_vm11, %v6253_v10  ;;  %6185 = vst.msk [vmem:[%s9334_s20 + $0x38] sm:$0xf] %vm3914_vm11, %v6252_v21  ;;  %v4584_v29 = vsel %vm2767_vm10, %v4542_v59, 0.0 }
 0x2e4   : > { %v6251_v14 = vpack.c.bf16 %v5404_v30, %v5404_v30  ;;  %v6250_v18 = vpack.c.bf16 %v5403_v28, %v5403_v28  ;;  %v4483_v44 = vadd.f32 %v4482_v33, %v4481_v51 }
 0x2e5   : > { %v4583_v40 = vadd.f32 %v4582_v35, %v4581_v37 }
 0x2e6   : > { %6184 = vst.msk [vmem:[%s9334_s20 + $0x2c] sm:$0xf] %vm3914_vm11, %v6251_v14  ;;  %6183 = vst.msk [vmem:[%s9334_s20 + $0x28] sm:$0xf] %vm3914_vm11, %v6250_v18 }
 0x2e7   : > { %v4585_v57 = vadd.f32 %v4584_v29, %v4583_v40 }
 0x2ea   : > { %v6492_v41 = vpop.f32.mrb[60].mxu1 }
 0x2eb   : > { %v5199_v26 = vmul.f32 %v6492_v41, %v6492_v41  ;;  %v5084_v0 = vpop.f32.mrb[61].mxu1  ;;  %v5158_v17 = vsel %vm2767_vm10, %v6492_v41, 0.0 }
 0x2ec   : > { %v5154_v23 = vsel %vm2767_vm10, %v5084_v0, 0.0  ;;  %v5197_v22 = vmul.f32 %v5084_v0, %v5084_v0  ;;  %v6493_v56 = vpop.f32.mrb[62].mxu1 }
 0x2ed   : > { %v5155_v43 = vadd.f32 %v5154_v23, %v5153_v49  ;;  %v6679_v50 = vpack.i.bf16 %v6493_v56, %v6492_v41  ;;  %v5087_v48 = vpop.f32.mrb[63].mxu1  ;;  %v5260_v1 = vsel %vm2767_vm10, %v5199_v26, 0.0  ;;  %v5160_v32 = vsel %vm2767_vm10, %v6493_v56, 0.0 }
 0x2ee   : > { %v5256_v39 = vsel %vm2767_vm10, %v5197_v22, 0.0  ;;  %v6674_v7 = vpack.i.bf16 %v5087_v48, %v5084_v0  ;;  %v5156_v2 = vsel %vm2767_vm10, %v5087_v48, 0.0  ;;  %v5198_v5 = vmul.f32 %v5087_v48, %v5087_v48 }
 0x2ef   : > { %v5257_v36 = vadd.f32 %v5256_v39, %v5255_v3  ;;  %v5157_v9 = vadd.f32 %v5156_v2, %v5155_v43  ;;  %6680 = vrot.lane.b32.xlu1 %v6679_v50, %s6720_s16  ;;  %v5200_v42 = vmul.f32 %v6493_v56, %v6493_v56 }
 0x2f0   : > { %v6626_v12 = vpop.permute.xlu1 %6625  ;;  %v6631_v53 = vpop.permute.xlu0 %6630  ;;  %6675 = vrot.lane.b32.xlu0 %v6674_v7, %s6720_s16  ;;  %v5258_v4 = vsel %vm2767_vm10, %v5198_v5, 0.0 }
 0x2f1   : > { %v6628_v61 = vunpack.i.h.bf16 %v6626_v12  ;;  %v6627_v49 = vunpack.i.l.bf16 %v6626_v12  ;;  %v6633_v31 = vunpack.i.h.bf16 %v6631_v53  ;;  %v6632_v8 = vunpack.i.l.bf16 %v6631_v53 }
 0x2f2   : > { %v5159_v16 = vadd.f32 %v5158_v17, %v5157_v9  ;;  %v5259_v47 = vadd.f32 %v5258_v4, %v5257_v36  ;;  %v5262_v20 = vsel %vm2767_vm10, %v5200_v42, 0.0 }
 0x2f3   : > { %v5410_v62 = vsel %vm2767_vm10, %v9741_v46, %v6628_v61  ;;  %v5409_v11 = vsel %vm2767_vm10, %v9732_v38, %v6627_v49  ;;  %v5408_v52 = vsel %vm2767_vm10, %v9749_v13, %v6633_v31  ;;  %v5407_v34 = vsel %vm2767_vm10, %v9734_v58, %v6632_v8  ;;  %v6440_v59 = vpop.f32.mrb[44].mxu0 }
 0x2f4   : > { %v6257_v33 = vpack.c.bf16 %v5410_v62, %v5410_v62  ;;  %v9792_v6 = vadd.f32 %v5160_v32, %v5159_v16  ;;  %v6256_v63 = vpack.c.bf16 %v5409_v11, %v5409_v11  ;;  %v6255_v45 = vpack.c.bf16 %v5408_v52, %v5408_v52  ;;  %v4382_v60 = vpop.f32.mrb[45].mxu0 }
 0x2f5   : > { %v5261_v54 = vadd.f32 %v5260_v1, %v5259_v47  ;;  %v6254_v46 = vpack.c.bf16 %v5407_v34, %v5407_v34  ;;  %v4484_v38 = vsel %vm2767_vm10, %v4382_v60, 0.0  ;;  %v4543_v13 = vmul.f32 %v4382_v60, %v4382_v60  ;;  %v6441_v24 = vpop.f32.mrb[46].mxu0 }
 0x2f6   : > { %6190 = vst.msk [vmem:[%s9334_s20 + $0x5c] sm:$0xf] %vm3914_vm11, %v6257_v33  ;;  %6189 = vst.msk [vmem:[%s9334_s20 + $0x58] sm:$0xf] %vm3914_vm11, %v6256_v63  ;;  %v4545_v58 = vmul.f32 %v6440_v59, %v6440_v59  ;;  %v4485_v15 = vadd.f32 %v4484_v38, %v4483_v44  ;;  %v4385_v10 = vpop.f32.mrb[47].mxu0  ;;  %v4488_v21 = vsel %vm2767_vm10, %v6440_v59, 0.0  ;;  %v4546_v30 = vmul.f32 %v6441_v24, %v6441_v24 }
 0x2f7   : > { %6188 = vst.msk [vmem:[%s9334_s20 + $0x4c] sm:$0xf] %vm3914_vm11, %v6255_v45  ;;  %v9804_v55 = vadd.f32 %v5262_v20, %v5261_v54  ;;  %6187 = vst.msk [vmem:[%s9334_s20 + $0x48] sm:$0xf] %vm3914_vm11, %v6254_v46  ;;  %v4586_v51 = vsel %vm2767_vm10, %v4543_v13, 0.0  ;;  %v4486_v25 = vsel %vm2767_vm10, %v4385_v10, 0.0  ;;  %v4544_v3 = vmul.f32 %v4385_v10, %v4385_v10 }
 0x2f8   : > { %v4587_v37 = vadd.f32 %v4586_v51, %v4585_v57  ;;  %v4487_v28 = vadd.f32 %v4486_v25, %v4485_v15  ;;  %v4490_v35 = vsel %vm2767_vm10, %v6441_v24, 0.0  ;;  %v4590_v14 = vsel %vm2767_vm10, %v4545_v58, 0.0 }
 0x2f9   : > { %v4588_v40 = vsel %vm2767_vm10, %v4544_v3, 0.0  ;;  %v4592_v44 = vsel %vm2767_vm10, %v4546_v30, 0.0 }
 0x2fa   : > { %v4489_v18 = vadd.f32 %v4488_v21, %v4487_v28  ;;  %v4589_v29 = vadd.f32 %v4588_v40, %v4587_v37 }
 0x2fc   : > { %v4491_v41 = vadd.f32 %v4490_v35, %v4489_v18  ;;  %v4591_v26 = vadd.f32 %v4590_v14, %v4589_v29 }
 0x2fe   : > { %v4593_v23 = vadd.f32 %v4592_v44, %v4591_v26 }
 0x2ff   : > { %v9815_v0 = vpop.f32.mrb[48].mxu0 }
 0x300   : > { %v4549_v57 = vmul.f32 %v9815_v0, %v9815_v0  ;;  %v9819_v22 = vpop.f32.mrb[49].mxu0  ;;  %v4496_v50 = vsel %vm2767_vm10, %v9815_v0, 0.0 }
 0x301   : > { %v4492_v56 = vsel %vm2767_vm10, %v9819_v22, 0.0  ;;  %v4547_v17 = vmul.f32 %v9819_v22, %v9819_v22  ;;  %v9825_v43 = vpop.f32.mrb[50].mxu0 }
 0x302   : > { %v4598_v48 = vsel %vm2767_vm10, %v4549_v57, 0.0  ;;  %v4493_v1 = vadd.f32 %v4492_v56, %v4491_v41  ;;  %v4498_v39 = vsel %vm2767_vm10, %v9825_v43, 0.0  ;;  %v9832_v7 = vpop.f32.mrb[51].mxu0  ;;  %v6636_v2 = vpop.permute.xlu1 %6635  ;;  %v4550_v36 = vmul.f32 %v9825_v43, %v9825_v43 }
 0x303   : > { %v4594_v12 = vsel %vm2767_vm10, %v4547_v17, 0.0  ;;  %v4494_v9 = vsel %vm2767_vm10, %v9832_v7, 0.0  ;;  %v4548_v5 = vmul.f32 %v9832_v7, %v9832_v7  ;;  %v6641_v61 = vpop.permute.xlu0 %6640  ;;  %v6638_v49 = vunpack.i.h.bf16 %v6636_v2 }
 0x304   : > { %v4595_v53 = vadd.f32 %v4594_v12, %v4593_v23  ;;  %v4495_v32 = vadd.f32 %v4494_v9, %v4493_v1  ;;  %v6637_v31 = vunpack.i.l.bf16 %v6636_v2  ;;  %v4600_v8 = vsel %vm2767_vm10, %v4550_v36, 0.0 }
 0x305   : > { %v4596_v42 = vsel %vm2767_vm10, %v4548_v5, 0.0  ;;  %v6643_v16 = vunpack.i.h.bf16 %v6641_v61  ;;  %v6642_v4 = vunpack.i.l.bf16 %v6641_v61  ;;  %v5414_v33 = vsel %vm2767_vm10, %v6441_v24, %v6638_v49 }
 0x306   : > { %v4497_v62 = vadd.f32 %v4496_v50, %v4495_v32  ;;  %v4597_v47 = vadd.f32 %v4596_v42, %v4595_v53  ;;  %v5413_v11 = vsel %vm2767_vm10, %v6440_v59, %v6637_v31  ;;  %v6261_v52 = vpack.c.bf16 %v5414_v33, %v5414_v33 }
 0x307   : > { %v6260_v63 = vpack.c.bf16 %v5413_v11, %v5413_v11  ;;  %v5412_v45 = vsel %vm2767_vm10, %v4385_v10, %v6643_v16  ;;  %v5411_v34 = vsel %vm2767_vm10, %v4382_v60, %v6642_v4 }
 0x308   : > { %v4599_v54 = vadd.f32 %v4598_v48, %v4597_v47  ;;  %v6259_v46 = vpack.c.bf16 %v5412_v45, %v5412_v45  ;;  %v6258_v20 = vpack.c.bf16 %v5411_v34, %v5411_v34  ;;  %v4499_v38 = vadd.f32 %v4498_v39, %v4497_v62  ;;  %6194 = vst.msk [vmem:[%s9334_s20 + $0x7c] sm:$0xf] %vm3914_vm11, %v6261_v52 }
 0x309   : > { %6193 = vst.msk [vmem:[%s9334_s20 + $0x78] sm:$0xf] %vm3914_vm11, %v6260_v63 }
 0x30a   : > { %6192 = vst.msk [vmem:[%s9334_s20 + $0x6c] sm:$0xf] %vm3914_vm11, %v6259_v46  ;;  %6191 = vst.msk [vmem:[%s9334_s20 + $0x68] sm:$0xf] %vm3914_vm11, %v6258_v20  ;;  %v4601_v13 = vadd.f32 %v4600_v8, %v4599_v54 }
 0x30b   : > { %v9855_v59 = vpop.f32.mrb[52].mxu0 }
 0x30c   : > { %v9857_v24 = vpop.f32.mrb[53].mxu0  ;;  %v4553_v60 = vmul.f32 %v9855_v59, %v9855_v59  ;;  %v4504_v21 = vsel %vm2767_vm10, %v9855_v59, 0.0 }
 0x30d   : > { %v4500_v58 = vsel %vm2767_vm10, %v9857_v24, 0.0  ;;  %v4551_v15 = vmul.f32 %v9857_v24, %v9857_v24  ;;  %v9865_v10 = vpop.f32.mrb[54].mxu0 }
 0x30e   : > { %v4501_v51 = vadd.f32 %v4500_v58, %v4499_v38  ;;  %v9869_v25 = vpop.f32.mrb[55].mxu0  ;;  %v4554_v30 = vmul.f32 %v9865_v10, %v9865_v10  ;;  %v4606_v18 = vsel %vm2767_vm10, %v4553_v60, 0.0  ;;  %v4506_v40 = vsel %vm2767_vm10, %v9865_v10, 0.0 }
 0x30f   : > { %v4602_v37 = vsel %vm2767_vm10, %v4551_v15, 0.0  ;;  %v4502_v28 = vsel %vm2767_vm10, %v9869_v25, 0.0  ;;  %v4552_v3 = vmul.f32 %v9869_v25, %v9869_v25 }
 0x310   : > { %v4603_v35 = vadd.f32 %v4602_v37, %v4601_v13  ;;  %v4503_v14 = vadd.f32 %v4502_v28, %v4501_v51  ;;  %v4608_v26 = vsel %vm2767_vm10, %v4554_v30, 0.0 }
 0x311   : > { %v4604_v29 = vsel %vm2767_vm10, %v4552_v3, 0.0 }
 0x312   : > { %v4505_v44 = vadd.f32 %v4504_v21, %v4503_v14  ;;  %v4605_v41 = vadd.f32 %v4604_v29, %v4603_v35  ;;  %v5264_v35 = vrot.slane %v9804_v55, 4 }
 0x314   : > { %v4607_v23 = vadd.f32 %v4606_v18, %v4605_v41  ;;  %v4507_v57 = vadd.f32 %v4506_v40, %v4505_v44 }
 0x316   : > { %v4609_v56 = vadd.f32 %v4608_v26, %v4607_v23 }
 0x317   : > { %v9883_v17 = vpop.f32.mrb[56].mxu0 }
 0x318   : > { %v4557_v50 = vmul.f32 %v9883_v17, %v9883_v17  ;;  %v9887_v48 = vpop.f32.mrb[57].mxu0  ;;  %v4512_v36 = vsel %vm2767_vm10, %v9883_v17, 0.0 }
 0x319   : > { %v4508_v1 = vsel %vm2767_vm10, %v9887_v48, 0.0  ;;  %v4555_v39 = vmul.f32 %v9887_v48, %v9887_v48  ;;  %v9893_v2 = vpop.f32.mrb[58].mxu0  ;;  %v6646_v12 = vpop.permute.xlu1 %6645 }
 0x31a   : > { %v4614_v9 = vsel %vm2767_vm10, %v4557_v50, 0.0  ;;  %v4509_v5 = vadd.f32 %v4508_v1, %v4507_v57  ;;  %v4514_v61 = vsel %vm2767_vm10, %v9893_v2, 0.0  ;;  %v9900_v53 = vpop.f32.mrb[59].mxu0  ;;  %v6648_v49 = vunpack.i.h.bf16 %v6646_v12  ;;  %v6651_v42 = vpop.permute.xlu0 %6650 }
 0x31b   : > { %v4610_v32 = vsel %vm2767_vm10, %v4555_v39, 0.0  ;;  %v6647_v31 = vunpack.i.l.bf16 %v6646_v12  ;;  %v4510_v8 = vsel %vm2767_vm10, %v9900_v53, 0.0  ;;  %v4558_v4 = vmul.f32 %v9893_v2, %v9893_v2 }
 0x31c   : > { %v4611_v16 = vadd.f32 %v4610_v32, %v4609_v56  ;;  %v4511_v62 = vadd.f32 %v4510_v8, %v4509_v5  ;;  %v4556_v47 = vmul.f32 %v9900_v53, %v9900_v53  ;;  %v5418_v33 = vsel %vm2767_vm10, %v9825_v43, %v6648_v49 }
 0x31d   : > { %v5417_v11 = vsel %vm2767_vm10, %v9815_v0, %v6647_v31  ;;  %v6653_v52 = vunpack.i.h.bf16 %v6651_v42  ;;  %v6652_v63 = vunpack.i.l.bf16 %v6651_v42  ;;  %v6265_v45 = vpack.c.bf16 %v5418_v33, %v5418_v33 }
 0x31e   : > { %v6264_v34 = vpack.c.bf16 %v5417_v11, %v5417_v11  ;;  %v4513_v54 = vadd.f32 %v4512_v36, %v4511_v62  ;;  %v4612_v46 = vsel %vm2767_vm10, %v4556_v47, 0.0  ;;  %v4616_v43 = vsel %vm2767_vm10, %v4558_v4, 0.0 }
 0x31f   : > { %v4613_v20 = vadd.f32 %v4612_v46, %v4611_v16  ;;  %v5416_v38 = vsel %vm2767_vm10, %v9832_v7, %v6653_v52  ;;  %v5415_v13 = vsel %vm2767_vm10, %v9819_v22, %v6652_v63  ;;  %6198 = vst.msk [vmem:[%s9334_s20 + $0x9c] sm:$0xf] %vm3914_vm11, %v6265_v45  ;;  %v5162_v22 = vrot.slane %v9792_v6, 4 }
 0x320   : > { %6197 = vst.msk [vmem:[%s9334_s20 + $0x98] sm:$0xf] %vm3914_vm11, %v6264_v34  ;;  %v6263_v0 = vpack.c.bf16 %v5416_v38, %v5416_v38  ;;  %v6262_v60 = vpack.c.bf16 %v5415_v13, %v5415_v13  ;;  %v4515_v58 = vadd.f32 %v4514_v61, %v4513_v54 }
 0x321   : > { %v4615_v15 = vadd.f32 %v4614_v9, %v4613_v20  ;;  %v5163_v56 = vadd.f32 %v5162_v22, %v9792_v6  ;;  %v5265_v9 = vadd.f32 %v5264_v35, %v9804_v55 }
 0x322   : > { %6196 = vst.msk [vmem:[%s9334_s20 + $0x8c] sm:$0xf] %vm3914_vm11, %v6263_v0  ;;  %6195 = vst.msk [vmem:[%s9334_s20 + $0x88] sm:$0xf] %vm3914_vm11, %v6262_v60 }
 0x323   : > { %v4617_v21 = vadd.f32 %v4616_v43, %v4615_v15  ;;  %v5164_v49 = vrot.slane %v5163_v56, 2  ;;  %v5266_v42 = vrot.slane %v5265_v9, 2 }
 0x324   : > { %v9927_v51 = vpop.f32.mrb[60].mxu0 }
 0x325   : > { %v9929_v7 = vpop.f32.mrb[61].mxu0  ;;  %v4561_v37 = vmul.f32 %v9927_v51, %v9927_v51  ;;  %v4520_v14 = vsel %vm2767_vm10, %v9927_v51, 0.0  ;;  %v5165_v33 = vadd.f32 %v5164_v49, %v5163_v56  ;;  %v5267_v38 = vadd.f32 %v5266_v42, %v5265_v9 }
 0x326   : > { %v4516_v30 = vsel %vm2767_vm10, %v9929_v7, 0.0  ;;  %v4559_v28 = vmul.f32 %v9929_v7, %v9929_v7  ;;  %v9938_v3 = vpop.f32.mrb[62].mxu0 }
 0x327   : > { %v4517_v18 = vadd.f32 %v4516_v30, %v4515_v58  ;;  %v9943_v40 = vpop.f32.mrb[63].mxu0  ;;  %v4562_v44 = vmul.f32 %v9938_v3, %v9938_v3  ;;  %v4622_v50 = vsel %vm2767_vm10, %v4561_v37, 0.0  ;;  %v4522_v1 = vsel %vm2767_vm10, %v9938_v3, 0.0 }
 0x328   : > { %v4618_v29 = vsel %vm2767_vm10, %v4559_v28, 0.0  ;;  %v4518_v41 = vsel %vm2767_vm10, %v9943_v40, 0.0  ;;  %v4560_v26 = vmul.f32 %v9943_v40, %v9943_v40  ;;  %v5166_v0 = vrot.slane %v5165_v33, 1 }
 0x329   : > { %v4619_v23 = vadd.f32 %v4618_v29, %v4617_v21  ;;  %v4519_v57 = vadd.f32 %v4518_v41, %v4517_v18  ;;  %v4624_v5 = vsel %vm2767_vm10, %v4562_v44, 0.0  ;;  %v5268_v22 = vrot.slane %v5267_v38, 1 }
 0x32a   : > { %v4620_v39 = vsel %vm2767_vm10, %v4560_v26, 0.0  ;;  %v5167_v28 = vadd.f32 %v5166_v0, %v5165_v33 }
 0x32b   : > { %v4521_v12 = vadd.f32 %v4520_v14, %v4519_v57  ;;  %v4621_v36 = vadd.f32 %v4620_v39, %v4619_v23 }
 0x32d   : > { %v4523_v61 = vadd.f32 %v4522_v1, %v4521_v12  ;;  %v4623_v32 = vadd.f32 %v4622_v50, %v4621_v36 }
 0x32f   : > { %v4524_v31 = vrot.slane %v4523_v61, 4  ;;  %v4625_v8 = vadd.f32 %v4624_v5, %v4623_v32 }
 0x331   : > { %v6656_v6 = vpop.permute.xlu1 %6655  ;;  %v4525_v16 = vadd.f32 %v4524_v31, %v4523_v61  ;;  %v4626_v4 = vrot.slane %v4625_v8, 4 }
 0x332   : > { %v6658_v62 = vunpack.i.h.bf16 %v6656_v6  ;;  %v6657_v47 = vunpack.i.l.bf16 %v6656_v6  ;;  %v6661_v11 = vpop.permute.xlu0 %6660 }
 0x333   : > { %v4526_v52 = vrot.slane %v4525_v16, 2  ;;  %v4627_v63 = vadd.f32 %v4626_v4, %v4625_v8  ;;  %v6663_v46 = vunpack.i.h.bf16 %v6661_v11  ;;  %v6662_v20 = vunpack.i.l.bf16 %v6661_v11 }
 0x334   : > { %v5422_v55 = vsel %vm2767_vm10, %v9865_v10, %v6658_v62  ;;  %v5421_v45 = vsel %vm2767_vm10, %v9855_v59, %v6657_v47 }
 0x335   : > { %v6269_v34 = vpack.c.bf16 %v5422_v55, %v5422_v55  ;;  %v6268_v54 = vpack.c.bf16 %v5421_v45, %v5421_v45  ;;  %v4527_v13 = vadd.f32 %v4526_v52, %v4525_v16  ;;  %v4628_v43 = vrot.slane %v4627_v63, 2 }
 0x336   : > { %v5420_v10 = vsel %vm2767_vm10, %v9869_v25, %v6663_v46  ;;  %v5419_v59 = vsel %vm2767_vm10, %v9857_v24, %v6662_v20  ;;  %v5269_v25 = vadd.f32 %v5268_v22, %v5267_v38 }
 0x337   : > { %6202 = vst.msk [vmem:[%s9334_s20 + $0xbc] sm:$0xf] %vm3914_vm11, %v6269_v34  ;;  %6201 = vst.msk [vmem:[%s9334_s20 + $0xb8] sm:$0xf] %vm3914_vm11, %v6268_v54  ;;  %v4528_v60 = vrot.slane %v4527_v13, 1  ;;  %v4629_v58 = vadd.f32 %v4628_v43, %v4627_v63  ;;  %v6267_v15 = vpack.c.bf16 %v5420_v10, %v5420_v10  ;;  %v6266_v21 = vpack.c.bf16 %v5419_v59, %v5419_v59 }
 0x339   : > { %v4529_v37 = vadd.f32 %v4528_v60, %v4527_v13  ;;  %v4630_v30 = vrot.slane %v4629_v58, 1  ;;  %6200 = vst.msk [vmem:[%s9334_s20 + $0xac] sm:$0xf] %vm3914_vm11, %v6267_v15  ;;  %6199 = vst.msk [vmem:[%s9334_s20 + $0xa8] sm:$0xf] %vm3914_vm11, %v6266_v21 }
 0x33b   : > { %v4530_v35 = vadd.f32 %v4529_v37, %v9602_v19  ;;  %v4631_v14 = vadd.f32 %v4630_v30, %v4629_v58 }
 0x33d   : > { %v4632_v18 = vadd.f32 %v4631_v14, %v9608_v27  ;;  %v5168_v24 = vadd.f32 %v5167_v28, %v4530_v35 }
 0x33f   : > { %v5270_v29 = vadd.f32 %v5269_v25, %v4632_v18 }
 0x341   : > { %v5593_v44 = vsel %vm5592_vm12, %v5168_v24, %v5270_v29 }
 0x342   : > { %5595 = vst.msk [vmem:[%s214_s24] sm:$0x3] %vm5594_vm13, %v5593_v44 }
 0x349   : > { %v6666_v41 = vpop.permute.xlu1 %6665 }
 0x34a   : > { %v6668_v19 = vunpack.i.h.bf16 %v6666_v41  ;;  %v6667_v26 = vunpack.i.l.bf16 %v6666_v41  ;;  %v6671_v23 = vpop.permute.xlu0 %6670 }
 0x34b   : > { %v6673_v57 = vunpack.i.h.bf16 %v6671_v23  ;;  %v6672_v27 = vunpack.i.l.bf16 %v6671_v23 }
 0x34c   : > { %v5426_v56 = vsel %vm2767_vm10, %v9893_v2, %v6668_v19  ;;  %v5425_v50 = vsel %vm2767_vm10, %v9883_v17, %v6667_v26 }
 0x34d   : > { %v6273_v1 = vpack.c.bf16 %v5426_v56, %v5426_v56  ;;  %v6272_v39 = vpack.c.bf16 %v5425_v50, %v5425_v50  ;;  %v5424_v12 = vsel %vm2767_vm10, %v9900_v53, %v6673_v57  ;;  %v5423_v36 = vsel %vm2767_vm10, %v9887_v48, %v6672_v27 }
 0x34e   : > { %v6271_v9 = vpack.c.bf16 %v5424_v12, %v5424_v12  ;;  %v6270_v5 = vpack.c.bf16 %v5423_v36, %v5423_v36 }
 0x34f   : > { %6206 = vst.msk [vmem:[%s9334_s20 + $0xdc] sm:$0xf] %vm3914_vm11, %v6273_v1  ;;  %6205 = vst.msk [vmem:[%s9334_s20 + $0xd8] sm:$0xf] %vm3914_vm11, %v6272_v39 }
 0x350   : > { %6204 = vst.msk [vmem:[%s9334_s20 + $0xcc] sm:$0xf] %vm3914_vm11, %v6271_v9  ;;  %6203 = vst.msk [vmem:[%s9334_s20 + $0xc8] sm:$0xf] %vm3914_vm11, %v6270_v5 }
 0x361   : > { %v6681_v17 = vpop.permute.xlu1 %6680 }
 0x362   : > { %v6683_v2 = vunpack.i.h.bf16 %v6681_v17  ;;  %v6682_v53 = vunpack.i.l.bf16 %v6681_v17  ;;  %v6676_v61 = vpop.permute.xlu0 %6675 }
 0x363   : > { %v6678_v32 = vunpack.i.h.bf16 %v6676_v61  ;;  %v6677_v48 = vunpack.i.l.bf16 %v6676_v61 }
 0x364   : > { %v5430_v49 = vsel %vm2767_vm10, %v9938_v3, %v6683_v2  ;;  %v5429_v31 = vsel %vm2767_vm10, %v9927_v51, %v6682_v53 }
 0x365   : > { %v6277_v8 = vpack.c.bf16 %v5430_v49, %v5430_v49  ;;  %v6276_v42 = vpack.c.bf16 %v5429_v31, %v5429_v31  ;;  %v5428_v6 = vsel %vm2767_vm10, %v9943_v40, %v6678_v32  ;;  %v5427_v16 = vsel %vm2767_vm10, %v9929_v7, %v6677_v48 }
 0x366   : > { %v6275_v4 = vpack.c.bf16 %v5428_v6, %v5428_v6  ;;  %v6274_v62 = vpack.c.bf16 %v5427_v16, %v5427_v16 }
 0x367   : > { %6210 = vst.msk [vmem:[%s9334_s20 + $0xfc] sm:$0xf] %vm3914_vm11, %v6277_v8  ;;  %6209 = vst.msk [vmem:[%s9334_s20 + $0xf8] sm:$0xf] %vm3914_vm11, %v6276_v42 }
 0x368   : > { %6208 = vst.msk [vmem:[%s9334_s20 + $0xec] sm:$0xf] %vm3914_vm11, %v6275_v4  ;;  %6207 = vst.msk [vmem:[%s9334_s20 + $0xe8] sm:$0xf] %vm3914_vm11, %v6274_v62 }
 0x369 PF: > { %s14_s14 = sadd.s32 1, %s6714_s14   ;;  %s10487_s12 = smov %s6710_s13 }
 0x36a   : > { %p11_p5 = scmp.ge.s32.totalorder %s14_s14, 4   ;;  %s10488_s13 = smov %s10490_s15 }
 0x36c   :  { %13 = sbr.rel (!%p11_p5) target bundleno = 2 (0x2), region = 77 }

</bundles_post_ra>
